<compile_context>
chip_gen: v7x
topology: tpu7x:2x2x1
jax: 0.10.0
libtpu: 0.0.40
codegen_flags: <defaults>
</compile_context>

<pallas_src>
import functools

import jax
import jax.numpy as jnp
from jax.experimental import pallas as pl
from jax.experimental.pallas import tpu as pltpu

_SUBLANE = 8     # f32 sublane tile
_LANES = 128     # lane tile


def _sigmoid(x):
    # Exact sigmoid with a single EUP op: sigmoid(x) = 0.5 * (tanh(x/2) + 1).
    return 0.5 * jnp.tanh(0.5 * x) + 0.5


def _cnn_lstm_ar_kernel(future_steps, t_unroll, dec_unroll,
                        x_ref,                       # (T*BB, Cin) time-major batch block
                        c1w_ref, c1b_ref,            # (3, Cin, C1), (1, C1)
                        c2w_ref, c2b_ref,            # (3, C1, C1),  (1, C1)
                        wih0_ref, whh0_ref, b0_ref,  # (C1, 4HP), (HP, 4HP), (1, 4HP)
                        wih1_ref, whh1_ref, b1_ref,  # (HP, 4HP), (HP, 4HP), (1, 4HP)
                        fcw_ref, fcb_ref,            # (HP, 1), (1, 1)
                        wdec1_ref, bdec1_ref,        # fused emb∘conv1-centre: (1, C1) ×2
                        out_ref,                     # (BB, FP)
                        xproj_ref):                  # scratch (T*BB, 4HP)
    f32 = jnp.float32
    mxu = wih0_ref.dtype                      # matmul operand dtype (bf16)
    BB = out_ref.shape[0]
    N = x_ref.shape[0]
    T = N // BB
    HP = whh0_ref.shape[0]
    FP = out_ref.shape[1]

    # ---------------- encoder: conv1 -> relu -> conv2 -> relu ----------------
    def conv_relu(seq, w_ref, b_ref):
        # Conv1d(k=3, pad=1) on a time-major (T*BB, C) slab: one timestep shift
        # == BB sublane rows.  Three accumulating matmuls (MXU sums the taps)
        # instead of a lane-axis concat + one matmul.
        n, c = seq.shape
        zrow = jnp.zeros((BB, c), seq.dtype)
        prev = jnp.concatenate([zrow, seq[:n - BB, :]], axis=0)
        nxt = jnp.concatenate([seq[BB:, :], zrow], axis=0)
        acc = jnp.dot(prev, w_ref[0], preferred_element_type=f32)
        acc = acc + jnp.dot(seq, w_ref[1], preferred_element_type=f32)
        acc = acc + jnp.dot(nxt, w_ref[2], preferred_element_type=f32)
        return jnp.maximum(acc + b_ref[...], 0.0)

    feat = conv_relu(x_ref[...], c1w_ref, c1b_ref)                   # (T*BB, C1)
    feat = conv_relu(feat, c2w_ref, c2b_ref)                         # (T*BB, C1)

    # ---------------- 2-layer LSTM over the encoded sequence -----------------
    def lstm_cell(pre, h, c, whh_ref):
        # pre = x_t @ W_ih + b (precomputed).  The weight ref is indexed at
        # the point of use (cheap in-loop vld) instead of a hoisted 64-vreg
        # SSA value that would spill across the loop.
        gates = pre + jnp.dot(h.astype(mxu), whh_ref[...],
                              preferred_element_type=f32)
        i = _sigmoid(gates[:, 0 * HP:1 * HP])
        f = _sigmoid(gates[:, 1 * HP:2 * HP])
        g = jnp.tanh(gates[:, 2 * HP:3 * HP])
        o = _sigmoid(gates[:, 3 * HP:4 * HP])
        c_new = f * c + i * g
        h_new = o * jnp.tanh(c_new)
        return h_new, c_new

    def l1_pre(h0):
        return (jnp.dot(h0.astype(mxu), wih1_ref[...],
                        preferred_element_type=f32) + b1_ref[...])

    # layer-0 input projection for all T steps hoisted into one matmul
    xproj_ref[...] = (jnp.dot(feat.astype(mxu), wih0_ref[...],
                              preferred_element_type=f32) + b0_ref[...])

    zeros_h = jnp.zeros((BB, HP), f32)

    # Software-pipelined recurrence: at iteration t, layer 0 processes step t
    # while layer 1 processes step t-1 -- the two cells are independent, so
    # their MXU pushes / EUP activations interleave on the critical path.
    h0, c0 = lstm_cell(xproj_ref[pl.ds(0, BB), :], zeros_h, zeros_h, whh0_ref)
    h1, c1 = zeros_h, zeros_h

    def fused_step(t, carry):
        h0, c0, h1, c1 = carry
        # layer 1, step t-1 (consumes the *incoming* h0 = h0_{t-1})
        h1n, c1n = lstm_cell(l1_pre(h0), h1, c1, whh1_ref)
        # layer 0, step t
        off = pl.multiple_of(t * BB, BB)
        h0n, c0n = lstm_cell(xproj_ref[pl.ds(off, BB), :], h0, c0, whh0_ref)
        return h0n, c0n, h1n, c1n

    h0, c0, h1, c1 = jax.lax.fori_loop(1, T, fused_step, (h0, c0, h1, c1),
                                       unroll=t_unroll)
    # epilogue: layer 1, step T-1
    h1, c1 = lstm_cell(l1_pre(h0), h1, c1, whh1_ref)

    # dropout(p=0.2) is identity in eval/inference mode.
    # TODO(synk): train-mode stochastic dropout not implemented.
    pred = (jnp.dot(h1, fcw_ref[...], preferred_element_type=f32)
            + fcb_ref[...])                                           # (BB, 1)

    # Lane-dense prediction buffer: column k <- step-k prediction.
    col = jax.lax.broadcasted_iota(jnp.int32, (BB, FP), 1)
    preds = jnp.where(col == 0, pred, jnp.zeros((BB, FP), f32))

    # ---------------- autoregressive decode ----------------
    # embedding -> conv1 (length-1 sequence => only the centre tap sees data)
    # is fused into a VPU broadcast-FMA on the carried scalar prediction
    # (valid because output_size == 1), so the per-step serial chain only has
    # conv2, the two cell projections, and fc left on the MXU.
    def decode_step(k, carry):
        h0, c0, h1, c1, pred, preds = carry
        g1 = jnp.maximum(pred * wdec1_ref[...] + bdec1_ref[...], 0.0)     # (BB, C1)
        g2 = jnp.maximum(jnp.dot(g1, c2w_ref[1], preferred_element_type=f32)
                         + c2b_ref[...], 0.0)
        pre0 = (jnp.dot(g2.astype(mxu), wih0_ref[...],
                        preferred_element_type=f32) + b0_ref[...])
        h0, c0 = lstm_cell(pre0, h0, c0, whh0_ref)
        h1, c1 = lstm_cell(l1_pre(h0), h1, c1, whh1_ref)
        pred = (jnp.dot(h1, fcw_ref[...], preferred_element_type=f32)
                + fcb_ref[...])
        preds = jnp.where(col == k, pred, preds)
        return h0, c0, h1, c1, pred, preds

    _, _, _, _, _, preds = jax.lax.fori_loop(
        1, future_steps, decode_step, (h0, c0, h1, c1, pred, preds),
        unroll=dec_unroll)

    out_ref[...] = preds


def _round_up(n, m):
    return ((n + m - 1) // m) * m


def _pad_gate_cols(w, h, hp):
    """(..., 4h) -> (..., 4*hp): gate g -> columns [g*hp, g*hp + h), rest zero."""
    if hp == h:
        return w
    parts = []
    for g in range(4):
        blk = w[..., g * h:(g + 1) * h]
        pad = jnp.zeros(blk.shape[:-1] + (hp - h,), blk.dtype)
        parts.append(jnp.concatenate([blk, pad], axis=-1))
    return jnp.concatenate(parts, axis=-1)


def _pad_rows(w, rows):
    if w.shape[0] == rows:
        return w
    return jnp.zeros((rows,) + w.shape[1:], w.dtype).at[:w.shape[0]].set(w)


def cnn_lstm_ar_forward(x, params, future_steps=1, *, max_batch_tile=64,
                        mxu_dtype=jnp.bfloat16):
    """x: (B, T, C_in) float32. Returns (B, future_steps, 1), matching PyTorch."""
    x = x.astype(jnp.float32)
    B, T, Cin = x.shape
    H = params["whh0"].shape[0]
    C1 = params["c1b"].shape[-1]                      # conv channels (32)
    assert params["fcw"].shape[-1] == 1, "fused decode assumes output_size == 1"

    HP = _round_up(H, _LANES)                         # gate-aligned hidden width
    FP = _round_up(max(future_steps, 1), _LANES)      # lane-dense output width

    # Batch tiling: pad to the f32 sublane tile; use a large tile for big B
    # but keep >= 2 grid blocks when possible so v7x's two TCs both get work.
    Bp0 = _round_up(B, _SUBLANE)
    bb = min(max_batch_tile, Bp0)
    if Bp0 >= 2 * _SUBLANE:
        bb = min(bb, max(_SUBLANE, (Bp0 // 2) // _SUBLANE * _SUBLANE))
    Bp = _round_up(Bp0, bb)
    nb = Bp // bb

    # batch-block, time-major layout: xg[i, t*bb + j, :] = x[i*bb + j, t, :]
    xp = jnp.zeros((Bp, T, Cin), jnp.float32).at[:B].set(x)
    xg = (xp.reshape(nb, bb, T, Cin)
            .transpose(0, 2, 1, 3)
            .reshape(nb, T * bb, Cin))

    p = params
    # Recurrent / projection weights in bf16 (MXU-native, f32 accumulate);
    # biases, conv and fc weights stay f32.  Padded columns/rows are exact
    # zeros in either dtype, so padded hidden lanes stay exactly 0.
    wih0 = _pad_gate_cols(p["wih0"], H, HP).astype(mxu_dtype)          # (C1, 4HP)
    whh0 = _pad_rows(_pad_gate_cols(p["whh0"], H, HP), HP).astype(mxu_dtype)
    b0 = _pad_gate_cols(p["b0"], H, HP)                                # (1, 4HP)
    wih1 = _pad_rows(_pad_gate_cols(p["wih1"], H, HP), HP).astype(mxu_dtype)
    whh1 = _pad_rows(_pad_gate_cols(p["whh1"], H, HP), HP).astype(mxu_dtype)
    b1 = _pad_gate_cols(p["b1"], H, HP)
    fcw = _pad_rows(p["fcw"], HP)                                      # (HP, 1)
    fcb = p["fcb"]                                                     # (1, 1)
    # decode-path fusion: embedding -> conv1 centre tap (length-1 sequence)
    wdec1 = jnp.dot(p["embw"], p["c1w"][1])                            # (1, C1)
    bdec1 = jnp.dot(p["embb"], p["c1w"][1]) + p["c1b"]                 # (1, C1)

    weights = (p["c1w"], p["c1b"], p["c2w"], p["c2b"],
               wih0, whh0, b0, wih1, whh1, b1, fcw, fcb, wdec1, bdec1)

    def wspec(a):
        if a.ndim == 3:
            return pl.BlockSpec(a.shape, lambda i: (0, 0, 0))
        return pl.BlockSpec(a.shape, lambda i: (0, 0))

    # Explicit VMEM budget (v7x has only 64 MiB physical; stay well under it).
    # TODO(synk): chunk the xproj hoist into timestep slabs for very long T.
    wbytes = sum(int(w.size) * jnp.dtype(w.dtype).itemsize for w in weights)
    est = (2 * (T * bb * Cin * 4 + bb * FP * 4) + 2 * wbytes
           + T * bb * 4 * HP * 4)
    vmem_limit = int(min(48 << 20, max(16 << 20, 2 * est)))

    t_unroll = True if T <= 32 else 8                 # full unroll only for short T
    dec_unroll = True if future_steps <= 32 else 8

    out = pl.pallas_call(
        functools.partial(_cnn_lstm_ar_kernel, future_steps, t_unroll, dec_unroll),
        out_shape=jax.ShapeDtypeStruct((Bp, FP), jnp.float32),
        grid=(nb,),
        in_specs=[pl.BlockSpec((None, T * bb, Cin), lambda i: (i, 0, 0))]
                 + [wspec(w) for w in weights],
        out_specs=pl.BlockSpec((bb, FP), lambda i: (i, 0)),
        scratch_shapes=[pltpu.VMEM((T * bb, 4 * HP), jnp.float32)],
        compiler_params=pltpu.CompilerParams(
            dimension_semantics=("parallel",),
            vmem_limit_bytes=vmem_limit),
    )(xg, *weights)

    return out[:B, :future_steps].reshape(B, future_steps, 1)


def init_params(key, input_size, hidden_size, output_size=1):
    """Deterministic synthetic parameters:
       conv weights as (3, C_in, C_out) (tap-major, transposed),
       LSTM weights transposed to (In, 4H) / (H, 4H), biases folded, all 2-D.
    """
    H = hidden_size
    ks = jax.random.split(key, 14)

    def rnd(k, shape, scale=0.1):
        return (scale * jax.random.normal(k, shape)).astype(jnp.float32)

    return dict(
        c1w=rnd(ks[0], (3, input_size, 32)),
        c1b=rnd(ks[1], (1, 32)),
        c2w=rnd(ks[2], (3, 32, 32)),
        c2b=rnd(ks[3], (1, 32)),
        wih0=rnd(ks[4], (32, 4 * H)),
        whh0=rnd(ks[5], (H, 4 * H)),
        b0=rnd(ks[6], (1, 4 * H)),          # b_ih_l0 + b_hh_l0
        wih1=rnd(ks[7], (H, 4 * H)),
        whh1=rnd(ks[8], (H, 4 * H)),
        b1=rnd(ks[9], (1, 4 * H)),          # b_ih_l1 + b_hh_l1
        fcw=rnd(ks[10], (H, output_size)),
        fcb=rnd(ks[11], (1, output_size)),
        embw=rnd(ks[12], (output_size, input_size)),
        embb=rnd(ks[13], (1, input_size)),
    )


def _reference_forward(x, params, future_steps):
    """Pure-JAX reference with identical semantics (f32), for validation."""
    p = {k: jnp.asarray(v, jnp.float32) for k, v in params.items()}

    def conv(seq, w, b):                              # seq (B,T,C), 'same' pad
        z = jnp.zeros_like(seq[:, :1])
        prev = jnp.concatenate([z, seq[:, :-1]], axis=1)
        nxt = jnp.concatenate([seq[:, 1:], z], axis=1)
        out = (jnp.einsum("btc,cd->btd", prev, w[0])
               + jnp.einsum("btc,cd->btd", seq, w[1])
               + jnp.einsum("btc,cd->btd", nxt, w[2]) + b)
        return jnp.maximum(out, 0.0)

    def cell(xt, h, c, wih, whh, b):
        gates = xt @ wih + h @ whh + b
        Hh = h.shape[-1]
        i = jax.nn.sigmoid(gates[:, :Hh]); f = jax.nn.sigmoid(gates[:, Hh:2 * Hh])
        g = jnp.tanh(gates[:, 2 * Hh:3 * Hh]); o = jax.nn.sigmoid(gates[:, 3 * Hh:])
        c = f * c + i * g
        return o * jnp.tanh(c), c

    def lstm(seq, h0, c0, h1, c1):
        for t in range(seq.shape[1]):
            h0, c0 = cell(seq[:, t], h0, c0, p["wih0"], p["whh0"], p["b0"])
            h1, c1 = cell(h0, h1, c1, p["wih1"], p["whh1"], p["b1"])
        return h0, c0, h1, c1

    B = x.shape[0]
    H = p["whh0"].shape[0]
    z = jnp.zeros((B, H), jnp.float32)
    feat = conv(conv(x, p["c1w"], p["c1b"]), p["c2w"], p["c2b"])
    h0, c0, h1, c1 = lstm(feat, z, z, z, z)
    pred = h1 @ p["fcw"] + p["fcb"]
    preds = [pred]
    for _ in range(future_steps - 1):
        emb = pred @ p["embw"] + p["embb"]
        g = conv(conv(emb[:, None, :], p["c1w"], p["c1b"]), p["c2w"], p["c2b"])
        h0, c0, h1, c1 = lstm(g, h0, c0, h1, c1)
        pred = h1 @ p["fcw"] + p["fcb"]
        preds.append(pred)
    return jnp.stack(preds, axis=1)


if __name__ == "__main__":
    key = jax.random.PRNGKey(0)
    k_x, k_p = jax.random.split(key)

    B, T, C_IN, HIDDEN, OUT, FUTURE = 2, 8, 4, 32, 1, 3
    x = jax.random.normal(k_x, (B, T, C_IN), dtype=jnp.float32)
    params = init_params(k_p, C_IN, HIDDEN, OUT)

    preds = cnn_lstm_ar_forward(x, params, future_steps=FUTURE)
    jax.block_until_ready(preds)

    assert preds.shape == (B, FUTURE, OUT), preds.shape
    assert bool(jnp.all(jnp.isfinite(preds)))

    ref = _reference_forward(x, params, FUTURE)
    max_err = float(jnp.max(jnp.abs(preds - ref)))
    assert max_err < 2e-3, f"max abs err {max_err} vs f32 reference"

    print("KERNEL_OK")
</pallas_src>

<mosaic_0001>
module attributes {stable_mosaic.version = 11 : i64} {
  func.func @_cnn_lstm_ar_kernel(%arg0: i32, %arg1: memref<1x64x4xf32, #tpu.memory_space<vmem>>, %arg2: memref<3x4x32xf32, #tpu.memory_space<vmem>>, %arg3: memref<1x32xf32, #tpu.memory_space<vmem>>, %arg4: memref<3x32x32xf32, #tpu.memory_space<vmem>>, %arg5: memref<1x32xf32, #tpu.memory_space<vmem>>, %arg6: memref<32x512xbf16, #tpu.memory_space<vmem>>, %arg7: memref<128x512xbf16, #tpu.memory_space<vmem>>, %arg8: memref<1x512xf32, #tpu.memory_space<vmem>>, %arg9: memref<128x512xbf16, #tpu.memory_space<vmem>>, %arg10: memref<128x512xbf16, #tpu.memory_space<vmem>>, %arg11: memref<1x512xf32, #tpu.memory_space<vmem>>, %arg12: memref<128x1xf32, #tpu.memory_space<vmem>>, %arg13: memref<1x1xf32, #tpu.memory_space<vmem>>, %arg14: memref<1x32xf32, #tpu.memory_space<vmem>>, %arg15: memref<1x32xf32, #tpu.memory_space<vmem>>, %arg16: memref<8x128xf32, #tpu.memory_space<vmem>>, %arg17: memref<64x512xf32, #tpu.memory_space<vmem>>) attributes {dimension_semantics = [#tpu.dimension_semantics<parallel>], iteration_bounds = array<i64: 1>, scalar_prefetch = 0 : i64, scratch_operands = 1 : i64, tpu.core_type = #tpu.core_type<tc>, window_params = [{transform_indices = @transform_0, window_bounds = array<i64: 1, 64, 4>}, {pipeline_mode = #tpu.pipeline_mode<synchronous>, transform_indices = @transform_1, window_bounds = array<i64: 3, 4, 32>}, {pipeline_mode = #tpu.pipeline_mode<synchronous>, transform_indices = @transform_2, window_bounds = array<i64: 1, 32>}, {pipeline_mode = #tpu.pipeline_mode<synchronous>, transform_indices = @transform_3, window_bounds = array<i64: 3, 32, 32>}, {pipeline_mode = #tpu.pipeline_mode<synchronous>, transform_indices = @transform_4, window_bounds = array<i64: 1, 32>}, {pipeline_mode = #tpu.pipeline_mode<synchronous>, transform_indices = @transform_5, window_bounds = array<i64: 32, 512>}, {pipeline_mode = #tpu.pipeline_mode<synchronous>, transform_indices = @transform_6, window_bounds = array<i64: 128, 512>}, {pipeline_mode = #tpu.pipeline_mode<synchronous>, transform_indices = @transform_7, window_bounds = array<i64: 1, 512>}, {pipeline_mode = #tpu.pipeline_mode<synchronous>, transform_indices = @transform_8, window_bounds = array<i64: 128, 512>}, {pipeline_mode = #tpu.pipeline_mode<synchronous>, transform_indices = @transform_9, window_bounds = array<i64: 128, 512>}, {pipeline_mode = #tpu.pipeline_mode<synchronous>, transform_indices = @transform_10, window_bounds = array<i64: 1, 512>}, {pipeline_mode = #tpu.pipeline_mode<synchronous>, transform_indices = @transform_11, window_bounds = array<i64: 128, 1>}, {pipeline_mode = #tpu.pipeline_mode<synchronous>, transform_indices = @transform_12, window_bounds = array<i64: 1, 1>}, {pipeline_mode = #tpu.pipeline_mode<synchronous>, transform_indices = @transform_13, window_bounds = array<i64: 1, 32>}, {pipeline_mode = #tpu.pipeline_mode<synchronous>, transform_indices = @transform_14, window_bounds = array<i64: 1, 32>}, {transform_indices = @transform_15, window_bounds = array<i64: 8, 128>}]} {
    %c0 = arith.constant 0 : index
    %c0_0 = arith.constant 0 : index
    %c0_1 = arith.constant 0 : index
    %0 = vector.load %arg1[%c0, %c0_0, %c0_1] : memref<1x64x4xf32, #tpu.memory_space<vmem>>, vector<1x64x4xf32>
    %1 = vector.shape_cast %0 : vector<1x64x4xf32> to vector<64x4xf32>
    %cst = arith.constant 0.000000e+00 : f32
    %2 = vector.broadcast %cst : f32 to vector<8x4xf32>
    %3 = vector.extract_strided_slice %1 {offsets = [0, 0], sizes = [56, 4], strides = [1, 1]} : vector<64x4xf32> to vector<56x4xf32>
    %4 = tpu.concatenate %2, %3 in 0 : vector<8x4xf32>, vector<56x4xf32> -> vector<64x4xf32>
    %5 = vector.extract_strided_slice %1 {offsets = [8, 0], sizes = [56, 4], strides = [1, 1]} : vector<64x4xf32> to vector<56x4xf32>
    %6 = tpu.concatenate %5, %2 in 0 : vector<56x4xf32>, vector<8x4xf32> -> vector<64x4xf32>
    %c0_2 = arith.constant 0 : index
    %c0_3 = arith.constant 0 : index
    %c0_4 = arith.constant 0 : index
    %7 = vector.load %arg2[%c0_2, %c0_3, %c0_4] : memref<3x4x32xf32, #tpu.memory_space<vmem>>, vector<1x4x32xf32>
    %8 = vector.shape_cast %7 : vector<1x4x32xf32> to vector<4x32xf32>
    %cst_5 = arith.constant dense<0.000000e+00> : vector<64x32xf32>
    %9 = tpu.matmul %4, %8, %cst_5 {dimension_numbers = #tpu.dot_dimension_numbers<[1], [0], [0], [1], [0, 0, 1, 1], [], []>} : vector<64x4xf32>, vector<4x32xf32>, vector<64x32xf32> -> vector<64x32xf32>
    %c1 = arith.constant 1 : index
    %c0_6 = arith.constant 0 : index
    %c0_7 = arith.constant 0 : index
    %10 = vector.load %arg2[%c1, %c0_6, %c0_7] : memref<3x4x32xf32, #tpu.memory_space<vmem>>, vector<1x4x32xf32>
    %11 = vector.shape_cast %10 : vector<1x4x32xf32> to vector<4x32xf32>
    %cst_8 = arith.constant dense<0.000000e+00> : vector<64x32xf32>
    %12 = tpu.matmul %1, %11, %cst_8 {dimension_numbers = #tpu.dot_dimension_numbers<[1], [0], [0], [1], [0, 0, 1, 1], [], []>} : vector<64x4xf32>, vector<4x32xf32>, vector<64x32xf32> -> vector<64x32xf32>
    %13 = arith.addf %9, %12 : vector<64x32xf32>
    %c2 = arith.constant 2 : index
    %c0_9 = arith.constant 0 : index
    %c0_10 = arith.constant 0 : index
    %14 = vector.load %arg2[%c2, %c0_9, %c0_10] : memref<3x4x32xf32, #tpu.memory_space<vmem>>, vector<1x4x32xf32>
    %15 = vector.shape_cast %14 : vector<1x4x32xf32> to vector<4x32xf32>
    %cst_11 = arith.constant dense<0.000000e+00> : vector<64x32xf32>
    %16 = tpu.matmul %6, %15, %cst_11 {dimension_numbers = #tpu.dot_dimension_numbers<[1], [0], [0], [1], [0, 0, 1, 1], [], []>} : vector<64x4xf32>, vector<4x32xf32>, vector<64x32xf32> -> vector<64x32xf32>
    %17 = arith.addf %13, %16 : vector<64x32xf32>
    %c0_12 = arith.constant 0 : index
    %c0_13 = arith.constant 0 : index
    %18 = vector.load %arg3[%c0_12, %c0_13] : memref<1x32xf32, #tpu.memory_space<vmem>>, vector<1x32xf32>
    %19 = vector.broadcast %18 : vector<1x32xf32> to vector<64x32xf32>
    %20 = arith.addf %17, %19 : vector<64x32xf32>
    %cst_14 = arith.constant 0.000000e+00 : f32
    %21 = vector.broadcast %cst_14 : f32 to vector<64x32xf32>
    %22 = arith.maximumf %20, %21 : vector<64x32xf32>
    %cst_15 = arith.constant 0.000000e+00 : f32
    %23 = vector.broadcast %cst_15 : f32 to vector<8x32xf32>
    %24 = vector.extract_strided_slice %22 {offsets = [0, 0], sizes = [56, 32], strides = [1, 1]} : vector<64x32xf32> to vector<56x32xf32>
    %25 = tpu.concatenate %23, %24 in 0 : vector<8x32xf32>, vector<56x32xf32> -> vector<64x32xf32>
    %26 = vector.extract_strided_slice %22 {offsets = [8, 0], sizes = [56, 32], strides = [1, 1]} : vector<64x32xf32> to vector<56x32xf32>
    %27 = tpu.concatenate %26, %23 in 0 : vector<56x32xf32>, vector<8x32xf32> -> vector<64x32xf32>
    %c0_16 = arith.constant 0 : index
    %c0_17 = arith.constant 0 : index
    %c0_18 = arith.constant 0 : index
    %28 = vector.load %arg4[%c0_16, %c0_17, %c0_18] : memref<3x32x32xf32, #tpu.memory_space<vmem>>, vector<1x32x32xf32>
    %29 = vector.shape_cast %28 : vector<1x32x32xf32> to vector<32x32xf32>
    %cst_19 = arith.constant dense<0.000000e+00> : vector<64x32xf32>
    %30 = tpu.matmul %25, %29, %cst_19 {dimension_numbers = #tpu.dot_dimension_numbers<[1], [0], [0], [1], [0, 0, 1, 1], [], []>} : vector<64x32xf32>, vector<32x32xf32>, vector<64x32xf32> -> vector<64x32xf32>
    %c1_20 = arith.constant 1 : index
    %c0_21 = arith.constant 0 : index
    %c0_22 = arith.constant 0 : index
    %31 = vector.load %arg4[%c1_20, %c0_21, %c0_22] : memref<3x32x32xf32, #tpu.memory_space<vmem>>, vector<1x32x32xf32>
    %32 = vector.shape_cast %31 : vector<1x32x32xf32> to vector<32x32xf32>
    %cst_23 = arith.constant dense<0.000000e+00> : vector<64x32xf32>
    %33 = tpu.matmul %22, %32, %cst_23 {dimension_numbers = #tpu.dot_dimension_numbers<[1], [0], [0], [1], [0, 0, 1, 1], [], []>} : vector<64x32xf32>, vector<32x32xf32>, vector<64x32xf32> -> vector<64x32xf32>
    %34 = arith.addf %30, %33 : vector<64x32xf32>
    %c2_24 = arith.constant 2 : index
    %c0_25 = arith.constant 0 : index
    %c0_26 = arith.constant 0 : index
    %35 = vector.load %arg4[%c2_24, %c0_25, %c0_26] : memref<3x32x32xf32, #tpu.memory_space<vmem>>, vector<1x32x32xf32>
    %36 = vector.shape_cast %35 : vector<1x32x32xf32> to vector<32x32xf32>
    %cst_27 = arith.constant dense<0.000000e+00> : vector<64x32xf32>
    %37 = tpu.matmul %27, %36, %cst_27 {dimension_numbers = #tpu.dot_dimension_numbers<[1], [0], [0], [1], [0, 0, 1, 1], [], []>} : vector<64x32xf32>, vector<32x32xf32>, vector<64x32xf32> -> vector<64x32xf32>
    %38 = arith.addf %34, %37 : vector<64x32xf32>
    %c0_28 = arith.constant 0 : index
    %c0_29 = arith.constant 0 : index
    %39 = vector.load %arg5[%c0_28, %c0_29] : memref<1x32xf32, #tpu.memory_space<vmem>>, vector<1x32xf32>
    %40 = vector.broadcast %39 : vector<1x32xf32> to vector<64x32xf32>
    %41 = arith.addf %38, %40 : vector<64x32xf32>
    %cst_30 = arith.constant 0.000000e+00 : f32
    %42 = vector.broadcast %cst_30 : f32 to vector<64x32xf32>
    %43 = arith.maximumf %41, %42 : vector<64x32xf32>
    %44 = arith.truncf %43 : vector<64x32xf32> to vector<64x32xbf16>
    %c0_31 = arith.constant 0 : index
    %c0_32 = arith.constant 0 : index
    %45 = vector.load %arg6[%c0_31, %c0_32] : memref<32x512xbf16, #tpu.memory_space<vmem>>, vector<32x512xbf16>
    %cst_33 = arith.constant dense<0.000000e+00> : vector<64x512xf32>
    %46 = tpu.matmul %44, %45, %cst_33 {dimension_numbers = #tpu.dot_dimension_numbers<[1], [0], [0], [1], [0, 0, 1, 1], [], []>} : vector<64x32xbf16>, vector<32x512xbf16>, vector<64x512xf32> -> vector<64x512xf32>
    %c0_34 = arith.constant 0 : index
    %c0_35 = arith.constant 0 : index
    %47 = vector.load %arg8[%c0_34, %c0_35] : memref<1x512xf32, #tpu.memory_space<vmem>>, vector<1x512xf32>
    %48 = vector.broadcast %47 : vector<1x512xf32> to vector<64x512xf32>
    %49 = arith.addf %46, %48 : vector<64x512xf32>
    %c0_36 = arith.constant 0 : index
    %c0_37 = arith.constant 0 : index
    %50 = vector.load %arg17[%c0_36, %c0_37] : memref<64x512xf32, #tpu.memory_space<vmem>>, vector<64x512xf32>
    tpu.vector_store %arg17[%c0_36, %c0_37], %49 {strides = array<i32>} : memref<64x512xf32, #tpu.memory_space<vmem>>, vector<64x512xf32>,
    %cst_38 = arith.constant 0.000000e+00 : f32
    %51 = vector.broadcast %cst_38 : f32 to vector<8x128xf32>
    %c0_39 = arith.constant 0 : index
    %c0_40 = arith.constant 0 : index
    %52 = vector.load %arg17[%c0_39, %c0_40] : memref<64x512xf32, #tpu.memory_space<vmem>>, vector<8x512xf32>
    %53 = arith.truncf %51 : vector<8x128xf32> to vector<8x128xbf16>
    %c0_41 = arith.constant 0 : index
    %c0_42 = arith.constant 0 : index
    %54 = vector.load %arg7[%c0_41, %c0_42] : memref<128x512xbf16, #tpu.memory_space<vmem>>, vector<128x512xbf16>
    %cst_43 = arith.constant dense<0.000000e+00> : vector<8x512xf32>
    %55 = tpu.matmul %53, %54, %cst_43 {dimension_numbers = #tpu.dot_dimension_numbers<[1], [0], [0], [1], [0, 0, 1, 1], [], []>} : vector<8x128xbf16>, vector<128x512xbf16>, vector<8x512xf32> -> vector<8x512xf32>
    %56 = arith.addf %52, %55 : vector<8x512xf32>
    %57 = vector.extract_strided_slice %56 {offsets = [0, 0], sizes = [8, 128], strides = [1, 1]} : vector<8x512xf32> to vector<8x128xf32>
    %cst_44 = arith.constant 5.000000e-01 : f32
    %58 = vector.broadcast %cst_44 : f32 to vector<8x128xf32>
    %59 = arith.mulf %58, %57 : vector<8x128xf32>
    %60 = math.tanh %59 : vector<8x128xf32>
    %cst_45 = arith.constant 5.000000e-01 : f32
    %61 = vector.broadcast %cst_45 : f32 to vector<8x128xf32>
    %62 = arith.mulf %61, %60 : vector<8x128xf32>
    %cst_46 = arith.constant 5.000000e-01 : f32
    %63 = vector.broadcast %cst_46 : f32 to vector<8x128xf32>
    %64 = arith.addf %62, %63 : vector<8x128xf32>
    %65 = vector.extract_strided_slice %56 {offsets = [0, 128], sizes = [8, 128], strides = [1, 1]} : vector<8x512xf32> to vector<8x128xf32>
    %cst_47 = arith.constant 5.000000e-01 : f32
    %66 = vector.broadcast %cst_47 : f32 to vector<8x128xf32>
    %67 = arith.mulf %66, %65 : vector<8x128xf32>
    %68 = math.tanh %67 : vector<8x128xf32>
    %cst_48 = arith.constant 5.000000e-01 : f32
    %69 = vector.broadcast %cst_48 : f32 to vector<8x128xf32>
    %70 = arith.mulf %69, %68 : vector<8x128xf32>
    %cst_49 = arith.constant 5.000000e-01 : f32
    %71 = vector.broadcast %cst_49 : f32 to vector<8x128xf32>
    %72 = arith.addf %70, %71 : vector<8x128xf32>
    %73 = vector.extract_strided_slice %56 {offsets = [0, 256], sizes = [8, 128], strides = [1, 1]} : vector<8x512xf32> to vector<8x128xf32>
    %74 = math.tanh %73 : vector<8x128xf32>
    %75 = vector.extract_strided_slice %56 {offsets = [0, 384], sizes = [8, 128], strides = [1, 1]} : vector<8x512xf32> to vector<8x128xf32>
    %cst_50 = arith.constant 5.000000e-01 : f32
    %76 = vector.broadcast %cst_50 : f32 to vector<8x128xf32>
    %77 = arith.mulf %76, %75 : vector<8x128xf32>
    %78 = math.tanh %77 : vector<8x128xf32>
    %cst_51 = arith.constant 5.000000e-01 : f32
    %79 = vector.broadcast %cst_51 : f32 to vector<8x128xf32>
    %80 = arith.mulf %79, %78 : vector<8x128xf32>
    %cst_52 = arith.constant 5.000000e-01 : f32
    %81 = vector.broadcast %cst_52 : f32 to vector<8x128xf32>
    %82 = arith.addf %80, %81 : vector<8x128xf32>
    %83 = arith.mulf %72, %51 : vector<8x128xf32>
    %84 = arith.mulf %64, %74 : vector<8x128xf32>
    %85 = arith.addf %83, %84 : vector<8x128xf32>
    %86 = math.tanh %85 : vector<8x128xf32>
    %87 = arith.mulf %82, %86 : vector<8x128xf32>
    %c1_i32 = arith.constant 1 : i32
    %88 = arith.truncf %87 : vector<8x128xf32> to vector<8x128xbf16>
    %c0_53 = arith.constant 0 : index
    %c0_54 = arith.constant 0 : index
    %89 = vector.load %arg9[%c0_53, %c0_54] : memref<128x512xbf16, #tpu.memory_space<vmem>>, vector<128x512xbf16>
    %cst_55 = arith.constant dense<0.000000e+00> : vector<8x512xf32>
    %90 = tpu.matmul %88, %89, %cst_55 {dimension_numbers = #tpu.dot_dimension_numbers<[1], [0], [0], [1], [0, 0, 1, 1], [], []>} : vector<8x128xbf16>, vector<128x512xbf16>, vector<8x512xf32> -> vector<8x512xf32>
    %c0_56 = arith.constant 0 : index
    %c0_57 = arith.constant 0 : index
    %91 = vector.load %arg11[%c0_56, %c0_57] : memref<1x512xf32, #tpu.memory_space<vmem>>, vector<1x512xf32>
    %92 = vector.broadcast %91 : vector<1x512xf32> to vector<8x512xf32>
    %93 = arith.addf %90, %92 : vector<8x512xf32>
    %94 = arith.truncf %51 : vector<8x128xf32> to vector<8x128xbf16>
    %c0_58 = arith.constant 0 : index
    %c0_59 = arith.constant 0 : index
    %95 = vector.load %arg10[%c0_58, %c0_59] : memref<128x512xbf16, #tpu.memory_space<vmem>>, vector<128x512xbf16>
    %cst_60 = arith.constant dense<0.000000e+00> : vector<8x512xf32>
    %96 = tpu.matmul %94, %95, %cst_60 {dimension_numbers = #tpu.dot_dimension_numbers<[1], [0], [0], [1], [0, 0, 1, 1], [], []>} : vector<8x128xbf16>, vector<128x512xbf16>, vector<8x512xf32> -> vector<8x512xf32>
    %97 = arith.addf %93, %96 : vector<8x512xf32>
    %98 = vector.extract_strided_slice %97 {offsets = [0, 0], sizes = [8, 128], strides = [1, 1]} : vector<8x512xf32> to vector<8x128xf32>
    %cst_61 = arith.constant 5.000000e-01 : f32
    %99 = vector.broadcast %cst_61 : f32 to vector<8x128xf32>
    %100 = arith.mulf %99, %98 : vector<8x128xf32>
    %101 = math.tanh %100 : vector<8x128xf32>
    %cst_62 = arith.constant 5.000000e-01 : f32
    %102 = vector.broadcast %cst_62 : f32 to vector<8x128xf32>
    %103 = arith.mulf %102, %101 : vector<8x128xf32>
    %cst_63 = arith.constant 5.000000e-01 : f32
    %104 = vector.broadcast %cst_63 : f32 to vector<8x128xf32>
    %105 = arith.addf %103, %104 : vector<8x128xf32>
    %106 = vector.extract_strided_slice %97 {offsets = [0, 128], sizes = [8, 128], strides = [1, 1]} : vector<8x512xf32> to vector<8x128xf32>
    %cst_64 = arith.constant 5.000000e-01 : f32
    %107 = vector.broadcast %cst_64 : f32 to vector<8x128xf32>
    %108 = arith.mulf %107, %106 : vector<8x128xf32>
    %109 = math.tanh %108 : vector<8x128xf32>
    %cst_65 = arith.constant 5.000000e-01 : f32
    %110 = vector.broadcast %cst_65 : f32 to vector<8x128xf32>
    %111 = arith.mulf %110, %109 : vector<8x128xf32>
    %cst_66 = arith.constant 5.000000e-01 : f32
    %112 = vector.broadcast %cst_66 : f32 to vector<8x128xf32>
    %113 = arith.addf %111, %112 : vector<8x128xf32>
    %114 = vector.extract_strided_slice %97 {offsets = [0, 256], sizes = [8, 128], strides = [1, 1]} : vector<8x512xf32> to vector<8x128xf32>
    %115 = math.tanh %114 : vector<8x128xf32>
    %116 = vector.extract_strided_slice %97 {offsets = [0, 384], sizes = [8, 128], strides = [1, 1]} : vector<8x512xf32> to vector<8x128xf32>
    %cst_67 = arith.constant 5.000000e-01 : f32
    %117 = vector.broadcast %cst_67 : f32 to vector<8x128xf32>
    %118 = arith.mulf %117, %116 : vector<8x128xf32>
    %119 = math.tanh %118 : vector<8x128xf32>
    %cst_68 = arith.constant 5.000000e-01 : f32
    %120 = vector.broadcast %cst_68 : f32 to vector<8x128xf32>
    %121 = arith.mulf %120, %119 : vector<8x128xf32>
    %cst_69 = arith.constant 5.000000e-01 : f32
    %122 = vector.broadcast %cst_69 : f32 to vector<8x128xf32>
    %123 = arith.addf %121, %122 : vector<8x128xf32>
    %124 = arith.mulf %113, %51 : vector<8x128xf32>
    %125 = arith.mulf %105, %115 : vector<8x128xf32>
    %126 = arith.addf %124, %125 : vector<8x128xf32>
    %127 = math.tanh %126 : vector<8x128xf32>
    %128 = arith.mulf %123, %127 : vector<8x128xf32>
    %c8_i32 = arith.constant 8 : i32
    %129 = arith.muli %c1_i32, %c8_i32 : i32
    %130 = tpu.assume_multiple %129, 8 : i32
    %131 = arith.index_cast %130 : i32 to index
    %c0_70 = arith.constant 0 : index
    %132 = vector.load %arg17[%131, %c0_70] : memref<64x512xf32, #tpu.memory_space<vmem>>, vector<8x512xf32>
    %133 = arith.truncf %87 : vector<8x128xf32> to vector<8x128xbf16>
    %c0_71 = arith.constant 0 : index
    %c0_72 = arith.constant 0 : index
    %134 = vector.load %arg7[%c0_71, %c0_72] : memref<128x512xbf16, #tpu.memory_space<vmem>>, vector<128x512xbf16>
    %cst_73 = arith.constant dense<0.000000e+00> : vector<8x512xf32>
    %135 = tpu.matmul %133, %134, %cst_73 {dimension_numbers = #tpu.dot_dimension_numbers<[1], [0], [0], [1], [0, 0, 1, 1], [], []>} : vector<8x128xbf16>, vector<128x512xbf16>, vector<8x512xf32> -> vector<8x512xf32>
    %136 = arith.addf %132, %135 : vector<8x512xf32>
    %137 = vector.extract_strided_slice %136 {offsets = [0, 0], sizes = [8, 128], strides = [1, 1]} : vector<8x512xf32> to vector<8x128xf32>
    %cst_74 = arith.constant 5.000000e-01 : f32
    %138 = vector.broadcast %cst_74 : f32 to vector<8x128xf32>
    %139 = arith.mulf %138, %137 : vector<8x128xf32>
    %140 = math.tanh %139 : vector<8x128xf32>
    %cst_75 = arith.constant 5.000000e-01 : f32
    %141 = vector.broadcast %cst_75 : f32 to vector<8x128xf32>
    %142 = arith.mulf %141, %140 : vector<8x128xf32>
    %cst_76 = arith.constant 5.000000e-01 : f32
    %143 = vector.broadcast %cst_76 : f32 to vector<8x128xf32>
    %144 = arith.addf %142, %143 : vector<8x128xf32>
    %145 = vector.extract_strided_slice %136 {offsets = [0, 128], sizes = [8, 128], strides = [1, 1]} : vector<8x512xf32> to vector<8x128xf32>
    %cst_77 = arith.constant 5.000000e-01 : f32
    %146 = vector.broadcast %cst_77 : f32 to vector<8x128xf32>
    %147 = arith.mulf %146, %145 : vector<8x128xf32>
    %148 = math.tanh %147 : vector<8x128xf32>
    %cst_78 = arith.constant 5.000000e-01 : f32
    %149 = vector.broadcast %cst_78 : f32 to vector<8x128xf32>
    %150 = arith.mulf %149, %148 : vector<8x128xf32>
    %cst_79 = arith.constant 5.000000e-01 : f32
    %151 = vector.broadcast %cst_79 : f32 to vector<8x128xf32>
    %152 = arith.addf %150, %151 : vector<8x128xf32>
    %153 = vector.extract_strided_slice %136 {offsets = [0, 256], sizes = [8, 128], strides = [1, 1]} : vector<8x512xf32> to vector<8x128xf32>
    %154 = math.tanh %153 : vector<8x128xf32>
    %155 = vector.extract_strided_slice %136 {offsets = [0, 384], sizes = [8, 128], strides = [1, 1]} : vector<8x512xf32> to vector<8x128xf32>
    %cst_80 = arith.constant 5.000000e-01 : f32
    %156 = vector.broadcast %cst_80 : f32 to vector<8x128xf32>
    %157 = arith.mulf %156, %155 : vector<8x128xf32>
    %158 = math.tanh %157 : vector<8x128xf32>
    %cst_81 = arith.constant 5.000000e-01 : f32
    %159 = vector.broadcast %cst_81 : f32 to vector<8x128xf32>
    %160 = arith.mulf %159, %158 : vector<8x128xf32>
    %cst_82 = arith.constant 5.000000e-01 : f32
    %161 = vector.broadcast %cst_82 : f32 to vector<8x128xf32>
    %162 = arith.addf %160, %161 : vector<8x128xf32>
    %163 = arith.mulf %152, %85 : vector<8x128xf32>
    %164 = arith.mulf %144, %154 : vector<8x128xf32>
    %165 = arith.addf %163, %164 : vector<8x128xf32>
    %166 = math.tanh %165 : vector<8x128xf32>
    %167 = arith.mulf %162, %166 : vector<8x128xf32>
    %c2_i32 = arith.constant 2 : i32
    %168 = arith.truncf %167 : vector<8x128xf32> to vector<8x128xbf16>
    %c0_83 = arith.constant 0 : index
    %c0_84 = arith.constant 0 : index
    %169 = vector.load %arg9[%c0_83, %c0_84] : memref<128x512xbf16, #tpu.memory_space<vmem>>, vector<128x512xbf16>
    %cst_85 = arith.constant dense<0.000000e+00> : vector<8x512xf32>
    %170 = tpu.matmul %168, %169, %cst_85 {dimension_numbers = #tpu.dot_dimension_numbers<[1], [0], [0], [1], [0, 0, 1, 1], [], []>} : vector<8x128xbf16>, vector<128x512xbf16>, vector<8x512xf32> -> vector<8x512xf32>
    %c0_86 = arith.constant 0 : index
    %c0_87 = arith.constant 0 : index
    %171 = vector.load %arg11[%c0_86, %c0_87] : memref<1x512xf32, #tpu.memory_space<vmem>>, vector<1x512xf32>
    %172 = vector.broadcast %171 : vector<1x512xf32> to vector<8x512xf32>
    %173 = arith.addf %170, %172 : vector<8x512xf32>
    %174 = arith.truncf %128 : vector<8x128xf32> to vector<8x128xbf16>
    %c0_88 = arith.constant 0 : index
    %c0_89 = arith.constant 0 : index
    %175 = vector.load %arg10[%c0_88, %c0_89] : memref<128x512xbf16, #tpu.memory_space<vmem>>, vector<128x512xbf16>
    %cst_90 = arith.constant dense<0.000000e+00> : vector<8x512xf32>
    %176 = tpu.matmul %174, %175, %cst_90 {dimension_numbers = #tpu.dot_dimension_numbers<[1], [0], [0], [1], [0, 0, 1, 1], [], []>} : vector<8x128xbf16>, vector<128x512xbf16>, vector<8x512xf32> -> vector<8x512xf32>
    %177 = arith.addf %173, %176 : vector<8x512xf32>
    %178 = vector.extract_strided_slice %177 {offsets = [0, 0], sizes = [8, 128], strides = [1, 1]} : vector<8x512xf32> to vector<8x128xf32>
    %cst_91 = arith.constant 5.000000e-01 : f32
    %179 = vector.broadcast %cst_91 : f32 to vector<8x128xf32>
    %180 = arith.mulf %179, %178 : vector<8x128xf32>
    %181 = math.tanh %180 : vector<8x128xf32>
    %cst_92 = arith.constant 5.000000e-01 : f32
    %182 = vector.broadcast %cst_92 : f32 to vector<8x128xf32>
    %183 = arith.mulf %182, %181 : vector<8x128xf32>
    %cst_93 = arith.constant 5.000000e-01 : f32
    %184 = vector.broadcast %cst_93 : f32 to vector<8x128xf32>
    %185 = arith.addf %183, %184 : vector<8x128xf32>
    %186 = vector.extract_strided_slice %177 {offsets = [0, 128], sizes = [8, 128], strides = [1, 1]} : vector<8x512xf32> to vector<8x128xf32>
    %cst_94 = arith.constant 5.000000e-01 : f32
    %187 = vector.broadcast %cst_94 : f32 to vector<8x128xf32>
    %188 = arith.mulf %187, %186 : vector<8x128xf32>
    %189 = math.tanh %188 : vector<8x128xf32>
    %cst_95 = arith.constant 5.000000e-01 : f32
    %190 = vector.broadcast %cst_95 : f32 to vector<8x128xf32>
    %191 = arith.mulf %190, %189 : vector<8x128xf32>
    %cst_96 = arith.constant 5.000000e-01 : f32
    %192 = vector.broadcast %cst_96 : f32 to vector<8x128xf32>
    %193 = arith.addf %191, %192 : vector<8x128xf32>
    %194 = vector.extract_strided_slice %177 {offsets = [0, 256], sizes = [8, 128], strides = [1, 1]} : vector<8x512xf32> to vector<8x128xf32>
    %195 = math.tanh %194 : vector<8x128xf32>
    %196 = vector.extract_strided_slice %177 {offsets = [0, 384], sizes = [8, 128], strides = [1, 1]} : vector<8x512xf32> to vector<8x128xf32>
    %cst_97 = arith.constant 5.000000e-01 : f32
    %197 = vector.broadcast %cst_97 : f32 to vector<8x128xf32>
    %198 = arith.mulf %197, %196 : vector<8x128xf32>
    %199 = math.tanh %198 : vector<8x128xf32>
    %cst_98 = arith.constant 5.000000e-01 : f32
    %200 = vector.broadcast %cst_98 : f32 to vector<8x128xf32>
    %201 = arith.mulf %200, %199 : vector<8x128xf32>
    %cst_99 = arith.constant 5.000000e-01 : f32
    %202 = vector.broadcast %cst_99 : f32 to vector<8x128xf32>
    %203 = arith.addf %201, %202 : vector<8x128xf32>
    %204 = arith.mulf %193, %126 : vector<8x128xf32>
    %205 = arith.mulf %185, %195 : vector<8x128xf32>
    %206 = arith.addf %204, %205 : vector<8x128xf32>
    %207 = math.tanh %206 : vector<8x128xf32>
    %208 = arith.mulf %203, %207 : vector<8x128xf32>
    %c8_i32_100 = arith.constant 8 : i32
    %209 = arith.muli %c2_i32, %c8_i32_100 : i32
    %210 = tpu.assume_multiple %209, 8 : i32
    %211 = arith.index_cast %210 : i32 to index
    %c0_101 = arith.constant 0 : index
    %212 = vector.load %arg17[%211, %c0_101] : memref<64x512xf32, #tpu.memory_space<vmem>>, vector<8x512xf32>
    %213 = arith.truncf %167 : vector<8x128xf32> to vector<8x128xbf16>
    %c0_102 = arith.constant 0 : index
    %c0_103 = arith.constant 0 : index
    %214 = vector.load %arg7[%c0_102, %c0_103] : memref<128x512xbf16, #tpu.memory_space<vmem>>, vector<128x512xbf16>
    %cst_104 = arith.constant dense<0.000000e+00> : vector<8x512xf32>
    %215 = tpu.matmul %213, %214, %cst_104 {dimension_numbers = #tpu.dot_dimension_numbers<[1], [0], [0], [1], [0, 0, 1, 1], [], []>} : vector<8x128xbf16>, vector<128x512xbf16>, vector<8x512xf32> -> vector<8x512xf32>
    %216 = arith.addf %212, %215 : vector<8x512xf32>
    %217 = vector.extract_strided_slice %216 {offsets = [0, 0], sizes = [8, 128], strides = [1, 1]} : vector<8x512xf32> to vector<8x128xf32>
    %cst_105 = arith.constant 5.000000e-01 : f32
    %218 = vector.broadcast %cst_105 : f32 to vector<8x128xf32>
    %219 = arith.mulf %218, %217 : vector<8x128xf32>
    %220 = math.tanh %219 : vector<8x128xf32>
    %cst_106 = arith.constant 5.000000e-01 : f32
    %221 = vector.broadcast %cst_106 : f32 to vector<8x128xf32>
    %222 = arith.mulf %221, %220 : vector<8x128xf32>
    %cst_107 = arith.constant 5.000000e-01 : f32
    %223 = vector.broadcast %cst_107 : f32 to vector<8x128xf32>
    %224 = arith.addf %222, %223 : vector<8x128xf32>
    %225 = vector.extract_strided_slice %216 {offsets = [0, 128], sizes = [8, 128], strides = [1, 1]} : vector<8x512xf32> to vector<8x128xf32>
    %cst_108 = arith.constant 5.000000e-01 : f32
    %226 = vector.broadcast %cst_108 : f32 to vector<8x128xf32>
    %227 = arith.mulf %226, %225 : vector<8x128xf32>
    %228 = math.tanh %227 : vector<8x128xf32>
    %cst_109 = arith.constant 5.000000e-01 : f32
    %229 = vector.broadcast %cst_109 : f32 to vector<8x128xf32>
    %230 = arith.mulf %229, %228 : vector<8x128xf32>
    %cst_110 = arith.constant 5.000000e-01 : f32
    %231 = vector.broadcast %cst_110 : f32 to vector<8x128xf32>
    %232 = arith.addf %230, %231 : vector<8x128xf32>
    %233 = vector.extract_strided_slice %216 {offsets = [0, 256], sizes = [8, 128], strides = [1, 1]} : vector<8x512xf32> to vector<8x128xf32>
    %234 = math.tanh %233 : vector<8x128xf32>
    %235 = vector.extract_strided_slice %216 {offsets = [0, 384], sizes = [8, 128], strides = [1, 1]} : vector<8x512xf32> to vector<8x128xf32>
    %cst_111 = arith.constant 5.000000e-01 : f32
    %236 = vector.broadcast %cst_111 : f32 to vector<8x128xf32>
    %237 = arith.mulf %236, %235 : vector<8x128xf32>
    %238 = math.tanh %237 : vector<8x128xf32>
    %cst_112 = arith.constant 5.000000e-01 : f32
    %239 = vector.broadcast %cst_112 : f32 to vector<8x128xf32>
    %240 = arith.mulf %239, %238 : vector<8x128xf32>
    %cst_113 = arith.constant 5.000000e-01 : f32
    %241 = vector.broadcast %cst_113 : f32 to vector<8x128xf32>
    %242 = arith.addf %240, %241 : vector<8x128xf32>
    %243 = arith.mulf %232, %165 : vector<8x128xf32>
    %244 = arith.mulf %224, %234 : vector<8x128xf32>
    %245 = arith.addf %243, %244 : vector<8x128xf32>
    %246 = math.tanh %245 : vector<8x128xf32>
    %247 = arith.mulf %242, %246 : vector<8x128xf32>
    %c3_i32 = arith.constant 3 : i32
    %248 = arith.truncf %247 : vector<8x128xf32> to vector<8x128xbf16>
    %c0_114 = arith.constant 0 : index
    %c0_115 = arith.constant 0 : index
    %249 = vector.load %arg9[%c0_114, %c0_115] : memref<128x512xbf16, #tpu.memory_space<vmem>>, vector<128x512xbf16>
    %cst_116 = arith.constant dense<0.000000e+00> : vector<8x512xf32>
    %250 = tpu.matmul %248, %249, %cst_116 {dimension_numbers = #tpu.dot_dimension_numbers<[1], [0], [0], [1], [0, 0, 1, 1], [], []>} : vector<8x128xbf16>, vector<128x512xbf16>, vector<8x512xf32> -> vector<8x512xf32>
    %c0_117 = arith.constant 0 : index
    %c0_118 = arith.constant 0 : index
    %251 = vector.load %arg11[%c0_117, %c0_118] : memref<1x512xf32, #tpu.memory_space<vmem>>, vector<1x512xf32>
    %252 = vector.broadcast %251 : vector<1x512xf32> to vector<8x512xf32>
    %253 = arith.addf %250, %252 : vector<8x512xf32>
    %254 = arith.truncf %208 : vector<8x128xf32> to vector<8x128xbf16>
    %c0_119 = arith.constant 0 : index
    %c0_120 = arith.constant 0 : index
    %255 = vector.load %arg10[%c0_119, %c0_120] : memref<128x512xbf16, #tpu.memory_space<vmem>>, vector<128x512xbf16>
    %cst_121 = arith.constant dense<0.000000e+00> : vector<8x512xf32>
    %256 = tpu.matmul %254, %255, %cst_121 {dimension_numbers = #tpu.dot_dimension_numbers<[1], [0], [0], [1], [0, 0, 1, 1], [], []>} : vector<8x128xbf16>, vector<128x512xbf16>, vector<8x512xf32> -> vector<8x512xf32>
    %257 = arith.addf %253, %256 : vector<8x512xf32>
    %258 = vector.extract_strided_slice %257 {offsets = [0, 0], sizes = [8, 128], strides = [1, 1]} : vector<8x512xf32> to vector<8x128xf32>
    %cst_122 = arith.constant 5.000000e-01 : f32
    %259 = vector.broadcast %cst_122 : f32 to vector<8x128xf32>
    %260 = arith.mulf %259, %258 : vector<8x128xf32>
    %261 = math.tanh %260 : vector<8x128xf32>
    %cst_123 = arith.constant 5.000000e-01 : f32
    %262 = vector.broadcast %cst_123 : f32 to vector<8x128xf32>
    %263 = arith.mulf %262, %261 : vector<8x128xf32>
    %cst_124 = arith.constant 5.000000e-01 : f32
    %264 = vector.broadcast %cst_124 : f32 to vector<8x128xf32>
    %265 = arith.addf %263, %264 : vector<8x128xf32>
    %266 = vector.extract_strided_slice %257 {offsets = [0, 128], sizes = [8, 128], strides = [1, 1]} : vector<8x512xf32> to vector<8x128xf32>
    %cst_125 = arith.constant 5.000000e-01 : f32
    %267 = vector.broadcast %cst_125 : f32 to vector<8x128xf32>
    %268 = arith.mulf %267, %266 : vector<8x128xf32>
    %269 = math.tanh %268 : vector<8x128xf32>
    %cst_126 = arith.constant 5.000000e-01 : f32
    %270 = vector.broadcast %cst_126 : f32 to vector<8x128xf32>
    %271 = arith.mulf %270, %269 : vector<8x128xf32>
    %cst_127 = arith.constant 5.000000e-01 : f32
    %272 = vector.broadcast %cst_127 : f32 to vector<8x128xf32>
    %273 = arith.addf %271, %272 : vector<8x128xf32>
    %274 = vector.extract_strided_slice %257 {offsets = [0, 256], sizes = [8, 128], strides = [1, 1]} : vector<8x512xf32> to vector<8x128xf32>
    %275 = math.tanh %274 : vector<8x128xf32>
    %276 = vector.extract_strided_slice %257 {offsets = [0, 384], sizes = [8, 128], strides = [1, 1]} : vector<8x512xf32> to vector<8x128xf32>
    %cst_128 = arith.constant 5.000000e-01 : f32
    %277 = vector.broadcast %cst_128 : f32 to vector<8x128xf32>
    %278 = arith.mulf %277, %276 : vector<8x128xf32>
    %279 = math.tanh %278 : vector<8x128xf32>
    %cst_129 = arith.constant 5.000000e-01 : f32
    %280 = vector.broadcast %cst_129 : f32 to vector<8x128xf32>
    %281 = arith.mulf %280, %279 : vector<8x128xf32>
    %cst_130 = arith.constant 5.000000e-01 : f32
    %282 = vector.broadcast %cst_130 : f32 to vector<8x128xf32>
    %283 = arith.addf %281, %282 : vector<8x128xf32>
    %284 = arith.mulf %273, %206 : vector<8x128xf32>
    %285 = arith.mulf %265, %275 : vector<8x128xf32>
    %286 = arith.addf %284, %285 : vector<8x128xf32>
    %287 = math.tanh %286 : vector<8x128xf32>
    %288 = arith.mulf %283, %287 : vector<8x128xf32>
    %c8_i32_131 = arith.constant 8 : i32
    %289 = arith.muli %c3_i32, %c8_i32_131 : i32
    %290 = tpu.assume_multiple %289, 8 : i32
    %291 = arith.index_cast %290 : i32 to index
    %c0_132 = arith.constant 0 : index
    %292 = vector.load %arg17[%291, %c0_132] : memref<64x512xf32, #tpu.memory_space<vmem>>, vector<8x512xf32>
    %293 = arith.truncf %247 : vector<8x128xf32> to vector<8x128xbf16>
    %c0_133 = arith.constant 0 : index
    %c0_134 = arith.constant 0 : index
    %294 = vector.load %arg7[%c0_133, %c0_134] : memref<128x512xbf16, #tpu.memory_space<vmem>>, vector<128x512xbf16>
    %cst_135 = arith.constant dense<0.000000e+00> : vector<8x512xf32>
    %295 = tpu.matmul %293, %294, %cst_135 {dimension_numbers = #tpu.dot_dimension_numbers<[1], [0], [0], [1], [0, 0, 1, 1], [], []>} : vector<8x128xbf16>, vector<128x512xbf16>, vector<8x512xf32> -> vector<8x512xf32>
    %296 = arith.addf %292, %295 : vector<8x512xf32>
    %297 = vector.extract_strided_slice %296 {offsets = [0, 0], sizes = [8, 128], strides = [1, 1]} : vector<8x512xf32> to vector<8x128xf32>
    %cst_136 = arith.constant 5.000000e-01 : f32
    %298 = vector.broadcast %cst_136 : f32 to vector<8x128xf32>
    %299 = arith.mulf %298, %297 : vector<8x128xf32>
    %300 = math.tanh %299 : vector<8x128xf32>
    %cst_137 = arith.constant 5.000000e-01 : f32
    %301 = vector.broadcast %cst_137 : f32 to vector<8x128xf32>
    %302 = arith.mulf %301, %300 : vector<8x128xf32>
    %cst_138 = arith.constant 5.000000e-01 : f32
    %303 = vector.broadcast %cst_138 : f32 to vector<8x128xf32>
    %304 = arith.addf %302, %303 : vector<8x128xf32>
    %305 = vector.extract_strided_slice %296 {offsets = [0, 128], sizes = [8, 128], strides = [1, 1]} : vector<8x512xf32> to vector<8x128xf32>
    %cst_139 = arith.constant 5.000000e-01 : f32
    %306 = vector.broadcast %cst_139 : f32 to vector<8x128xf32>
    %307 = arith.mulf %306, %305 : vector<8x128xf32>
    %308 = math.tanh %307 : vector<8x128xf32>
    %cst_140 = arith.constant 5.000000e-01 : f32
    %309 = vector.broadcast %cst_140 : f32 to vector<8x128xf32>
    %310 = arith.mulf %309, %308 : vector<8x128xf32>
    %cst_141 = arith.constant 5.000000e-01 : f32
    %311 = vector.broadcast %cst_141 : f32 to vector<8x128xf32>
    %312 = arith.addf %310, %311 : vector<8x128xf32>
    %313 = vector.extract_strided_slice %296 {offsets = [0, 256], sizes = [8, 128], strides = [1, 1]} : vector<8x512xf32> to vector<8x128xf32>
    %314 = math.tanh %313 : vector<8x128xf32>
    %315 = vector.extract_strided_slice %296 {offsets = [0, 384], sizes = [8, 128], strides = [1, 1]} : vector<8x512xf32> to vector<8x128xf32>
    %cst_142 = arith.constant 5.000000e-01 : f32
    %316 = vector.broadcast %cst_142 : f32 to vector<8x128xf32>
    %317 = arith.mulf %316, %315 : vector<8x128xf32>
    %318 = math.tanh %317 : vector<8x128xf32>
    %cst_143 = arith.constant 5.000000e-01 : f32
    %319 = vector.broadcast %cst_143 : f32 to vector<8x128xf32>
    %320 = arith.mulf %319, %318 : vector<8x128xf32>
    %cst_144 = arith.constant 5.000000e-01 : f32
    %321 = vector.broadcast %cst_144 : f32 to vector<8x128xf32>
    %322 = arith.addf %320, %321 : vector<8x128xf32>
    %323 = arith.mulf %312, %245 : vector<8x128xf32>
    %324 = arith.mulf %304, %314 : vector<8x128xf32>
    %325 = arith.addf %323, %324 : vector<8x128xf32>
    %326 = math.tanh %325 : vector<8x128xf32>
    %327 = arith.mulf %322, %326 : vector<8x128xf32>
    %c4_i32 = arith.constant 4 : i32
    %328 = arith.truncf %327 : vector<8x128xf32> to vector<8x128xbf16>
    %c0_145 = arith.constant 0 : index
    %c0_146 = arith.constant 0 : index
    %329 = vector.load %arg9[%c0_145, %c0_146] : memref<128x512xbf16, #tpu.memory_space<vmem>>, vector<128x512xbf16>
    %cst_147 = arith.constant dense<0.000000e+00> : vector<8x512xf32>
    %330 = tpu.matmul %328, %329, %cst_147 {dimension_numbers = #tpu.dot_dimension_numbers<[1], [0], [0], [1], [0, 0, 1, 1], [], []>} : vector<8x128xbf16>, vector<128x512xbf16>, vector<8x512xf32> -> vector<8x512xf32>
    %c0_148 = arith.constant 0 : index
    %c0_149 = arith.constant 0 : index
    %331 = vector.load %arg11[%c0_148, %c0_149] : memref<1x512xf32, #tpu.memory_space<vmem>>, vector<1x512xf32>
    %332 = vector.broadcast %331 : vector<1x512xf32> to vector<8x512xf32>
    %333 = arith.addf %330, %332 : vector<8x512xf32>
    %334 = arith.truncf %288 : vector<8x128xf32> to vector<8x128xbf16>
    %c0_150 = arith.constant 0 : index
    %c0_151 = arith.constant 0 : index
    %335 = vector.load %arg10[%c0_150, %c0_151] : memref<128x512xbf16, #tpu.memory_space<vmem>>, vector<128x512xbf16>
    %cst_152 = arith.constant dense<0.000000e+00> : vector<8x512xf32>
    %336 = tpu.matmul %334, %335, %cst_152 {dimension_numbers = #tpu.dot_dimension_numbers<[1], [0], [0], [1], [0, 0, 1, 1], [], []>} : vector<8x128xbf16>, vector<128x512xbf16>, vector<8x512xf32> -> vector<8x512xf32>
    %337 = arith.addf %333, %336 : vector<8x512xf32>
    %338 = vector.extract_strided_slice %337 {offsets = [0, 0], sizes = [8, 128], strides = [1, 1]} : vector<8x512xf32> to vector<8x128xf32>
    %cst_153 = arith.constant 5.000000e-01 : f32
    %339 = vector.broadcast %cst_153 : f32 to vector<8x128xf32>
    %340 = arith.mulf %339, %338 : vector<8x128xf32>
    %341 = math.tanh %340 : vector<8x128xf32>
    %cst_154 = arith.constant 5.000000e-01 : f32
    %342 = vector.broadcast %cst_154 : f32 to vector<8x128xf32>
    %343 = arith.mulf %342, %341 : vector<8x128xf32>
    %cst_155 = arith.constant 5.000000e-01 : f32
    %344 = vector.broadcast %cst_155 : f32 to vector<8x128xf32>
    %345 = arith.addf %343, %344 : vector<8x128xf32>
    %346 = vector.extract_strided_slice %337 {offsets = [0, 128], sizes = [8, 128], strides = [1, 1]} : vector<8x512xf32> to vector<8x128xf32>
    %cst_156 = arith.constant 5.000000e-01 : f32
    %347 = vector.broadcast %cst_156 : f32 to vector<8x128xf32>
    %348 = arith.mulf %347, %346 : vector<8x128xf32>
    %349 = math.tanh %348 : vector<8x128xf32>
    %cst_157 = arith.constant 5.000000e-01 : f32
    %350 = vector.broadcast %cst_157 : f32 to vector<8x128xf32>
    %351 = arith.mulf %350, %349 : vector<8x128xf32>
    %cst_158 = arith.constant 5.000000e-01 : f32
    %352 = vector.broadcast %cst_158 : f32 to vector<8x128xf32>
    %353 = arith.addf %351, %352 : vector<8x128xf32>
    %354 = vector.extract_strided_slice %337 {offsets = [0, 256], sizes = [8, 128], strides = [1, 1]} : vector<8x512xf32> to vector<8x128xf32>
    %355 = math.tanh %354 : vector<8x128xf32>
    %356 = vector.extract_strided_slice %337 {offsets = [0, 384], sizes = [8, 128], strides = [1, 1]} : vector<8x512xf32> to vector<8x128xf32>
    %cst_159 = arith.constant 5.000000e-01 : f32
    %357 = vector.broadcast %cst_159 : f32 to vector<8x128xf32>
    %358 = arith.mulf %357, %356 : vector<8x128xf32>
    %359 = math.tanh %358 : vector<8x128xf32>
    %cst_160 = arith.constant 5.000000e-01 : f32
    %360 = vector.broadcast %cst_160 : f32 to vector<8x128xf32>
    %361 = arith.mulf %360, %359 : vector<8x128xf32>
    %cst_161 = arith.constant 5.000000e-01 : f32
    %362 = vector.broadcast %cst_161 : f32 to vector<8x128xf32>
    %363 = arith.addf %361, %362 : vector<8x128xf32>
    %364 = arith.mulf %353, %286 : vector<8x128xf32>
    %365 = arith.mulf %345, %355 : vector<8x128xf32>
    %366 = arith.addf %364, %365 : vector<8x128xf32>
    %367 = math.tanh %366 : vector<8x128xf32>
    %368 = arith.mulf %363, %367 : vector<8x128xf32>
    %c8_i32_162 = arith.constant 8 : i32
    %369 = arith.muli %c4_i32, %c8_i32_162 : i32
    %370 = tpu.assume_multiple %369, 8 : i32
    %371 = arith.index_cast %370 : i32 to index
    %c0_163 = arith.constant 0 : index
    %372 = vector.load %arg17[%371, %c0_163] : memref<64x512xf32, #tpu.memory_space<vmem>>, vector<8x512xf32>
    %373 = arith.truncf %327 : vector<8x128xf32> to vector<8x128xbf16>
    %c0_164 = arith.constant 0 : index
    %c0_165 = arith.constant 0 : index
    %374 = vector.load %arg7[%c0_164, %c0_165] : memref<128x512xbf16, #tpu.memory_space<vmem>>, vector<128x512xbf16>
    %cst_166 = arith.constant dense<0.000000e+00> : vector<8x512xf32>
    %375 = tpu.matmul %373, %374, %cst_166 {dimension_numbers = #tpu.dot_dimension_numbers<[1], [0], [0], [1], [0, 0, 1, 1], [], []>} : vector<8x128xbf16>, vector<128x512xbf16>, vector<8x512xf32> -> vector<8x512xf32>
    %376 = arith.addf %372, %375 : vector<8x512xf32>
    %377 = vector.extract_strided_slice %376 {offsets = [0, 0], sizes = [8, 128], strides = [1, 1]} : vector<8x512xf32> to vector<8x128xf32>
    %cst_167 = arith.constant 5.000000e-01 : f32
    %378 = vector.broadcast %cst_167 : f32 to vector<8x128xf32>
    %379 = arith.mulf %378, %377 : vector<8x128xf32>
    %380 = math.tanh %379 : vector<8x128xf32>
    %cst_168 = arith.constant 5.000000e-01 : f32
    %381 = vector.broadcast %cst_168 : f32 to vector<8x128xf32>
    %382 = arith.mulf %381, %380 : vector<8x128xf32>
    %cst_169 = arith.constant 5.000000e-01 : f32
    %383 = vector.broadcast %cst_169 : f32 to vector<8x128xf32>
    %384 = arith.addf %382, %383 : vector<8x128xf32>
    %385 = vector.extract_strided_slice %376 {offsets = [0, 128], sizes = [8, 128], strides = [1, 1]} : vector<8x512xf32> to vector<8x128xf32>
    %cst_170 = arith.constant 5.000000e-01 : f32
    %386 = vector.broadcast %cst_170 : f32 to vector<8x128xf32>
    %387 = arith.mulf %386, %385 : vector<8x128xf32>
    %388 = math.tanh %387 : vector<8x128xf32>
    %cst_171 = arith.constant 5.000000e-01 : f32
    %389 = vector.broadcast %cst_171 : f32 to vector<8x128xf32>
    %390 = arith.mulf %389, %388 : vector<8x128xf32>
    %cst_172 = arith.constant 5.000000e-01 : f32
    %391 = vector.broadcast %cst_172 : f32 to vector<8x128xf32>
    %392 = arith.addf %390, %391 : vector<8x128xf32>
    %393 = vector.extract_strided_slice %376 {offsets = [0, 256], sizes = [8, 128], strides = [1, 1]} : vector<8x512xf32> to vector<8x128xf32>
    %394 = math.tanh %393 : vector<8x128xf32>
    %395 = vector.extract_strided_slice %376 {offsets = [0, 384], sizes = [8, 128], strides = [1, 1]} : vector<8x512xf32> to vector<8x128xf32>
    %cst_173 = arith.constant 5.000000e-01 : f32
    %396 = vector.broadcast %cst_173 : f32 to vector<8x128xf32>
    %397 = arith.mulf %396, %395 : vector<8x128xf32>
    %398 = math.tanh %397 : vector<8x128xf32>
    %cst_174 = arith.constant 5.000000e-01 : f32
    %399 = vector.broadcast %cst_174 : f32 to vector<8x128xf32>
    %400 = arith.mulf %399, %398 : vector<8x128xf32>
    %cst_175 = arith.constant 5.000000e-01 : f32
    %401 = vector.broadcast %cst_175 : f32 to vector<8x128xf32>
    %402 = arith.addf %400, %401 : vector<8x128xf32>
    %403 = arith.mulf %392, %325 : vector<8x128xf32>
    %404 = arith.mulf %384, %394 : vector<8x128xf32>
    %405 = arith.addf %403, %404 : vector<8x128xf32>
    %406 = math.tanh %405 : vector<8x128xf32>
    %407 = arith.mulf %402, %406 : vector<8x128xf32>
    %c5_i32 = arith.constant 5 : i32
    %408 = arith.truncf %407 : vector<8x128xf32> to vector<8x128xbf16>
    %c0_176 = arith.constant 0 : index
    %c0_177 = arith.constant 0 : index
    %409 = vector.load %arg9[%c0_176, %c0_177] : memref<128x512xbf16, #tpu.memory_space<vmem>>, vector<128x512xbf16>
    %cst_178 = arith.constant dense<0.000000e+00> : vector<8x512xf32>
    %410 = tpu.matmul %408, %409, %cst_178 {dimension_numbers = #tpu.dot_dimension_numbers<[1], [0], [0], [1], [0, 0, 1, 1], [], []>} : vector<8x128xbf16>, vector<128x512xbf16>, vector<8x512xf32> -> vector<8x512xf32>
    %c0_179 = arith.constant 0 : index
    %c0_180 = arith.constant 0 : index
    %411 = vector.load %arg11[%c0_179, %c0_180] : memref<1x512xf32, #tpu.memory_space<vmem>>, vector<1x512xf32>
    %412 = vector.broadcast %411 : vector<1x512xf32> to vector<8x512xf32>
    %413 = arith.addf %410, %412 : vector<8x512xf32>
    %414 = arith.truncf %368 : vector<8x128xf32> to vector<8x128xbf16>
    %c0_181 = arith.constant 0 : index
    %c0_182 = arith.constant 0 : index
    %415 = vector.load %arg10[%c0_181, %c0_182] : memref<128x512xbf16, #tpu.memory_space<vmem>>, vector<128x512xbf16>
    %cst_183 = arith.constant dense<0.000000e+00> : vector<8x512xf32>
    %416 = tpu.matmul %414, %415, %cst_183 {dimension_numbers = #tpu.dot_dimension_numbers<[1], [0], [0], [1], [0, 0, 1, 1], [], []>} : vector<8x128xbf16>, vector<128x512xbf16>, vector<8x512xf32> -> vector<8x512xf32>
    %417 = arith.addf %413, %416 : vector<8x512xf32>
    %418 = vector.extract_strided_slice %417 {offsets = [0, 0], sizes = [8, 128], strides = [1, 1]} : vector<8x512xf32> to vector<8x128xf32>
    %cst_184 = arith.constant 5.000000e-01 : f32
    %419 = vector.broadcast %cst_184 : f32 to vector<8x128xf32>
    %420 = arith.mulf %419, %418 : vector<8x128xf32>
    %421 = math.tanh %420 : vector<8x128xf32>
    %cst_185 = arith.constant 5.000000e-01 : f32
    %422 = vector.broadcast %cst_185 : f32 to vector<8x128xf32>
    %423 = arith.mulf %422, %421 : vector<8x128xf32>
    %cst_186 = arith.constant 5.000000e-01 : f32
    %424 = vector.broadcast %cst_186 : f32 to vector<8x128xf32>
    %425 = arith.addf %423, %424 : vector<8x128xf32>
    %426 = vector.extract_strided_slice %417 {offsets = [0, 128], sizes = [8, 128], strides = [1, 1]} : vector<8x512xf32> to vector<8x128xf32>
    %cst_187 = arith.constant 5.000000e-01 : f32
    %427 = vector.broadcast %cst_187 : f32 to vector<8x128xf32>
    %428 = arith.mulf %427, %426 : vector<8x128xf32>
    %429 = math.tanh %428 : vector<8x128xf32>
    %cst_188 = arith.constant 5.000000e-01 : f32
    %430 = vector.broadcast %cst_188 : f32 to vector<8x128xf32>
    %431 = arith.mulf %430, %429 : vector<8x128xf32>
    %cst_189 = arith.constant 5.000000e-01 : f32
    %432 = vector.broadcast %cst_189 : f32 to vector<8x128xf32>
    %433 = arith.addf %431, %432 : vector<8x128xf32>
    %434 = vector.extract_strided_slice %417 {offsets = [0, 256], sizes = [8, 128], strides = [1, 1]} : vector<8x512xf32> to vector<8x128xf32>
    %435 = math.tanh %434 : vector<8x128xf32>
    %436 = vector.extract_strided_slice %417 {offsets = [0, 384], sizes = [8, 128], strides = [1, 1]} : vector<8x512xf32> to vector<8x128xf32>
    %cst_190 = arith.constant 5.000000e-01 : f32
    %437 = vector.broadcast %cst_190 : f32 to vector<8x128xf32>
    %438 = arith.mulf %437, %436 : vector<8x128xf32>
    %439 = math.tanh %438 : vector<8x128xf32>
    %cst_191 = arith.constant 5.000000e-01 : f32
    %440 = vector.broadcast %cst_191 : f32 to vector<8x128xf32>
    %441 = arith.mulf %440, %439 : vector<8x128xf32>
    %cst_192 = arith.constant 5.000000e-01 : f32
    %442 = vector.broadcast %cst_192 : f32 to vector<8x128xf32>
    %443 = arith.addf %441, %442 : vector<8x128xf32>
    %444 = arith.mulf %433, %366 : vector<8x128xf32>
    %445 = arith.mulf %425, %435 : vector<8x128xf32>
    %446 = arith.addf %444, %445 : vector<8x128xf32>
    %447 = math.tanh %446 : vector<8x128xf32>
    %448 = arith.mulf %443, %447 : vector<8x128xf32>
    %c8_i32_193 = arith.constant 8 : i32
    %449 = arith.muli %c5_i32, %c8_i32_193 : i32
    %450 = tpu.assume_multiple %449, 8 : i32
    %451 = arith.index_cast %450 : i32 to index
    %c0_194 = arith.constant 0 : index
    %452 = vector.load %arg17[%451, %c0_194] : memref<64x512xf32, #tpu.memory_space<vmem>>, vector<8x512xf32>
    %453 = arith.truncf %407 : vector<8x128xf32> to vector<8x128xbf16>
    %c0_195 = arith.constant 0 : index
    %c0_196 = arith.constant 0 : index
    %454 = vector.load %arg7[%c0_195, %c0_196] : memref<128x512xbf16, #tpu.memory_space<vmem>>, vector<128x512xbf16>
    %cst_197 = arith.constant dense<0.000000e+00> : vector<8x512xf32>
    %455 = tpu.matmul %453, %454, %cst_197 {dimension_numbers = #tpu.dot_dimension_numbers<[1], [0], [0], [1], [0, 0, 1, 1], [], []>} : vector<8x128xbf16>, vector<128x512xbf16>, vector<8x512xf32> -> vector<8x512xf32>
    %456 = arith.addf %452, %455 : vector<8x512xf32>
    %457 = vector.extract_strided_slice %456 {offsets = [0, 0], sizes = [8, 128], strides = [1, 1]} : vector<8x512xf32> to vector<8x128xf32>
    %cst_198 = arith.constant 5.000000e-01 : f32
    %458 = vector.broadcast %cst_198 : f32 to vector<8x128xf32>
    %459 = arith.mulf %458, %457 : vector<8x128xf32>
    %460 = math.tanh %459 : vector<8x128xf32>
    %cst_199 = arith.constant 5.000000e-01 : f32
    %461 = vector.broadcast %cst_199 : f32 to vector<8x128xf32>
    %462 = arith.mulf %461, %460 : vector<8x128xf32>
    %cst_200 = arith.constant 5.000000e-01 : f32
    %463 = vector.broadcast %cst_200 : f32 to vector<8x128xf32>
    %464 = arith.addf %462, %463 : vector<8x128xf32>
    %465 = vector.extract_strided_slice %456 {offsets = [0, 128], sizes = [8, 128], strides = [1, 1]} : vector<8x512xf32> to vector<8x128xf32>
    %cst_201 = arith.constant 5.000000e-01 : f32
    %466 = vector.broadcast %cst_201 : f32 to vector<8x128xf32>
    %467 = arith.mulf %466, %465 : vector<8x128xf32>
    %468 = math.tanh %467 : vector<8x128xf32>
    %cst_202 = arith.constant 5.000000e-01 : f32
    %469 = vector.broadcast %cst_202 : f32 to vector<8x128xf32>
    %470 = arith.mulf %469, %468 : vector<8x128xf32>
    %cst_203 = arith.constant 5.000000e-01 : f32
    %471 = vector.broadcast %cst_203 : f32 to vector<8x128xf32>
    %472 = arith.addf %470, %471 : vector<8x128xf32>
    %473 = vector.extract_strided_slice %456 {offsets = [0, 256], sizes = [8, 128], strides = [1, 1]} : vector<8x512xf32> to vector<8x128xf32>
    %474 = math.tanh %473 : vector<8x128xf32>
    %475 = vector.extract_strided_slice %456 {offsets = [0, 384], sizes = [8, 128], strides = [1, 1]} : vector<8x512xf32> to vector<8x128xf32>
    %cst_204 = arith.constant 5.000000e-01 : f32
    %476 = vector.broadcast %cst_204 : f32 to vector<8x128xf32>
    %477 = arith.mulf %476, %475 : vector<8x128xf32>
    %478 = math.tanh %477 : vector<8x128xf32>
    %cst_205 = arith.constant 5.000000e-01 : f32
    %479 = vector.broadcast %cst_205 : f32 to vector<8x128xf32>
    %480 = arith.mulf %479, %478 : vector<8x128xf32>
    %cst_206 = arith.constant 5.000000e-01 : f32
    %481 = vector.broadcast %cst_206 : f32 to vector<8x128xf32>
    %482 = arith.addf %480, %481 : vector<8x128xf32>
    %483 = arith.mulf %472, %405 : vector<8x128xf32>
    %484 = arith.mulf %464, %474 : vector<8x128xf32>
    %485 = arith.addf %483, %484 : vector<8x128xf32>
    %486 = math.tanh %485 : vector<8x128xf32>
    %487 = arith.mulf %482, %486 : vector<8x128xf32>
    %c6_i32 = arith.constant 6 : i32
    %488 = arith.truncf %487 : vector<8x128xf32> to vector<8x128xbf16>
    %c0_207 = arith.constant 0 : index
    %c0_208 = arith.constant 0 : index
    %489 = vector.load %arg9[%c0_207, %c0_208] : memref<128x512xbf16, #tpu.memory_space<vmem>>, vector<128x512xbf16>
    %cst_209 = arith.constant dense<0.000000e+00> : vector<8x512xf32>
    %490 = tpu.matmul %488, %489, %cst_209 {dimension_numbers = #tpu.dot_dimension_numbers<[1], [0], [0], [1], [0, 0, 1, 1], [], []>} : vector<8x128xbf16>, vector<128x512xbf16>, vector<8x512xf32> -> vector<8x512xf32>
    %c0_210 = arith.constant 0 : index
    %c0_211 = arith.constant 0 : index
    %491 = vector.load %arg11[%c0_210, %c0_211] : memref<1x512xf32, #tpu.memory_space<vmem>>, vector<1x512xf32>
    %492 = vector.broadcast %491 : vector<1x512xf32> to vector<8x512xf32>
    %493 = arith.addf %490, %492 : vector<8x512xf32>
    %494 = arith.truncf %448 : vector<8x128xf32> to vector<8x128xbf16>
    %c0_212 = arith.constant 0 : index
    %c0_213 = arith.constant 0 : index
    %495 = vector.load %arg10[%c0_212, %c0_213] : memref<128x512xbf16, #tpu.memory_space<vmem>>, vector<128x512xbf16>
    %cst_214 = arith.constant dense<0.000000e+00> : vector<8x512xf32>
    %496 = tpu.matmul %494, %495, %cst_214 {dimension_numbers = #tpu.dot_dimension_numbers<[1], [0], [0], [1], [0, 0, 1, 1], [], []>} : vector<8x128xbf16>, vector<128x512xbf16>, vector<8x512xf32> -> vector<8x512xf32>
    %497 = arith.addf %493, %496 : vector<8x512xf32>
    %498 = vector.extract_strided_slice %497 {offsets = [0, 0], sizes = [8, 128], strides = [1, 1]} : vector<8x512xf32> to vector<8x128xf32>
    %cst_215 = arith.constant 5.000000e-01 : f32
    %499 = vector.broadcast %cst_215 : f32 to vector<8x128xf32>
    %500 = arith.mulf %499, %498 : vector<8x128xf32>
    %501 = math.tanh %500 : vector<8x128xf32>
    %cst_216 = arith.constant 5.000000e-01 : f32
    %502 = vector.broadcast %cst_216 : f32 to vector<8x128xf32>
    %503 = arith.mulf %502, %501 : vector<8x128xf32>
    %cst_217 = arith.constant 5.000000e-01 : f32
    %504 = vector.broadcast %cst_217 : f32 to vector<8x128xf32>
    %505 = arith.addf %503, %504 : vector<8x128xf32>
    %506 = vector.extract_strided_slice %497 {offsets = [0, 128], sizes = [8, 128], strides = [1, 1]} : vector<8x512xf32> to vector<8x128xf32>
    %cst_218 = arith.constant 5.000000e-01 : f32
    %507 = vector.broadcast %cst_218 : f32 to vector<8x128xf32>
    %508 = arith.mulf %507, %506 : vector<8x128xf32>
    %509 = math.tanh %508 : vector<8x128xf32>
    %cst_219 = arith.constant 5.000000e-01 : f32
    %510 = vector.broadcast %cst_219 : f32 to vector<8x128xf32>
    %511 = arith.mulf %510, %509 : vector<8x128xf32>
    %cst_220 = arith.constant 5.000000e-01 : f32
    %512 = vector.broadcast %cst_220 : f32 to vector<8x128xf32>
    %513 = arith.addf %511, %512 : vector<8x128xf32>
    %514 = vector.extract_strided_slice %497 {offsets = [0, 256], sizes = [8, 128], strides = [1, 1]} : vector<8x512xf32> to vector<8x128xf32>
    %515 = math.tanh %514 : vector<8x128xf32>
    %516 = vector.extract_strided_slice %497 {offsets = [0, 384], sizes = [8, 128], strides = [1, 1]} : vector<8x512xf32> to vector<8x128xf32>
    %cst_221 = arith.constant 5.000000e-01 : f32
    %517 = vector.broadcast %cst_221 : f32 to vector<8x128xf32>
    %518 = arith.mulf %517, %516 : vector<8x128xf32>
    %519 = math.tanh %518 : vector<8x128xf32>
    %cst_222 = arith.constant 5.000000e-01 : f32
    %520 = vector.broadcast %cst_222 : f32 to vector<8x128xf32>
    %521 = arith.mulf %520, %519 : vector<8x128xf32>
    %cst_223 = arith.constant 5.000000e-01 : f32
    %522 = vector.broadcast %cst_223 : f32 to vector<8x128xf32>
    %523 = arith.addf %521, %522 : vector<8x128xf32>
    %524 = arith.mulf %513, %446 : vector<8x128xf32>
    %525 = arith.mulf %505, %515 : vector<8x128xf32>
    %526 = arith.addf %524, %525 : vector<8x128xf32>
    %527 = math.tanh %526 : vector<8x128xf32>
    %528 = arith.mulf %523, %527 : vector<8x128xf32>
    %c8_i32_224 = arith.constant 8 : i32
    %529 = arith.muli %c6_i32, %c8_i32_224 : i32
    %530 = tpu.assume_multiple %529, 8 : i32
    %531 = arith.index_cast %530 : i32 to index
    %c0_225 = arith.constant 0 : index
    %532 = vector.load %arg17[%531, %c0_225] : memref<64x512xf32, #tpu.memory_space<vmem>>, vector<8x512xf32>
    %533 = arith.truncf %487 : vector<8x128xf32> to vector<8x128xbf16>
    %c0_226 = arith.constant 0 : index
    %c0_227 = arith.constant 0 : index
    %534 = vector.load %arg7[%c0_226, %c0_227] : memref<128x512xbf16, #tpu.memory_space<vmem>>, vector<128x512xbf16>
    %cst_228 = arith.constant dense<0.000000e+00> : vector<8x512xf32>
    %535 = tpu.matmul %533, %534, %cst_228 {dimension_numbers = #tpu.dot_dimension_numbers<[1], [0], [0], [1], [0, 0, 1, 1], [], []>} : vector<8x128xbf16>, vector<128x512xbf16>, vector<8x512xf32> -> vector<8x512xf32>
    %536 = arith.addf %532, %535 : vector<8x512xf32>
    %537 = vector.extract_strided_slice %536 {offsets = [0, 0], sizes = [8, 128], strides = [1, 1]} : vector<8x512xf32> to vector<8x128xf32>
    %cst_229 = arith.constant 5.000000e-01 : f32
    %538 = vector.broadcast %cst_229 : f32 to vector<8x128xf32>
    %539 = arith.mulf %538, %537 : vector<8x128xf32>
    %540 = math.tanh %539 : vector<8x128xf32>
    %cst_230 = arith.constant 5.000000e-01 : f32
    %541 = vector.broadcast %cst_230 : f32 to vector<8x128xf32>
    %542 = arith.mulf %541, %540 : vector<8x128xf32>
    %cst_231 = arith.constant 5.000000e-01 : f32
    %543 = vector.broadcast %cst_231 : f32 to vector<8x128xf32>
    %544 = arith.addf %542, %543 : vector<8x128xf32>
    %545 = vector.extract_strided_slice %536 {offsets = [0, 128], sizes = [8, 128], strides = [1, 1]} : vector<8x512xf32> to vector<8x128xf32>
    %cst_232 = arith.constant 5.000000e-01 : f32
    %546 = vector.broadcast %cst_232 : f32 to vector<8x128xf32>
    %547 = arith.mulf %546, %545 : vector<8x128xf32>
    %548 = math.tanh %547 : vector<8x128xf32>
    %cst_233 = arith.constant 5.000000e-01 : f32
    %549 = vector.broadcast %cst_233 : f32 to vector<8x128xf32>
    %550 = arith.mulf %549, %548 : vector<8x128xf32>
    %cst_234 = arith.constant 5.000000e-01 : f32
    %551 = vector.broadcast %cst_234 : f32 to vector<8x128xf32>
    %552 = arith.addf %550, %551 : vector<8x128xf32>
    %553 = vector.extract_strided_slice %536 {offsets = [0, 256], sizes = [8, 128], strides = [1, 1]} : vector<8x512xf32> to vector<8x128xf32>
    %554 = math.tanh %553 : vector<8x128xf32>
    %555 = vector.extract_strided_slice %536 {offsets = [0, 384], sizes = [8, 128], strides = [1, 1]} : vector<8x512xf32> to vector<8x128xf32>
    %cst_235 = arith.constant 5.000000e-01 : f32
    %556 = vector.broadcast %cst_235 : f32 to vector<8x128xf32>
    %557 = arith.mulf %556, %555 : vector<8x128xf32>
    %558 = math.tanh %557 : vector<8x128xf32>
    %cst_236 = arith.constant 5.000000e-01 : f32
    %559 = vector.broadcast %cst_236 : f32 to vector<8x128xf32>
    %560 = arith.mulf %559, %558 : vector<8x128xf32>
    %cst_237 = arith.constant 5.000000e-01 : f32
    %561 = vector.broadcast %cst_237 : f32 to vector<8x128xf32>
    %562 = arith.addf %560, %561 : vector<8x128xf32>
    %563 = arith.mulf %552, %485 : vector<8x128xf32>
    %564 = arith.mulf %544, %554 : vector<8x128xf32>
    %565 = arith.addf %563, %564 : vector<8x128xf32>
    %566 = math.tanh %565 : vector<8x128xf32>
    %567 = arith.mulf %562, %566 : vector<8x128xf32>
    %c7_i32 = arith.constant 7 : i32
    %568 = arith.truncf %567 : vector<8x128xf32> to vector<8x128xbf16>
    %c0_238 = arith.constant 0 : index
    %c0_239 = arith.constant 0 : index
    %569 = vector.load %arg9[%c0_238, %c0_239] : memref<128x512xbf16, #tpu.memory_space<vmem>>, vector<128x512xbf16>
    %cst_240 = arith.constant dense<0.000000e+00> : vector<8x512xf32>
    %570 = tpu.matmul %568, %569, %cst_240 {dimension_numbers = #tpu.dot_dimension_numbers<[1], [0], [0], [1], [0, 0, 1, 1], [], []>} : vector<8x128xbf16>, vector<128x512xbf16>, vector<8x512xf32> -> vector<8x512xf32>
    %c0_241 = arith.constant 0 : index
    %c0_242 = arith.constant 0 : index
    %571 = vector.load %arg11[%c0_241, %c0_242] : memref<1x512xf32, #tpu.memory_space<vmem>>, vector<1x512xf32>
    %572 = vector.broadcast %571 : vector<1x512xf32> to vector<8x512xf32>
    %573 = arith.addf %570, %572 : vector<8x512xf32>
    %574 = arith.truncf %528 : vector<8x128xf32> to vector<8x128xbf16>
    %c0_243 = arith.constant 0 : index
    %c0_244 = arith.constant 0 : index
    %575 = vector.load %arg10[%c0_243, %c0_244] : memref<128x512xbf16, #tpu.memory_space<vmem>>, vector<128x512xbf16>
    %cst_245 = arith.constant dense<0.000000e+00> : vector<8x512xf32>
    %576 = tpu.matmul %574, %575, %cst_245 {dimension_numbers = #tpu.dot_dimension_numbers<[1], [0], [0], [1], [0, 0, 1, 1], [], []>} : vector<8x128xbf16>, vector<128x512xbf16>, vector<8x512xf32> -> vector<8x512xf32>
    %577 = arith.addf %573, %576 : vector<8x512xf32>
    %578 = vector.extract_strided_slice %577 {offsets = [0, 0], sizes = [8, 128], strides = [1, 1]} : vector<8x512xf32> to vector<8x128xf32>
    %cst_246 = arith.constant 5.000000e-01 : f32
    %579 = vector.broadcast %cst_246 : f32 to vector<8x128xf32>
    %580 = arith.mulf %579, %578 : vector<8x128xf32>
    %581 = math.tanh %580 : vector<8x128xf32>
    %cst_247 = arith.constant 5.000000e-01 : f32
    %582 = vector.broadcast %cst_247 : f32 to vector<8x128xf32>
    %583 = arith.mulf %582, %581 : vector<8x128xf32>
    %cst_248 = arith.constant 5.000000e-01 : f32
    %584 = vector.broadcast %cst_248 : f32 to vector<8x128xf32>
    %585 = arith.addf %583, %584 : vector<8x128xf32>
    %586 = vector.extract_strided_slice %577 {offsets = [0, 128], sizes = [8, 128], strides = [1, 1]} : vector<8x512xf32> to vector<8x128xf32>
    %cst_249 = arith.constant 5.000000e-01 : f32
    %587 = vector.broadcast %cst_249 : f32 to vector<8x128xf32>
    %588 = arith.mulf %587, %586 : vector<8x128xf32>
    %589 = math.tanh %588 : vector<8x128xf32>
    %cst_250 = arith.constant 5.000000e-01 : f32
    %590 = vector.broadcast %cst_250 : f32 to vector<8x128xf32>
    %591 = arith.mulf %590, %589 : vector<8x128xf32>
    %cst_251 = arith.constant 5.000000e-01 : f32
    %592 = vector.broadcast %cst_251 : f32 to vector<8x128xf32>
    %593 = arith.addf %591, %592 : vector<8x128xf32>
    %594 = vector.extract_strided_slice %577 {offsets = [0, 256], sizes = [8, 128], strides = [1, 1]} : vector<8x512xf32> to vector<8x128xf32>
    %595 = math.tanh %594 : vector<8x128xf32>
    %596 = vector.extract_strided_slice %577 {offsets = [0, 384], sizes = [8, 128], strides = [1, 1]} : vector<8x512xf32> to vector<8x128xf32>
    %cst_252 = arith.constant 5.000000e-01 : f32
    %597 = vector.broadcast %cst_252 : f32 to vector<8x128xf32>
    %598 = arith.mulf %597, %596 : vector<8x128xf32>
    %599 = math.tanh %598 : vector<8x128xf32>
    %cst_253 = arith.constant 5.000000e-01 : f32
    %600 = vector.broadcast %cst_253 : f32 to vector<8x128xf32>
    %601 = arith.mulf %600, %599 : vector<8x128xf32>
    %cst_254 = arith.constant 5.000000e-01 : f32
    %602 = vector.broadcast %cst_254 : f32 to vector<8x128xf32>
    %603 = arith.addf %601, %602 : vector<8x128xf32>
    %604 = arith.mulf %593, %526 : vector<8x128xf32>
    %605 = arith.mulf %585, %595 : vector<8x128xf32>
    %606 = arith.addf %604, %605 : vector<8x128xf32>
    %607 = math.tanh %606 : vector<8x128xf32>
    %608 = arith.mulf %603, %607 : vector<8x128xf32>
    %c8_i32_255 = arith.constant 8 : i32
    %609 = arith.muli %c7_i32, %c8_i32_255 : i32
    %610 = tpu.assume_multiple %609, 8 : i32
    %611 = arith.index_cast %610 : i32 to index
    %c0_256 = arith.constant 0 : index
    %612 = vector.load %arg17[%611, %c0_256] : memref<64x512xf32, #tpu.memory_space<vmem>>, vector<8x512xf32>
    %613 = arith.truncf %567 : vector<8x128xf32> to vector<8x128xbf16>
    %c0_257 = arith.constant 0 : index
    %c0_258 = arith.constant 0 : index
    %614 = vector.load %arg7[%c0_257, %c0_258] : memref<128x512xbf16, #tpu.memory_space<vmem>>, vector<128x512xbf16>
    %cst_259 = arith.constant dense<0.000000e+00> : vector<8x512xf32>
    %615 = tpu.matmul %613, %614, %cst_259 {dimension_numbers = #tpu.dot_dimension_numbers<[1], [0], [0], [1], [0, 0, 1, 1], [], []>} : vector<8x128xbf16>, vector<128x512xbf16>, vector<8x512xf32> -> vector<8x512xf32>
    %616 = arith.addf %612, %615 : vector<8x512xf32>
    %617 = vector.extract_strided_slice %616 {offsets = [0, 0], sizes = [8, 128], strides = [1, 1]} : vector<8x512xf32> to vector<8x128xf32>
    %cst_260 = arith.constant 5.000000e-01 : f32
    %618 = vector.broadcast %cst_260 : f32 to vector<8x128xf32>
    %619 = arith.mulf %618, %617 : vector<8x128xf32>
    %620 = math.tanh %619 : vector<8x128xf32>
    %cst_261 = arith.constant 5.000000e-01 : f32
    %621 = vector.broadcast %cst_261 : f32 to vector<8x128xf32>
    %622 = arith.mulf %621, %620 : vector<8x128xf32>
    %cst_262 = arith.constant 5.000000e-01 : f32
    %623 = vector.broadcast %cst_262 : f32 to vector<8x128xf32>
    %624 = arith.addf %622, %623 : vector<8x128xf32>
    %625 = vector.extract_strided_slice %616 {offsets = [0, 128], sizes = [8, 128], strides = [1, 1]} : vector<8x512xf32> to vector<8x128xf32>
    %cst_263 = arith.constant 5.000000e-01 : f32
    %626 = vector.broadcast %cst_263 : f32 to vector<8x128xf32>
    %627 = arith.mulf %626, %625 : vector<8x128xf32>
    %628 = math.tanh %627 : vector<8x128xf32>
    %cst_264 = arith.constant 5.000000e-01 : f32
    %629 = vector.broadcast %cst_264 : f32 to vector<8x128xf32>
    %630 = arith.mulf %629, %628 : vector<8x128xf32>
    %cst_265 = arith.constant 5.000000e-01 : f32
    %631 = vector.broadcast %cst_265 : f32 to vector<8x128xf32>
    %632 = arith.addf %630, %631 : vector<8x128xf32>
    %633 = vector.extract_strided_slice %616 {offsets = [0, 256], sizes = [8, 128], strides = [1, 1]} : vector<8x512xf32> to vector<8x128xf32>
    %634 = math.tanh %633 : vector<8x128xf32>
    %635 = vector.extract_strided_slice %616 {offsets = [0, 384], sizes = [8, 128], strides = [1, 1]} : vector<8x512xf32> to vector<8x128xf32>
    %cst_266 = arith.constant 5.000000e-01 : f32
    %636 = vector.broadcast %cst_266 : f32 to vector<8x128xf32>
    %637 = arith.mulf %636, %635 : vector<8x128xf32>
    %638 = math.tanh %637 : vector<8x128xf32>
    %cst_267 = arith.constant 5.000000e-01 : f32
    %639 = vector.broadcast %cst_267 : f32 to vector<8x128xf32>
    %640 = arith.mulf %639, %638 : vector<8x128xf32>
    %cst_268 = arith.constant 5.000000e-01 : f32
    %641 = vector.broadcast %cst_268 : f32 to vector<8x128xf32>
    %642 = arith.addf %640, %641 : vector<8x128xf32>
    %643 = arith.mulf %632, %565 : vector<8x128xf32>
    %644 = arith.mulf %624, %634 : vector<8x128xf32>
    %645 = arith.addf %643, %644 : vector<8x128xf32>
    %646 = math.tanh %645 : vector<8x128xf32>
    %647 = arith.mulf %642, %646 : vector<8x128xf32>
    %c7_i32_269 = arith.constant 7 : i32
    %648 = arith.truncf %647 : vector<8x128xf32> to vector<8x128xbf16>
    %c0_270 = arith.constant 0 : index
    %c0_271 = arith.constant 0 : index
    %649 = vector.load %arg9[%c0_270, %c0_271] : memref<128x512xbf16, #tpu.memory_space<vmem>>, vector<128x512xbf16>
    %cst_272 = arith.constant dense<0.000000e+00> : vector<8x512xf32>
    %650 = tpu.matmul %648, %649, %cst_272 {dimension_numbers = #tpu.dot_dimension_numbers<[1], [0], [0], [1], [0, 0, 1, 1], [], []>} : vector<8x128xbf16>, vector<128x512xbf16>, vector<8x512xf32> -> vector<8x512xf32>
    %c0_273 = arith.constant 0 : index
    %c0_274 = arith.constant 0 : index
    %651 = vector.load %arg11[%c0_273, %c0_274] : memref<1x512xf32, #tpu.memory_space<vmem>>, vector<1x512xf32>
    %652 = vector.broadcast %651 : vector<1x512xf32> to vector<8x512xf32>
    %653 = arith.addf %650, %652 : vector<8x512xf32>
    %654 = arith.truncf %608 : vector<8x128xf32> to vector<8x128xbf16>
    %c0_275 = arith.constant 0 : index
    %c0_276 = arith.constant 0 : index
    %655 = vector.load %arg10[%c0_275, %c0_276] : memref<128x512xbf16, #tpu.memory_space<vmem>>, vector<128x512xbf16>
    %cst_277 = arith.constant dense<0.000000e+00> : vector<8x512xf32>
    %656 = tpu.matmul %654, %655, %cst_277 {dimension_numbers = #tpu.dot_dimension_numbers<[1], [0], [0], [1], [0, 0, 1, 1], [], []>} : vector<8x128xbf16>, vector<128x512xbf16>, vector<8x512xf32> -> vector<8x512xf32>
    %657 = arith.addf %653, %656 : vector<8x512xf32>
    %658 = vector.extract_strided_slice %657 {offsets = [0, 0], sizes = [8, 128], strides = [1, 1]} : vector<8x512xf32> to vector<8x128xf32>
    %cst_278 = arith.constant 5.000000e-01 : f32
    %659 = vector.broadcast %cst_278 : f32 to vector<8x128xf32>
    %660 = arith.mulf %659, %658 : vector<8x128xf32>
    %661 = math.tanh %660 : vector<8x128xf32>
    %cst_279 = arith.constant 5.000000e-01 : f32
    %662 = vector.broadcast %cst_279 : f32 to vector<8x128xf32>
    %663 = arith.mulf %662, %661 : vector<8x128xf32>
    %cst_280 = arith.constant 5.000000e-01 : f32
    %664 = vector.broadcast %cst_280 : f32 to vector<8x128xf32>
    %665 = arith.addf %663, %664 : vector<8x128xf32>
    %666 = vector.extract_strided_slice %657 {offsets = [0, 128], sizes = [8, 128], strides = [1, 1]} : vector<8x512xf32> to vector<8x128xf32>
    %cst_281 = arith.constant 5.000000e-01 : f32
    %667 = vector.broadcast %cst_281 : f32 to vector<8x128xf32>
    %668 = arith.mulf %667, %666 : vector<8x128xf32>
    %669 = math.tanh %668 : vector<8x128xf32>
    %cst_282 = arith.constant 5.000000e-01 : f32
    %670 = vector.broadcast %cst_282 : f32 to vector<8x128xf32>
    %671 = arith.mulf %670, %669 : vector<8x128xf32>
    %cst_283 = arith.constant 5.000000e-01 : f32
    %672 = vector.broadcast %cst_283 : f32 to vector<8x128xf32>
    %673 = arith.addf %671, %672 : vector<8x128xf32>
    %674 = vector.extract_strided_slice %657 {offsets = [0, 256], sizes = [8, 128], strides = [1, 1]} : vector<8x512xf32> to vector<8x128xf32>
    %675 = math.tanh %674 : vector<8x128xf32>
    %676 = vector.extract_strided_slice %657 {offsets = [0, 384], sizes = [8, 128], strides = [1, 1]} : vector<8x512xf32> to vector<8x128xf32>
    %cst_284 = arith.constant 5.000000e-01 : f32
    %677 = vector.broadcast %cst_284 : f32 to vector<8x128xf32>
    %678 = arith.mulf %677, %676 : vector<8x128xf32>
    %679 = math.tanh %678 : vector<8x128xf32>
    %cst_285 = arith.constant 5.000000e-01 : f32
    %680 = vector.broadcast %cst_285 : f32 to vector<8x128xf32>
    %681 = arith.mulf %680, %679 : vector<8x128xf32>
    %cst_286 = arith.constant 5.000000e-01 : f32
    %682 = vector.broadcast %cst_286 : f32 to vector<8x128xf32>
    %683 = arith.addf %681, %682 : vector<8x128xf32>
    %684 = arith.mulf %673, %606 : vector<8x128xf32>
    %685 = arith.mulf %665, %675 : vector<8x128xf32>
    %686 = arith.addf %684, %685 : vector<8x128xf32>
    %687 = math.tanh %686 : vector<8x128xf32>
    %688 = arith.mulf %683, %687 : vector<8x128xf32>
    %c0_287 = arith.constant 0 : index
    %c0_288 = arith.constant 0 : index
    %689 = vector.load %arg12[%c0_287, %c0_288] : memref<128x1xf32, #tpu.memory_space<vmem>>, vector<128x1xf32>
    %cst_289 = arith.constant dense<0.000000e+00> : vector<8x1xf32>
    %690 = tpu.matmul %688, %689, %cst_289 {dimension_numbers = #tpu.dot_dimension_numbers<[1], [0], [0], [1], [0, 0, 1, 1], [], []>} : vector<8x128xf32>, vector<128x1xf32>, vector<8x1xf32> -> vector<8x1xf32>
    %c0_290 = arith.constant 0 : index
    %c0_291 = arith.constant 0 : index
    %691 = vector.load %arg13[%c0_290, %c0_291] : memref<1x1xf32, #tpu.memory_space<vmem>>, vector<1x1xf32>
    %692 = vector.broadcast %691 : vector<1x1xf32> to vector<8x1xf32>
    %693 = arith.addf %690, %692 : vector<8x1xf32>
    %694 = tpu.iota {dimensions = array<i32: 1>} : vector<8x128xi32>
    %c0_i32 = arith.constant 0 : i32
    %695 = vector.broadcast %c0_i32 : i32 to vector<8x128xi32>
    %696 = arith.cmpi eq, %694, %695 : vector<8x128xi32>
    %cst_292 = arith.constant 0.000000e+00 : f32
    %697 = vector.broadcast %cst_292 : f32 to vector<8x128xf32>
    %698 = vector.shape_cast %693 : vector<8x1xf32> to vector<8x1xf32>
    %699 = vector.broadcast %698 : vector<8x1xf32> to vector<8x128xf32>
    %700 = arith.select %696, %699, %697 : vector<8x128xi1>, vector<8x128xf32>
    %c1_i32_293 = arith.constant 1 : i32
    %c0_294 = arith.constant 0 : index
    %c0_295 = arith.constant 0 : index
    %701 = vector.load %arg14[%c0_294, %c0_295] : memref<1x32xf32, #tpu.memory_space<vmem>>, vector<1x32xf32>
    %702 = vector.broadcast %693 : vector<8x1xf32> to vector<8x32xf32>
    %703 = vector.broadcast %701 : vector<1x32xf32> to vector<8x32xf32>
    %704 = arith.mulf %702, %703 : vector<8x32xf32>
    %c0_296 = arith.constant 0 : index
    %c0_297 = arith.constant 0 : index
    %705 = vector.load %arg15[%c0_296, %c0_297] : memref<1x32xf32, #tpu.memory_space<vmem>>, vector<1x32xf32>
    %706 = vector.broadcast %705 : vector<1x32xf32> to vector<8x32xf32>
    %707 = arith.addf %704, %706 : vector<8x32xf32>
    %cst_298 = arith.constant 0.000000e+00 : f32
    %708 = vector.broadcast %cst_298 : f32 to vector<8x32xf32>
    %709 = arith.maximumf %707, %708 : vector<8x32xf32>
    %c1_299 = arith.constant 1 : index
    %c0_300 = arith.constant 0 : index
    %c0_301 = arith.constant 0 : index
    %710 = vector.load %arg4[%c1_299, %c0_300, %c0_301] : memref<3x32x32xf32, #tpu.memory_space<vmem>>, vector<1x32x32xf32>
    %711 = vector.shape_cast %710 : vector<1x32x32xf32> to vector<32x32xf32>
    %cst_302 = arith.constant dense<0.000000e+00> : vector<8x32xf32>
    %712 = tpu.matmul %709, %711, %cst_302 {dimension_numbers = #tpu.dot_dimension_numbers<[1], [0], [0], [1], [0, 0, 1, 1], [], []>} : vector<8x32xf32>, vector<32x32xf32>, vector<8x32xf32> -> vector<8x32xf32>
    %c0_303 = arith.constant 0 : index
    %c0_304 = arith.constant 0 : index
    %713 = vector.load %arg5[%c0_303, %c0_304] : memref<1x32xf32, #tpu.memory_space<vmem>>, vector<1x32xf32>
    %714 = vector.broadcast %713 : vector<1x32xf32> to vector<8x32xf32>
    %715 = arith.addf %712, %714 : vector<8x32xf32>
    %cst_305 = arith.constant 0.000000e+00 : f32
    %716 = vector.broadcast %cst_305 : f32 to vector<8x32xf32>
    %717 = arith.maximumf %715, %716 : vector<8x32xf32>
    %718 = arith.truncf %717 : vector<8x32xf32> to vector<8x32xbf16>
    %c0_306 = arith.constant 0 : index
    %c0_307 = arith.constant 0 : index
    %719 = vector.load %arg6[%c0_306, %c0_307] : memref<32x512xbf16, #tpu.memory_space<vmem>>, vector<32x512xbf16>
    %cst_308 = arith.constant dense<0.000000e+00> : vector<8x512xf32>
    %720 = tpu.matmul %718, %719, %cst_308 {dimension_numbers = #tpu.dot_dimension_numbers<[1], [0], [0], [1], [0, 0, 1, 1], [], []>} : vector<8x32xbf16>, vector<32x512xbf16>, vector<8x512xf32> -> vector<8x512xf32>
    %c0_309 = arith.constant 0 : index
    %c0_310 = arith.constant 0 : index
    %721 = vector.load %arg8[%c0_309, %c0_310] : memref<1x512xf32, #tpu.memory_space<vmem>>, vector<1x512xf32>
    %722 = vector.broadcast %721 : vector<1x512xf32> to vector<8x512xf32>
    %723 = arith.addf %720, %722 : vector<8x512xf32>
    %724 = arith.truncf %647 : vector<8x128xf32> to vector<8x128xbf16>
    %c0_311 = arith.constant 0 : index
    %c0_312 = arith.constant 0 : index
    %725 = vector.load %arg7[%c0_311, %c0_312] : memref<128x512xbf16, #tpu.memory_space<vmem>>, vector<128x512xbf16>
    %cst_313 = arith.constant dense<0.000000e+00> : vector<8x512xf32>
    %726 = tpu.matmul %724, %725, %cst_313 {dimension_numbers = #tpu.dot_dimension_numbers<[1], [0], [0], [1], [0, 0, 1, 1], [], []>} : vector<8x128xbf16>, vector<128x512xbf16>, vector<8x512xf32> -> vector<8x512xf32>
    %727 = arith.addf %723, %726 : vector<8x512xf32>
    %728 = vector.extract_strided_slice %727 {offsets = [0, 0], sizes = [8, 128], strides = [1, 1]} : vector<8x512xf32> to vector<8x128xf32>
    %cst_314 = arith.constant 5.000000e-01 : f32
    %729 = vector.broadcast %cst_314 : f32 to vector<8x128xf32>
    %730 = arith.mulf %729, %728 : vector<8x128xf32>
    %731 = math.tanh %730 : vector<8x128xf32>
    %cst_315 = arith.constant 5.000000e-01 : f32
    %732 = vector.broadcast %cst_315 : f32 to vector<8x128xf32>
    %733 = arith.mulf %732, %731 : vector<8x128xf32>
    %cst_316 = arith.constant 5.000000e-01 : f32
    %734 = vector.broadcast %cst_316 : f32 to vector<8x128xf32>
    %735 = arith.addf %733, %734 : vector<8x128xf32>
    %736 = vector.extract_strided_slice %727 {offsets = [0, 128], sizes = [8, 128], strides = [1, 1]} : vector<8x512xf32> to vector<8x128xf32>
    %cst_317 = arith.constant 5.000000e-01 : f32
    %737 = vector.broadcast %cst_317 : f32 to vector<8x128xf32>
    %738 = arith.mulf %737, %736 : vector<8x128xf32>
    %739 = math.tanh %738 : vector<8x128xf32>
    %cst_318 = arith.constant 5.000000e-01 : f32
    %740 = vector.broadcast %cst_318 : f32 to vector<8x128xf32>
    %741 = arith.mulf %740, %739 : vector<8x128xf32>
    %cst_319 = arith.constant 5.000000e-01 : f32
    %742 = vector.broadcast %cst_319 : f32 to vector<8x128xf32>
    %743 = arith.addf %741, %742 : vector<8x128xf32>
    %744 = vector.extract_strided_slice %727 {offsets = [0, 256], sizes = [8, 128], strides = [1, 1]} : vector<8x512xf32> to vector<8x128xf32>
    %745 = math.tanh %744 : vector<8x128xf32>
    %746 = vector.extract_strided_slice %727 {offsets = [0, 384], sizes = [8, 128], strides = [1, 1]} : vector<8x512xf32> to vector<8x128xf32>
    %cst_320 = arith.constant 5.000000e-01 : f32
    %747 = vector.broadcast %cst_320 : f32 to vector<8x128xf32>
    %748 = arith.mulf %747, %746 : vector<8x128xf32>
    %749 = math.tanh %748 : vector<8x128xf32>
    %cst_321 = arith.constant 5.000000e-01 : f32
    %750 = vector.broadcast %cst_321 : f32 to vector<8x128xf32>
    %751 = arith.mulf %750, %749 : vector<8x128xf32>
    %cst_322 = arith.constant 5.000000e-01 : f32
    %752 = vector.broadcast %cst_322 : f32 to vector<8x128xf32>
    %753 = arith.addf %751, %752 : vector<8x128xf32>
    %754 = arith.mulf %743, %645 : vector<8x128xf32>
    %755 = arith.mulf %735, %745 : vector<8x128xf32>
    %756 = arith.addf %754, %755 : vector<8x128xf32>
    %757 = math.tanh %756 : vector<8x128xf32>
    %758 = arith.mulf %753, %757 : vector<8x128xf32>
    %759 = arith.truncf %758 : vector<8x128xf32> to vector<8x128xbf16>
    %c0_323 = arith.constant 0 : index
    %c0_324 = arith.constant 0 : index
    %760 = vector.load %arg9[%c0_323, %c0_324] : memref<128x512xbf16, #tpu.memory_space<vmem>>, vector<128x512xbf16>
    %cst_325 = arith.constant dense<0.000000e+00> : vector<8x512xf32>
    %761 = tpu.matmul %759, %760, %cst_325 {dimension_numbers = #tpu.dot_dimension_numbers<[1], [0], [0], [1], [0, 0, 1, 1], [], []>} : vector<8x128xbf16>, vector<128x512xbf16>, vector<8x512xf32> -> vector<8x512xf32>
    %c0_326 = arith.constant 0 : index
    %c0_327 = arith.constant 0 : index
    %762 = vector.load %arg11[%c0_326, %c0_327] : memref<1x512xf32, #tpu.memory_space<vmem>>, vector<1x512xf32>
    %763 = vector.broadcast %762 : vector<1x512xf32> to vector<8x512xf32>
    %764 = arith.addf %761, %763 : vector<8x512xf32>
    %765 = arith.truncf %688 : vector<8x128xf32> to vector<8x128xbf16>
    %c0_328 = arith.constant 0 : index
    %c0_329 = arith.constant 0 : index
    %766 = vector.load %arg10[%c0_328, %c0_329] : memref<128x512xbf16, #tpu.memory_space<vmem>>, vector<128x512xbf16>
    %cst_330 = arith.constant dense<0.000000e+00> : vector<8x512xf32>
    %767 = tpu.matmul %765, %766, %cst_330 {dimension_numbers = #tpu.dot_dimension_numbers<[1], [0], [0], [1], [0, 0, 1, 1], [], []>} : vector<8x128xbf16>, vector<128x512xbf16>, vector<8x512xf32> -> vector<8x512xf32>
    %768 = arith.addf %764, %767 : vector<8x512xf32>
    %769 = vector.extract_strided_slice %768 {offsets = [0, 0], sizes = [8, 128], strides = [1, 1]} : vector<8x512xf32> to vector<8x128xf32>
    %cst_331 = arith.constant 5.000000e-01 : f32
    %770 = vector.broadcast %cst_331 : f32 to vector<8x128xf32>
    %771 = arith.mulf %770, %769 : vector<8x128xf32>
    %772 = math.tanh %771 : vector<8x128xf32>
    %cst_332 = arith.constant 5.000000e-01 : f32
    %773 = vector.broadcast %cst_332 : f32 to vector<8x128xf32>
    %774 = arith.mulf %773, %772 : vector<8x128xf32>
    %cst_333 = arith.constant 5.000000e-01 : f32
    %775 = vector.broadcast %cst_333 : f32 to vector<8x128xf32>
    %776 = arith.addf %774, %775 : vector<8x128xf32>
    %777 = vector.extract_strided_slice %768 {offsets = [0, 128], sizes = [8, 128], strides = [1, 1]} : vector<8x512xf32> to vector<8x128xf32>
    %cst_334 = arith.constant 5.000000e-01 : f32
    %778 = vector.broadcast %cst_334 : f32 to vector<8x128xf32>
    %779 = arith.mulf %778, %777 : vector<8x128xf32>
    %780 = math.tanh %779 : vector<8x128xf32>
    %cst_335 = arith.constant 5.000000e-01 : f32
    %781 = vector.broadcast %cst_335 : f32 to vector<8x128xf32>
    %782 = arith.mulf %781, %780 : vector<8x128xf32>
    %cst_336 = arith.constant 5.000000e-01 : f32
    %783 = vector.broadcast %cst_336 : f32 to vector<8x128xf32>
    %784 = arith.addf %782, %783 : vector<8x128xf32>
    %785 = vector.extract_strided_slice %768 {offsets = [0, 256], sizes = [8, 128], strides = [1, 1]} : vector<8x512xf32> to vector<8x128xf32>
    %786 = math.tanh %785 : vector<8x128xf32>
    %787 = vector.extract_strided_slice %768 {offsets = [0, 384], sizes = [8, 128], strides = [1, 1]} : vector<8x512xf32> to vector<8x128xf32>
    %cst_337 = arith.constant 5.000000e-01 : f32
    %788 = vector.broadcast %cst_337 : f32 to vector<8x128xf32>
    %789 = arith.mulf %788, %787 : vector<8x128xf32>
    %790 = math.tanh %789 : vector<8x128xf32>
    %cst_338 = arith.constant 5.000000e-01 : f32
    %791 = vector.broadcast %cst_338 : f32 to vector<8x128xf32>
    %792 = arith.mulf %791, %790 : vector<8x128xf32>
    %cst_339 = arith.constant 5.000000e-01 : f32
    %793 = vector.broadcast %cst_339 : f32 to vector<8x128xf32>
    %794 = arith.addf %792, %793 : vector<8x128xf32>
    %795 = arith.mulf %784, %686 : vector<8x128xf32>
    %796 = arith.mulf %776, %786 : vector<8x128xf32>
    %797 = arith.addf %795, %796 : vector<8x128xf32>
    %798 = math.tanh %797 : vector<8x128xf32>
    %799 = arith.mulf %794, %798 : vector<8x128xf32>
    %c0_340 = arith.constant 0 : index
    %c0_341 = arith.constant 0 : index
    %800 = vector.load %arg12[%c0_340, %c0_341] : memref<128x1xf32, #tpu.memory_space<vmem>>, vector<128x1xf32>
    %cst_342 = arith.constant dense<0.000000e+00> : vector<8x1xf32>
    %801 = tpu.matmul %799, %800, %cst_342 {dimension_numbers = #tpu.dot_dimension_numbers<[1], [0], [0], [1], [0, 0, 1, 1], [], []>} : vector<8x128xf32>, vector<128x1xf32>, vector<8x1xf32> -> vector<8x1xf32>
    %c0_343 = arith.constant 0 : index
    %c0_344 = arith.constant 0 : index
    %802 = vector.load %arg13[%c0_343, %c0_344] : memref<1x1xf32, #tpu.memory_space<vmem>>, vector<1x1xf32>
    %803 = vector.broadcast %802 : vector<1x1xf32> to vector<8x1xf32>
    %804 = arith.addf %801, %803 : vector<8x1xf32>
    %805 = vector.broadcast %c1_i32_293 : i32 to vector<8x128xi32>
    %806 = arith.cmpi eq, %694, %805 : vector<8x128xi32>
    %807 = vector.shape_cast %804 : vector<8x1xf32> to vector<8x1xf32>
    %808 = vector.broadcast %807 : vector<8x1xf32> to vector<8x128xf32>
    %809 = arith.select %806, %808, %700 : vector<8x128xi1>, vector<8x128xf32>
    %c2_i32_345 = arith.constant 2 : i32
    %c0_346 = arith.constant 0 : index
    %c0_347 = arith.constant 0 : index
    %810 = vector.load %arg14[%c0_346, %c0_347] : memref<1x32xf32, #tpu.memory_space<vmem>>, vector<1x32xf32>
    %811 = vector.broadcast %804 : vector<8x1xf32> to vector<8x32xf32>
    %812 = vector.broadcast %810 : vector<1x32xf32> to vector<8x32xf32>
    %813 = arith.mulf %811, %812 : vector<8x32xf32>
    %c0_348 = arith.constant 0 : index
    %c0_349 = arith.constant 0 : index
    %814 = vector.load %arg15[%c0_348, %c0_349] : memref<1x32xf32, #tpu.memory_space<vmem>>, vector<1x32xf32>
    %815 = vector.broadcast %814 : vector<1x32xf32> to vector<8x32xf32>
    %816 = arith.addf %813, %815 : vector<8x32xf32>
    %cst_350 = arith.constant 0.000000e+00 : f32
    %817 = vector.broadcast %cst_350 : f32 to vector<8x32xf32>
    %818 = arith.maximumf %816, %817 : vector<8x32xf32>
    %c1_351 = arith.constant 1 : index
    %c0_352 = arith.constant 0 : index
    %c0_353 = arith.constant 0 : index
    %819 = vector.load %arg4[%c1_351, %c0_352, %c0_353] : memref<3x32x32xf32, #tpu.memory_space<vmem>>, vector<1x32x32xf32>
    %820 = vector.shape_cast %819 : vector<1x32x32xf32> to vector<32x32xf32>
    %cst_354 = arith.constant dense<0.000000e+00> : vector<8x32xf32>
    %821 = tpu.matmul %818, %820, %cst_354 {dimension_numbers = #tpu.dot_dimension_numbers<[1], [0], [0], [1], [0, 0, 1, 1], [], []>} : vector<8x32xf32>, vector<32x32xf32>, vector<8x32xf32> -> vector<8x32xf32>
    %c0_355 = arith.constant 0 : index
    %c0_356 = arith.constant 0 : index
    %822 = vector.load %arg5[%c0_355, %c0_356] : memref<1x32xf32, #tpu.memory_space<vmem>>, vector<1x32xf32>
    %823 = vector.broadcast %822 : vector<1x32xf32> to vector<8x32xf32>
    %824 = arith.addf %821, %823 : vector<8x32xf32>
    %cst_357 = arith.constant 0.000000e+00 : f32
    %825 = vector.broadcast %cst_357 : f32 to vector<8x32xf32>
    %826 = arith.maximumf %824, %825 : vector<8x32xf32>
    %827 = arith.truncf %826 : vector<8x32xf32> to vector<8x32xbf16>
    %c0_358 = arith.constant 0 : index
    %c0_359 = arith.constant 0 : index
    %828 = vector.load %arg6[%c0_358, %c0_359] : memref<32x512xbf16, #tpu.memory_space<vmem>>, vector<32x512xbf16>
    %cst_360 = arith.constant dense<0.000000e+00> : vector<8x512xf32>
    %829 = tpu.matmul %827, %828, %cst_360 {dimension_numbers = #tpu.dot_dimension_numbers<[1], [0], [0], [1], [0, 0, 1, 1], [], []>} : vector<8x32xbf16>, vector<32x512xbf16>, vector<8x512xf32> -> vector<8x512xf32>
    %c0_361 = arith.constant 0 : index
    %c0_362 = arith.constant 0 : index
    %830 = vector.load %arg8[%c0_361, %c0_362] : memref<1x512xf32, #tpu.memory_space<vmem>>, vector<1x512xf32>
    %831 = vector.broadcast %830 : vector<1x512xf32> to vector<8x512xf32>
    %832 = arith.addf %829, %831 : vector<8x512xf32>
    %833 = arith.truncf %758 : vector<8x128xf32> to vector<8x128xbf16>
    %c0_363 = arith.constant 0 : index
    %c0_364 = arith.constant 0 : index
    %834 = vector.load %arg7[%c0_363, %c0_364] : memref<128x512xbf16, #tpu.memory_space<vmem>>, vector<128x512xbf16>
    %cst_365 = arith.constant dense<0.000000e+00> : vector<8x512xf32>
    %835 = tpu.matmul %833, %834, %cst_365 {dimension_numbers = #tpu.dot_dimension_numbers<[1], [0], [0], [1], [0, 0, 1, 1], [], []>} : vector<8x128xbf16>, vector<128x512xbf16>, vector<8x512xf32> -> vector<8x512xf32>
    %836 = arith.addf %832, %835 : vector<8x512xf32>
    %837 = vector.extract_strided_slice %836 {offsets = [0, 0], sizes = [8, 128], strides = [1, 1]} : vector<8x512xf32> to vector<8x128xf32>
    %cst_366 = arith.constant 5.000000e-01 : f32
    %838 = vector.broadcast %cst_366 : f32 to vector<8x128xf32>
    %839 = arith.mulf %838, %837 : vector<8x128xf32>
    %840 = math.tanh %839 : vector<8x128xf32>
    %cst_367 = arith.constant 5.000000e-01 : f32
    %841 = vector.broadcast %cst_367 : f32 to vector<8x128xf32>
    %842 = arith.mulf %841, %840 : vector<8x128xf32>
    %cst_368 = arith.constant 5.000000e-01 : f32
    %843 = vector.broadcast %cst_368 : f32 to vector<8x128xf32>
    %844 = arith.addf %842, %843 : vector<8x128xf32>
    %845 = vector.extract_strided_slice %836 {offsets = [0, 128], sizes = [8, 128], strides = [1, 1]} : vector<8x512xf32> to vector<8x128xf32>
    %cst_369 = arith.constant 5.000000e-01 : f32
    %846 = vector.broadcast %cst_369 : f32 to vector<8x128xf32>
    %847 = arith.mulf %846, %845 : vector<8x128xf32>
    %848 = math.tanh %847 : vector<8x128xf32>
    %cst_370 = arith.constant 5.000000e-01 : f32
    %849 = vector.broadcast %cst_370 : f32 to vector<8x128xf32>
    %850 = arith.mulf %849, %848 : vector<8x128xf32>
    %cst_371 = arith.constant 5.000000e-01 : f32
    %851 = vector.broadcast %cst_371 : f32 to vector<8x128xf32>
    %852 = arith.addf %850, %851 : vector<8x128xf32>
    %853 = vector.extract_strided_slice %836 {offsets = [0, 256], sizes = [8, 128], strides = [1, 1]} : vector<8x512xf32> to vector<8x128xf32>
    %854 = math.tanh %853 : vector<8x128xf32>
    %855 = vector.extract_strided_slice %836 {offsets = [0, 384], sizes = [8, 128], strides = [1, 1]} : vector<8x512xf32> to vector<8x128xf32>
    %cst_372 = arith.constant 5.000000e-01 : f32
    %856 = vector.broadcast %cst_372 : f32 to vector<8x128xf32>
    %857 = arith.mulf %856, %855 : vector<8x128xf32>
    %858 = math.tanh %857 : vector<8x128xf32>
    %cst_373 = arith.constant 5.000000e-01 : f32
    %859 = vector.broadcast %cst_373 : f32 to vector<8x128xf32>
    %860 = arith.mulf %859, %858 : vector<8x128xf32>
    %cst_374 = arith.constant 5.000000e-01 : f32
    %861 = vector.broadcast %cst_374 : f32 to vector<8x128xf32>
    %862 = arith.addf %860, %861 : vector<8x128xf32>
    %863 = arith.mulf %852, %756 : vector<8x128xf32>
    %864 = arith.mulf %844, %854 : vector<8x128xf32>
    %865 = arith.addf %863, %864 : vector<8x128xf32>
    %866 = math.tanh %865 : vector<8x128xf32>
    %867 = arith.mulf %862, %866 : vector<8x128xf32>
    %868 = arith.truncf %867 : vector<8x128xf32> to vector<8x128xbf16>
    %c0_375 = arith.constant 0 : index
    %c0_376 = arith.constant 0 : index
    %869 = vector.load %arg9[%c0_375, %c0_376] : memref<128x512xbf16, #tpu.memory_space<vmem>>, vector<128x512xbf16>
    %cst_377 = arith.constant dense<0.000000e+00> : vector<8x512xf32>
    %870 = tpu.matmul %868, %869, %cst_377 {dimension_numbers = #tpu.dot_dimension_numbers<[1], [0], [0], [1], [0, 0, 1, 1], [], []>} : vector<8x128xbf16>, vector<128x512xbf16>, vector<8x512xf32> -> vector<8x512xf32>
    %c0_378 = arith.constant 0 : index
    %c0_379 = arith.constant 0 : index
    %871 = vector.load %arg11[%c0_378, %c0_379] : memref<1x512xf32, #tpu.memory_space<vmem>>, vector<1x512xf32>
    %872 = vector.broadcast %871 : vector<1x512xf32> to vector<8x512xf32>
    %873 = arith.addf %870, %872 : vector<8x512xf32>
    %874 = arith.truncf %799 : vector<8x128xf32> to vector<8x128xbf16>
    %c0_380 = arith.constant 0 : index
    %c0_381 = arith.constant 0 : index
    %875 = vector.load %arg10[%c0_380, %c0_381] : memref<128x512xbf16, #tpu.memory_space<vmem>>, vector<128x512xbf16>
    %cst_382 = arith.constant dense<0.000000e+00> : vector<8x512xf32>
    %876 = tpu.matmul %874, %875, %cst_382 {dimension_numbers = #tpu.dot_dimension_numbers<[1], [0], [0], [1], [0, 0, 1, 1], [], []>} : vector<8x128xbf16>, vector<128x512xbf16>, vector<8x512xf32> -> vector<8x512xf32>
    %877 = arith.addf %873, %876 : vector<8x512xf32>
    %878 = vector.extract_strided_slice %877 {offsets = [0, 0], sizes = [8, 128], strides = [1, 1]} : vector<8x512xf32> to vector<8x128xf32>
    %cst_383 = arith.constant 5.000000e-01 : f32
    %879 = vector.broadcast %cst_383 : f32 to vector<8x128xf32>
    %880 = arith.mulf %879, %878 : vector<8x128xf32>
    %881 = math.tanh %880 : vector<8x128xf32>
    %cst_384 = arith.constant 5.000000e-01 : f32
    %882 = vector.broadcast %cst_384 : f32 to vector<8x128xf32>
    %883 = arith.mulf %882, %881 : vector<8x128xf32>
    %cst_385 = arith.constant 5.000000e-01 : f32
    %884 = vector.broadcast %cst_385 : f32 to vector<8x128xf32>
    %885 = arith.addf %883, %884 : vector<8x128xf32>
    %886 = vector.extract_strided_slice %877 {offsets = [0, 128], sizes = [8, 128], strides = [1, 1]} : vector<8x512xf32> to vector<8x128xf32>
    %cst_386 = arith.constant 5.000000e-01 : f32
    %887 = vector.broadcast %cst_386 : f32 to vector<8x128xf32>
    %888 = arith.mulf %887, %886 : vector<8x128xf32>
    %889 = math.tanh %888 : vector<8x128xf32>
    %cst_387 = arith.constant 5.000000e-01 : f32
    %890 = vector.broadcast %cst_387 : f32 to vector<8x128xf32>
    %891 = arith.mulf %890, %889 : vector<8x128xf32>
    %cst_388 = arith.constant 5.000000e-01 : f32
    %892 = vector.broadcast %cst_388 : f32 to vector<8x128xf32>
    %893 = arith.addf %891, %892 : vector<8x128xf32>
    %894 = vector.extract_strided_slice %877 {offsets = [0, 256], sizes = [8, 128], strides = [1, 1]} : vector<8x512xf32> to vector<8x128xf32>
    %895 = math.tanh %894 : vector<8x128xf32>
    %896 = vector.extract_strided_slice %877 {offsets = [0, 384], sizes = [8, 128], strides = [1, 1]} : vector<8x512xf32> to vector<8x128xf32>
    %cst_389 = arith.constant 5.000000e-01 : f32
    %897 = vector.broadcast %cst_389 : f32 to vector<8x128xf32>
    %898 = arith.mulf %897, %896 : vector<8x128xf32>
    %899 = math.tanh %898 : vector<8x128xf32>
    %cst_390 = arith.constant 5.000000e-01 : f32
    %900 = vector.broadcast %cst_390 : f32 to vector<8x128xf32>
    %901 = arith.mulf %900, %899 : vector<8x128xf32>
    %cst_391 = arith.constant 5.000000e-01 : f32
    %902 = vector.broadcast %cst_391 : f32 to vector<8x128xf32>
    %903 = arith.addf %901, %902 : vector<8x128xf32>
    %904 = arith.mulf %893, %797 : vector<8x128xf32>
    %905 = arith.mulf %885, %895 : vector<8x128xf32>
    %906 = arith.addf %904, %905 : vector<8x128xf32>
    %907 = math.tanh %906 : vector<8x128xf32>
    %908 = arith.mulf %903, %907 : vector<8x128xf32>
    %c0_392 = arith.constant 0 : index
    %c0_393 = arith.constant 0 : index
    %909 = vector.load %arg12[%c0_392, %c0_393] : memref<128x1xf32, #tpu.memory_space<vmem>>, vector<128x1xf32>
    %cst_394 = arith.constant dense<0.000000e+00> : vector<8x1xf32>
    %910 = tpu.matmul %908, %909, %cst_394 {dimension_numbers = #tpu.dot_dimension_numbers<[1], [0], [0], [1], [0, 0, 1, 1], [], []>} : vector<8x128xf32>, vector<128x1xf32>, vector<8x1xf32> -> vector<8x1xf32>
    %c0_395 = arith.constant 0 : index
    %c0_396 = arith.constant 0 : index
    %911 = vector.load %arg13[%c0_395, %c0_396] : memref<1x1xf32, #tpu.memory_space<vmem>>, vector<1x1xf32>
    %912 = vector.broadcast %911 : vector<1x1xf32> to vector<8x1xf32>
    %913 = arith.addf %910, %912 : vector<8x1xf32>
    %914 = vector.broadcast %c2_i32_345 : i32 to vector<8x128xi32>
    %915 = arith.cmpi eq, %694, %914 : vector<8x128xi32>
    %916 = vector.shape_cast %913 : vector<8x1xf32> to vector<8x1xf32>
    %917 = vector.broadcast %916 : vector<8x1xf32> to vector<8x128xf32>
    %918 = arith.select %915, %917, %809 : vector<8x128xi1>, vector<8x128xf32>
    %c2_i32_397 = arith.constant 2 : i32
    %c0_398 = arith.constant 0 : index
    %c0_399 = arith.constant 0 : index
    %919 = vector.load %arg16[%c0_398, %c0_399] : memref<8x128xf32, #tpu.memory_space<vmem>>, vector<8x128xf32>
    tpu.vector_store %arg16[%c0_398, %c0_399], %918 {strides = array<i32>} : memref<8x128xf32, #tpu.memory_space<vmem>>, vector<8x128xf32>,
    return
  }
  func.func @transform_0(%arg0: i32) -> (i32, i32, i32) {
    %c0_i32 = arith.constant 0 : i32
    %c0_i32_0 = arith.constant 0 : i32
    %c0_i32_1 = arith.constant 0 : i32
    return %arg0, %c0_i32, %c0_i32_0 : i32, i32, i32
  }
  func.func @transform_1(%arg0: i32) -> (i32, i32, i32) {
    %c0_i32 = arith.constant 0 : i32
    %c0_i32_0 = arith.constant 0 : i32
    %c0_i32_1 = arith.constant 0 : i32
    %c0_i32_2 = arith.constant 0 : i32
    return %c0_i32, %c0_i32_0, %c0_i32_1 : i32, i32, i32
  }
  func.func @transform_2(%arg0: i32) -> (i32, i32) {
    %c0_i32 = arith.constant 0 : i32
    %c0_i32_0 = arith.constant 0 : i32
    %c0_i32_1 = arith.constant 0 : i32
    return %c0_i32, %c0_i32_0 : i32, i32
  }
  func.func @transform_3(%arg0: i32) -> (i32, i32, i32) {
    %c0_i32 = arith.constant 0 : i32
    %c0_i32_0 = arith.constant 0 : i32
    %c0_i32_1 = arith.constant 0 : i32
    %c0_i32_2 = arith.constant 0 : i32
    return %c0_i32, %c0_i32_0, %c0_i32_1 : i32, i32, i32
  }
  func.func @transform_4(%arg0: i32) -> (i32, i32) {
    %c0_i32 = arith.constant 0 : i32
    %c0_i32_0 = arith.constant 0 : i32
    %c0_i32_1 = arith.constant 0 : i32
    return %c0_i32, %c0_i32_0 : i32, i32
  }
  func.func @transform_5(%arg0: i32) -> (i32, i32) {
    %c0_i32 = arith.constant 0 : i32
    %c0_i32_0 = arith.constant 0 : i32
    %c0_i32_1 = arith.constant 0 : i32
    return %c0_i32, %c0_i32_0 : i32, i32
  }
  func.func @transform_6(%arg0: i32) -> (i32, i32) {
    %c0_i32 = arith.constant 0 : i32
    %c0_i32_0 = arith.constant 0 : i32
    %c0_i32_1 = arith.constant 0 : i32
    return %c0_i32, %c0_i32_0 : i32, i32
  }
  func.func @transform_7(%arg0: i32) -> (i32, i32) {
    %c0_i32 = arith.constant 0 : i32
    %c0_i32_0 = arith.constant 0 : i32
    %c0_i32_1 = arith.constant 0 : i32
    return %c0_i32, %c0_i32_0 : i32, i32
  }
  func.func @transform_8(%arg0: i32) -> (i32, i32) {
    %c0_i32 = arith.constant 0 : i32
    %c0_i32_0 = arith.constant 0 : i32
    %c0_i32_1 = arith.constant 0 : i32
    return %c0_i32, %c0_i32_0 : i32, i32
  }
  func.func @transform_9(%arg0: i32) -> (i32, i32) {
    %c0_i32 = arith.constant 0 : i32
    %c0_i32_0 = arith.constant 0 : i32
    %c0_i32_1 = arith.constant 0 : i32
    return %c0_i32, %c0_i32_0 : i32, i32
  }
  func.func @transform_10(%arg0: i32) -> (i32, i32) {
    %c0_i32 = arith.constant 0 : i32
    %c0_i32_0 = arith.constant 0 : i32
    %c0_i32_1 = arith.constant 0 : i32
    return %c0_i32, %c0_i32_0 : i32, i32
  }
  func.func @transform_11(%arg0: i32) -> (i32, i32) {
    %c0_i32 = arith.constant 0 : i32
    %c0_i32_0 = arith.constant 0 : i32
    %c0_i32_1 = arith.constant 0 : i32
    return %c0_i32, %c0_i32_0 : i32, i32
  }
  func.func @transform_12(%arg0: i32) -> (i32, i32) {
    %c0_i32 = arith.constant 0 : i32
    %c0_i32_0 = arith.constant 0 : i32
    %c0_i32_1 = arith.constant 0 : i32
    return %c0_i32, %c0_i32_0 : i32, i32
  }
  func.func @transform_13(%arg0: i32) -> (i32, i32) {
    %c0_i32 = arith.constant 0 : i32
    %c0_i32_0 = arith.constant 0 : i32
    %c0_i32_1 = arith.constant 0 : i32
    return %c0_i32, %c0_i32_0 : i32, i32
  }
  func.func @transform_14(%arg0: i32) -> (i32, i32) {
    %c0_i32 = arith.constant 0 : i32
    %c0_i32_0 = arith.constant 0 : i32
    %c0_i32_1 = arith.constant 0 : i32
    return %c0_i32, %c0_i32_0 : i32, i32
  }
  func.func @transform_15(%arg0: i32) -> (i32, i32) {
    %c0_i32 = arith.constant 0 : i32
    %c0_i32_0 = arith.constant 0 : i32
    return %arg0, %c0_i32 : i32, i32
  }
}

</mosaic_0001>

<bundles_post_ra>
// kernel: tpu_custom_call.1
= control target key start
LH: loop header
LB: loop body
LE: loop exit
PB: predicated region body
PF: predicated region fallthrough
CT: control target
= control target key end

     0   :  { %s9514_s0 = inlined_call_operand.vmem [shape: f32[1,64,4], index: 0, kind: input, shape index: {}]   ;;  %s9515_s1 = inlined_call_operand.vmem [shape: f32[3,4,32], index: 1, kind: input, shape index: {}]   ;;  %s9516_s2 = inlined_call_operand.vmem [shape: f32[1,32], index: 2, kind: input, shape index: {}]   ;;  %s9517_s3 = inlined_call_operand.vmem [shape: f32[3,32,32], index: 3, kind: input, shape index: {}]   ;;  %s9518_s4 = inlined_call_operand.vmem [shape: f32[1,32], index: 4, kind: input, shape index: {}]   ;;  %s9519_s5 = inlined_call_operand.vmem [shape: bf16[32,512], index: 5, kind: input, shape index: {}]   ;;  %s9520_s6 = inlined_call_operand.hbm [shape: bf16[128,512], index: 6, kind: input, shape index: {}]   ;;  %s9521_s7 = inlined_call_operand.vmem [shape: f32[1,512], index: 7, kind: input, shape index: {}]   ;;  %s9522_s8 = inlined_call_operand.hbm [shape: bf16[128,512], index: 8, kind: input, shape index: {}]   ;;  %s9523_s9 = inlined_call_operand.hbm [shape: bf16[128,512], index: 9, kind: input, shape index: {}]   ;;  %s9524_s10 = inlined_call_operand.vmem [shape: f32[1,512], index: 10, kind: input, shape index: {}]   ;;  %s9525_s11 = inlined_call_operand.vmem [shape: f32[128,1], index: 11, kind: input, shape index: {}]   ;;  %s9526_s12 = inlined_call_operand.<no memory space> [shape: f32[1,1], index: 12, kind: input, shape index: {}]   ;;  %s9527_s13 = inlined_call_operand.vmem [shape: f32[1,32], index: 13, kind: input, shape index: {}]   ;;  %s9528_s14 = inlined_call_operand.vmem [shape: f32[1,32], index: 14, kind: input, shape index: {}]   ;;  %s9529_s15 = inlined_call_operand.hbm [shape: f32[8,128], index: 15, kind: output, shape index: {}]  }
   0x1   :  { %v20_v0 = vstv %s9526_s12 }
   0x2   :  { %21 = vst [vmem:[#allocation3] sm:$0x1] %v20_v0 }
   0x3   :  { %22 = vsyncpa [#allocation5], 0 }
   0x4   :  { %23 = vsyncpa [#allocation8], 0 }
   0x5   :  { %24 = vsyncpa [#allocation6], 0  ;;  %s7008_s20 = smov [#allocation7]   ;;  %s7009_s22 = smov [#allocation4]  }
   0x6   :  { %s56_s21 = sshll.u32 %s7008_s20, 4  ;;  %s42_s23 = sshll.u32 %s7009_s22, 4  ;;  %s57_s21 = int_to_ptr.vmem [resolvable:$true] %s56_s21  ;;  %s7101_s23 = int_to_ptr.vmem [resolvable:$true] %s42_s23 }
   0x7   :  { %s6914_s26 = scalar_lea.hbm %s9522_s8, 4096 }
   0x8   :  { %p6915_p0 = scmp.ne.s32.totalorder %s9522_s8, %s6914_s26  ;;  %p6918_p1 = scmp.lt.u32.totalorder %s6914_s26, %s9522_s8 }
   0xa   :  { %p6920_p2 = pnand %p6918_p1, %p6915_p0 }
   0xc   :  { %6923 = shalt.err (!%p6920_p2)
}
   0xd   :  { %s6924_s30 = scalar_lea.vmem %s57_s21, 4096  ;;  %p6929_p4 = scmp.lt.s32.totalorder %s57_s21, %s57_s21 }
   0xe   :  { %p6925_p3 = scmp.ne.s32.totalorder %s57_s21, %s6924_s30  ;;  %p6930_p5 = scmp.lt.s32.totalorder %s6924_s30, %s6924_s30 }
  0x10   :  { %p6931_p6 = por %p6930_p5, %p6929_p4 }
  0x12   :  { %p6932_p7 = pnand %p6931_p6, %p6925_p3 }
  0x14   :  { %6935 = shalt.err (!%p6932_p7)
}
  0x15   :  { %s7010_s16 = smov 256   ;;  %s7011_s17 = smov 16  }
  0x16   :  { %62 = dma.hbm_to_vmem [thread:$0]  %s9522_s8, 4096, %s57_s21, [#allocation8], %s7010_s16, %s7010_s16, %s7011_s17  }
  0x17   :  { %s6936_s24 = scalar_lea.hbm %s9520_s6, 4096 }
  0x18   :  { %p6937_p8 = scmp.ne.s32.totalorder %s9520_s6, %s6936_s24  ;;  %p6940_p9 = scmp.lt.u32.totalorder %s6936_s24, %s9520_s6 }
  0x1a   :  { %p6942_p10 = pnand %p6940_p9, %p6937_p8 }
  0x1c   :  { %6945 = shalt.err (!%p6942_p10)
}
  0x1d   :  { %s6946_s12 = scalar_lea.vmem %s7101_s23, 4096  ;;  %p6951_p12 = scmp.lt.s32.totalorder %s7101_s23, %s7101_s23 }
  0x1e   :  { %p6947_p11 = scmp.ne.s32.totalorder %s7101_s23, %s6946_s12  ;;  %p6952_p13 = scmp.lt.s32.totalorder %s6946_s12, %s6946_s12 }
  0x20   :  { %p6953_p0 = por %p6952_p13, %p6951_p12 }
  0x22   :  { %p6954_p1 = pnand %p6953_p0, %p6947_p11 }
  0x24   :  { %6957 = shalt.err (!%p6954_p1)
}
  0x25   :  { %48 = dma.hbm_to_vmem [thread:$0]  %s9520_s6, 4096, %s7101_s23, [#allocation5], %s7010_s16, %s7010_s16, %s7011_s17  }
  0x26   :  { %s7012_s29 = smov [#allocation9]   ;;  %s6958_s20 = scalar_lea.hbm %s9523_s9, 4096 }
  0x27   :  { %s68_s30 = sshll.u32 %s7012_s29, 4  ;;  %p6959_p2 = scmp.ne.s32.totalorder %s9523_s9, %s6958_s20  ;;  %s69_s30 = int_to_ptr.vmem [resolvable:$true] %s68_s30 }
  0x28   :  { %p6962_p3 = scmp.lt.u32.totalorder %s6958_s20, %s9523_s9 }
  0x2a   :  { %p6964_p4 = pnand %p6962_p3, %p6959_p2 }
  0x2c   :  { %6967 = shalt.err (!%p6964_p4)
}
  0x2d   :  { %s6968_s27 = scalar_lea.vmem %s69_s30, 4096  ;;  %p6973_p6 = scmp.lt.s32.totalorder %s69_s30, %s69_s30 }
  0x2e   :  { %p6969_p5 = scmp.ne.s32.totalorder %s69_s30, %s6968_s27  ;;  %p6974_p7 = scmp.lt.s32.totalorder %s6968_s27, %s6968_s27 }
  0x30   :  { %p6975_p8 = por %p6974_p7, %p6973_p6 }
  0x32   :  { %p6976_p9 = pnand %p6975_p8, %p6969_p5 }
  0x34   :  { %6979 = shalt.err (!%p6976_p9)
}
  0x35   :  { %74 = dma.hbm_to_vmem [thread:$0]  %s9523_s9, 4096, %s69_s30, [#allocation8], %s7010_s16, %s7010_s16, %s7011_s17  }
  0x36   :  { %7002 = dma.done.wait [#allocation5], 4096  }
  0x37   :  { %7003 = vsyncadd [#allocation5], 4294963200 }
  0x38   :  { %7004 = dma.done.wait [#allocation8], 8192  }
  0x39   :  { %7005 = vsyncadd [#allocation8], 4294959104  ;;  %v9530_v1 = vmov 0.0   ;;  %vm131_vm0 = vcmask 1043456   ;;  %vm106_vm1 = vcmask 31744   ;;  %v95_v4 = vld [vmem:[%s9514_s0] sm:$0xff] }
  0x3a   :  { %5747 = vmatprep.mubr.f32.mxu0 %v9530_v1  ;;  %v5414_v2 = vld [vmem:[%s9515_s1 + $0x4] sm:$0xf]  ;;  %v103_v3 = vld [vmem:[%s9515_s1] sm:$0xf]  ;;  %v96_v5 = vld [vmem:[%s9514_s0 + $0x8] sm:$0xff]  ;;  %5733 = vmatprep.mubr.msk.f32.mxu1 %vm106_vm1, %v95_v4  ;;  %vm501_vm2 = vcmask 261120  }
  0x3b   :  { %5731 = vmatprep.subr.msk.mxu1 %vm131_vm0, %v5414_v2  ;;  %5745 = vmatprep.subr.msk.mxu0 %vm131_vm0, %v103_v3  ;;  %v97_v6 = vld [vmem:[%s9514_s0 + $0x10] sm:$0xff]  ;;  %v98_v7 = vld [vmem:[%s9514_s0 + $0x18] sm:$0xff]  ;;  %v5432_v8 = vld [vmem:[%s9515_s1 + $0x8] sm:$0xf]  ;;  %vm7016_vm3 = vmmov 0  }
  0x3c   :  { %5732 = vmatpush3.msk.msra.mxu1 %vm131_vm0, %v5414_v2  ;;  %5746 = vmatpush3.msk.msra.mxu0 %vm131_vm0, %v103_v3  ;;  %v99_v9 = vld [vmem:[%s9514_s0 + $0x20] sm:$0xff]  ;;  %v100_v10 = vld [vmem:[%s9514_s0 + $0x28] sm:$0xff]  ;;  %v101_v11 = vld [vmem:[%s9514_s0 + $0x30] sm:$0xff] }
  0x3d   :  { %5734 = vmatmul.mubr.msk.f32.vlgmr.msra.gmra.mrb[0].mxu1 %vm106_vm1, %v96_v5  ;;  %6068 = vmatprep.subr.msk.mxu1 %vm131_vm0, %v103_v3  ;;  %v102_v12 = vld [vmem:[%s9514_s0 + $0x38] sm:$0xff]  ;;  %v5442_v13 = vld [vmem:[%s9517_s3 + $0x20] sm:$0xff]  ;;  %v5443_v14 = vld [vmem:[%s9517_s3 + $0x28] sm:$0xff] }
  0x3e   :  { %5748 = vmatmul.mubr.msk.f32.vlgmr.msra.gmra.mrb[0].mxu0 %vm106_vm1, %v95_v4  ;;  %6069 = vmatpush3.msk.msra.mxu1 %vm131_vm0, %v103_v3  ;;  %v5960_v15 = vpack.c.bf16 %v5443_v14, %v5442_v13  ;;  %v5444_v16 = vld [vmem:[%s9517_s3 + $0x30] sm:$0xff]  ;;  %v5445_v17 = vld [vmem:[%s9517_s3 + $0x38] sm:$0xff]  ;;  %v492_v19 = vld [vmem:[%s9517_s3] sm:$0xff] }
  0x3f   :  { %5736 = vmatprep.mubr.msk.f32.mxu1 %vm106_vm1, %v97_v6  ;;  %5759 = vmatprep.subr.msk.mxu0 %vm131_vm0, %v5432_v8  ;;  %v5964_v18 = vpack.c.bf16 %v5445_v17, %v5444_v16  ;;  %v493_v20 = vld [vmem:[%s9517_s3 + $0x8] sm:$0xff]  ;;  %v6258_v22 = vld [vmem:[%s9519_s5] ss:$16 sps:$4 sm:$0xff]   ;;  %v6260_v23 = vld [vmem:[%s9519_s5 + $0x4] ss:$16 sps:$4 sm:$0xff]  }
  0x40   :  { %5761 = vmatprep.mubr.msk.f32.mxu0 %vm106_vm1, %v96_v5  ;;  %5760 = vmatpush3.msk.msra.mxu0 %vm131_vm0, %v5432_v8  ;;  %v5968_v21 = vpack.c.bf16 %v493_v20, %v492_v19  ;;  %v5441_v27 = vld [vmem:[%s9516_s2] ss:$0 sm:$0xff]  ;;  %v494_v34 = vld [vmem:[%s9517_s3 + $0x10] sm:$0xff]  ;;  %v495_v35 = vld [vmem:[%s9517_s3 + $0x18] sm:$0xff]  ;;  %v9532_v19 = vmov 0  }
  0x41   :  { %5737 = vmatmul.mubr.msk.f32.gmra.mrb[2].mxu1 %vm106_vm1, %v98_v7  ;;  %5961 = vmatprep.subr.bf16.mxu1 %v5960_v15  ;;  %v5972_v40 = vpack.c.bf16 %v495_v35, %v494_v34  ;;  %v5461_v44 = vld [vmem:[%s9517_s3 + $0x40] sm:$0xff]  ;;  %v5462_v45 = vld [vmem:[%s9517_s3 + $0x48] sm:$0xff]  ;;  %v5463_v8 = vld [vmem:[%s9517_s3 + $0x50] sm:$0xff] }
  0x42   :  { %5739 = vmatprep.mubr.msk.f32.mxu1 %vm106_vm1, %v99_v9  ;;  %965 = vmatprep.subr.bf16.mxu0 %v6260_v23  ;;  %v5976_v51 = vpack.c.bf16 %v5462_v45, %v5461_v44  ;;  %v6264_v13 = vld [vmem:[%s9519_s5 + $0x20] ss:$16 sps:$4 sm:$0xff]   ;;  %v6266_v14 = vld [vmem:[%s9519_s5 + $0x24] ss:$16 sps:$4 sm:$0xff]   ;;  %v6267_v16 = vld [vmem:[%s9519_s5 + $0x28] ss:$16 sps:$4 sm:$0xff]  }
  0x43   :  { %v7305_v17 = vld [vmem:[#allocation4 + $0x4] ss:$16 sps:$4 sm:$0xff]   ;;  %6256 = vset.pattern.permute.xlu0 %v9532_v19  ;;  %6257 = vset.pattern.permute.xlu1 %v9532_v19  ;;  %v5472_v20 = vld [vmem:[%s9518_s4] ss:$0 sm:$0xff] }
  0x44   :  { %v7322_v34 = vld [vmem:[#allocation4 + $0x24] ss:$16 sps:$4 sm:$0xff]   ;;  %v7324_v35 = vld [vmem:[#allocation4 + $0x2c] ss:$16 sps:$4 sm:$0xff]  }
  0x45   :  { %5740 = vmatmul.mubr.msk.f32.gmra.mrb[4].mxu1 %vm106_vm1, %v100_v10  ;;  %v7336_v45 = vld [vmem:[#allocation4 + $0x44] ss:$16 sps:$4 sm:$0xff]  }
  0x46   :  { %5762 = vmatmul.mubr.msk.f32.vlgmr.msra.gmra.mrb[0].mxu0 %vm106_vm1, %v97_v6  ;;  %5742 = vmatprep.mubr.msk.f32.mxu1 %vm106_vm1, %v101_v11 }
  0x47   :  { %5764 = vmatprep.mubr.msk.f32.mxu0 %vm106_vm1, %v98_v7  ;;  %966 = vmatpush1.bf16.msra.mxu0 %v6258_v22 }
  0x48   :  { %967 = vmatprep.subr.bf16.mxu0 %v6266_v14  ;;  %v7414_v14 = vld [vmem:[#allocation4 + $0xe0] ss:$16 sps:$4 sm:$0xff]  }
  0x49   :  { %5743 = vmatmul.mubr.msk.f32.gmra.mrb[6].mxu1 %vm106_vm1, %v102_v12  ;;  %9853 = vst [vmem:[#allocation19_spill] sm:$0xff] %v7414_v14 }
  0x4a   :  { %5750 = vmatprep.mubr.msk.f32.mxu1 %vm106_vm1, %v96_v5  ;;  %5765 = vmatmul.mubr.msk.f32.gmra.mrb[2].mxu0 %vm106_vm1, %v99_v9 }
  0x4b   :  { %5767 = vmatprep.mubr.msk.f32.mxu0 %vm106_vm1, %v100_v10  ;;  %968 = vmatpush1.bf16.msra.mxu0 %v6264_v13  ;;  %v7408_v13 = vld [vmem:[#allocation4 + $0xec] ss:$16 sps:$4 sm:$0xff]  }
  0x4c   :  { %1339 = vmatprep.subr.bf16.mxu0 %v7305_v17  ;;  %9852 = vst [vmem:[#allocation18_spill] sm:$0xff] %v7408_v13 }
  0x4d   :  { %5751 = vmatmul.mubr.msk.f32.vlgmr.msra.gmra.mrb[2].mxu1 %vm106_vm1, %v97_v6 }
  0x4e   :  { %5753 = vmatprep.mubr.msk.f32.mxu1 %vm106_vm1, %v98_v7  ;;  %5768 = vmatmul.mubr.msk.f32.gmra.mrb[4].mxu0 %vm106_vm1, %v101_v11 }
  0x4f   :  { %5770 = vmatprep.mubr.msk.f32.mxu0 %vm106_vm1, %v102_v12  ;;  %5963 = vmatpush3.bf16.msra.mxu1 %v5960_v15  ;;  %v6261_v12 = vld [vmem:[%s9519_s5 + $0x8] ss:$16 sps:$4 sm:$0xff]   ;;  %v6269_v15 = vld [vmem:[%s9519_s5 + $0x2c] ss:$16 sps:$4 sm:$0xff]  }
  0x50   :  { %5965 = vmatprep.subr.bf16.mxu1 %v5964_v18 }
  0x51   :  { %5754 = vmatmul.mubr.msk.f32.gmra.mrb[4].mxu1 %vm106_vm1, %v99_v9  ;;  %v5464_v9 = vld [vmem:[%s9517_s3 + $0x58] sm:$0xff] }
  0x52   :  { %5756 = vmatprep.mubr.msk.f32.mxu1 %vm106_vm1, %v100_v10  ;;  %5771 = vmatmul.mubr.f32.gmra.mrb[6].mxu0 %v9530_v1  ;;  %v5980_v10 = vpack.c.bf16 %v5464_v9, %v5463_v8  ;;  %v7392_v8 = vld [vmem:[#allocation4 + $0xc4] ss:$16 sps:$4 sm:$0xff]   ;;  %v7394_v9 = vld [vmem:[#allocation4 + $0xcc] ss:$16 sps:$4 sm:$0xff]  }
  0x53   :  { %5967 = vmatpush3.bf16.msra.mxu1 %v5964_v18  ;;  %v7307_v18 = vld [vmem:[#allocation4 + $0xc] ss:$16 sps:$4 sm:$0xff]   ;;  %997 = vmatprep.mubr.bf16.mxu0 %v9532_v19  ;;  %9848 = vst [vmem:[#allocation14_spill] sm:$0xff] %v7394_v9 }
  0x54   :  { %5969 = vmatprep.subr.bf16.mxu1 %v5968_v21 }
  0x55   :  { %5757 = vmatmul.mubr.msk.f32.gmra.mrb[6].mxu1 %vm106_vm1, %v101_v11  ;;  %v6263_v11 = vld [vmem:[%s9519_s5 + $0xc] ss:$16 sps:$4 sm:$0xff]  }
 0x110   :  { %v5735_v24 = vpop.f32.mrb[0].mxu1 }
 0x111   :  { %v201_v25 = vpop.f32.mrb[1].mxu1 }
 0x119   :  { %v5763_v26 = vpop.f32.mrb[0].mxu0 }
 0x11a   :  { %v6070_v28 = vadd.f32 %v5763_v26, %v5735_v24  ;;  %v422_v29 = vpop.f32.mrb[1].mxu0 }
 0x11b   :  { %v6071_v30 = vadd.f32 %v422_v29, %v201_v25 }
 0x11c   :  { %v477_v31 = vadd.f32 %v6070_v28, %v5441_v27 }
 0x11d   :  { %v476_v32 = vadd.f32 %v6071_v30, %v5441_v27  ;;  %v5766_v33 = vpop.f32.mrb[2].mxu0  ;;  %v7318_v30 = vld [vmem:[#allocation4] ss:$16 sps:$4 sm:$0xff]  }
 0x11e   :  { %v432_v36 = vpop.f32.mrb[3].mxu0  ;;  %v485_v38 = vmax.f32 %v477_v31, 0.0  ;;  %v7320_v31 = vld [vmem:[#allocation4 + $0x8] ss:$16 sps:$4 sm:$0xff]  }
 0x11f   :  { %v484_v37 = vmax.f32 %v476_v32, 0.0 }
 0x120   :  { %v5752_v39 = vpop.f32.mrb[2].mxu1 }
 0x121   :  { %v6072_v41 = vadd.f32 %v5766_v33, %v5752_v39  ;;  %5781 = vmatprep.mubr.msk.f32.mxu1 %vm501_vm2, %v484_v37  ;;  %v322_v42 = vpop.f32.mrb[3].mxu1  ;;  %v5769_v43 = vpop.f32.mrb[4].mxu0 }
 0x122   :  { %v6073_v46 = vadd.f32 %v432_v36, %v322_v42  ;;  %5782 = vmatmul.mubr.msk.f32.vlgmr.msra.gmra.mrb[8].mxu1 %vm501_vm2, %v485_v38  ;;  %v442_v47 = vpop.f32.mrb[5].mxu0  ;;  %v7332_v42 = vld [vmem:[#allocation4 + $0x28] ss:$16 sps:$4 sm:$0xff]  }
 0x123   :  { %v479_v48 = vadd.f32 %v6072_v41, %v5441_v27  ;;  %5971 = vmatpush3.bf16.msra.mxu1 %v5968_v21  ;;  %v7330_v41 = vld [vmem:[#allocation4 + $0x20] ss:$16 sps:$4 sm:$0xff]  }
 0x124   :  { %v478_v49 = vadd.f32 %v6073_v46, %v5441_v27  ;;  %v5755_v50 = vpop.f32.mrb[4].mxu1  ;;  %5973 = vmatprep.subr.bf16.mxu1 %v5972_v40  ;;  %v7338_v46 = vld [vmem:[#allocation4 + $0x4c] ss:$16 sps:$4 sm:$0xff]  }
 0x125   :  { %v6074_v52 = vadd.f32 %v5769_v43, %v5755_v50  ;;  %v332_v53 = vpop.f32.mrb[5].mxu1  ;;  %v5772_v54 = vpop.f32.mrb[6].mxu0  ;;  %v487_v58 = vmax.f32 %v479_v48, 0.0 }
 0x126   :  { %v486_v55 = vmax.f32 %v478_v49, 0.0  ;;  %v6075_v56 = vadd.f32 %v442_v47, %v332_v53  ;;  %v452_v57 = vpop.f32.mrb[7].mxu0  ;;  %v7346_v53 = vld [vmem:[#allocation4 + $0x48] ss:$16 sps:$4 sm:$0xff]  }
 0x127   :  { %v481_v59 = vadd.f32 %v6074_v52, %v5441_v27  ;;  %5975 = vmatpush3.bf16.msra.mxu1 %v5972_v40  ;;  %v7344_v52 = vld [vmem:[#allocation4 + $0x40] ss:$16 sps:$4 sm:$0xff]  }
 0x128   :  { %v480_v60 = vadd.f32 %v6075_v56, %v5441_v27  ;;  %v5758_v61 = vpop.f32.mrb[6].mxu1  ;;  %5784 = vmatprep.mubr.msk.f32.mxu1 %vm501_vm2, %v486_v55  ;;  %5977 = vmatprep.subr.bf16.mxu1 %v5976_v51  ;;  %v7350_v56 = vld [vmem:[#allocation4 + $0x64] ss:$16 sps:$4 sm:$0xff]  }
 0x129   :  { %v6076_v62 = vadd.f32 %v5772_v54, %v5758_v61  ;;  %v342_v63 = vpop.f32.mrb[7].mxu1  ;;  %5785 = vmatmul.mubr.msk.f32.gmra.mrb[10].mxu1 %vm501_vm2, %v487_v58  ;;  %v489_v3 = vmax.f32 %v481_v59, 0.0  ;;  %v7360_v61 = vld [vmem:[#allocation4 + $0x68] ss:$16 sps:$4 sm:$0xff]  }
 0x12a   :  { %v488_v0 = vmax.f32 %v480_v60, 0.0  ;;  %v6077_v2 = vadd.f32 %v452_v57, %v342_v63  ;;  %v7352_v57 = vld [vmem:[#allocation4 + $0x6c] ss:$16 sps:$4 sm:$0xff]   ;;  %v7358_v60 = vld [vmem:[#allocation4 + $0x60] ss:$16 sps:$4 sm:$0xff]  }
 0x12b   :  { %v483_v4 = vadd.f32 %v6076_v62, %v5441_v27  ;;  %v7364_v63 = vld [vmem:[#allocation4 + $0x84] ss:$16 sps:$4 sm:$0xff]  }
 0x12c   :  { %v482_v5 = vadd.f32 %v6077_v2, %v5441_v27  ;;  %5787 = vmatprep.mubr.msk.f32.mxu1 %vm501_vm2, %v488_v0  ;;  %v7372_v2 = vld [vmem:[#allocation4 + $0x80] ss:$16 sps:$4 sm:$0xff]  }
 0x12d   :  { %5788 = vmatmul.mubr.msk.f32.gmra.mrb[12].mxu1 %vm501_vm2, %v489_v3  ;;  %v491_v7 = vmax.f32 %v483_v4, 0.0  ;;  %v7378_v4 = vld [vmem:[#allocation4 + $0xa4] ss:$16 sps:$4 sm:$0xff]  }
 0x12e   :  { %v490_v6 = vmax.f32 %v482_v5, 0.0  ;;  %v7380_v5 = vld [vmem:[#allocation4 + $0xac] ss:$16 sps:$4 sm:$0xff]  }
 0x130   :  { %5790 = vmatprep.mubr.msk.f32.mxu1 %vm501_vm2, %v490_v6 }
 0x131   :  { %5791 = vmatmul.mubr.msk.f32.gmra.mrb[14].mxu1 %vm501_vm2, %v491_v7 }
 0x132   :  { %5801 = vmatprep.mubr.f32.mxu1 %v9530_v1 }
 0x135   :  { %5802 = vmatmul.mubr.msk.f32.vlgmr.msra.gmra.mrb[8].mxu1 %vm501_vm2, %v484_v37 }
 0x136   :  { %5804 = vmatprep.mubr.msk.f32.mxu1 %vm501_vm2, %v485_v38  ;;  %5979 = vmatpush3.bf16.msra.mxu1 %v5976_v51 }
 0x137   :  { %5981 = vmatprep.subr.bf16.mxu1 %v5980_v10 }
 0x139   :  { %5805 = vmatmul.mubr.msk.f32.gmra.mrb[10].mxu1 %vm501_vm2, %v486_v55 }
 0x13a   :  { %5807 = vmatprep.mubr.msk.f32.mxu1 %vm501_vm2, %v487_v58  ;;  %5983 = vmatpush3.bf16.msra.mxu1 %v5980_v10  ;;  %v7400_v10 = vld [vmem:[#allocation4 + $0xc0] ss:$16 sps:$4 sm:$0xff]  }
 0x13b   :  { %1038 = vmatprep.subr.bf16.mxu1 %v6263_v11  ;;  %9849 = vst [vmem:[#allocation15_spill] sm:$0xff] %v7400_v10  ;;  %v7402_v11 = vld [vmem:[#allocation4 + $0xc8] ss:$16 sps:$4 sm:$0xff]  }
 0x13c   :  { %9850 = vst [vmem:[#allocation16_spill] sm:$0xff] %v7402_v11 }
 0x13d   :  { %5808 = vmatmul.mubr.msk.f32.gmra.mrb[12].mxu1 %vm501_vm2, %v488_v0 }
 0x13e   :  { %5810 = vmatprep.mubr.msk.f32.mxu1 %vm501_vm2, %v489_v3 }
 0x141   :  { %5811 = vmatmul.mubr.msk.f32.gmra.mrb[14].mxu1 %vm501_vm2, %v490_v6 }
 0x142   :  { %5821 = vmatprep.mubr.msk.f32.mxu1 %vm501_vm2, %v485_v38 }
 0x145   :  { %5822 = vmatmul.mubr.msk.f32.vlgmr.msra.gmra.mrb[8].mxu1 %vm501_vm2, %v486_v55 }
 0x146   :  { %5824 = vmatprep.mubr.msk.f32.mxu1 %vm501_vm2, %v487_v58  ;;  %1039 = vmatpush1.bf16.msra.mxu1 %v6261_v12  ;;  %v7406_v12 = vld [vmem:[#allocation4 + $0xe4] ss:$16 sps:$4 sm:$0xff]  }
 0x147   :  { %1040 = vmatprep.subr.bf16.mxu1 %v6269_v15  ;;  %9851 = vst [vmem:[#allocation17_spill] sm:$0xff] %v7406_v12  ;;  %v7416_v15 = vld [vmem:[#allocation4 + $0xe8] ss:$16 sps:$4 sm:$0xff]  }
 0x148   :  { %9854 = vst [vmem:[#allocation20_spill] sm:$0xff] %v7416_v15 }
 0x149   :  { %5825 = vmatmul.mubr.msk.f32.gmra.mrb[10].mxu1 %vm501_vm2, %v488_v0  ;;  %v7366_v0 = vld [vmem:[#allocation4 + $0x8c] ss:$16 sps:$4 sm:$0xff]  }
 0x14a   :  { %5827 = vmatprep.mubr.msk.f32.mxu1 %vm501_vm2, %v489_v3  ;;  %1041 = vmatpush1.bf16.msra.mxu1 %v6267_v16  ;;  %v7374_v3 = vld [vmem:[#allocation4 + $0x88] ss:$16 sps:$4 sm:$0xff]   ;;  %v7428_v16 = vld [vmem:[#allocation7 + $0x4] ss:$16 sps:$4 sm:$0xff]  }
 0x14b   :  { %1380 = vmatprep.subr.bf16.mxu1 %v7307_v18  ;;  %9855 = vst [vmem:[#allocation21_spill] sm:$0xff] %v7428_v16 }
 0x14d   :  { %5828 = vmatmul.mubr.msk.f32.gmra.mrb[12].mxu1 %vm501_vm2, %v490_v6  ;;  %v7386_v6 = vld [vmem:[#allocation4 + $0xa0] ss:$16 sps:$4 sm:$0xff]  }
 0x14e   :  { %5830 = vmatprep.mubr.msk.f32.mxu1 %vm501_vm2, %v491_v7  ;;  %v7388_v7 = vld [vmem:[#allocation4 + $0xa8] ss:$16 sps:$4 sm:$0xff]  }
 0x151   :  { %5831 = vmatmul.mubr.f32.gmra.mrb[14].mxu1 %v9530_v1  ;;  %v7516_v1 = vld [vmem:[#allocation7 + $0xe0] ss:$16 sps:$4 sm:$0xff]  }
 0x152   :  { %1070 = vmatprep.mubr.bf16.mxu1 %v9532_v19  ;;  %9885 = vst [vmem:[#allocation51_spill] sm:$0xff] %v7516_v1 }
 0x218   :  { %v5823_v21 = vpop.f32.mrb[8].mxu1 }
 0x219   :  { %v864_v22 = vadd.f32 %v5823_v21, %v5472_v20  ;;  %v809_v23 = vpop.f32.mrb[9].mxu1  ;;  %v7432_v21 = vld [vmem:[#allocation7] ss:$16 sps:$4 sm:$0xff]  }
 0x21a   :  { %v863_v24 = vadd.f32 %v5472_v20, %v809_v23  ;;  %9857 = vst [vmem:[#allocation23_spill] sm:$0xff] %v7432_v21  ;;  %v7440_v23 = vld [vmem:[#allocation7 + $0x24] ss:$16 sps:$4 sm:$0xff]  }
 0x21b   :  { %v872_v25 = vmax.f32 %v864_v22, 0.0  ;;  %v7434_v22 = vld [vmem:[#allocation7 + $0x8] ss:$16 sps:$4 sm:$0xff]   ;;  %9859 = vst [vmem:[#allocation25_spill] sm:$0xff] %v7440_v23 }
 0x21c   :  { %v871_v26 = vmax.f32 %v863_v24, 0.0  ;;  %v5826_v27 = vpop.f32.mrb[10].mxu1  ;;  %9858 = vst [vmem:[#allocation24_spill] sm:$0xff] %v7434_v22  ;;  %v7442_v24 = vld [vmem:[#allocation7 + $0x2c] ss:$16 sps:$4 sm:$0xff]  }
 0x21d   :  { %v866_v28 = vadd.f32 %v5826_v27, %v5472_v20  ;;  %v819_v29 = vpop.f32.mrb[11].mxu1  ;;  %9860 = vst [vmem:[#allocation26_spill] sm:$0xff] %v7442_v24  ;;  %v7452_v27 = vld [vmem:[#allocation7 + $0x44] ss:$16 sps:$4 sm:$0xff]  }
 0x21e   :  { %v879_v32 = vpack.c.bf16 %v872_v25, %v871_v26  ;;  %v865_v33 = vadd.f32 %v5472_v20, %v819_v29  ;;  %v7444_v25 = vld [vmem:[#allocation7 + $0x20] ss:$16 sps:$4 sm:$0xff]   ;;  %v7446_v26 = vld [vmem:[#allocation7 + $0x28] ss:$16 sps:$4 sm:$0xff]   ;;  %9863 = vst [vmem:[#allocation29_spill] sm:$0xff] %v7452_v27 }
 0x21f   :  { %v874_v36 = vmax.f32 %v866_v28, 0.0  ;;  %9861 = vst [vmem:[#allocation27_spill] sm:$0xff] %v7444_v25  ;;  %9862 = vst [vmem:[#allocation28_spill] sm:$0xff] %v7446_v26  ;;  %v7454_v28 = vld [vmem:[#allocation7 + $0x4c] ss:$16 sps:$4 sm:$0xff]  }
 0x220   :  { %v873_v37 = vmax.f32 %v865_v33, 0.0  ;;  %v5829_v38 = vpop.f32.mrb[12].mxu1  ;;  %5481 = vmatmul.mubr.msk.bf16.vlgmr.msra.gmra.mrb[8].mxu0 %vm501_vm2, %v879_v32  ;;  %5485 = vmatmul.mubr.msk.bf16.vlgmr.msra.gmra.mrb[16].mxu1 %vm501_vm2, %v879_v32  ;;  %9864 = vst [vmem:[#allocation30_spill] sm:$0xff] %v7454_v28  ;;  %v7456_v29 = vld [vmem:[#allocation7 + $0x40] ss:$16 sps:$4 sm:$0xff]  }
 0x221   :  { %v868_v39 = vadd.f32 %v5829_v38, %v5472_v20  ;;  %v829_v40 = vpop.f32.mrb[13].mxu1  ;;  %1340 = vmatpush1.bf16.msra.mxu0 %v7318_v30  ;;  %1381 = vmatpush1.bf16.msra.mxu1 %v7320_v31  ;;  %9865 = vst [vmem:[#allocation31_spill] sm:$0xff] %v7456_v29  ;;  %v7458_v32 = vld [vmem:[#allocation7 + $0x48] ss:$16 sps:$4 sm:$0xff]   ;;  %v7464_v33 = vld [vmem:[#allocation7 + $0x64] ss:$16 sps:$4 sm:$0xff]  }
 0x222   :  { %v880_v43 = vpack.c.bf16 %v874_v36, %v873_v37  ;;  %v867_v44 = vadd.f32 %v5472_v20, %v829_v40  ;;  %1341 = vmatprep.subr.bf16.mxu0 %v7322_v34  ;;  %1382 = vmatprep.subr.bf16.mxu1 %v7324_v35  ;;  %9866 = vst [vmem:[#allocation32_spill] sm:$0xff] %v7458_v32  ;;  %9867 = vst [vmem:[#allocation33_spill] sm:$0xff] %v7464_v33  ;;  %v7466_v36 = vld [vmem:[#allocation7 + $0x6c] ss:$16 sps:$4 sm:$0xff]   ;;  %v7468_v37 = vld [vmem:[#allocation7 + $0x60] ss:$16 sps:$4 sm:$0xff]  }
 0x223   :  { %v876_v47 = vmax.f32 %v868_v39, 0.0  ;;  %1007 = vmatprep.mubr.bf16.mxu0 %v9532_v19  ;;  %1080 = vmatprep.mubr.bf16.mxu1 %v9532_v19  ;;  %9868 = vst [vmem:[#allocation34_spill] sm:$0xff] %v7466_v36  ;;  %9869 = vst [vmem:[#allocation35_spill] sm:$0xff] %v7468_v37  ;;  %v7470_v38 = vld [vmem:[#allocation7 + $0x68] ss:$16 sps:$4 sm:$0xff]  }
 0x224   :  { %v875_v48 = vmax.f32 %v867_v44, 0.0  ;;  %v5832_v49 = vpop.f32.mrb[14].mxu1  ;;  %9870 = vst [vmem:[#allocation36_spill] sm:$0xff] %v7470_v38  ;;  %v7476_v39 = vld [vmem:[#allocation7 + $0x84] ss:$16 sps:$4 sm:$0xff]  }
 0x225   :  { %v870_v50 = vadd.f32 %v5832_v49, %v5472_v20  ;;  %v839_v51 = vpop.f32.mrb[15].mxu1  ;;  %1342 = vmatpush1.bf16.msra.mxu0 %v7330_v41  ;;  %1383 = vmatpush1.bf16.msra.mxu1 %v7332_v42  ;;  %9871 = vst [vmem:[#allocation37_spill] sm:$0xff] %v7476_v39  ;;  %v7478_v40 = vld [vmem:[#allocation7 + $0x8c] ss:$16 sps:$4 sm:$0xff]   ;;  %v7482_v44 = vld [vmem:[#allocation7 + $0x88] ss:$16 sps:$4 sm:$0xff]  }
 0x226   :  { %v881_v54 = vpack.c.bf16 %v876_v47, %v875_v48  ;;  %v869_v55 = vadd.f32 %v5472_v20, %v839_v51  ;;  %1343 = vmatprep.subr.bf16.mxu0 %v7336_v45  ;;  %1384 = vmatprep.subr.bf16.mxu1 %v7338_v46  ;;  %v7430_v20 = vld [vmem:[#allocation7 + $0xc] ss:$16 sps:$4 sm:$0xff]   ;;  %9872 = vst [vmem:[#allocation38_spill] sm:$0xff] %v7478_v40  ;;  %9874 = vst [vmem:[#allocation40_spill] sm:$0xff] %v7482_v44  ;;  %v7488_v47 = vld [vmem:[#allocation7 + $0xa4] ss:$16 sps:$4 sm:$0xff]  }
 0x227   :  { %v878_v58 = vmax.f32 %v870_v50, 0.0  ;;  %9856 = vst [vmem:[#allocation22_spill] sm:$0xff] %v7430_v20  ;;  %9875 = vst [vmem:[#allocation41_spill] sm:$0xff] %v7488_v47  ;;  %v7490_v48 = vld [vmem:[#allocation7 + $0xac] ss:$16 sps:$4 sm:$0xff]  }
 0x228   :  { %v877_v59 = vmax.f32 %v869_v55, 0.0  ;;  %5482 = vmatmul.mubr.msk.bf16.gmra.mrb[12].mxu0 %vm501_vm2, %v880_v43  ;;  %5486 = vmatmul.mubr.msk.bf16.gmra.mrb[20].mxu1 %vm501_vm2, %v880_v43  ;;  %v7480_v43 = vld [vmem:[#allocation7 + $0x80] ss:$16 sps:$4 sm:$0xff]   ;;  %9876 = vst [vmem:[#allocation42_spill] sm:$0xff] %v7490_v48  ;;  %v7494_v50 = vld [vmem:[#allocation7 + $0xa8] ss:$16 sps:$4 sm:$0xff]  }
 0x229   :  { %1344 = vmatpush1.bf16.msra.mxu0 %v7344_v52  ;;  %1385 = vmatpush1.bf16.msra.mxu1 %v7346_v53  ;;  %9873 = vst [vmem:[#allocation39_spill] sm:$0xff] %v7480_v43  ;;  %v7492_v49 = vld [vmem:[#allocation7 + $0xa0] ss:$16 sps:$4 sm:$0xff]   ;;  %9878 = vst [vmem:[#allocation44_spill] sm:$0xff] %v7494_v50  ;;  %v7500_v51 = vld [vmem:[#allocation7 + $0xc4] ss:$16 sps:$4 sm:$0xff]  }
 0x22a   :  { %v882_v62 = vpack.c.bf16 %v878_v58, %v877_v59  ;;  %1345 = vmatprep.subr.bf16.mxu0 %v7350_v56  ;;  %1386 = vmatprep.subr.bf16.mxu1 %v7352_v57  ;;  %9877 = vst [vmem:[#allocation43_spill] sm:$0xff] %v7492_v49  ;;  %9879 = vst [vmem:[#allocation45_spill] sm:$0xff] %v7500_v51  ;;  %v7504_v55 = vld [vmem:[#allocation7 + $0xc0] ss:$16 sps:$4 sm:$0xff]   ;;  %v7506_v58 = vld [vmem:[#allocation7 + $0xc8] ss:$16 sps:$4 sm:$0xff]  }
 0x22b   :  { %1017 = vmatprep.mubr.bf16.mxu0 %v9532_v19  ;;  %1090 = vmatprep.mubr.bf16.mxu1 %v9532_v19  ;;  %9881 = vst [vmem:[#allocation47_spill] sm:$0xff] %v7504_v55  ;;  %9882 = vst [vmem:[#allocation48_spill] sm:$0xff] %v7506_v58  ;;  %v7512_v59 = vld [vmem:[#allocation7 + $0xe4] ss:$16 sps:$4 sm:$0xff]  }
 0x22c   :  { %9883 = vst [vmem:[#allocation49_spill] sm:$0xff] %v7512_v59 }
 0x22d   :  { %1346 = vmatpush1.bf16.msra.mxu0 %v7358_v60  ;;  %1387 = vmatpush1.bf16.msra.mxu1 %v7360_v61 }
 0x22e   :  { %1347 = vmatprep.subr.bf16.mxu0 %v7364_v63  ;;  %1388 = vmatprep.subr.bf16.mxu1 %v7366_v0 }
 0x230   :  { %5483 = vmatmul.mubr.msk.bf16.gmra.mrb[16].mxu0 %vm501_vm2, %v881_v54  ;;  %5487 = vmatmul.mubr.msk.bf16.gmra.mrb[24].mxu1 %vm501_vm2, %v881_v54  ;;  %v7502_v54 = vld [vmem:[#allocation7 + $0xcc] ss:$16 sps:$4 sm:$0xff]  }
 0x231   :  { %1348 = vmatpush1.bf16.msra.mxu0 %v7372_v2  ;;  %1389 = vmatpush1.bf16.msra.mxu1 %v7374_v3  ;;  %9880 = vst [vmem:[#allocation46_spill] sm:$0xff] %v7502_v54 }
 0x232   :  { %1349 = vmatprep.subr.bf16.mxu0 %v7378_v4  ;;  %1390 = vmatprep.subr.bf16.mxu1 %v7380_v5 }
 0x233   :  { %1027 = vmatprep.mubr.bf16.mxu0 %v9532_v19  ;;  %1100 = vmatprep.mubr.bf16.mxu1 %v9532_v19 }
 0x235   :  { %1350 = vmatpush1.bf16.msra.mxu0 %v7386_v6  ;;  %1391 = vmatpush1.bf16.msra.mxu1 %v7388_v7 }
 0x236   :  { %1351 = vmatprep.subr.bf16.mxu0 %v7392_v8  ;;  %1392 = vmatprep.subr.bf16.mxu1 %v7394_v9 }
 0x238   :  { %5484 = vmatmul.mubr.msk.bf16.gmra.mrb[20].mxu0 %vm501_vm2, %v882_v62  ;;  %5488 = vmatmul.mubr.msk.bf16.gmra.mrb[28].mxu1 %vm501_vm2, %v882_v62  ;;  %v7514_v62 = vld [vmem:[#allocation7 + $0xec] ss:$16 sps:$4 sm:$0xff]  }
 0x239   :  { %1352 = vmatpush1.bf16.msra.mxu0 %v7400_v10  ;;  %1393 = vmatpush1.bf16.msra.mxu1 %v7402_v11  ;;  %9884 = vst [vmem:[#allocation50_spill] sm:$0xff] %v7514_v62 }
 0x23a   :  { %1353 = vmatprep.subr.bf16.mxu0 %v7406_v12  ;;  %1394 = vmatprep.subr.bf16.mxu1 %v7408_v13 }
 0x23b   :  { %1371 = vmatprep.mubr.bf16.mxu0 %v9532_v19  ;;  %1412 = vmatprep.mubr.bf16.mxu1 %v9532_v19 }
 0x23d   :  { %1354 = vmatpush1.bf16.msra.mxu0 %v7414_v14  ;;  %1395 = vmatpush1.bf16.msra.mxu1 %v7416_v15 }
 0x23e   :  { %1658 = vmatprep.subr.bf16.mxu0 %v7428_v16  ;;  %1699 = vmatprep.subr.bf16.mxu1 %v7430_v20 }
 0x240   :  { %1372 = vmatmul.mubr.bf16.vlgmr.msra.gmra.mrb[24].mxu0 %v9532_v19  ;;  %1413 = vmatmul.mubr.bf16.vlgmr.msra.gmra.mrb[32].mxu1 %v9532_v19 }
 0x241   :  { %1690 = vmatprep.mubr.bf16.mxu0 %v9532_v19  ;;  %1731 = vmatprep.mubr.bf16.mxu1 %v9532_v19  ;;  %v7518_v19 = vld [vmem:[#allocation7 + $0xe8] ss:$16 sps:$4 sm:$0xff]  }
 0x242   :  { %1659 = vmatpush1.bf16.msra.mxu0 %v7432_v21  ;;  %1700 = vmatpush1.bf16.msra.mxu1 %v7434_v22  ;;  %9886 = vst [vmem:[#allocation52_spill] sm:$0xff] %v7518_v19 }
 0x243   :  { %1660 = vmatprep.subr.bf16.mxu0 %v7440_v23  ;;  %1701 = vmatprep.subr.bf16.mxu1 %v7442_v24 }
 0x246   :  { %1661 = vmatpush1.bf16.msra.mxu0 %v7444_v25  ;;  %1702 = vmatpush1.bf16.msra.mxu1 %v7446_v26 }
 0x247   :  { %1662 = vmatprep.subr.bf16.mxu0 %v7452_v27  ;;  %1703 = vmatprep.subr.bf16.mxu1 %v7454_v28 }
 0x24a   :  { %1663 = vmatpush1.bf16.msra.mxu0 %v7456_v29  ;;  %1704 = vmatpush1.bf16.msra.mxu1 %v7458_v32 }
 0x24b   :  { %1664 = vmatprep.subr.bf16.mxu0 %v7464_v33  ;;  %1705 = vmatprep.subr.bf16.mxu1 %v7466_v36 }
 0x24e   :  { %1665 = vmatpush1.bf16.msra.mxu0 %v7468_v37  ;;  %1706 = vmatpush1.bf16.msra.mxu1 %v7470_v38 }
 0x24f   :  { %1666 = vmatprep.subr.bf16.mxu0 %v7476_v39  ;;  %1707 = vmatprep.subr.bf16.mxu1 %v7478_v40 }
 0x252   :  { %1667 = vmatpush1.bf16.msra.mxu0 %v7480_v43  ;;  %1708 = vmatpush1.bf16.msra.mxu1 %v7482_v44 }
 0x253   :  { %1668 = vmatprep.subr.bf16.mxu0 %v7488_v47  ;;  %1709 = vmatprep.subr.bf16.mxu1 %v7490_v48 }
 0x256   :  { %1669 = vmatpush1.bf16.msra.mxu0 %v7492_v49  ;;  %1710 = vmatpush1.bf16.msra.mxu1 %v7494_v50 }
 0x257   :  { %1670 = vmatprep.subr.bf16.mxu0 %v7500_v51  ;;  %1711 = vmatprep.subr.bf16.mxu1 %v7502_v54  ;;  %v7524_v54 = vld [vmem:[#allocation9 + $0x4] ss:$16 sps:$4 sm:$0xff]  }
 0x258   :  { %9887 = vst [vmem:[#allocation53_spill] sm:$0xff] %v7524_v54 }
 0x25a   :  { %1671 = vmatpush1.bf16.msra.mxu0 %v7504_v55  ;;  %1712 = vmatpush1.bf16.msra.mxu1 %v7506_v58  ;;  %v7526_v55 = vld [vmem:[#allocation9 + $0xc] ss:$16 sps:$4 sm:$0xff]   ;;  %v9558_v58 = vlaneseq }
 0x25b   :  { %1672 = vmatprep.subr.bf16.mxu0 %v7512_v59  ;;  %1713 = vmatprep.subr.bf16.mxu1 %v7514_v62  ;;  %9888 = vst [vmem:[#allocation54_spill] sm:$0xff] %v7526_v55 }
 0x25c   :  { %v894_v51 = vshrl.u32 %v9558_v58, 7 }
 0x25e   :  { %1673 = vmatpush1.bf16.msra.mxu0 %v7516_v1  ;;  %1714 = vmatpush1.bf16.msra.mxu1 %v7518_v19  ;;  %v7531_v50 = vsub.s32 0, %v894_v51  ;;  %v7533_v59 = vsub.s32 2, %v894_v51  ;;  %v891_v1 = vld [vmem:[%s9521_s7] sm:$0xf]  ;;  %v7538_v19 = vsub.s32 1, %v894_v51  ;;  %v7540_v62 = vsub.s32 3, %v894_v51 }
 0x25f   :  { %1932 = vmatprep.subr.bf16.mxu0 %v7524_v54  ;;  %1973 = vmatprep.subr.bf16.mxu1 %v7526_v55 }
 0x260   :  { %9889 = vst [vmem:[#allocation55_spill] sm:$0xff] %v7531_v50  ;;  %9890 = vst [vmem:[#allocation56_spill] sm:$0xff] %v7533_v59  ;;  %v896_v55 = vrot.slane %v891_v1, %v7531_v50  ;;  %v904_v58 = vrot.slane %v891_v1, %v7533_v59  ;;  %v900_v44 = vrot.slane %v891_v1, %v7538_v19 }
 0x261   :  { %9891 = vst [vmem:[#allocation57_spill] sm:$0xff] %v7538_v19  ;;  %9892 = vst [vmem:[#allocation58_spill] sm:$0xff] %v7540_v62  ;;  %v908_v43 = vrot.slane %v891_v1, %v7540_v62 }
 0x2f3   :  { %v7542_v49 = vpop.f32.mrb[8].mxu0  ;;  %v7544_v54 = vpop.f32.mrb[16].mxu1 }
 0x2f4   :  { %v1001_v48 = vpop.f32.mrb[9].mxu0  ;;  %v1074_v47 = vpop.f32.mrb[17].mxu1 }
 0x2f5   :  { %v1003_v40 = vpop.f32.mrb[10].mxu0  ;;  %v1076_v39 = vpop.f32.mrb[18].mxu1 }
 0x2f6   :  { %v7550_v38 = vadd.f32 %v1003_v40, %v896_v55  ;;  %v7552_v51 = vadd.f32 %v1076_v39, %v904_v58  ;;  %v1005_v37 = vpop.f32.mrb[11].mxu0  ;;  %v1078_v36 = vpop.f32.mrb[19].mxu1 }
 0x2f7   :  { %v7554_v33 = vadd.f32 %v1005_v37, %v900_v44  ;;  %v7556_v32 = vadd.f32 %v1078_v36, %v908_v43 }
 0x2f8   :  { %9893 = vst [vmem:[#allocation59_spill] sm:$0xff] %v7550_v38  ;;  %9894 = vst [vmem:[#allocation60_spill] sm:$0xff] %v7552_v51 }
 0x2f9   :  { %9895 = vst [vmem:[#allocation61_spill] sm:$0xff] %v7554_v33  ;;  %9896 = vst [vmem:[#allocation62_spill] sm:$0xff] %v7556_v32 }
 0x2fb   :  { %v1009_v50 = vpop.f32.mrb[12].mxu0  ;;  %v1082_v59 = vpop.f32.mrb[20].mxu1 }
 0x2fc   :  { %v7558_v29 = vadd.f32 %v1009_v50, %v896_v55  ;;  %v7560_v28 = vadd.f32 %v1082_v59, %v904_v58  ;;  %v1011_v19 = vpop.f32.mrb[13].mxu0  ;;  %v1084_v1 = vpop.f32.mrb[21].mxu1 }
 0x2fd   :  { %v7562_v62 = vadd.f32 %v1011_v19, %v900_v44  ;;  %v7564_v40 = vadd.f32 %v1084_v1, %v908_v43  ;;  %v1013_v39 = vpop.f32.mrb[14].mxu0  ;;  %v1086_v51 = vpop.f32.mrb[22].mxu1 }
 0x2fe   :  { %9897 = vst [vmem:[#allocation63_spill] sm:$0xff] %v7558_v29  ;;  %9898 = vst [vmem:[#allocation64_spill] sm:$0xff] %v7560_v28  ;;  %v7566_v38 = vadd.f32 %v1013_v39, %v896_v55  ;;  %v7568_v37 = vadd.f32 %v1086_v51, %v904_v58  ;;  %v1015_v36 = vpop.f32.mrb[15].mxu0  ;;  %v1088_v32 = vpop.f32.mrb[23].mxu1 }
 0x2ff   :  { %9899 = vst [vmem:[#allocation65_spill] sm:$0xff] %v7562_v62  ;;  %9900 = vst [vmem:[#allocation66_spill] sm:$0xff] %v7564_v40  ;;  %v7570_v33 = vadd.f32 %v1015_v36, %v900_v44  ;;  %v7572_v50 = vadd.f32 %v1088_v32, %v908_v43 }
 0x300   :  { %9901 = vst [vmem:[#allocation67_spill] sm:$0xff] %v7566_v38  ;;  %9902 = vst [vmem:[#allocation68_spill] sm:$0xff] %v7568_v37 }
 0x301   :  { %9903 = vst [vmem:[#allocation69_spill] sm:$0xff] %v7570_v33  ;;  %9904 = vst [vmem:[#allocation70_spill] sm:$0xff] %v7572_v50 }
 0x303   :  { %v1019_v59 = vpop.f32.mrb[16].mxu0  ;;  %v1092_v28 = vpop.f32.mrb[24].mxu1 }
 0x304   :  { %v7574_v29 = vadd.f32 %v1019_v59, %v896_v55  ;;  %v7576_v19 = vadd.f32 %v1092_v28, %v904_v58  ;;  %v1021_v1 = vpop.f32.mrb[17].mxu0  ;;  %v1094_v40 = vpop.f32.mrb[25].mxu1 }
 0x305   :  { %v7578_v62 = vadd.f32 %v1021_v1, %v900_v44  ;;  %v7580_v39 = vadd.f32 %v1094_v40, %v908_v43  ;;  %v1023_v51 = vpop.f32.mrb[18].mxu0  ;;  %v1096_v37 = vpop.f32.mrb[26].mxu1 }
 0x306   :  { %9905 = vst [vmem:[#allocation71_spill] sm:$0xff] %v7574_v29  ;;  %9906 = vst [vmem:[#allocation72_spill] sm:$0xff] %v7576_v19  ;;  %v7582_v38 = vadd.f32 %v1023_v51, %v896_v55  ;;  %v7584_v36 = vadd.f32 %v1096_v37, %v904_v58  ;;  %v1025_v32 = vpop.f32.mrb[19].mxu0  ;;  %v1098_v50 = vpop.f32.mrb[27].mxu1 }
 0x307   :  { %9907 = vst [vmem:[#allocation73_spill] sm:$0xff] %v7578_v62  ;;  %9908 = vst [vmem:[#allocation74_spill] sm:$0xff] %v7580_v39  ;;  %v7586_v33 = vadd.f32 %v1025_v32, %v900_v44  ;;  %v7588_v59 = vadd.f32 %v1098_v50, %v908_v43 }
 0x308   :  { %9909 = vst [vmem:[#allocation75_spill] sm:$0xff] %v7582_v38  ;;  %9910 = vst [vmem:[#allocation76_spill] sm:$0xff] %v7584_v36 }
 0x309   :  { %9911 = vst [vmem:[#allocation77_spill] sm:$0xff] %v7586_v33  ;;  %9912 = vst [vmem:[#allocation78_spill] sm:$0xff] %v7588_v59 }
 0x30b   :  { %v1029_v28 = vpop.f32.mrb[20].mxu0  ;;  %v1102_v19 = vpop.f32.mrb[28].mxu1 }
 0x30c   :  { %v7590_v29 = vadd.f32 %v1029_v28, %v896_v55  ;;  %v7592_v1 = vadd.f32 %v1102_v19, %v904_v58  ;;  %v1031_v40 = vpop.f32.mrb[21].mxu0  ;;  %v1104_v39 = vpop.f32.mrb[29].mxu1  ;;  %v1000_v19 = vadd.f32 %v7542_v49, %v896_v55 }
 0x30d   :  { %v7594_v62 = vadd.f32 %v1031_v40, %v900_v44  ;;  %v7596_v51 = vadd.f32 %v1104_v39, %v908_v43  ;;  %v1033_v37 = vpop.f32.mrb[22].mxu0  ;;  %v1106_v36 = vpop.f32.mrb[30].mxu1  ;;  %v1002_v40 = vadd.f32 %v1001_v48, %v900_v44 }
 0x30e   :  { %9913 = vst [vmem:[#allocation79_spill] sm:$0xff] %v7590_v29  ;;  %9914 = vst [vmem:[#allocation80_spill] sm:$0xff] %v7592_v1  ;;  %v7598_v38 = vadd.f32 %v1033_v37, %v896_v55  ;;  %v7600_v32 = vadd.f32 %v1106_v36, %v904_v58  ;;  %v1035_v50 = vpop.f32.mrb[23].mxu0  ;;  %v1108_v59 = vpop.f32.mrb[31].mxu1  ;;  %v1073_v1 = vadd.f32 %v7544_v54, %v904_v58 }
 0x30f   :  { %9915 = vst [vmem:[#allocation81_spill] sm:$0xff] %v7594_v62  ;;  %9916 = vst [vmem:[#allocation82_spill] sm:$0xff] %v7596_v51  ;;  %v7602_v33 = vadd.f32 %v1035_v50, %v900_v44  ;;  %v7604_v28 = vadd.f32 %v1108_v59, %v908_v43  ;;  %v1075_v62 = vadd.f32 %v1074_v47, %v908_v43 }
 0x310   :  { %9917 = vst [vmem:[#allocation83_spill] sm:$0xff] %v7598_v38  ;;  %9918 = vst [vmem:[#allocation84_spill] sm:$0xff] %v7600_v32 }
 0x311   :  { %9919 = vst [vmem:[#allocation85_spill] sm:$0xff] %v7602_v33  ;;  %9920 = vst [vmem:[#allocation86_spill] sm:$0xff] %v7604_v28 }
 0x313   :  { %v1373_v39 = vpop.f32.mrb[24].mxu0  ;;  %v1414_v51 = vpop.f32.mrb[32].mxu1 }
 0x314   :  { %v1421_v29 = vadd.f32 %v1373_v39, %v1000_v19  ;;  %v1423_v27 = vadd.f32 %v1414_v51, %v1073_v1  ;;  %v1375_v37 = vpop.f32.mrb[25].mxu0  ;;  %v1416_v38 = vpop.f32.mrb[33].mxu1  ;;  %v7611_v51 = vld [vmem:[#allocation9] ss:$16 sps:$4 sm:$0xff]   ;;  %v7617_v19 = vld [vmem:[#allocation9 + $0x24] ss:$16 sps:$4 sm:$0xff]  }
 0x315   :  { %v1422_v36 = vadd.f32 %v1375_v37, %v1002_v40  ;;  %v1424_v32 = vadd.f32 %v1416_v38, %v1075_v62  ;;  %v1377_v26 = vpop.f32.mrb[26].mxu0  ;;  %v1418_v25 = vpop.f32.mrb[34].mxu1  ;;  %v7619_v40 = vld [vmem:[#allocation9 + $0x2c] ss:$16 sps:$4 sm:$0xff]   ;;  %v7625_v39 = vld [vmem:[#allocation9 + $0x20] ss:$16 sps:$4 sm:$0xff]  }
 0x316   :  { %v1425_v50 = vmul.f32 0.5, %v1421_v29  ;;  %v1378_v33 = vpop.f32.mrb[27].mxu0  ;;  %v1419_v59 = vpop.f32.mrb[35].mxu1  ;;  %v7627_v37 = vld [vmem:[#allocation9 + $0x28] ss:$16 sps:$4 sm:$0xff]  }
 0x317   :  { %v1429_v28 = vmul.f32 0.5, %v1422_v36  ;;  %v1434_v49 = vmul.f32 0.5, %v1424_v32  ;;  %v7613_v32 = vld [vmem:[#allocation9 + $0x8] ss:$16 sps:$4 sm:$0xff]   ;;  %v7631_v36 = vld [vmem:[#allocation9 + $0x44] ss:$16 sps:$4 sm:$0xff]  }
 0x318   :  { %6426 = vtanh.f32 %v1425_v50  ;;  %v7633_v50 = vld [vmem:[#allocation9 + $0x4c] ss:$16 sps:$4 sm:$0xff]   ;;  %v9921_v59 = vmov 0  }
 0x319   :  { %6428 = vtanh.f32 %v1429_v28 }
 0x31a   :  { %6430 = vtanh.f32 %v1423_v27 }
 0x31b   :  { %6432 = vtanh.f32 %v1434_v49  ;;  %v7639_v49 = vld [vmem:[#allocation9 + $0x40] ss:$16 sps:$4 sm:$0xff]  }
 0x322   :  { %v6427_v44 = vpop.eup %6426 }
 0x323   :  { %v6429_v43 = vpop.eup %6428  ;;  %v1427_v47 = vmul.f32 0.5, %v6427_v44  ;;  %v7641_v44 = vld [vmem:[#allocation9 + $0x48] ss:$16 sps:$4 sm:$0xff]  }
 0x324   :  { %v1431_v48 = vmul.f32 0.5, %v6429_v43  ;;  %v6431_v55 = vpop.eup %6430  ;;  %v7645_v43 = vld [vmem:[#allocation9 + $0x64] ss:$16 sps:$4 sm:$0xff]  }
 0x325   :  { %v1428_v54 = vadd.f32 0.5, %v1427_v47  ;;  %v6433_v25 = vpop.eup %6432  ;;  %v7647_v47 = vld [vmem:[#allocation9 + $0x6c] ss:$16 sps:$4 sm:$0xff]  }
 0x326   :  { %v1432_v58 = vadd.f32 0.5, %v1431_v48  ;;  %v1436_v29 = vmul.f32 0.5, %v6433_v25  ;;  %v7651_v48 = vld [vmem:[#allocation9 + $0x60] ss:$16 sps:$4 sm:$0xff]   ;;  %v7669_v25 = vld [vmem:[#allocation9 + $0xa4] ss:$16 sps:$4 sm:$0xff]  }
 0x327   :  { %v1439_v1 = vmul.f32 %v6431_v55, %v1428_v54  ;;  %v7653_v54 = vld [vmem:[#allocation9 + $0x68] ss:$16 sps:$4 sm:$0xff]   ;;  %v7657_v55 = vld [vmem:[#allocation9 + $0x84] ss:$16 sps:$4 sm:$0xff]   ;;  %9926 = vst [vmem:[#allocation91_spill] sm:$0xff] %v7669_v25 }
 0x328   :  { %v1438_v38 = vmul.f32 0.0, %v1432_v58  ;;  %v1437_v33 = vadd.f32 0.5, %v1436_v29  ;;  %9922 = vst [vmem:[#allocation87_spill] sm:$0xff] %v7657_v55  ;;  %v7659_v58 = vld [vmem:[#allocation9 + $0x8c] ss:$16 sps:$4 sm:$0xff]  }
 0x329   :  { %9923 = vst [vmem:[#allocation88_spill] sm:$0xff] %v7659_v58  ;;  %v7671_v29 = vld [vmem:[#allocation9 + $0xac] ss:$16 sps:$4 sm:$0xff]  }
 0x32a   :  { %v7608_v26 = vadd.f32 %v1439_v1, %v1438_v38  ;;  %v7663_v1 = vld [vmem:[#allocation9 + $0x80] ss:$16 sps:$4 sm:$0xff]   ;;  %v7665_v38 = vld [vmem:[#allocation9 + $0x88] ss:$16 sps:$4 sm:$0xff]   ;;  %9927 = vst [vmem:[#allocation92_spill] sm:$0xff] %v7671_v29 }
 0x32b   :  { %9924 = vst [vmem:[#allocation89_spill] sm:$0xff] %v7663_v1  ;;  %9925 = vst [vmem:[#allocation90_spill] sm:$0xff] %v7665_v38 }
 0x32c   :  { %6434 = vtanh.f32 %v7608_v26 }
 0x336   :  { %v6435_v62 = vpop.eup %6434 }
 0x337   :  { %v1442_v27 = vmul.f32 %v6435_v62, %v1437_v33  ;;  %v7675_v33 = vld [vmem:[#allocation9 + $0xa0] ss:$16 sps:$4 sm:$0xff]   ;;  %v7677_v62 = vld [vmem:[#allocation9 + $0xa8] ss:$16 sps:$4 sm:$0xff]  }
 0x338   :  { %9928 = vst [vmem:[#allocation93_spill] sm:$0xff] %v7675_v33 }
 0x339   :  { %v7615_v28 = vpack.c.bf16 %v1442_v27, %v1442_v27  ;;  %v7681_v27 = vld [vmem:[#allocation9 + $0xc4] ss:$16 sps:$4 sm:$0xff]  }
 0x33b   :  { %1691 = vmatmul.mubr.bf16.vlgmr.msra.gmra.mrb[28].mxu0 %v7615_v28  ;;  %1732 = vmatmul.mubr.bf16.vlgmr.msra.gmra.mrb[36].mxu1 %v7615_v28 }
 0x33c   :  { %1933 = vmatpush1.bf16.msra.mxu0 %v7611_v51  ;;  %1974 = vmatpush1.bf16.msra.mxu1 %v7613_v32 }
 0x33d   :  { %1934 = vmatprep.subr.bf16.mxu0 %v7617_v19  ;;  %1975 = vmatprep.subr.bf16.mxu1 %v7619_v40 }
 0x33e   :  { %1964 = vmatprep.mubr.bf16.mxu0 %v9921_v59  ;;  %2005 = vmatprep.mubr.bf16.mxu1 %v9921_v59 }
 0x340   :  { %1935 = vmatpush1.bf16.msra.mxu0 %v7625_v39  ;;  %1976 = vmatpush1.bf16.msra.mxu1 %v7627_v37 }
 0x341   :  { %1936 = vmatprep.subr.bf16.mxu0 %v7631_v36  ;;  %1977 = vmatprep.subr.bf16.mxu1 %v7633_v50 }
 0x344   :  { %1937 = vmatpush1.bf16.msra.mxu0 %v7639_v49  ;;  %1978 = vmatpush1.bf16.msra.mxu1 %v7641_v44 }
 0x345   :  { %1938 = vmatprep.subr.bf16.mxu0 %v7645_v43  ;;  %1979 = vmatprep.subr.bf16.mxu1 %v7647_v47 }
 0x348   :  { %1939 = vmatpush1.bf16.msra.mxu0 %v7651_v48  ;;  %1980 = vmatpush1.bf16.msra.mxu1 %v7653_v54 }
 0x349   :  { %1940 = vmatprep.subr.bf16.mxu0 %v7657_v55  ;;  %1981 = vmatprep.subr.bf16.mxu1 %v7659_v58  ;;  %v7683_v55 = vld [vmem:[#allocation9 + $0xcc] ss:$16 sps:$4 sm:$0xff]   ;;  %v7687_v58 = vld [vmem:[#allocation9 + $0xc0] ss:$16 sps:$4 sm:$0xff]  }
 0x34c   :  { %1941 = vmatpush1.bf16.msra.mxu0 %v7663_v1  ;;  %1982 = vmatpush1.bf16.msra.mxu1 %v7665_v38  ;;  %v7689_v1 = vld [vmem:[#allocation9 + $0xc8] ss:$16 sps:$4 sm:$0xff]   ;;  %v7693_v38 = vld [vmem:[#allocation9 + $0xe4] ss:$16 sps:$4 sm:$0xff]  }
 0x34d   :  { %1942 = vmatprep.subr.bf16.mxu0 %v7669_v25  ;;  %1983 = vmatprep.subr.bf16.mxu1 %v7671_v29  ;;  %v7695_v25 = vld [vmem:[#allocation9 + $0xec] ss:$16 sps:$4 sm:$0xff]   ;;  %v7699_v29 = vld [vmem:[#allocation9 + $0xe0] ss:$16 sps:$4 sm:$0xff]  }
 0x350   :  { %1943 = vmatpush1.bf16.msra.mxu0 %v7675_v33  ;;  %1984 = vmatpush1.bf16.msra.mxu1 %v7677_v62  ;;  %v7701_v33 = vld [vmem:[#allocation9 + $0xe8] ss:$16 sps:$4 sm:$0xff]  }
 0x351   :  { %1944 = vmatprep.subr.bf16.mxu0 %v7681_v27  ;;  %1985 = vmatprep.subr.bf16.mxu1 %v7683_v55 }
 0x354   :  { %1945 = vmatpush1.bf16.msra.mxu0 %v7687_v58  ;;  %1986 = vmatpush1.bf16.msra.mxu1 %v7689_v1 }
 0x355   :  { %1946 = vmatprep.subr.bf16.mxu0 %v7693_v38  ;;  %1987 = vmatprep.subr.bf16.mxu1 %v7695_v25 }
 0x358   :  { %1947 = vmatpush1.bf16.msra.mxu0 %v7699_v29  ;;  %1988 = vmatpush1.bf16.msra.mxu1 %v7701_v33 }
 0x359   :  { %2043 = vmatprep.subr.bf16.mxu0 %v7305_v17  ;;  %2084 = vmatprep.subr.bf16.mxu1 %v7307_v18  ;;  %v9929_v17 = vld [vmem:[#allocation27_spill] sm:$0xff]  ;;  %v9930_v18 = vld [vmem:[#allocation28_spill] sm:$0xff] }
 0x35b   :  { %1965 = vmatmul.mubr.bf16.vlgmr.msra.gmra.mrb[28].mxu0 %v9921_v59  ;;  %2006 = vmatmul.mubr.bf16.vlgmr.msra.gmra.mrb[36].mxu1 %v9921_v59 }
 0x35c   :  { %2044 = vmatpush1.bf16.msra.mxu0 %v7318_v30  ;;  %2085 = vmatpush1.bf16.msra.mxu1 %v7320_v31  ;;  %v9931_v30 = vld [vmem:[#allocation29_spill] sm:$0xff]  ;;  %v9932_v31 = vld [vmem:[#allocation30_spill] sm:$0xff] }
 0x35d   :  { %2045 = vmatprep.subr.bf16.mxu0 %v7322_v34  ;;  %2086 = vmatprep.subr.bf16.mxu1 %v7324_v35  ;;  %v9933_v34 = vld [vmem:[#allocation31_spill] sm:$0xff]  ;;  %v9934_v35 = vld [vmem:[#allocation32_spill] sm:$0xff] }
 0x35e   :  { %2075 = vmatprep.mubr.bf16.mxu0 %v9921_v59  ;;  %2116 = vmatprep.mubr.bf16.mxu1 %v9921_v59 }
 0x360   :  { %2046 = vmatpush1.bf16.msra.mxu0 %v7330_v41  ;;  %2087 = vmatpush1.bf16.msra.mxu1 %v7332_v42  ;;  %v9935_v41 = vld [vmem:[#allocation33_spill] sm:$0xff]  ;;  %v9936_v42 = vld [vmem:[#allocation34_spill] sm:$0xff] }
 0x361   :  { %2047 = vmatprep.subr.bf16.mxu0 %v7336_v45  ;;  %2088 = vmatprep.subr.bf16.mxu1 %v7338_v46  ;;  %v9937_v45 = vld [vmem:[#allocation35_spill] sm:$0xff]  ;;  %v9938_v46 = vld [vmem:[#allocation36_spill] sm:$0xff] }
 0x364   :  { %2048 = vmatpush1.bf16.msra.mxu0 %v7344_v52  ;;  %2089 = vmatpush1.bf16.msra.mxu1 %v7346_v53 }
 0x365   :  { %2049 = vmatprep.subr.bf16.mxu0 %v7350_v56  ;;  %2090 = vmatprep.subr.bf16.mxu1 %v7352_v57 }
 0x368   :  { %2050 = vmatpush1.bf16.msra.mxu0 %v7358_v60  ;;  %2091 = vmatpush1.bf16.msra.mxu1 %v7360_v61 }
 0x369   :  { %2051 = vmatprep.subr.bf16.mxu0 %v7364_v63  ;;  %2092 = vmatprep.subr.bf16.mxu1 %v7366_v0 }
 0x36c   :  { %2052 = vmatpush1.bf16.msra.mxu0 %v7372_v2  ;;  %2093 = vmatpush1.bf16.msra.mxu1 %v7374_v3 }
 0x36d   :  { %2053 = vmatprep.subr.bf16.mxu0 %v7378_v4  ;;  %2094 = vmatprep.subr.bf16.mxu1 %v7380_v5 }
 0x370   :  { %2054 = vmatpush1.bf16.msra.mxu0 %v7386_v6  ;;  %2095 = vmatpush1.bf16.msra.mxu1 %v7388_v7 }
 0x371   :  { %2055 = vmatprep.subr.bf16.mxu0 %v7392_v8  ;;  %2096 = vmatprep.subr.bf16.mxu1 %v7394_v9 }
 0x374   :  { %2056 = vmatpush1.bf16.msra.mxu0 %v7400_v10  ;;  %2097 = vmatpush1.bf16.msra.mxu1 %v7402_v11 }
 0x375   :  { %2057 = vmatprep.subr.bf16.mxu0 %v7406_v12  ;;  %2098 = vmatprep.subr.bf16.mxu1 %v7408_v13 }
 0x378   :  { %2058 = vmatpush1.bf16.msra.mxu0 %v7414_v14  ;;  %2099 = vmatpush1.bf16.msra.mxu1 %v7416_v15 }
 0x379   :  { %2148 = vmatprep.subr.bf16.mxu0 %v7428_v16  ;;  %2189 = vmatprep.subr.bf16.mxu1 %v7430_v20 }
 0x37b   :  { %2076 = vmatmul.mubr.bf16.vlgmr.msra.gmra.mrb[32].mxu0 %v7615_v28  ;;  %2117 = vmatmul.mubr.bf16.vlgmr.msra.gmra.mrb[40].mxu1 %v7615_v28  ;;  %v9939_v28 = vld [vmem:[#allocation37_spill] sm:$0xff] }
 0x37c   :  { %2149 = vmatpush1.bf16.msra.mxu0 %v7432_v21  ;;  %2190 = vmatpush1.bf16.msra.mxu1 %v7434_v22 }
 0x37d   :  { %2150 = vmatprep.subr.bf16.mxu0 %v7440_v23  ;;  %2191 = vmatprep.subr.bf16.mxu1 %v7442_v24 }
 0x37e   :  { %2180 = vmatprep.mubr.bf16.mxu0 %v9921_v59  ;;  %2221 = vmatprep.mubr.bf16.mxu1 %v9921_v59 }
 0x380   :  { %2151 = vmatpush1.bf16.msra.mxu0 %v9929_v17  ;;  %2192 = vmatpush1.bf16.msra.mxu1 %v9930_v18  ;;  %v9940_v17 = vld [vmem:[#allocation38_spill] sm:$0xff]  ;;  %v9941_v18 = vld [vmem:[#allocation39_spill] sm:$0xff] }
 0x381   :  { %2152 = vmatprep.subr.bf16.mxu0 %v9931_v30  ;;  %2193 = vmatprep.subr.bf16.mxu1 %v9932_v31  ;;  %v9942_v30 = vld [vmem:[#allocation40_spill] sm:$0xff]  ;;  %v9943_v31 = vld [vmem:[#allocation41_spill] sm:$0xff] }
 0x384   :  { %2153 = vmatpush1.bf16.msra.mxu0 %v9933_v34  ;;  %2194 = vmatpush1.bf16.msra.mxu1 %v9934_v35  ;;  %v9944_v34 = vld [vmem:[#allocation42_spill] sm:$0xff]  ;;  %v9945_v35 = vld [vmem:[#allocation43_spill] sm:$0xff] }
 0x385   :  { %2154 = vmatprep.subr.bf16.mxu0 %v9935_v41  ;;  %2195 = vmatprep.subr.bf16.mxu1 %v9936_v42  ;;  %v9946_v41 = vld [vmem:[#allocation44_spill] sm:$0xff]  ;;  %v9947_v42 = vld [vmem:[#allocation45_spill] sm:$0xff] }
 0x388   :  { %2155 = vmatpush1.bf16.msra.mxu0 %v9937_v45  ;;  %2196 = vmatpush1.bf16.msra.mxu1 %v9938_v46  ;;  %v9948_v45 = vld [vmem:[#allocation46_spill] sm:$0xff]  ;;  %v9949_v46 = vld [vmem:[#allocation47_spill] sm:$0xff] }
 0x389   :  { %2156 = vmatprep.subr.bf16.mxu0 %v9939_v28  ;;  %2197 = vmatprep.subr.bf16.mxu1 %v9940_v17  ;;  %v9950_v28 = vld [vmem:[#allocation48_spill] sm:$0xff]  ;;  %v9951_v17 = vld [vmem:[#allocation49_spill] sm:$0xff] }
 0x38c   :  { %2157 = vmatpush1.bf16.msra.mxu0 %v9941_v18  ;;  %2198 = vmatpush1.bf16.msra.mxu1 %v9942_v30  ;;  %v9952_v18 = vld [vmem:[#allocation50_spill] sm:$0xff]  ;;  %v9953_v30 = vld [vmem:[#allocation51_spill] sm:$0xff] }
 0x38d   :  { %2158 = vmatprep.subr.bf16.mxu0 %v9943_v31  ;;  %2199 = vmatprep.subr.bf16.mxu1 %v9944_v34  ;;  %v9954_v31 = vld [vmem:[#allocation52_spill] sm:$0xff]  ;;  %v9955_v34 = vld [vmem:[#allocation53_spill] sm:$0xff] }
 0x390   :  { %2159 = vmatpush1.bf16.msra.mxu0 %v9945_v35  ;;  %2200 = vmatpush1.bf16.msra.mxu1 %v9946_v41  ;;  %v9956_v35 = vld [vmem:[#allocation54_spill] sm:$0xff] }
 0x391   :  { %2160 = vmatprep.subr.bf16.mxu0 %v9947_v42  ;;  %2201 = vmatprep.subr.bf16.mxu1 %v9948_v45  ;;  %v7784_v45 = vld [vmem:[%s9524_s10] sm:$0xf] }
 0x394   :  { %2161 = vmatpush1.bf16.msra.mxu0 %v9949_v46  ;;  %2202 = vmatpush1.bf16.msra.mxu1 %v9950_v28  ;;  %v9957_v46 = vld [vmem:[#allocation55_spill] sm:$0xff] }
 0x395   :  { %2162 = vmatprep.subr.bf16.mxu0 %v9951_v17  ;;  %2203 = vmatprep.subr.bf16.mxu1 %v9952_v18  ;;  %v7788_v28 = vrot.slane %v7784_v45, %v9957_v46  ;;  %v9959_v17 = vld [vmem:[#allocation57_spill] sm:$0xff] }
 0x396   :  { %v7792_v18 = vrot.slane %v7784_v45, %v9959_v17 }
 0x397   :  { %9958 = vst [vmem:[#allocation94_spill] sm:$0xff] %v7788_v28 }
 0x398   :  { %2163 = vmatpush1.bf16.msra.mxu0 %v9953_v30  ;;  %2204 = vmatpush1.bf16.msra.mxu1 %v9954_v31  ;;  %9960 = vst [vmem:[#allocation95_spill] sm:$0xff] %v7792_v18  ;;  %v9961_v31 = vld [vmem:[#allocation56_spill] sm:$0xff] }
 0x399   :  { %2231 = vmatprep.subr.bf16.mxu0 %v9955_v34  ;;  %2272 = vmatprep.subr.bf16.mxu1 %v9956_v35  ;;  %v7796_v34 = vrot.slane %v7784_v45, %v9961_v31 }
 0x39b   :  { %9962 = vst [vmem:[#allocation96_spill] sm:$0xff] %v7796_v34 }
 0x42e   :  { %v1966_v30 = vpop.f32.mrb[28].mxu0  ;;  %v2007_v42 = vpop.f32.mrb[36].mxu1 }
 0x42f   :  { %v6078_v35 = vadd.f32 %v1966_v30, %v7788_v28  ;;  %v1968_v41 = vpop.f32.mrb[29].mxu0  ;;  %v2009_v24 = vpop.f32.mrb[37].mxu1  ;;  %v6080_v17 = vadd.f32 %v2007_v42, %v7796_v34 }
 0x430   :  { %v6079_v23 = vadd.f32 %v1968_v41, %v7792_v18  ;;  %v1970_v22 = vpop.f32.mrb[30].mxu0  ;;  %v2011_v21 = vpop.f32.mrb[38].mxu1  ;;  %v9966_v18 = vld [vmem:[#allocation62_spill] sm:$0xff] }
 0x431   :  { %v2018_v46 = vmul.f32 0.5, %v6078_v35  ;;  %v1971_v20 = vpop.f32.mrb[31].mxu0  ;;  %v2012_v16 = vpop.f32.mrb[39].mxu1  ;;  %v9964_v35 = vld [vmem:[#allocation60_spill] sm:$0xff] }
 0x432   :  { %v2022_v15 = vmul.f32 0.5, %v6079_v23  ;;  %v9963_v16 = vld [vmem:[#allocation59_spill] sm:$0xff] }
 0x433   :  { %6436 = vtanh.f32 %v2018_v46 }
 0x434   :  { %6438 = vtanh.f32 %v2022_v15 }
 0x435   :  { %6440 = vtanh.f32 %v6080_v17  ;;  %v9965_v17 = vld [vmem:[#allocation61_spill] sm:$0xff] }
 0x43d   :  { %v6437_v14 = vpop.eup %6436 }
 0x43e   :  { %v6439_v31 = vpop.eup %6438  ;;  %v2020_v13 = vmul.f32 0.5, %v6437_v14 }
 0x43f   :  { %v2024_v12 = vmul.f32 0.5, %v6439_v31  ;;  %v6441_v28 = vpop.eup %6440 }
 0x440   :  { %v2021_v30 = vadd.f32 0.5, %v2020_v13 }
 0x441   :  { %v2025_v11 = vadd.f32 0.5, %v2024_v12 }
 0x442   :  { %v2032_v10 = vmul.f32 %v6441_v28, %v2021_v30 }
 0x443   :  { %v2031_v41 = vmul.f32 0.0, %v2025_v11 }
 0x445   :  { %v7801_v22 = vadd.f32 %v2032_v10, %v2031_v41 }
 0x44e   :  { %v2077_v21 = vpop.f32.mrb[32].mxu0  ;;  %v2118_v20 = vpop.f32.mrb[40].mxu1 }
 0x44f   :  { %v2125_v23 = vadd.f32 %v2077_v21, %v9963_v16  ;;  %v2127_v46 = vadd.f32 %v2118_v20, %v9964_v35  ;;  %v2079_v42 = vpop.f32.mrb[33].mxu0  ;;  %v2120_v15 = vpop.f32.mrb[41].mxu1 }
 0x450   :  { %v2126_v34 = vadd.f32 %v2079_v42, %v9965_v17  ;;  %v2128_v14 = vadd.f32 %v2120_v15, %v9966_v18  ;;  %v2081_v31 = vpop.f32.mrb[34].mxu0  ;;  %v2122_v13 = vpop.f32.mrb[42].mxu1 }
 0x451   :  { %v2129_v9 = vmul.f32 0.5, %v2125_v23  ;;  %v2082_v12 = vpop.f32.mrb[35].mxu0  ;;  %v2123_v28 = vpop.f32.mrb[43].mxu1 }
 0x452   :  { %v2133_v11 = vmul.f32 0.5, %v2126_v34  ;;  %v2138_v10 = vmul.f32 0.5, %v2128_v14  ;;  %v9967_v14 = vld [vmem:[#allocation58_spill] sm:$0xff] }
 0x453   :  { %6442 = vtanh.f32 %v2129_v9  ;;  %v7813_v31 = vrot.slane %v7784_v45, %v9967_v14  ;;  %v9969_v45 = vld [vmem:[#allocation88_spill] sm:$0xff] }
 0x454   :  { %6444 = vtanh.f32 %v2133_v11 }
 0x455   :  { %6446 = vtanh.f32 %v2127_v46  ;;  %v6081_v28 = vadd.f32 %v2009_v24, %v7813_v31  ;;  %v9968_v24 = vld [vmem:[#allocation87_spill] sm:$0xff] }
 0x456   :  { %6448 = vtanh.f32 %v2138_v10  ;;  %v9970_v10 = vld [vmem:[#allocation89_spill] sm:$0xff] }
 0x45d   :  { %v6443_v30 = vpop.eup %6442 }
 0x45e   :  { %v6445_v41 = vpop.eup %6444  ;;  %v2131_v21 = vmul.f32 0.5, %v6443_v30  ;;  %v9971_v30 = vld [vmem:[#allocation90_spill] sm:$0xff] }
 0x45f   :  { %v2135_v20 = vmul.f32 0.5, %v6445_v41  ;;  %v6447_v35 = vpop.eup %6446  ;;  %v9972_v41 = vld [vmem:[#allocation91_spill] sm:$0xff] }
 0x460   :  { %v2132_v16 = vadd.f32 0.5, %v2131_v21  ;;  %v6449_v34 = vpop.eup %6448  ;;  %v9973_v21 = vld [vmem:[#allocation92_spill] sm:$0xff] }
 0x461   :  { %v2136_v42 = vadd.f32 0.5, %v2135_v20  ;;  %v2140_v9 = vmul.f32 0.5, %v6449_v34  ;;  %v7853_v34 = vld [vmem:[#allocation4 + $0x4] ss:$16 sps:$4 sm:$0xff]  }
 0x462   :  { %v2143_v17 = vmul.f32 %v6447_v35, %v2132_v16  ;;  %v9974_v16 = vld [vmem:[#allocation93_spill] sm:$0xff] }
 0x463   :  { %v2142_v18 = vmul.f32 %v2136_v42, %v7608_v26  ;;  %v2141_v23 = vadd.f32 0.5, %v2140_v9  ;;  %v2027_v26 = vmul.f32 0.5, %v6081_v28  ;;  %v7856_v9 = vld [vmem:[#allocation4 + $0xc] ss:$16 sps:$4 sm:$0xff]  }
 0x464   :  { %v7868_v28 = vld [vmem:[#allocation4 + $0x2c] ss:$16 sps:$4 sm:$0xff]  }
 0x465   :  { %v7808_v15 = vadd.f32 %v2143_v17, %v2142_v18 }
 0x467   :  { %6450 = vtanh.f32 %v7808_v15 }
 0x468   :  { %6452 = vtanh.f32 %v2027_v26  ;;  %v7873_v26 = vld [vmem:[#allocation4 + $0x20] ss:$16 sps:$4 sm:$0xff]  }
 0x469   :  { %6454 = vtanh.f32 %v7801_v22 }
 0x471   :  { %v6451_v46 = vpop.eup %6450 }
 0x472   :  { %v2146_v13 = vmul.f32 %v6451_v46, %v2141_v23  ;;  %v6453_v11 = vpop.eup %6452  ;;  %v7859_v23 = vld [vmem:[#allocation4] ss:$16 sps:$4 sm:$0xff]   ;;  %v7862_v46 = vld [vmem:[#allocation4 + $0x8] ss:$16 sps:$4 sm:$0xff]  }
 0x473   :  { %v2029_v20 = vmul.f32 0.5, %v6453_v11  ;;  %v6455_v35 = vpop.eup %6454  ;;  %v7876_v11 = vld [vmem:[#allocation4 + $0x28] ss:$16 sps:$4 sm:$0xff]  }
 0x474   :  { %v7815_v12 = vpack.c.bf16 %v2146_v13, %v2146_v13  ;;  %v7865_v13 = vld [vmem:[#allocation4 + $0x24] ss:$16 sps:$4 sm:$0xff]  }
 0x475   :  { %v2030_v42 = vadd.f32 0.5, %v2029_v20  ;;  %v7879_v20 = vld [vmem:[#allocation4 + $0x44] ss:$16 sps:$4 sm:$0xff]  }
 0x476   :  { %2181 = vmatmul.mubr.bf16.vlgmr.msra.gmra.mrb[36].mxu0 %v7815_v12  ;;  %2222 = vmatmul.mubr.bf16.vlgmr.msra.gmra.mrb[44].mxu1 %v7815_v12  ;;  %9975 = vst [vmem:[#allocation59_spill] sm:$0xff] %v7879_v20 }
 0x477   :  { %2232 = vmatpush1.bf16.msra.mxu0 %v7611_v51  ;;  %2273 = vmatpush1.bf16.msra.mxu1 %v7613_v32  ;;  %v2035_v17 = vmul.f32 %v6455_v35, %v2030_v42  ;;  %v7882_v35 = vld [vmem:[#allocation4 + $0x4c] ss:$16 sps:$4 sm:$0xff]   ;;  %v9992_v42 = vld [vmem:[#allocation29_spill] sm:$0xff] }
 0x478   :  { %2233 = vmatprep.subr.bf16.mxu0 %v7617_v19  ;;  %2274 = vmatprep.subr.bf16.mxu1 %v7619_v40  ;;  %9976 = vst [vmem:[#allocation60_spill] sm:$0xff] %v7882_v35 }
 0x479   :  { %2263 = vmatprep.mubr.bf16.mxu0 %v9921_v59  ;;  %2304 = vmatprep.mubr.bf16.mxu1 %v9921_v59  ;;  %v2230_v18 = vpack.c.bf16 %v2035_v17, %v2035_v17  ;;  %v9993_v17 = vld [vmem:[#allocation30_spill] sm:$0xff] }
 0x47b   :  { %2234 = vmatpush1.bf16.msra.mxu0 %v7625_v39  ;;  %2275 = vmatpush1.bf16.msra.mxu1 %v7627_v37 }
 0x47c   :  { %2235 = vmatprep.subr.bf16.mxu0 %v7631_v36  ;;  %2276 = vmatprep.subr.bf16.mxu1 %v7633_v50 }
 0x47f   :  { %2236 = vmatpush1.bf16.msra.mxu0 %v7639_v49  ;;  %2277 = vmatpush1.bf16.msra.mxu1 %v7641_v44 }
 0x480   :  { %2237 = vmatprep.subr.bf16.mxu0 %v7645_v43  ;;  %2278 = vmatprep.subr.bf16.mxu1 %v7647_v47 }
 0x483   :  { %2238 = vmatpush1.bf16.msra.mxu0 %v7651_v48  ;;  %2279 = vmatpush1.bf16.msra.mxu1 %v7653_v54 }
 0x484   :  { %2239 = vmatprep.subr.bf16.mxu0 %v9968_v24  ;;  %2280 = vmatprep.subr.bf16.mxu1 %v9969_v45 }
 0x487   :  { %2240 = vmatpush1.bf16.msra.mxu0 %v9970_v10  ;;  %2281 = vmatpush1.bf16.msra.mxu1 %v9971_v30 }
 0x488   :  { %2241 = vmatprep.subr.bf16.mxu0 %v9972_v41  ;;  %2282 = vmatprep.subr.bf16.mxu1 %v9973_v21 }
 0x48b   :  { %2242 = vmatpush1.bf16.msra.mxu0 %v9974_v16  ;;  %2283 = vmatpush1.bf16.msra.mxu1 %v7677_v62 }
 0x48c   :  { %2243 = vmatprep.subr.bf16.mxu0 %v7681_v27  ;;  %2284 = vmatprep.subr.bf16.mxu1 %v7683_v55 }
 0x48f   :  { %2244 = vmatpush1.bf16.msra.mxu0 %v7687_v58  ;;  %2285 = vmatpush1.bf16.msra.mxu1 %v7689_v1 }
 0x490   :  { %2245 = vmatprep.subr.bf16.mxu0 %v7693_v38  ;;  %2286 = vmatprep.subr.bf16.mxu1 %v7695_v25 }
 0x493   :  { %2246 = vmatpush1.bf16.msra.mxu0 %v7699_v29  ;;  %2287 = vmatpush1.bf16.msra.mxu1 %v7701_v33 }
 0x494   :  { %2342 = vmatprep.subr.bf16.mxu0 %v7853_v34  ;;  %2383 = vmatprep.subr.bf16.mxu1 %v7856_v9 }
 0x496   :  { %2264 = vmatmul.mubr.bf16.vlgmr.msra.gmra.mrb[36].mxu0 %v2230_v18  ;;  %2305 = vmatmul.mubr.bf16.vlgmr.msra.gmra.mrb[44].mxu1 %v2230_v18  ;;  %v9995_v18 = vld [vmem:[#allocation32_spill] sm:$0xff] }
 0x497   :  { %2343 = vmatpush1.bf16.msra.mxu0 %v7859_v23  ;;  %2384 = vmatpush1.bf16.msra.mxu1 %v7862_v46 }
 0x498   :  { %2344 = vmatprep.subr.bf16.mxu0 %v7865_v13  ;;  %2385 = vmatprep.subr.bf16.mxu1 %v7868_v28 }
 0x499   :  { %2374 = vmatprep.mubr.bf16.mxu0 %v9921_v59  ;;  %2415 = vmatprep.mubr.bf16.mxu1 %v9921_v59 }
 0x49b   :  { %2345 = vmatpush1.bf16.msra.mxu0 %v7873_v26  ;;  %2386 = vmatpush1.bf16.msra.mxu1 %v7876_v11 }
 0x49c   :  { %2346 = vmatprep.subr.bf16.mxu0 %v7879_v20  ;;  %2387 = vmatprep.subr.bf16.mxu1 %v7882_v35 }
 0x49f   :  { %2347 = vmatpush1.bf16.msra.mxu0 %v7344_v52  ;;  %2388 = vmatpush1.bf16.msra.mxu1 %v7346_v53  ;;  %v9977_v52 = vld [vmem:[#allocation14_spill] sm:$0xff]  ;;  %v9978_v53 = vld [vmem:[#allocation15_spill] sm:$0xff] }
 0x4a0   :  { %2348 = vmatprep.subr.bf16.mxu0 %v7350_v56  ;;  %2389 = vmatprep.subr.bf16.mxu1 %v7352_v57  ;;  %v9979_v56 = vld [vmem:[#allocation16_spill] sm:$0xff]  ;;  %v9980_v57 = vld [vmem:[#allocation17_spill] sm:$0xff] }
 0x4a3   :  { %2349 = vmatpush1.bf16.msra.mxu0 %v7358_v60  ;;  %2390 = vmatpush1.bf16.msra.mxu1 %v7360_v61  ;;  %v9981_v60 = vld [vmem:[#allocation18_spill] sm:$0xff]  ;;  %v9982_v61 = vld [vmem:[#allocation19_spill] sm:$0xff] }
 0x4a4   :  { %2350 = vmatprep.subr.bf16.mxu0 %v7364_v63  ;;  %2391 = vmatprep.subr.bf16.mxu1 %v7366_v0  ;;  %v9983_v63 = vld [vmem:[#allocation20_spill] sm:$0xff]  ;;  %v9984_v0 = vld [vmem:[#allocation21_spill] sm:$0xff] }
 0x4a7   :  { %2351 = vmatpush1.bf16.msra.mxu0 %v7372_v2  ;;  %2392 = vmatpush1.bf16.msra.mxu1 %v7374_v3  ;;  %v9985_v2 = vld [vmem:[#allocation22_spill] sm:$0xff]  ;;  %v9986_v3 = vld [vmem:[#allocation23_spill] sm:$0xff] }
 0x4a8   :  { %2352 = vmatprep.subr.bf16.mxu0 %v7378_v4  ;;  %2393 = vmatprep.subr.bf16.mxu1 %v7380_v5  ;;  %v9987_v4 = vld [vmem:[#allocation24_spill] sm:$0xff]  ;;  %v9988_v5 = vld [vmem:[#allocation25_spill] sm:$0xff] }
 0x4ab   :  { %2353 = vmatpush1.bf16.msra.mxu0 %v7386_v6  ;;  %2394 = vmatpush1.bf16.msra.mxu1 %v7388_v7  ;;  %v9989_v6 = vld [vmem:[#allocation26_spill] sm:$0xff]  ;;  %v9990_v7 = vld [vmem:[#allocation27_spill] sm:$0xff] }
 0x4ac   :  { %2354 = vmatprep.subr.bf16.mxu0 %v7392_v8  ;;  %2395 = vmatprep.subr.bf16.mxu1 %v9977_v52  ;;  %v9991_v8 = vld [vmem:[#allocation28_spill] sm:$0xff]  ;;  %v9996_v52 = vld [vmem:[#allocation33_spill] sm:$0xff] }
 0x4af   :  { %2355 = vmatpush1.bf16.msra.mxu0 %v9978_v53  ;;  %2396 = vmatpush1.bf16.msra.mxu1 %v9979_v56  ;;  %v9997_v53 = vld [vmem:[#allocation34_spill] sm:$0xff]  ;;  %v9998_v56 = vld [vmem:[#allocation35_spill] sm:$0xff] }
 0x4b0   :  { %2356 = vmatprep.subr.bf16.mxu0 %v9980_v57  ;;  %2397 = vmatprep.subr.bf16.mxu1 %v9981_v60  ;;  %v9999_v57 = vld [vmem:[#allocation36_spill] sm:$0xff]  ;;  %v10000_v60 = vld [vmem:[#allocation37_spill] sm:$0xff] }
 0x4b3   :  { %2357 = vmatpush1.bf16.msra.mxu0 %v9982_v61  ;;  %2398 = vmatpush1.bf16.msra.mxu1 %v9983_v63  ;;  %v10001_v61 = vld [vmem:[#allocation38_spill] sm:$0xff]  ;;  %v10002_v63 = vld [vmem:[#allocation39_spill] sm:$0xff] }
 0x4b4   :  { %2447 = vmatprep.subr.bf16.mxu0 %v9984_v0  ;;  %2488 = vmatprep.subr.bf16.mxu1 %v9985_v2  ;;  %v10003_v0 = vld [vmem:[#allocation40_spill] sm:$0xff]  ;;  %v10004_v2 = vld [vmem:[#allocation41_spill] sm:$0xff] }
 0x4b6   :  { %2375 = vmatmul.mubr.bf16.vlgmr.msra.gmra.mrb[40].mxu0 %v7815_v12  ;;  %2416 = vmatmul.mubr.bf16.vlgmr.msra.gmra.mrb[48].mxu1 %v7815_v12  ;;  %v9994_v12 = vld [vmem:[#allocation31_spill] sm:$0xff] }
 0x4b7   :  { %2448 = vmatpush1.bf16.msra.mxu0 %v9986_v3  ;;  %2489 = vmatpush1.bf16.msra.mxu1 %v9987_v4  ;;  %v10005_v3 = vld [vmem:[#allocation42_spill] sm:$0xff]  ;;  %v10006_v4 = vld [vmem:[#allocation43_spill] sm:$0xff] }
 0x4b8   :  { %2449 = vmatprep.subr.bf16.mxu0 %v9988_v5  ;;  %2490 = vmatprep.subr.bf16.mxu1 %v9989_v6  ;;  %v10007_v5 = vld [vmem:[#allocation44_spill] sm:$0xff]  ;;  %v10008_v6 = vld [vmem:[#allocation45_spill] sm:$0xff] }
 0x4b9   :  { %2479 = vmatprep.mubr.bf16.mxu0 %v9921_v59  ;;  %2520 = vmatprep.mubr.bf16.mxu1 %v9921_v59 }
 0x4bb   :  { %2450 = vmatpush1.bf16.msra.mxu0 %v9990_v7  ;;  %2491 = vmatpush1.bf16.msra.mxu1 %v9991_v8  ;;  %v10009_v7 = vld [vmem:[#allocation46_spill] sm:$0xff]  ;;  %v10010_v8 = vld [vmem:[#allocation47_spill] sm:$0xff] }
 0x4bc   :  { %2451 = vmatprep.subr.bf16.mxu0 %v9992_v42  ;;  %2492 = vmatprep.subr.bf16.mxu1 %v9993_v17  ;;  %v10011_v42 = vld [vmem:[#allocation48_spill] sm:$0xff]  ;;  %v10012_v17 = vld [vmem:[#allocation49_spill] sm:$0xff] }
 0x4bf   :  { %2452 = vmatpush1.bf16.msra.mxu0 %v9994_v12  ;;  %2493 = vmatpush1.bf16.msra.mxu1 %v9995_v18  ;;  %v10013_v12 = vld [vmem:[#allocation50_spill] sm:$0xff]  ;;  %v10014_v18 = vld [vmem:[#allocation51_spill] sm:$0xff] }
 0x4c0   :  { %2453 = vmatprep.subr.bf16.mxu0 %v9996_v52  ;;  %2494 = vmatprep.subr.bf16.mxu1 %v9997_v53  ;;  %v10015_v52 = vld [vmem:[#allocation52_spill] sm:$0xff]  ;;  %v10016_v53 = vld [vmem:[#allocation53_spill] sm:$0xff] }
 0x4c3   :  { %2454 = vmatpush1.bf16.msra.mxu0 %v9998_v56  ;;  %2495 = vmatpush1.bf16.msra.mxu1 %v9999_v57  ;;  %v10017_v56 = vld [vmem:[#allocation54_spill] sm:$0xff] }
 0x4c4   :  { %2455 = vmatprep.subr.bf16.mxu0 %v10000_v60  ;;  %2496 = vmatprep.subr.bf16.mxu1 %v10001_v61  ;;  %v10018_v61 = vld [vmem:[#allocation94_spill] sm:$0xff] }
 0x4c7   :  { %2456 = vmatpush1.bf16.msra.mxu0 %v10002_v63  ;;  %2497 = vmatpush1.bf16.msra.mxu1 %v10003_v0 }
 0x4c8   :  { %2457 = vmatprep.subr.bf16.mxu0 %v10004_v2  ;;  %2498 = vmatprep.subr.bf16.mxu1 %v10005_v3  ;;  %v10019_v3 = vld [vmem:[#allocation95_spill] sm:$0xff] }
 0x4cb   :  { %2458 = vmatpush1.bf16.msra.mxu0 %v10006_v4  ;;  %2499 = vmatpush1.bf16.msra.mxu1 %v10007_v5 }
 0x4cc   :  { %2459 = vmatprep.subr.bf16.mxu0 %v10008_v6  ;;  %2500 = vmatprep.subr.bf16.mxu1 %v10009_v7 }
 0x4cf   :  { %2460 = vmatpush1.bf16.msra.mxu0 %v10010_v8  ;;  %2501 = vmatpush1.bf16.msra.mxu1 %v10011_v42 }
 0x4d0   :  { %2461 = vmatprep.subr.bf16.mxu0 %v10012_v17  ;;  %2502 = vmatprep.subr.bf16.mxu1 %v10013_v12  ;;  %v10020_v12 = vld [vmem:[#allocation96_spill] sm:$0xff] }
 0x4d3   :  { %2462 = vmatpush1.bf16.msra.mxu0 %v10014_v18  ;;  %2503 = vmatpush1.bf16.msra.mxu1 %v10015_v52 }
 0x4d4   :  { %2530 = vmatprep.subr.bf16.mxu0 %v10016_v53  ;;  %2571 = vmatprep.subr.bf16.mxu1 %v10017_v56 }
 0x569   :  { %v2265_v57 = vpop.f32.mrb[36].mxu0  ;;  %v2306_v60 = vpop.f32.mrb[44].mxu1 }
 0x56a   :  { %v6082_v63 = vadd.f32 %v2265_v57, %v10018_v61  ;;  %v2267_v0 = vpop.f32.mrb[37].mxu0  ;;  %v2308_v2 = vpop.f32.mrb[45].mxu1  ;;  %v6084_v18 = vadd.f32 %v2306_v60, %v10020_v12 }
 0x56b   :  { %v6083_v4 = vadd.f32 %v2267_v0, %v10019_v3  ;;  %v2269_v5 = vpop.f32.mrb[38].mxu0  ;;  %v2310_v6 = vpop.f32.mrb[46].mxu1 }
 0x56c   :  { %v2317_v7 = vmul.f32 0.5, %v6082_v63  ;;  %v2270_v8 = vpop.f32.mrb[39].mxu0  ;;  %v2311_v42 = vpop.f32.mrb[47].mxu1 }
 0x56d   :  { %v2321_v17 = vmul.f32 0.5, %v6083_v4  ;;  %v10021_v4 = vld [vmem:[#allocation63_spill] sm:$0xff]  ;;  %v10022_v8 = vld [vmem:[#allocation64_spill] sm:$0xff] }
 0x56e   :  { %6456 = vtanh.f32 %v2317_v7 }
 0x56f   :  { %6458 = vtanh.f32 %v2321_v17 }
 0x570   :  { %6460 = vtanh.f32 %v6084_v18  ;;  %v10023_v18 = vld [vmem:[#allocation65_spill] sm:$0xff] }
 0x578   :  { %v6457_v52 = vpop.eup %6456 }
 0x579   :  { %v6459_v53 = vpop.eup %6458  ;;  %v2319_v56 = vmul.f32 0.5, %v6457_v52  ;;  %v10024_v52 = vld [vmem:[#allocation66_spill] sm:$0xff] }
 0x57a   :  { %v2323_v14 = vmul.f32 0.5, %v6459_v53  ;;  %v6461_v61 = vpop.eup %6460 }
 0x57b   :  { %v2320_v57 = vadd.f32 0.5, %v2319_v56 }
 0x57c   :  { %v2324_v35 = vadd.f32 0.5, %v2323_v14 }
 0x57d   :  { %v2331_v20 = vmul.f32 %v6461_v61, %v2320_v57 }
 0x57e   :  { %v2330_v0 = vmul.f32 %v2324_v35, %v7801_v22 }
 0x580   :  { %v7949_v5 = vadd.f32 %v2331_v20, %v2330_v0 }
 0x589   :  { %v2376_v63 = vpop.f32.mrb[40].mxu0  ;;  %v2417_v6 = vpop.f32.mrb[48].mxu1 }
 0x58a   :  { %v2424_v7 = vadd.f32 %v2376_v63, %v10021_v4  ;;  %v2426_v60 = vadd.f32 %v2417_v6, %v10022_v8  ;;  %v2378_v42 = vpop.f32.mrb[41].mxu0  ;;  %v2419_v17 = vpop.f32.mrb[49].mxu1 }
 0x58b   :  { %v2425_v12 = vadd.f32 %v2378_v42, %v10023_v18  ;;  %v2427_v53 = vadd.f32 %v2419_v17, %v10024_v52  ;;  %v2380_v56 = vpop.f32.mrb[42].mxu0  ;;  %v2421_v3 = vpop.f32.mrb[50].mxu1 }
 0x58c   :  { %v2428_v14 = vmul.f32 0.5, %v2424_v7  ;;  %v2381_v61 = vpop.f32.mrb[43].mxu0  ;;  %v2422_v57 = vpop.f32.mrb[51].mxu1 }
 0x58d   :  { %v2432_v22 = vmul.f32 0.5, %v2425_v12  ;;  %v2437_v20 = vmul.f32 0.5, %v2427_v53  ;;  %v8078_v61 = vld [vmem:[#allocation7 + $0xc] ss:$16 sps:$4 sm:$0xff]   ;;  %v8083_v57 = vld [vmem:[#allocation7] ss:$16 sps:$4 sm:$0xff]  }
 0x58e   :  { %6462 = vtanh.f32 %v2428_v14  ;;  %v6085_v14 = vadd.f32 %v2308_v2, %v7813_v31  ;;  %v8075_v2 = vld [vmem:[#allocation7 + $0x4] ss:$16 sps:$4 sm:$0xff]   ;;  %10029 = vst [vmem:[#allocation87_spill] sm:$0xff] %v8078_v61  ;;  %10030 = vst [vmem:[#allocation88_spill] sm:$0xff] %v8083_v57 }
 0x58f   :  { %6464 = vtanh.f32 %v2432_v22  ;;  %10028 = vst [vmem:[#allocation62_spill] sm:$0xff] %v8075_v2  ;;  %v8086_v22 = vld [vmem:[#allocation7 + $0x8] ss:$16 sps:$4 sm:$0xff]  }
 0x590   :  { %6466 = vtanh.f32 %v2426_v60  ;;  %10031 = vst [vmem:[#allocation89_spill] sm:$0xff] %v8086_v22 }
 0x591   :  { %6468 = vtanh.f32 %v2437_v20  ;;  %v8089_v20 = vld [vmem:[#allocation7 + $0x24] ss:$16 sps:$4 sm:$0xff]  }
 0x592   :  { %10032 = vst [vmem:[#allocation90_spill] sm:$0xff] %v8089_v20 }
 0x598   :  { %v6463_v35 = vpop.eup %6462 }
 0x599   :  { %v6465_v0 = vpop.eup %6464  ;;  %v2430_v63 = vmul.f32 0.5, %v6463_v35  ;;  %v8092_v35 = vld [vmem:[#allocation7 + $0x2c] ss:$16 sps:$4 sm:$0xff]  }
 0x59a   :  { %v2434_v6 = vmul.f32 0.5, %v6465_v0  ;;  %v6467_v8 = vpop.eup %6466  ;;  %10033 = vst [vmem:[#allocation91_spill] sm:$0xff] %v8092_v35  ;;  %v8097_v0 = vld [vmem:[#allocation7 + $0x20] ss:$16 sps:$4 sm:$0xff]  }
 0x59b   :  { %v2431_v4 = vadd.f32 0.5, %v2430_v63  ;;  %v6469_v12 = vpop.eup %6468  ;;  %10034 = vst [vmem:[#allocation92_spill] sm:$0xff] %v8097_v0  ;;  %v8100_v63 = vld [vmem:[#allocation7 + $0x28] ss:$16 sps:$4 sm:$0xff]  }
 0x59c   :  { %v2435_v42 = vadd.f32 0.5, %v2434_v6  ;;  %v2439_v7 = vmul.f32 0.5, %v6469_v12  ;;  %10035 = vst [vmem:[#allocation93_spill] sm:$0xff] %v8100_v63  ;;  %v8103_v6 = vld [vmem:[#allocation7 + $0x44] ss:$16 sps:$4 sm:$0xff]  }
 0x59d   :  { %v2442_v18 = vmul.f32 %v6467_v8, %v2431_v4  ;;  %10036 = vst [vmem:[#allocation14_spill] sm:$0xff] %v8103_v6  ;;  %v8106_v4 = vld [vmem:[#allocation7 + $0x4c] ss:$16 sps:$4 sm:$0xff]   ;;  %v8109_v8 = vld [vmem:[#allocation7 + $0x40] ss:$16 sps:$4 sm:$0xff]  }
 0x59e   :  { %v2441_v17 = vmul.f32 %v2435_v42, %v7808_v15  ;;  %v2440_v52 = vadd.f32 0.5, %v2439_v7  ;;  %v2326_v15 = vmul.f32 0.5, %v6085_v14  ;;  %10037 = vst [vmem:[#allocation15_spill] sm:$0xff] %v8106_v4  ;;  %10038 = vst [vmem:[#allocation16_spill] sm:$0xff] %v8109_v8  ;;  %v8112_v42 = vld [vmem:[#allocation7 + $0x48] ss:$16 sps:$4 sm:$0xff]  }
 0x59f   :  { %10039 = vst [vmem:[#allocation17_spill] sm:$0xff] %v8112_v42  ;;  %v8121_v12 = vld [vmem:[#allocation7 + $0x60] ss:$16 sps:$4 sm:$0xff]   ;;  %v8124_v7 = vld [vmem:[#allocation7 + $0x68] ss:$16 sps:$4 sm:$0xff]  }
 0x5a0   :  { %v7956_v3 = vadd.f32 %v2442_v18, %v2441_v17  ;;  %v8115_v18 = vld [vmem:[#allocation7 + $0x64] ss:$16 sps:$4 sm:$0xff]   ;;  %v8118_v17 = vld [vmem:[#allocation7 + $0x6c] ss:$16 sps:$4 sm:$0xff]   ;;  %10042 = vst [vmem:[#allocation20_spill] sm:$0xff] %v8121_v12  ;;  %10043 = vst [vmem:[#allocation21_spill] sm:$0xff] %v8124_v7 }
 0x5a1   :  { %10040 = vst [vmem:[#allocation18_spill] sm:$0xff] %v8115_v18  ;;  %10041 = vst [vmem:[#allocation19_spill] sm:$0xff] %v8118_v17  ;;  %v8139_v14 = vld [vmem:[#allocation7 + $0xa4] ss:$16 sps:$4 sm:$0xff]  }
 0x5a2   :  { %6470 = vtanh.f32 %v7956_v3  ;;  %10048 = vst [vmem:[#allocation26_spill] sm:$0xff] %v8139_v14 }
 0x5a3   :  { %6472 = vtanh.f32 %v2326_v15  ;;  %v8142_v15 = vld [vmem:[#allocation7 + $0xac] ss:$16 sps:$4 sm:$0xff]  }
 0x5a4   :  { %6474 = vtanh.f32 %v7949_v5  ;;  %10049 = vst [vmem:[#allocation27_spill] sm:$0xff] %v8142_v15 }
 0x5ac   :  { %v6471_v60 = vpop.eup %6470 }
 0x5ad   :  { %v2445_v53 = vmul.f32 %v6471_v60, %v2440_v52  ;;  %v8127_v52 = vld [vmem:[#allocation7 + $0x84] ss:$16 sps:$4 sm:$0xff]   ;;  %v8130_v60 = vld [vmem:[#allocation7 + $0x8c] ss:$16 sps:$4 sm:$0xff]  }
 0x5ae   :  { %10044 = vst [vmem:[#allocation22_spill] sm:$0xff] %v8127_v52  ;;  %10045 = vst [vmem:[#allocation23_spill] sm:$0xff] %v8130_v60 }
 0x5af   :  { %v7959_v56 = vpack.c.bf16 %v2445_v53, %v2445_v53  ;;  %v8133_v53 = vld [vmem:[#allocation7 + $0x80] ss:$16 sps:$4 sm:$0xff]  }
 0x5b0   :  { %10046 = vst [vmem:[#allocation24_spill] sm:$0xff] %v8133_v53 }
 0x5b1   :  { %2480 = vmatmul.mubr.bf16.vlgmr.msra.gmra.mrb[44].mxu0 %v7959_v56  ;;  %2521 = vmatmul.mubr.bf16.vlgmr.msra.gmra.mrb[52].mxu1 %v7959_v56 }
 0x5b2   :  { %2531 = vmatpush1.bf16.msra.mxu0 %v7611_v51  ;;  %2572 = vmatpush1.bf16.msra.mxu1 %v7613_v32  ;;  %v6473_v51 = vpop.eup %6472 }
 0x5b3   :  { %2532 = vmatprep.subr.bf16.mxu0 %v7617_v19  ;;  %2573 = vmatprep.subr.bf16.mxu1 %v7619_v40  ;;  %v2328_v32 = vmul.f32 0.5, %v6473_v51  ;;  %v6475_v19 = vpop.eup %6474  ;;  %v8145_v51 = vld [vmem:[#allocation7 + $0xa0] ss:$16 sps:$4 sm:$0xff]  }
 0x5b4   :  { %2562 = vmatprep.mubr.bf16.mxu0 %v9921_v59  ;;  %2603 = vmatprep.mubr.bf16.mxu1 %v9921_v59  ;;  %10050 = vst [vmem:[#allocation28_spill] sm:$0xff] %v8145_v51 }
 0x5b5   :  { %v2329_v40 = vadd.f32 0.5, %v2328_v32  ;;  %v8148_v32 = vld [vmem:[#allocation7 + $0xa8] ss:$16 sps:$4 sm:$0xff]  }
 0x5b6   :  { %2533 = vmatpush1.bf16.msra.mxu0 %v7625_v39  ;;  %2574 = vmatpush1.bf16.msra.mxu1 %v7627_v37  ;;  %10051 = vst [vmem:[#allocation29_spill] sm:$0xff] %v8148_v32 }
 0x5b7   :  { %2534 = vmatprep.subr.bf16.mxu0 %v7631_v36  ;;  %2575 = vmatprep.subr.bf16.mxu1 %v7633_v50  ;;  %v2334_v39 = vmul.f32 %v6475_v19, %v2329_v40  ;;  %v10025_v36 = vld [vmem:[#allocation59_spill] sm:$0xff]  ;;  %v10026_v50 = vld [vmem:[#allocation60_spill] sm:$0xff] }
 0x5b8   :  { %v8151_v19 = vld [vmem:[#allocation7 + $0xc4] ss:$16 sps:$4 sm:$0xff]   ;;  %v8154_v40 = vld [vmem:[#allocation7 + $0xcc] ss:$16 sps:$4 sm:$0xff]  }
 0x5b9   :  { %v2529_v37 = vpack.c.bf16 %v2334_v39, %v2334_v39  ;;  %10052 = vst [vmem:[#allocation30_spill] sm:$0xff] %v8151_v19  ;;  %10053 = vst [vmem:[#allocation31_spill] sm:$0xff] %v8154_v40  ;;  %v8157_v39 = vld [vmem:[#allocation7 + $0xc0] ss:$16 sps:$4 sm:$0xff]  }
 0x5ba   :  { %2535 = vmatpush1.bf16.msra.mxu0 %v7639_v49  ;;  %2576 = vmatpush1.bf16.msra.mxu1 %v7641_v44  ;;  %v8009_v49 = vld [vmem:[#allocation4 + $0x40] ss:$16 sps:$4 sm:$0xff]   ;;  %v8012_v44 = vld [vmem:[#allocation4 + $0x48] ss:$16 sps:$4 sm:$0xff]   ;;  %10054 = vst [vmem:[#allocation32_spill] sm:$0xff] %v8157_v39 }
 0x5bb   :  { %2536 = vmatprep.subr.bf16.mxu0 %v7645_v43  ;;  %2577 = vmatprep.subr.bf16.mxu1 %v7647_v47  ;;  %v8015_v43 = vld [vmem:[#allocation4 + $0x64] ss:$16 sps:$4 sm:$0xff]   ;;  %v8018_v47 = vld [vmem:[#allocation4 + $0x6c] ss:$16 sps:$4 sm:$0xff]  }
 0x5be   :  { %2537 = vmatpush1.bf16.msra.mxu0 %v7651_v48  ;;  %2578 = vmatpush1.bf16.msra.mxu1 %v7653_v54  ;;  %v8021_v48 = vld [vmem:[#allocation4 + $0x60] ss:$16 sps:$4 sm:$0xff]   ;;  %v8024_v54 = vld [vmem:[#allocation4 + $0x68] ss:$16 sps:$4 sm:$0xff]  }
 0x5bf   :  { %2538 = vmatprep.subr.bf16.mxu0 %v9968_v24  ;;  %2579 = vmatprep.subr.bf16.mxu1 %v9969_v45  ;;  %v8054_v24 = vld [vmem:[#allocation4 + $0xcc] ss:$16 sps:$4 sm:$0xff]   ;;  %v8057_v45 = vld [vmem:[#allocation4 + $0xc0] ss:$16 sps:$4 sm:$0xff]  }
 0x5c2   :  { %2539 = vmatpush1.bf16.msra.mxu0 %v9970_v10  ;;  %2580 = vmatpush1.bf16.msra.mxu1 %v9971_v30  ;;  %v8060_v10 = vld [vmem:[#allocation4 + $0xc8] ss:$16 sps:$4 sm:$0xff]   ;;  %v8063_v30 = vld [vmem:[#allocation4 + $0xe4] ss:$16 sps:$4 sm:$0xff]  }
 0x5c3   :  { %2540 = vmatprep.subr.bf16.mxu0 %v9972_v41  ;;  %2581 = vmatprep.subr.bf16.mxu1 %v9973_v21  ;;  %v8066_v41 = vld [vmem:[#allocation4 + $0xec] ss:$16 sps:$4 sm:$0xff]   ;;  %v8069_v21 = vld [vmem:[#allocation4 + $0xe0] ss:$16 sps:$4 sm:$0xff]  }
 0x5c6   :  { %2541 = vmatpush1.bf16.msra.mxu0 %v9974_v16  ;;  %2582 = vmatpush1.bf16.msra.mxu1 %v7677_v62  ;;  %v8048_v62 = vld [vmem:[#allocation4 + $0xa8] ss:$16 sps:$4 sm:$0xff]  }
 0x5c7   :  { %2542 = vmatprep.subr.bf16.mxu0 %v7681_v27  ;;  %2583 = vmatprep.subr.bf16.mxu1 %v7683_v55  ;;  %v8027_v55 = vld [vmem:[#allocation4 + $0x84] ss:$16 sps:$4 sm:$0xff]   ;;  %v8072_v16 = vld [vmem:[#allocation4 + $0xe8] ss:$16 sps:$4 sm:$0xff]  }
 0x5c8   :  { %v8051_v27 = vld [vmem:[#allocation4 + $0xc4] ss:$16 sps:$4 sm:$0xff]   ;;  %10027 = vst [vmem:[#allocation61_spill] sm:$0xff] %v8072_v16 }
 0x5ca   :  { %2543 = vmatpush1.bf16.msra.mxu0 %v7687_v58  ;;  %2584 = vmatpush1.bf16.msra.mxu1 %v7689_v1  ;;  %v8030_v58 = vld [vmem:[#allocation4 + $0x8c] ss:$16 sps:$4 sm:$0xff]   ;;  %v8033_v1 = vld [vmem:[#allocation4 + $0x80] ss:$16 sps:$4 sm:$0xff]  }
 0x5cb   :  { %2544 = vmatprep.subr.bf16.mxu0 %v7693_v38  ;;  %2585 = vmatprep.subr.bf16.mxu1 %v7695_v25  ;;  %v8036_v38 = vld [vmem:[#allocation4 + $0x88] ss:$16 sps:$4 sm:$0xff]   ;;  %v8039_v25 = vld [vmem:[#allocation4 + $0xa4] ss:$16 sps:$4 sm:$0xff]  }
 0x5ce   :  { %2545 = vmatpush1.bf16.msra.mxu0 %v7699_v29  ;;  %2586 = vmatpush1.bf16.msra.mxu1 %v7701_v33  ;;  %v8042_v29 = vld [vmem:[#allocation4 + $0xac] ss:$16 sps:$4 sm:$0xff]   ;;  %v8045_v33 = vld [vmem:[#allocation4 + $0xa0] ss:$16 sps:$4 sm:$0xff]  }
 0x5cf   :  { %2641 = vmatprep.subr.bf16.mxu0 %v7853_v34  ;;  %2682 = vmatprep.subr.bf16.mxu1 %v7856_v9 }
 0x5d1   :  { %2563 = vmatmul.mubr.bf16.vlgmr.msra.gmra.mrb[44].mxu0 %v2529_v37  ;;  %2604 = vmatmul.mubr.bf16.vlgmr.msra.gmra.mrb[52].mxu1 %v2529_v37  ;;  %v8160_v37 = vld [vmem:[#allocation7 + $0xc8] ss:$16 sps:$4 sm:$0xff]  }
 0x5d2   :  { %2642 = vmatpush1.bf16.msra.mxu0 %v7859_v23  ;;  %2683 = vmatpush1.bf16.msra.mxu1 %v7862_v46  ;;  %10055 = vst [vmem:[#allocation33_spill] sm:$0xff] %v8160_v37 }
 0x5d3   :  { %2643 = vmatprep.subr.bf16.mxu0 %v7865_v13  ;;  %2684 = vmatprep.subr.bf16.mxu1 %v7868_v28 }
 0x5d4   :  { %2673 = vmatprep.mubr.bf16.mxu0 %v9921_v59  ;;  %2714 = vmatprep.mubr.bf16.mxu1 %v9921_v59 }
 0x5d6   :  { %2644 = vmatpush1.bf16.msra.mxu0 %v7873_v26  ;;  %2685 = vmatpush1.bf16.msra.mxu1 %v7876_v11 }
 0x5d7   :  { %2645 = vmatprep.subr.bf16.mxu0 %v10025_v36  ;;  %2686 = vmatprep.subr.bf16.mxu1 %v10026_v50 }
 0x5da   :  { %2646 = vmatpush1.bf16.msra.mxu0 %v8009_v49  ;;  %2687 = vmatpush1.bf16.msra.mxu1 %v8012_v44 }
 0x5db   :  { %2647 = vmatprep.subr.bf16.mxu0 %v8015_v43  ;;  %2688 = vmatprep.subr.bf16.mxu1 %v8018_v47 }
 0x5de   :  { %2648 = vmatpush1.bf16.msra.mxu0 %v8021_v48  ;;  %2689 = vmatpush1.bf16.msra.mxu1 %v8024_v54 }
 0x5df   :  { %2649 = vmatprep.subr.bf16.mxu0 %v8027_v55  ;;  %2690 = vmatprep.subr.bf16.mxu1 %v8030_v58 }
 0x5e2   :  { %2650 = vmatpush1.bf16.msra.mxu0 %v8033_v1  ;;  %2691 = vmatpush1.bf16.msra.mxu1 %v8036_v38 }
 0x5e3   :  { %2651 = vmatprep.subr.bf16.mxu0 %v8039_v25  ;;  %2692 = vmatprep.subr.bf16.mxu1 %v8042_v29 }
 0x5e6   :  { %2652 = vmatpush1.bf16.msra.mxu0 %v8045_v33  ;;  %2693 = vmatpush1.bf16.msra.mxu1 %v8048_v62 }
 0x5e7   :  { %2653 = vmatprep.subr.bf16.mxu0 %v8051_v27  ;;  %2694 = vmatprep.subr.bf16.mxu1 %v8054_v24 }
 0x5ea   :  { %2654 = vmatpush1.bf16.msra.mxu0 %v8057_v45  ;;  %2695 = vmatpush1.bf16.msra.mxu1 %v8060_v10 }
 0x5eb   :  { %2655 = vmatprep.subr.bf16.mxu0 %v8063_v30  ;;  %2696 = vmatprep.subr.bf16.mxu1 %v8066_v41 }
 0x5ee   :  { %2656 = vmatpush1.bf16.msra.mxu0 %v8069_v21  ;;  %2697 = vmatpush1.bf16.msra.mxu1 %v8072_v16 }
 0x5ef   :  { %2746 = vmatprep.subr.bf16.mxu0 %v8075_v2  ;;  %2787 = vmatprep.subr.bf16.mxu1 %v8078_v61 }
 0x5f1   :  { %2674 = vmatmul.mubr.bf16.vlgmr.msra.gmra.mrb[48].mxu0 %v7959_v56  ;;  %2715 = vmatmul.mubr.bf16.vlgmr.msra.gmra.mrb[56].mxu1 %v7959_v56  ;;  %v8136_v56 = vld [vmem:[#allocation7 + $0x88] ss:$16 sps:$4 sm:$0xff]  }
 0x5f2   :  { %2747 = vmatpush1.bf16.msra.mxu0 %v8083_v57  ;;  %2788 = vmatpush1.bf16.msra.mxu1 %v8086_v22  ;;  %10047 = vst [vmem:[#allocation25_spill] sm:$0xff] %v8136_v56 }
 0x5f3   :  { %2748 = vmatprep.subr.bf16.mxu0 %v8089_v20  ;;  %2789 = vmatprep.subr.bf16.mxu1 %v8092_v35 }
 0x5f4   :  { %2778 = vmatprep.mubr.bf16.mxu0 %v9921_v59  ;;  %2819 = vmatprep.mubr.bf16.mxu1 %v9921_v59 }
 0x5f6   :  { %2749 = vmatpush1.bf16.msra.mxu0 %v8097_v0  ;;  %2790 = vmatpush1.bf16.msra.mxu1 %v8100_v63 }
 0x5f7   :  { %2750 = vmatprep.subr.bf16.mxu0 %v8103_v6  ;;  %2791 = vmatprep.subr.bf16.mxu1 %v8106_v4 }
 0x5fa   :  { %2751 = vmatpush1.bf16.msra.mxu0 %v8109_v8  ;;  %2792 = vmatpush1.bf16.msra.mxu1 %v8112_v42 }
 0x5fb   :  { %2752 = vmatprep.subr.bf16.mxu0 %v8115_v18  ;;  %2793 = vmatprep.subr.bf16.mxu1 %v8118_v17 }
 0x5fe   :  { %2753 = vmatpush1.bf16.msra.mxu0 %v8121_v12  ;;  %2794 = vmatpush1.bf16.msra.mxu1 %v8124_v7 }
 0x5ff   :  { %2754 = vmatprep.subr.bf16.mxu0 %v8127_v52  ;;  %2795 = vmatprep.subr.bf16.mxu1 %v8130_v60  ;;  %v10063_v60 = vld [vmem:[#allocation95_spill] sm:$0xff] }
 0x602   :  { %2755 = vmatpush1.bf16.msra.mxu0 %v8133_v53  ;;  %2796 = vmatpush1.bf16.msra.mxu1 %v8136_v56 }
 0x603   :  { %2756 = vmatprep.subr.bf16.mxu0 %v8139_v14  ;;  %2797 = vmatprep.subr.bf16.mxu1 %v8142_v15  ;;  %v10062_v14 = vld [vmem:[#allocation94_spill] sm:$0xff] }
 0x606   :  { %2757 = vmatpush1.bf16.msra.mxu0 %v8145_v51  ;;  %2798 = vmatpush1.bf16.msra.mxu1 %v8148_v32  ;;  %v8163_v51 = vld [vmem:[#allocation7 + $0xe4] ss:$16 sps:$4 sm:$0xff]   ;;  %v8166_v32 = vld [vmem:[#allocation7 + $0xec] ss:$16 sps:$4 sm:$0xff]  }
 0x607   :  { %2758 = vmatprep.subr.bf16.mxu0 %v8151_v19  ;;  %2799 = vmatprep.subr.bf16.mxu1 %v8154_v40  ;;  %10056 = vst [vmem:[#allocation34_spill] sm:$0xff] %v8163_v51  ;;  %10057 = vst [vmem:[#allocation35_spill] sm:$0xff] %v8166_v32  ;;  %v8169_v19 = vld [vmem:[#allocation7 + $0xe0] ss:$16 sps:$4 sm:$0xff]   ;;  %v8172_v40 = vld [vmem:[#allocation7 + $0xe8] ss:$16 sps:$4 sm:$0xff]  }
 0x608   :  { %10058 = vst [vmem:[#allocation36_spill] sm:$0xff] %v8169_v19  ;;  %10059 = vst [vmem:[#allocation37_spill] sm:$0xff] %v8172_v40 }
 0x60a   :  { %2759 = vmatpush1.bf16.msra.mxu0 %v8157_v39  ;;  %2800 = vmatpush1.bf16.msra.mxu1 %v8160_v37  ;;  %v8175_v39 = vld [vmem:[#allocation9 + $0x4] ss:$16 sps:$4 sm:$0xff]   ;;  %v8178_v37 = vld [vmem:[#allocation9 + $0xc] ss:$16 sps:$4 sm:$0xff]  }
 0x60b   :  { %2760 = vmatprep.subr.bf16.mxu0 %v8163_v51  ;;  %2801 = vmatprep.subr.bf16.mxu1 %v8166_v32  ;;  %10060 = vst [vmem:[#allocation38_spill] sm:$0xff] %v8175_v39  ;;  %10061 = vst [vmem:[#allocation39_spill] sm:$0xff] %v8178_v37 }
 0x60e   :  { %2761 = vmatpush1.bf16.msra.mxu0 %v8169_v19  ;;  %2802 = vmatpush1.bf16.msra.mxu1 %v8172_v40 }
 0x60f   :  { %2829 = vmatprep.subr.bf16.mxu0 %v8175_v39  ;;  %2870 = vmatprep.subr.bf16.mxu1 %v8178_v37  ;;  %v10064_v39 = vld [vmem:[#allocation96_spill] sm:$0xff] }
 0x6a4   :  { %v2564_v51 = vpop.f32.mrb[44].mxu0  ;;  %v2605_v15 = vpop.f32.mrb[52].mxu1 }
 0x6a5   :  { %v6086_v32 = vadd.f32 %v2564_v51, %v10062_v14  ;;  %v2566_v56 = vpop.f32.mrb[45].mxu0  ;;  %v2607_v53 = vpop.f32.mrb[53].mxu1  ;;  %v6088_v42 = vadd.f32 %v2605_v15, %v10064_v39 }
 0x6a6   :  { %v6087_v19 = vadd.f32 %v2566_v56, %v10063_v60  ;;  %v2568_v52 = vpop.f32.mrb[46].mxu0  ;;  %v2609_v7 = vpop.f32.mrb[54].mxu1 }
 0x6a7   :  { %v2616_v12 = vmul.f32 0.5, %v6086_v32  ;;  %v2569_v40 = vpop.f32.mrb[47].mxu0  ;;  %v2610_v17 = vpop.f32.mrb[55].mxu1  ;;  %v10065_v32 = vld [vmem:[#allocation67_spill] sm:$0xff] }
 0x6a8   :  { %v2620_v18 = vmul.f32 0.5, %v6087_v19  ;;  %v10066_v19 = vld [vmem:[#allocation68_spill] sm:$0xff]  ;;  %v10067_v40 = vld [vmem:[#allocation69_spill] sm:$0xff] }
 0x6a9   :  { %6476 = vtanh.f32 %v2616_v12 }
 0x6aa   :  { %6478 = vtanh.f32 %v2620_v18 }
 0x6ab   :  { %6480 = vtanh.f32 %v6088_v42 }
 0x6b3   :  { %v6477_v37 = vpop.eup %6476 }
 0x6b4   :  { %v6479_v8 = vpop.eup %6478  ;;  %v2618_v4 = vmul.f32 0.5, %v6477_v37  ;;  %v10068_v37 = vld [vmem:[#allocation70_spill] sm:$0xff] }
 0x6b5   :  { %v2622_v6 = vmul.f32 0.5, %v6479_v8  ;;  %v6481_v14 = vpop.eup %6480 }
 0x6b6   :  { %v2619_v51 = vadd.f32 0.5, %v2618_v4 }
 0x6b7   :  { %v2623_v63 = vadd.f32 0.5, %v2622_v6 }
 0x6b8   :  { %v2630_v0 = vmul.f32 %v6481_v14, %v2619_v51 }
 0x6b9   :  { %v2629_v52 = vmul.f32 %v2623_v63, %v7949_v5 }
 0x6bb   :  { %v8185_v7 = vadd.f32 %v2630_v0, %v2629_v52 }
 0x6c4   :  { %v2675_v56 = vpop.f32.mrb[48].mxu0  ;;  %v2716_v17 = vpop.f32.mrb[56].mxu1 }
 0x6c5   :  { %v2723_v12 = vadd.f32 %v2675_v56, %v10065_v32  ;;  %v2725_v15 = vadd.f32 %v2716_v17, %v10066_v19  ;;  %v2677_v18 = vpop.f32.mrb[49].mxu0  ;;  %v2718_v42 = vpop.f32.mrb[57].mxu1 }
 0x6c6   :  { %v2724_v39 = vadd.f32 %v2677_v18, %v10067_v40  ;;  %v2726_v8 = vadd.f32 %v2718_v42, %v10068_v37  ;;  %v2679_v4 = vpop.f32.mrb[50].mxu0  ;;  %v2720_v60 = vpop.f32.mrb[58].mxu1 }
 0x6c7   :  { %v2727_v6 = vmul.f32 0.5, %v2723_v12  ;;  %v2680_v14 = vpop.f32.mrb[51].mxu0  ;;  %v2721_v51 = vpop.f32.mrb[59].mxu1 }
 0x6c8   :  { %v2731_v5 = vmul.f32 0.5, %v2724_v39  ;;  %v2736_v0 = vmul.f32 0.5, %v2726_v8  ;;  %v8200_v14 = vld [vmem:[#allocation9] ss:$16 sps:$4 sm:$0xff]   ;;  %v8206_v51 = vld [vmem:[#allocation9 + $0x24] ss:$16 sps:$4 sm:$0xff]  }
 0x6c9   :  { %6482 = vtanh.f32 %v2727_v6  ;;  %v6089_v6 = vadd.f32 %v2607_v53, %v7813_v31 }
 0x6ca   :  { %6484 = vtanh.f32 %v2731_v5  ;;  %v8209_v5 = vld [vmem:[#allocation9 + $0x2c] ss:$16 sps:$4 sm:$0xff]  }
 0x6cb   :  { %6486 = vtanh.f32 %v2725_v15  ;;  %v2625_v53 = vmul.f32 0.5, %v6089_v6  ;;  %v8257_v6 = vld [vmem:[#allocation9 + $0xa4] ss:$16 sps:$4 sm:$0xff]  }
 0x6cc   :  { %6488 = vtanh.f32 %v2736_v0  ;;  %v8214_v0 = vld [vmem:[#allocation9 + $0x20] ss:$16 sps:$4 sm:$0xff]   ;;  %10075 = vst [vmem:[#allocation46_spill] sm:$0xff] %v8257_v6 }
 0x6d3   :  { %v6483_v63 = vpop.eup %6482 }
 0x6d4   :  { %v6485_v52 = vpop.eup %6484  ;;  %v2729_v56 = vmul.f32 0.5, %v6483_v63  ;;  %v8217_v63 = vld [vmem:[#allocation9 + $0x28] ss:$16 sps:$4 sm:$0xff]  }
 0x6d5   :  { %v2733_v17 = vmul.f32 0.5, %v6485_v52  ;;  %v6487_v19 = vpop.eup %6486  ;;  %v8220_v52 = vld [vmem:[#allocation9 + $0x44] ss:$16 sps:$4 sm:$0xff]  }
 0x6d6   :  { %v2730_v32 = vadd.f32 0.5, %v2729_v56  ;;  %v6489_v39 = vpop.eup %6488  ;;  %v8223_v56 = vld [vmem:[#allocation9 + $0x4c] ss:$16 sps:$4 sm:$0xff]  }
 0x6d7   :  { %v2734_v18 = vadd.f32 0.5, %v2733_v17  ;;  %v2738_v12 = vmul.f32 0.5, %v6489_v39  ;;  %v8226_v17 = vld [vmem:[#allocation9 + $0x40] ss:$16 sps:$4 sm:$0xff]   ;;  %v8245_v39 = vld [vmem:[#allocation9 + $0x84] ss:$16 sps:$4 sm:$0xff]  }
 0x6d8   :  { %v2741_v40 = vmul.f32 %v6487_v19, %v2730_v32  ;;  %v8229_v32 = vld [vmem:[#allocation9 + $0x48] ss:$16 sps:$4 sm:$0xff]   ;;  %v8232_v19 = vld [vmem:[#allocation9 + $0x64] ss:$16 sps:$4 sm:$0xff]   ;;  %10071 = vst [vmem:[#allocation42_spill] sm:$0xff] %v8245_v39 }
 0x6d9   :  { %v2740_v42 = vmul.f32 %v2734_v18, %v7956_v3  ;;  %v2739_v37 = vadd.f32 0.5, %v2738_v12  ;;  %v8203_v3 = vld [vmem:[#allocation9 + $0x8] ss:$16 sps:$4 sm:$0xff]   ;;  %v8235_v18 = vld [vmem:[#allocation9 + $0x6c] ss:$16 sps:$4 sm:$0xff]  }
 0x6da   :  { %v8248_v12 = vld [vmem:[#allocation9 + $0x8c] ss:$16 sps:$4 sm:$0xff]  }
 0x6db   :  { %v8192_v60 = vadd.f32 %v2741_v40, %v2740_v42  ;;  %v8239_v40 = vld [vmem:[#allocation9 + $0x60] ss:$16 sps:$4 sm:$0xff]   ;;  %v8242_v42 = vld [vmem:[#allocation9 + $0x68] ss:$16 sps:$4 sm:$0xff]   ;;  %10072 = vst [vmem:[#allocation43_spill] sm:$0xff] %v8248_v12 }
 0x6dc   :  { %10069 = vst [vmem:[#allocation40_spill] sm:$0xff] %v8239_v40  ;;  %10070 = vst [vmem:[#allocation41_spill] sm:$0xff] %v8242_v42 }
 0x6dd   :  { %6490 = vtanh.f32 %v8192_v60 }
 0x6de   :  { %6492 = vtanh.f32 %v2625_v53  ;;  %v8260_v53 = vld [vmem:[#allocation9 + $0xac] ss:$16 sps:$4 sm:$0xff]  }
 0x6df   :  { %6494 = vtanh.f32 %v8185_v7  ;;  %10076 = vst [vmem:[#allocation47_spill] sm:$0xff] %v8260_v53 }
 0x6e7   :  { %v6491_v15 = vpop.eup %6490 }
 0x6e8   :  { %v2744_v8 = vmul.f32 %v6491_v15, %v2739_v37  ;;  %v6493_v37 = vpop.eup %6492  ;;  %v8251_v15 = vld [vmem:[#allocation9 + $0x80] ss:$16 sps:$4 sm:$0xff]  }
 0x6e9   :  { %10073 = vst [vmem:[#allocation44_spill] sm:$0xff] %v8251_v15 }
 0x6ea   :  { %v8195_v4 = vpack.c.bf16 %v2744_v8, %v2744_v8  ;;  %v8254_v8 = vld [vmem:[#allocation9 + $0x88] ss:$16 sps:$4 sm:$0xff]  }
 0x6eb   :  { %10074 = vst [vmem:[#allocation45_spill] sm:$0xff] %v8254_v8 }
 0x6ec   :  { %2779 = vmatmul.mubr.bf16.vlgmr.msra.gmra.mrb[52].mxu0 %v8195_v4  ;;  %2820 = vmatmul.mubr.bf16.vlgmr.msra.gmra.mrb[60].mxu1 %v8195_v4 }
 0x6ed   :  { %2830 = vmatpush1.bf16.msra.mxu0 %v8200_v14  ;;  %2871 = vmatpush1.bf16.msra.mxu1 %v8203_v3 }
 0x6ee   :  { %2831 = vmatprep.subr.bf16.mxu0 %v8206_v51  ;;  %2872 = vmatprep.subr.bf16.mxu1 %v8209_v5 }
 0x6ef   :  { %2861 = vmatprep.mubr.bf16.mxu0 %v9921_v59  ;;  %2902 = vmatprep.mubr.bf16.mxu1 %v9921_v59 }
 0x6f1   :  { %2832 = vmatpush1.bf16.msra.mxu0 %v8214_v0  ;;  %2873 = vmatpush1.bf16.msra.mxu1 %v8217_v63 }
 0x6f2   :  { %2833 = vmatprep.subr.bf16.mxu0 %v8220_v52  ;;  %2874 = vmatprep.subr.bf16.mxu1 %v8223_v56 }
 0x6f5   :  { %2834 = vmatpush1.bf16.msra.mxu0 %v8226_v17  ;;  %2875 = vmatpush1.bf16.msra.mxu1 %v8229_v32 }
 0x6f6   :  { %2835 = vmatprep.subr.bf16.mxu0 %v8232_v19  ;;  %2876 = vmatprep.subr.bf16.mxu1 %v8235_v18 }
 0x6f9   :  { %2836 = vmatpush1.bf16.msra.mxu0 %v8239_v40  ;;  %2877 = vmatpush1.bf16.msra.mxu1 %v8242_v42  ;;  %v8263_v42 = vld [vmem:[#allocation9 + $0xa0] ss:$16 sps:$4 sm:$0xff]  }
 0x6fa   :  { %2837 = vmatprep.subr.bf16.mxu0 %v8245_v39  ;;  %2878 = vmatprep.subr.bf16.mxu1 %v8248_v12  ;;  %v2627_v39 = vmul.f32 0.5, %v6493_v37  ;;  %10077 = vst [vmem:[#allocation48_spill] sm:$0xff] %v8263_v42  ;;  %v8266_v12 = vld [vmem:[#allocation9 + $0xa8] ss:$16 sps:$4 sm:$0xff]  }
 0x6fb   :  { %10078 = vst [vmem:[#allocation49_spill] sm:$0xff] %v8266_v12  ;;  %v8278_v37 = vld [vmem:[#allocation9 + $0xc8] ss:$16 sps:$4 sm:$0xff]  }
 0x6fc   :  { %v2628_v40 = vadd.f32 0.5, %v2627_v39  ;;  %v8290_v39 = vld [vmem:[#allocation9 + $0xe8] ss:$16 sps:$4 sm:$0xff]  }
 0x6fd   :  { %2838 = vmatpush1.bf16.msra.mxu0 %v8251_v15  ;;  %2879 = vmatpush1.bf16.msra.mxu1 %v8254_v8  ;;  %v8269_v15 = vld [vmem:[#allocation9 + $0xc4] ss:$16 sps:$4 sm:$0xff]   ;;  %v8272_v8 = vld [vmem:[#allocation9 + $0xcc] ss:$16 sps:$4 sm:$0xff]  }
 0x6fe   :  { %2839 = vmatprep.subr.bf16.mxu0 %v8257_v6  ;;  %2880 = vmatprep.subr.bf16.mxu1 %v8260_v53  ;;  %10079 = vst [vmem:[#allocation50_spill] sm:$0xff] %v8269_v15  ;;  %10080 = vst [vmem:[#allocation51_spill] sm:$0xff] %v8272_v8  ;;  %v6495_v6 = vpop.eup %6494  ;;  %v8275_v53 = vld [vmem:[#allocation9 + $0xc0] ss:$16 sps:$4 sm:$0xff]  }
 0x6ff   :  { %10081 = vst [vmem:[#allocation52_spill] sm:$0xff] %v8275_v53 }
 0x701   :  { %2840 = vmatpush1.bf16.msra.mxu0 %v8263_v42  ;;  %2881 = vmatpush1.bf16.msra.mxu1 %v8266_v12  ;;  %v2633_v42 = vmul.f32 %v6495_v6, %v2628_v40  ;;  %v8281_v12 = vld [vmem:[#allocation9 + $0xe4] ss:$16 sps:$4 sm:$0xff]  }
 0x702   :  { %2841 = vmatprep.subr.bf16.mxu0 %v8269_v15  ;;  %2882 = vmatprep.subr.bf16.mxu1 %v8272_v8  ;;  %v8284_v15 = vld [vmem:[#allocation9 + $0xec] ss:$16 sps:$4 sm:$0xff]   ;;  %v8287_v8 = vld [vmem:[#allocation9 + $0xe0] ss:$16 sps:$4 sm:$0xff]  }
 0x703   :  { %v10093_v40 = vld [vmem:[#allocation23_spill] sm:$0xff]  ;;  %v10095_v6 = vld [vmem:[#allocation25_spill] sm:$0xff] }
 0x705   :  { %2842 = vmatpush1.bf16.msra.mxu0 %v8275_v53  ;;  %2883 = vmatpush1.bf16.msra.mxu1 %v8278_v37  ;;  %v2828_v53 = vpack.c.bf16 %v2633_v42, %v2633_v42  ;;  %v10094_v42 = vld [vmem:[#allocation24_spill] sm:$0xff] }
 0x706   :  { %2843 = vmatprep.subr.bf16.mxu0 %v8281_v12  ;;  %2884 = vmatprep.subr.bf16.mxu1 %v8284_v15 }
 0x709   :  { %2844 = vmatpush1.bf16.msra.mxu0 %v8287_v8  ;;  %2885 = vmatpush1.bf16.msra.mxu1 %v8290_v39 }
 0x70a   :  { %2940 = vmatprep.subr.bf16.mxu0 %v7853_v34  ;;  %2981 = vmatprep.subr.bf16.mxu1 %v7856_v9  ;;  %v10082_v34 = vld [vmem:[#allocation92_spill] sm:$0xff]  ;;  %v10083_v9 = vld [vmem:[#allocation93_spill] sm:$0xff] }
 0x70c   :  { %2862 = vmatmul.mubr.bf16.vlgmr.msra.gmra.mrb[52].mxu0 %v2828_v53  ;;  %2903 = vmatmul.mubr.bf16.vlgmr.msra.gmra.mrb[60].mxu1 %v2828_v53  ;;  %v10096_v53 = vld [vmem:[#allocation26_spill] sm:$0xff] }
 0x70d   :  { %2941 = vmatpush1.bf16.msra.mxu0 %v7859_v23  ;;  %2982 = vmatpush1.bf16.msra.mxu1 %v7862_v46  ;;  %v10084_v23 = vld [vmem:[#allocation14_spill] sm:$0xff]  ;;  %v10085_v46 = vld [vmem:[#allocation15_spill] sm:$0xff] }
 0x70e   :  { %2942 = vmatprep.subr.bf16.mxu0 %v7865_v13  ;;  %2983 = vmatprep.subr.bf16.mxu1 %v7868_v28  ;;  %v10086_v13 = vld [vmem:[#allocation16_spill] sm:$0xff]  ;;  %v10087_v28 = vld [vmem:[#allocation17_spill] sm:$0xff] }
 0x70f   :  { %2972 = vmatprep.mubr.bf16.mxu0 %v9921_v59  ;;  %3013 = vmatprep.mubr.bf16.mxu1 %v9921_v59 }
 0x711   :  { %2943 = vmatpush1.bf16.msra.mxu0 %v7873_v26  ;;  %2984 = vmatpush1.bf16.msra.mxu1 %v7876_v11  ;;  %v10088_v26 = vld [vmem:[#allocation18_spill] sm:$0xff]  ;;  %v10089_v11 = vld [vmem:[#allocation19_spill] sm:$0xff] }
 0x712   :  { %2944 = vmatprep.subr.bf16.mxu0 %v10025_v36  ;;  %2985 = vmatprep.subr.bf16.mxu1 %v10026_v50  ;;  %v10090_v36 = vld [vmem:[#allocation20_spill] sm:$0xff]  ;;  %v10091_v50 = vld [vmem:[#allocation21_spill] sm:$0xff] }
 0x715   :  { %2945 = vmatpush1.bf16.msra.mxu0 %v8009_v49  ;;  %2986 = vmatpush1.bf16.msra.mxu1 %v8012_v44 }
 0x716   :  { %2946 = vmatprep.subr.bf16.mxu0 %v8015_v43  ;;  %2987 = vmatprep.subr.bf16.mxu1 %v8018_v47 }
 0x719   :  { %2947 = vmatpush1.bf16.msra.mxu0 %v8021_v48  ;;  %2988 = vmatpush1.bf16.msra.mxu1 %v8024_v54 }
 0x71a   :  { %2948 = vmatprep.subr.bf16.mxu0 %v8027_v55  ;;  %2989 = vmatprep.subr.bf16.mxu1 %v8030_v58 }
 0x71d   :  { %2949 = vmatpush1.bf16.msra.mxu0 %v8033_v1  ;;  %2990 = vmatpush1.bf16.msra.mxu1 %v8036_v38 }
 0x71e   :  { %2950 = vmatprep.subr.bf16.mxu0 %v8039_v25  ;;  %2991 = vmatprep.subr.bf16.mxu1 %v8042_v29 }
 0x721   :  { %2951 = vmatpush1.bf16.msra.mxu0 %v8045_v33  ;;  %2992 = vmatpush1.bf16.msra.mxu1 %v8048_v62 }
 0x722   :  { %2952 = vmatprep.subr.bf16.mxu0 %v8051_v27  ;;  %2993 = vmatprep.subr.bf16.mxu1 %v8054_v24 }
 0x725   :  { %2953 = vmatpush1.bf16.msra.mxu0 %v8057_v45  ;;  %2994 = vmatpush1.bf16.msra.mxu1 %v8060_v10 }
 0x726   :  { %2954 = vmatprep.subr.bf16.mxu0 %v8063_v30  ;;  %2995 = vmatprep.subr.bf16.mxu1 %v8066_v41 }
 0x729   :  { %2955 = vmatpush1.bf16.msra.mxu0 %v8069_v21  ;;  %2996 = vmatpush1.bf16.msra.mxu1 %v8072_v16 }
 0x72a   :  { %3045 = vmatprep.subr.bf16.mxu0 %v8075_v2  ;;  %3086 = vmatprep.subr.bf16.mxu1 %v8078_v61 }
 0x72c   :  { %2973 = vmatmul.mubr.bf16.vlgmr.msra.gmra.mrb[56].mxu0 %v8195_v4  ;;  %3014 = vmatmul.mubr.bf16.vlgmr.msra.gmra.mrb[64].mxu1 %v8195_v4  ;;  %v10092_v4 = vld [vmem:[#allocation22_spill] sm:$0xff] }
 0x72d   :  { %3046 = vmatpush1.bf16.msra.mxu0 %v8083_v57  ;;  %3087 = vmatpush1.bf16.msra.mxu1 %v8086_v22 }
 0x72e   :  { %3047 = vmatprep.subr.bf16.mxu0 %v8089_v20  ;;  %3088 = vmatprep.subr.bf16.mxu1 %v8092_v35 }
 0x72f   :  { %3077 = vmatprep.mubr.bf16.mxu0 %v9921_v59  ;;  %3118 = vmatprep.mubr.bf16.mxu1 %v9921_v59 }
 0x731   :  { %3048 = vmatpush1.bf16.msra.mxu0 %v10082_v34  ;;  %3089 = vmatpush1.bf16.msra.mxu1 %v10083_v9  ;;  %v10111_v9 = vld [vmem:[#allocation95_spill] sm:$0xff] }
 0x732   :  { %3049 = vmatprep.subr.bf16.mxu0 %v10084_v23  ;;  %3090 = vmatprep.subr.bf16.mxu1 %v10085_v46  ;;  %v10110_v46 = vld [vmem:[#allocation94_spill] sm:$0xff] }
 0x735   :  { %3050 = vmatpush1.bf16.msra.mxu0 %v10086_v13  ;;  %3091 = vmatpush1.bf16.msra.mxu1 %v10087_v28  ;;  %v10097_v13 = vld [vmem:[#allocation27_spill] sm:$0xff]  ;;  %v10098_v28 = vld [vmem:[#allocation28_spill] sm:$0xff] }
 0x736   :  { %3051 = vmatprep.subr.bf16.mxu0 %v10088_v26  ;;  %3092 = vmatprep.subr.bf16.mxu1 %v10089_v11  ;;  %v10099_v26 = vld [vmem:[#allocation29_spill] sm:$0xff]  ;;  %v10100_v11 = vld [vmem:[#allocation30_spill] sm:$0xff] }
 0x739   :  { %3052 = vmatpush1.bf16.msra.mxu0 %v10090_v36  ;;  %3093 = vmatpush1.bf16.msra.mxu1 %v10091_v50  ;;  %v10101_v36 = vld [vmem:[#allocation31_spill] sm:$0xff]  ;;  %v10102_v50 = vld [vmem:[#allocation32_spill] sm:$0xff] }
 0x73a   :  { %3053 = vmatprep.subr.bf16.mxu0 %v10092_v4  ;;  %3094 = vmatprep.subr.bf16.mxu1 %v10093_v40  ;;  %v10103_v4 = vld [vmem:[#allocation33_spill] sm:$0xff]  ;;  %v10104_v40 = vld [vmem:[#allocation34_spill] sm:$0xff] }
 0x73d   :  { %3054 = vmatpush1.bf16.msra.mxu0 %v10094_v42  ;;  %3095 = vmatpush1.bf16.msra.mxu1 %v10095_v6  ;;  %v10105_v42 = vld [vmem:[#allocation35_spill] sm:$0xff]  ;;  %v10106_v6 = vld [vmem:[#allocation36_spill] sm:$0xff] }
 0x73e   :  { %3055 = vmatprep.subr.bf16.mxu0 %v10096_v53  ;;  %3096 = vmatprep.subr.bf16.mxu1 %v10097_v13  ;;  %v10107_v53 = vld [vmem:[#allocation37_spill] sm:$0xff]  ;;  %v10108_v13 = vld [vmem:[#allocation38_spill] sm:$0xff] }
 0x741   :  { %3056 = vmatpush1.bf16.msra.mxu0 %v10098_v28  ;;  %3097 = vmatpush1.bf16.msra.mxu1 %v10099_v26  ;;  %v10109_v28 = vld [vmem:[#allocation39_spill] sm:$0xff] }
 0x742   :  { %3057 = vmatprep.subr.bf16.mxu0 %v10100_v11  ;;  %3098 = vmatprep.subr.bf16.mxu1 %v10101_v36 }
 0x745   :  { %3058 = vmatpush1.bf16.msra.mxu0 %v10102_v50  ;;  %3099 = vmatpush1.bf16.msra.mxu1 %v10103_v4 }
 0x746   :  { %3059 = vmatprep.subr.bf16.mxu0 %v10104_v40  ;;  %3100 = vmatprep.subr.bf16.mxu1 %v10105_v42 }
 0x749   :  { %3060 = vmatpush1.bf16.msra.mxu0 %v10106_v6  ;;  %3101 = vmatpush1.bf16.msra.mxu1 %v10107_v53  ;;  %v10112_v53 = vld [vmem:[#allocation96_spill] sm:$0xff] }
 0x74a   :  { %3128 = vmatprep.subr.bf16.mxu0 %v10108_v13  ;;  %3169 = vmatprep.subr.bf16.mxu1 %v10109_v28 }
 0x7df   :  { %v2863_v26 = vpop.f32.mrb[52].mxu0  ;;  %v2904_v11 = vpop.f32.mrb[60].mxu1 }
 0x7e0   :  { %v6090_v36 = vadd.f32 %v2863_v26, %v10110_v46  ;;  %v2865_v23 = vpop.f32.mrb[53].mxu0  ;;  %v2906_v50 = vpop.f32.mrb[61].mxu1  ;;  %v6092_v22 = vadd.f32 %v2904_v11, %v10112_v53 }
 0x7e1   :  { %v6091_v4 = vadd.f32 %v2865_v23, %v10111_v9  ;;  %v2867_v34 = vpop.f32.mrb[54].mxu0  ;;  %v2908_v40 = vpop.f32.mrb[62].mxu1 }
 0x7e2   :  { %v2915_v35 = vmul.f32 0.5, %v6090_v36  ;;  %v2868_v42 = vpop.f32.mrb[55].mxu0  ;;  %v2909_v20 = vpop.f32.mrb[63].mxu1  ;;  %v10114_v40 = vld [vmem:[#allocation72_spill] sm:$0xff] }
 0x7e3   :  { %v2919_v6 = vmul.f32 0.5, %v6091_v4  ;;  %v10113_v4 = vld [vmem:[#allocation71_spill] sm:$0xff] }
 0x7e4   :  { %6496 = vtanh.f32 %v2915_v35 }
 0x7e5   :  { %6498 = vtanh.f32 %v2919_v6  ;;  %v10115_v6 = vld [vmem:[#allocation73_spill] sm:$0xff] }
 0x7e6   :  { %6500 = vtanh.f32 %v6092_v22 }
 0x7ee   :  { %v6497_v28 = vpop.eup %6496 }
 0x7ef   :  { %v6499_v13 = vpop.eup %6498  ;;  %v2917_v57 = vmul.f32 0.5, %v6497_v28  ;;  %v10116_v28 = vld [vmem:[#allocation74_spill] sm:$0xff] }
 0x7f0   :  { %v2921_v61 = vmul.f32 0.5, %v6499_v13  ;;  %v6501_v46 = vpop.eup %6500 }
 0x7f1   :  { %v2918_v26 = vadd.f32 0.5, %v2917_v57 }
 0x7f2   :  { %v2922_v2 = vadd.f32 0.5, %v2921_v61 }
 0x7f3   :  { %v2929_v16 = vmul.f32 %v6501_v46, %v2918_v26 }
 0x7f4   :  { %v2928_v34 = vmul.f32 %v2922_v2, %v8185_v7 }
 0x7f6   :  { %v8369_v23 = vadd.f32 %v2929_v16, %v2928_v34 }
 0x7ff   :  { %v2974_v36 = vpop.f32.mrb[56].mxu0  ;;  %v3015_v20 = vpop.f32.mrb[64].mxu1 }
 0x800   :  { %v3022_v35 = vadd.f32 %v2974_v36, %v10113_v4  ;;  %v3024_v11 = vadd.f32 %v3015_v20, %v10114_v40  ;;  %v2976_v42 = vpop.f32.mrb[57].mxu0  ;;  %v3017_v22 = vpop.f32.mrb[65].mxu1 }
 0x801   :  { %v3023_v53 = vadd.f32 %v2976_v42, %v10115_v6  ;;  %v3025_v13 = vadd.f32 %v3017_v22, %v10116_v28  ;;  %v2978_v57 = vpop.f32.mrb[58].mxu0  ;;  %v3019_v9 = vpop.f32.mrb[66].mxu1 }
 0x802   :  { %v3026_v61 = vmul.f32 0.5, %v3022_v35  ;;  %v2979_v46 = vpop.f32.mrb[59].mxu0  ;;  %v3020_v26 = vpop.f32.mrb[67].mxu1 }
 0x803   :  { %v3030_v2 = vmul.f32 0.5, %v3023_v53  ;;  %v3035_v16 = vmul.f32 0.5, %v3025_v13  ;;  %v10118_v46 = vld [vmem:[#allocation41_spill] sm:$0xff]  ;;  %v10119_v26 = vld [vmem:[#allocation42_spill] sm:$0xff] }
 0x804   :  { %6502 = vtanh.f32 %v3026_v61  ;;  %v6093_v61 = vadd.f32 %v2906_v50, %v7813_v31  ;;  %v10117_v50 = vld [vmem:[#allocation40_spill] sm:$0xff] }
 0x805   :  { %6504 = vtanh.f32 %v3030_v2  ;;  %v10120_v2 = vld [vmem:[#allocation43_spill] sm:$0xff] }
 0x806   :  { %6506 = vtanh.f32 %v3024_v11 }
 0x807   :  { %6508 = vtanh.f32 %v3035_v16 }
 0x80e   :  { %v6503_v7 = vpop.eup %6502 }
 0x80f   :  { %v6505_v34 = vpop.eup %6504  ;;  %v3028_v36 = vmul.f32 0.5, %v6503_v7  ;;  %v10121_v7 = vld [vmem:[#allocation44_spill] sm:$0xff] }
 0x810   :  { %v3032_v20 = vmul.f32 0.5, %v6505_v34  ;;  %v6507_v40 = vpop.eup %6506  ;;  %v10122_v34 = vld [vmem:[#allocation45_spill] sm:$0xff] }
 0x811   :  { %v3029_v4 = vadd.f32 0.5, %v3028_v36  ;;  %v6509_v53 = vpop.eup %6508  ;;  %v10123_v36 = vld [vmem:[#allocation46_spill] sm:$0xff] }
 0x812   :  { %v3033_v42 = vadd.f32 0.5, %v3032_v20  ;;  %v3037_v35 = vmul.f32 0.5, %v6509_v53  ;;  %v10124_v20 = vld [vmem:[#allocation47_spill] sm:$0xff] }
 0x813   :  { %v3040_v6 = vmul.f32 %v6507_v40, %v3029_v4  ;;  %v10125_v40 = vld [vmem:[#allocation48_spill] sm:$0xff] }
 0x814   :  { %v3039_v22 = vmul.f32 %v3033_v42, %v8192_v60  ;;  %v3038_v28 = vadd.f32 0.5, %v3037_v35  ;;  %v2924_v60 = vmul.f32 0.5, %v6093_v61  ;;  %v10126_v42 = vld [vmem:[#allocation49_spill] sm:$0xff] }
 0x815   :  { %v8417_v61 = vld [vmem:[#allocation4 + $0x4] ss:$16 sps:$4 sm:$0xff]  }
 0x816   :  { %v8376_v9 = vadd.f32 %v3040_v6, %v3039_v22  ;;  %v10127_v6 = vld [vmem:[#allocation50_spill] sm:$0xff]  ;;  %v10128_v22 = vld [vmem:[#allocation51_spill] sm:$0xff] }
 0x818   :  { %6510 = vtanh.f32 %v8376_v9 }
 0x819   :  { %6512 = vtanh.f32 %v2924_v60  ;;  %v8420_v60 = vld [vmem:[#allocation4 + $0xc] ss:$16 sps:$4 sm:$0xff]  }
 0x81a   :  { %6514 = vtanh.f32 %v8369_v23 }
 0x822   :  { %v6511_v11 = vpop.eup %6510 }
 0x823   :  { %v3043_v13 = vmul.f32 %v6511_v11, %v3038_v28  ;;  %v6513_v16 = vpop.eup %6512  ;;  %v10129_v28 = vld [vmem:[#allocation52_spill] sm:$0xff] }
 0x824   :  { %v2926_v4 = vmul.f32 0.5, %v6513_v16  ;;  %v6515_v53 = vpop.eup %6514  ;;  %v8423_v16 = vld [vmem:[#allocation4] ss:$16 sps:$4 sm:$0xff]  }
 0x825   :  { %v8379_v57 = vpack.c.bf16 %v3043_v13, %v3043_v13 }
 0x826   :  { %v2927_v35 = vadd.f32 0.5, %v2926_v4  ;;  %v8426_v4 = vld [vmem:[#allocation4 + $0x8] ss:$16 sps:$4 sm:$0xff]  }
 0x827   :  { %3078 = vmatmul.mubr.bf16.vlgmr.msra.gmra.mrb[60].mxu0 %v8379_v57  ;;  %3119 = vmatmul.mubr.bf16.vlgmr.msra.gmra.mrb[68].mxu1 %v8379_v57  ;;  %10130 = vst [vmem:[#allocation53_spill] sm:$0xff] %v8426_v4 }
 0x828   :  { %3129 = vmatpush1.bf16.msra.mxu0 %v8200_v14  ;;  %3170 = vmatpush1.bf16.msra.mxu1 %v8203_v3  ;;  %v2932_v11 = vmul.f32 %v6515_v53, %v2927_v35  ;;  %v8429_v53 = vld [vmem:[#allocation4 + $0x24] ss:$16 sps:$4 sm:$0xff]   ;;  %v8432_v35 = vld [vmem:[#allocation4 + $0x2c] ss:$16 sps:$4 sm:$0xff]  }
 0x829   :  { %3130 = vmatprep.subr.bf16.mxu0 %v8206_v51  ;;  %3171 = vmatprep.subr.bf16.mxu1 %v8209_v5  ;;  %10131 = vst [vmem:[#allocation54_spill] sm:$0xff] %v8429_v53 }
 0x82a   :  { %3160 = vmatprep.mubr.bf16.mxu0 %v9921_v59  ;;  %3201 = vmatprep.mubr.bf16.mxu1 %v9921_v59  ;;  %v3127_v13 = vpack.c.bf16 %v2932_v11, %v2932_v11  ;;  %v8437_v11 = vld [vmem:[#allocation4 + $0x20] ss:$16 sps:$4 sm:$0xff]  }
 0x82c   :  { %3131 = vmatpush1.bf16.msra.mxu0 %v8214_v0  ;;  %3172 = vmatpush1.bf16.msra.mxu1 %v8217_v63 }
 0x82d   :  { %3132 = vmatprep.subr.bf16.mxu0 %v8220_v52  ;;  %3173 = vmatprep.subr.bf16.mxu1 %v8223_v56 }
 0x830   :  { %3133 = vmatpush1.bf16.msra.mxu0 %v8226_v17  ;;  %3174 = vmatpush1.bf16.msra.mxu1 %v8229_v32 }
 0x831   :  { %3134 = vmatprep.subr.bf16.mxu0 %v8232_v19  ;;  %3175 = vmatprep.subr.bf16.mxu1 %v8235_v18 }
 0x834   :  { %3135 = vmatpush1.bf16.msra.mxu0 %v10117_v50  ;;  %3176 = vmatpush1.bf16.msra.mxu1 %v10118_v46 }
 0x835   :  { %3136 = vmatprep.subr.bf16.mxu0 %v10119_v26  ;;  %3177 = vmatprep.subr.bf16.mxu1 %v10120_v2 }
 0x838   :  { %3137 = vmatpush1.bf16.msra.mxu0 %v10121_v7  ;;  %3178 = vmatpush1.bf16.msra.mxu1 %v10122_v34 }
 0x839   :  { %3138 = vmatprep.subr.bf16.mxu0 %v10123_v36  ;;  %3179 = vmatprep.subr.bf16.mxu1 %v10124_v20 }
 0x83c   :  { %3139 = vmatpush1.bf16.msra.mxu0 %v10125_v40  ;;  %3180 = vmatpush1.bf16.msra.mxu1 %v10126_v42 }
 0x83d   :  { %3140 = vmatprep.subr.bf16.mxu0 %v10127_v6  ;;  %3181 = vmatprep.subr.bf16.mxu1 %v10128_v22 }
 0x840   :  { %3141 = vmatpush1.bf16.msra.mxu0 %v10129_v28  ;;  %3182 = vmatpush1.bf16.msra.mxu1 %v8278_v37 }
 0x841   :  { %3142 = vmatprep.subr.bf16.mxu0 %v8281_v12  ;;  %3183 = vmatprep.subr.bf16.mxu1 %v8284_v15 }
 0x844   :  { %3143 = vmatpush1.bf16.msra.mxu0 %v8287_v8  ;;  %3184 = vmatpush1.bf16.msra.mxu1 %v8290_v39 }
 0x845   :  { %3239 = vmatprep.subr.bf16.mxu0 %v8417_v61  ;;  %3280 = vmatprep.subr.bf16.mxu1 %v8420_v60 }
 0x847   :  { %3161 = vmatmul.mubr.bf16.vlgmr.msra.gmra.mrb[60].mxu0 %v3127_v13  ;;  %3202 = vmatmul.mubr.bf16.vlgmr.msra.gmra.mrb[68].mxu1 %v3127_v13  ;;  %v8440_v13 = vld [vmem:[#allocation4 + $0x28] ss:$16 sps:$4 sm:$0xff]  }
 0x848   :  { %3240 = vmatpush1.bf16.msra.mxu0 %v8423_v16  ;;  %3281 = vmatpush1.bf16.msra.mxu1 %v8426_v4  ;;  %v8443_v4 = vld [vmem:[#allocation4 + $0x44] ss:$16 sps:$4 sm:$0xff]  }
 0x849   :  { %3241 = vmatprep.subr.bf16.mxu0 %v8429_v53  ;;  %3282 = vmatprep.subr.bf16.mxu1 %v8432_v35  ;;  %v8446_v53 = vld [vmem:[#allocation4 + $0x4c] ss:$16 sps:$4 sm:$0xff]  }
 0x84a   :  { %3271 = vmatprep.mubr.bf16.mxu0 %v9921_v59  ;;  %3312 = vmatprep.mubr.bf16.mxu1 %v9921_v59 }
 0x84c   :  { %3242 = vmatpush1.bf16.msra.mxu0 %v8437_v11  ;;  %3283 = vmatpush1.bf16.msra.mxu1 %v8440_v13 }
 0x84d   :  { %3243 = vmatprep.subr.bf16.mxu0 %v8443_v4  ;;  %3284 = vmatprep.subr.bf16.mxu1 %v8446_v53 }
 0x850   :  { %3244 = vmatpush1.bf16.msra.mxu0 %v8009_v49  ;;  %3285 = vmatpush1.bf16.msra.mxu1 %v8012_v44  ;;  %v10132_v49 = vld [vmem:[#allocation61_spill] sm:$0xff]  ;;  %v10133_v44 = vld [vmem:[#allocation62_spill] sm:$0xff] }
 0x851   :  { %3245 = vmatprep.subr.bf16.mxu0 %v8015_v43  ;;  %3286 = vmatprep.subr.bf16.mxu1 %v8018_v47  ;;  %v10134_v43 = vld [vmem:[#allocation87_spill] sm:$0xff]  ;;  %v10135_v47 = vld [vmem:[#allocation88_spill] sm:$0xff] }
 0x854   :  { %3246 = vmatpush1.bf16.msra.mxu0 %v8021_v48  ;;  %3287 = vmatpush1.bf16.msra.mxu1 %v8024_v54  ;;  %v10136_v48 = vld [vmem:[#allocation89_spill] sm:$0xff]  ;;  %v10137_v54 = vld [vmem:[#allocation90_spill] sm:$0xff] }
 0x855   :  { %3247 = vmatprep.subr.bf16.mxu0 %v8027_v55  ;;  %3288 = vmatprep.subr.bf16.mxu1 %v8030_v58  ;;  %v10138_v55 = vld [vmem:[#allocation91_spill] sm:$0xff]  ;;  %v10139_v58 = vld [vmem:[#allocation92_spill] sm:$0xff] }
 0x858   :  { %3248 = vmatpush1.bf16.msra.mxu0 %v8033_v1  ;;  %3289 = vmatpush1.bf16.msra.mxu1 %v8036_v38  ;;  %v10140_v1 = vld [vmem:[#allocation93_spill] sm:$0xff]  ;;  %v10141_v38 = vld [vmem:[#allocation14_spill] sm:$0xff] }
 0x859   :  { %3249 = vmatprep.subr.bf16.mxu0 %v8039_v25  ;;  %3290 = vmatprep.subr.bf16.mxu1 %v8042_v29  ;;  %v10142_v25 = vld [vmem:[#allocation15_spill] sm:$0xff]  ;;  %v10143_v29 = vld [vmem:[#allocation16_spill] sm:$0xff] }
 0x85c   :  { %3250 = vmatpush1.bf16.msra.mxu0 %v8045_v33  ;;  %3291 = vmatpush1.bf16.msra.mxu1 %v8048_v62  ;;  %v10144_v33 = vld [vmem:[#allocation17_spill] sm:$0xff]  ;;  %v10145_v62 = vld [vmem:[#allocation18_spill] sm:$0xff] }
 0x85d   :  { %3251 = vmatprep.subr.bf16.mxu0 %v8051_v27  ;;  %3292 = vmatprep.subr.bf16.mxu1 %v8054_v24  ;;  %v10146_v27 = vld [vmem:[#allocation19_spill] sm:$0xff]  ;;  %v10147_v24 = vld [vmem:[#allocation20_spill] sm:$0xff] }
 0x860   :  { %3252 = vmatpush1.bf16.msra.mxu0 %v8057_v45  ;;  %3293 = vmatpush1.bf16.msra.mxu1 %v8060_v10  ;;  %v10148_v45 = vld [vmem:[#allocation21_spill] sm:$0xff]  ;;  %v10149_v10 = vld [vmem:[#allocation22_spill] sm:$0xff] }
 0x861   :  { %3253 = vmatprep.subr.bf16.mxu0 %v8063_v30  ;;  %3294 = vmatprep.subr.bf16.mxu1 %v8066_v41  ;;  %v10150_v30 = vld [vmem:[#allocation23_spill] sm:$0xff]  ;;  %v10151_v41 = vld [vmem:[#allocation24_spill] sm:$0xff] }
 0x864   :  { %3254 = vmatpush1.bf16.msra.mxu0 %v8069_v21  ;;  %3295 = vmatpush1.bf16.msra.mxu1 %v10132_v49  ;;  %v10152_v21 = vld [vmem:[#allocation25_spill] sm:$0xff]  ;;  %v10154_v49 = vld [vmem:[#allocation27_spill] sm:$0xff] }
 0x865   :  { %3344 = vmatprep.subr.bf16.mxu0 %v10133_v44  ;;  %3385 = vmatprep.subr.bf16.mxu1 %v10134_v43  ;;  %v10155_v44 = vld [vmem:[#allocation28_spill] sm:$0xff]  ;;  %v10156_v43 = vld [vmem:[#allocation29_spill] sm:$0xff] }
 0x867   :  { %3272 = vmatmul.mubr.bf16.vlgmr.msra.gmra.mrb[64].mxu0 %v8379_v57  ;;  %3313 = vmatmul.mubr.bf16.vlgmr.msra.gmra.mrb[72].mxu1 %v8379_v57  ;;  %v10153_v57 = vld [vmem:[#allocation26_spill] sm:$0xff] }
 0x868   :  { %3345 = vmatpush1.bf16.msra.mxu0 %v10135_v47  ;;  %3386 = vmatpush1.bf16.msra.mxu1 %v10136_v48  ;;  %v10157_v47 = vld [vmem:[#allocation30_spill] sm:$0xff]  ;;  %v10158_v48 = vld [vmem:[#allocation31_spill] sm:$0xff] }
 0x869   :  { %3346 = vmatprep.subr.bf16.mxu0 %v10137_v54  ;;  %3387 = vmatprep.subr.bf16.mxu1 %v10138_v55  ;;  %v10159_v54 = vld [vmem:[#allocation32_spill] sm:$0xff]  ;;  %v10160_v55 = vld [vmem:[#allocation33_spill] sm:$0xff] }
 0x86a   :  { %3376 = vmatprep.mubr.bf16.mxu0 %v9921_v59  ;;  %3417 = vmatprep.mubr.bf16.mxu1 %v9921_v59 }
 0x86c   :  { %3347 = vmatpush1.bf16.msra.mxu0 %v10139_v58  ;;  %3388 = vmatpush1.bf16.msra.mxu1 %v10140_v1  ;;  %v10161_v58 = vld [vmem:[#allocation34_spill] sm:$0xff]  ;;  %v10162_v1 = vld [vmem:[#allocation35_spill] sm:$0xff] }
 0x86d   :  { %3348 = vmatprep.subr.bf16.mxu0 %v10141_v38  ;;  %3389 = vmatprep.subr.bf16.mxu1 %v10142_v25  ;;  %v10163_v38 = vld [vmem:[#allocation36_spill] sm:$0xff]  ;;  %v10164_v25 = vld [vmem:[#allocation37_spill] sm:$0xff] }
 0x870   :  { %3349 = vmatpush1.bf16.msra.mxu0 %v10143_v29  ;;  %3390 = vmatpush1.bf16.msra.mxu1 %v10144_v33  ;;  %v10165_v29 = vld [vmem:[#allocation38_spill] sm:$0xff]  ;;  %v10166_v33 = vld [vmem:[#allocation39_spill] sm:$0xff] }
 0x871   :  { %3350 = vmatprep.subr.bf16.mxu0 %v10145_v62  ;;  %3391 = vmatprep.subr.bf16.mxu1 %v10146_v27 }
 0x874   :  { %3351 = vmatpush1.bf16.msra.mxu0 %v10147_v24  ;;  %3392 = vmatpush1.bf16.msra.mxu1 %v10148_v45  ;;  %v10167_v24 = vld [vmem:[#allocation94_spill] sm:$0xff] }
 0x875   :  { %3352 = vmatprep.subr.bf16.mxu0 %v10149_v10  ;;  %3393 = vmatprep.subr.bf16.mxu1 %v10150_v30 }
 0x878   :  { %3353 = vmatpush1.bf16.msra.mxu0 %v10151_v41  ;;  %3394 = vmatpush1.bf16.msra.mxu1 %v10152_v21  ;;  %v10168_v41 = vld [vmem:[#allocation95_spill] sm:$0xff] }
 0x879   :  { %3354 = vmatprep.subr.bf16.mxu0 %v10153_v57  ;;  %3395 = vmatprep.subr.bf16.mxu1 %v10154_v49 }
 0x87c   :  { %3355 = vmatpush1.bf16.msra.mxu0 %v10155_v44  ;;  %3396 = vmatpush1.bf16.msra.mxu1 %v10156_v43 }
 0x87d   :  { %3356 = vmatprep.subr.bf16.mxu0 %v10157_v47  ;;  %3397 = vmatprep.subr.bf16.mxu1 %v10158_v48 }
 0x880   :  { %3357 = vmatpush1.bf16.msra.mxu0 %v10159_v54  ;;  %3398 = vmatpush1.bf16.msra.mxu1 %v10160_v55  ;;  %v10169_v54 = vld [vmem:[#allocation96_spill] sm:$0xff] }
 0x881   :  { %3358 = vmatprep.subr.bf16.mxu0 %v10161_v58  ;;  %3399 = vmatprep.subr.bf16.mxu1 %v10162_v1 }
 0x884   :  { %3359 = vmatpush1.bf16.msra.mxu0 %v10163_v38  ;;  %3400 = vmatpush1.bf16.msra.mxu1 %v10164_v25 }
 0x885   :  { %3427 = vmatprep.subr.bf16.mxu0 %v10165_v29  ;;  %3468 = vmatprep.subr.bf16.mxu1 %v10166_v33 }
 0x91a   :  { %v3162_v62 = vpop.f32.mrb[60].mxu0  ;;  %v3203_v27 = vpop.f32.mrb[68].mxu1 }
 0x91b   :  { %v6094_v45 = vadd.f32 %v3162_v62, %v10167_v24  ;;  %v3164_v10 = vpop.f32.mrb[61].mxu0  ;;  %v3205_v30 = vpop.f32.mrb[69].mxu1  ;;  %v6096_v55 = vadd.f32 %v3203_v27, %v10169_v54 }
 0x91c   :  { %v6095_v21 = vadd.f32 %v3164_v10, %v10168_v41  ;;  %v3166_v57 = vpop.f32.mrb[62].mxu0  ;;  %v3207_v49 = vpop.f32.mrb[70].mxu1 }
 0x91d   :  { %v3214_v44 = vmul.f32 0.5, %v6094_v45  ;;  %v3167_v43 = vpop.f32.mrb[63].mxu0  ;;  %v3208_v47 = vpop.f32.mrb[71].mxu1 }
 0x91e   :  { %v3218_v48 = vmul.f32 0.5, %v6095_v21  ;;  %v10170_v21 = vld [vmem:[#allocation75_spill] sm:$0xff]  ;;  %v10171_v43 = vld [vmem:[#allocation76_spill] sm:$0xff] }
 0x91f   :  { %6516 = vtanh.f32 %v3214_v44 }
 0x920   :  { %6518 = vtanh.f32 %v3218_v48 }
 0x921   :  { %6520 = vtanh.f32 %v6096_v55  ;;  %v10172_v55 = vld [vmem:[#allocation77_spill] sm:$0xff] }
 0x929   :  { %v6517_v58 = vpop.eup %6516 }
 0x92a   :  { %v6519_v1 = vpop.eup %6518  ;;  %v3216_v38 = vmul.f32 0.5, %v6517_v58  ;;  %v10173_v58 = vld [vmem:[#allocation78_spill] sm:$0xff] }
 0x92b   :  { %v3220_v25 = vmul.f32 0.5, %v6519_v1  ;;  %v6521_v33 = vpop.eup %6520 }
 0x92c   :  { %v3217_v29 = vadd.f32 0.5, %v3216_v38 }
 0x92d   :  { %v3221_v62 = vadd.f32 0.5, %v3220_v25 }
 0x92e   :  { %v3228_v24 = vmul.f32 %v6521_v33, %v3217_v29 }
 0x92f   :  { %v3227_v10 = vmul.f32 %v3221_v62, %v8369_v23 }
 0x931   :  { %v8513_v57 = vadd.f32 %v3228_v24, %v3227_v10 }
 0x93a   :  { %v3273_v45 = vpop.f32.mrb[64].mxu0  ;;  %v3314_v49 = vpop.f32.mrb[72].mxu1 }
 0x93b   :  { %v3321_v44 = vadd.f32 %v3273_v45, %v10170_v21  ;;  %v3323_v27 = vadd.f32 %v3314_v49, %v10171_v43  ;;  %v3275_v47 = vpop.f32.mrb[65].mxu0  ;;  %v3316_v48 = vpop.f32.mrb[73].mxu1 }
 0x93c   :  { %v3322_v54 = vadd.f32 %v3275_v47, %v10172_v55  ;;  %v3324_v1 = vadd.f32 %v3316_v48, %v10173_v58  ;;  %v3277_v38 = vpop.f32.mrb[66].mxu0  ;;  %v3318_v41 = vpop.f32.mrb[74].mxu1 }
 0x93d   :  { %v3325_v25 = vmul.f32 0.5, %v3321_v44  ;;  %v3278_v29 = vpop.f32.mrb[67].mxu0  ;;  %v3319_v33 = vpop.f32.mrb[75].mxu1 }
 0x93e   :  { %v3329_v23 = vmul.f32 0.5, %v3322_v54  ;;  %v3334_v24 = vmul.f32 0.5, %v3324_v1  ;;  %v8642_v29 = vld [vmem:[#allocation7 + $0xc] ss:$16 sps:$4 sm:$0xff]   ;;  %v8647_v33 = vld [vmem:[#allocation7] ss:$16 sps:$4 sm:$0xff]  }
 0x93f   :  { %6522 = vtanh.f32 %v3325_v25  ;;  %v6097_v25 = vadd.f32 %v3205_v30, %v7813_v31  ;;  %v8639_v30 = vld [vmem:[#allocation7 + $0x4] ss:$16 sps:$4 sm:$0xff]  }
 0x940   :  { %6524 = vtanh.f32 %v3329_v23  ;;  %v8650_v23 = vld [vmem:[#allocation7 + $0x8] ss:$16 sps:$4 sm:$0xff]  }
 0x941   :  { %6526 = vtanh.f32 %v3323_v27 }
 0x942   :  { %6528 = vtanh.f32 %v3334_v24  ;;  %v8653_v24 = vld [vmem:[#allocation7 + $0x24] ss:$16 sps:$4 sm:$0xff]  }
 0x949   :  { %v6523_v62 = vpop.eup %6522 }
 0x94a   :  { %v6525_v10 = vpop.eup %6524  ;;  %v3327_v45 = vmul.f32 0.5, %v6523_v62  ;;  %v8656_v62 = vld [vmem:[#allocation7 + $0x2c] ss:$16 sps:$4 sm:$0xff]  }
 0x94b   :  { %v3331_v49 = vmul.f32 0.5, %v6525_v10  ;;  %v6527_v43 = vpop.eup %6526  ;;  %v8661_v10 = vld [vmem:[#allocation7 + $0x20] ss:$16 sps:$4 sm:$0xff]  }
 0x94c   :  { %v3328_v21 = vadd.f32 0.5, %v3327_v45  ;;  %v6529_v54 = vpop.eup %6528  ;;  %10191 = vst [vmem:[#allocation41_spill] sm:$0xff] %v8661_v10  ;;  %v8664_v45 = vld [vmem:[#allocation7 + $0x28] ss:$16 sps:$4 sm:$0xff]  }
 0x94d   :  { %v3332_v47 = vadd.f32 0.5, %v3331_v49  ;;  %v3336_v44 = vmul.f32 0.5, %v6529_v54  ;;  %10192 = vst [vmem:[#allocation42_spill] sm:$0xff] %v8664_v45  ;;  %v8667_v49 = vld [vmem:[#allocation7 + $0x44] ss:$16 sps:$4 sm:$0xff]  }
 0x94e   :  { %v3339_v55 = vmul.f32 %v6527_v43, %v3328_v21  ;;  %10193 = vst [vmem:[#allocation43_spill] sm:$0xff] %v8667_v49  ;;  %v8670_v21 = vld [vmem:[#allocation7 + $0x4c] ss:$16 sps:$4 sm:$0xff]   ;;  %v8673_v43 = vld [vmem:[#allocation7 + $0x40] ss:$16 sps:$4 sm:$0xff]  }
 0x94f   :  { %v3338_v48 = vmul.f32 %v3332_v47, %v8376_v9  ;;  %v3337_v58 = vadd.f32 0.5, %v3336_v44  ;;  %v3223_v9 = vmul.f32 0.5, %v6097_v25  ;;  %10194 = vst [vmem:[#allocation44_spill] sm:$0xff] %v8670_v21  ;;  %10195 = vst [vmem:[#allocation45_spill] sm:$0xff] %v8673_v43  ;;  %v8676_v47 = vld [vmem:[#allocation7 + $0x48] ss:$16 sps:$4 sm:$0xff]  }
 0x950   :  { %10196 = vst [vmem:[#allocation46_spill] sm:$0xff] %v8676_v47  ;;  %v8685_v54 = vld [vmem:[#allocation7 + $0x60] ss:$16 sps:$4 sm:$0xff]   ;;  %v8688_v44 = vld [vmem:[#allocation7 + $0x68] ss:$16 sps:$4 sm:$0xff]  }
 0x951   :  { %v8520_v41 = vadd.f32 %v3339_v55, %v3338_v48  ;;  %v8679_v55 = vld [vmem:[#allocation7 + $0x64] ss:$16 sps:$4 sm:$0xff]   ;;  %v8682_v48 = vld [vmem:[#allocation7 + $0x6c] ss:$16 sps:$4 sm:$0xff]   ;;  %10199 = vst [vmem:[#allocation49_spill] sm:$0xff] %v8685_v54  ;;  %10200 = vst [vmem:[#allocation50_spill] sm:$0xff] %v8688_v44 }
 0x952   :  { %10197 = vst [vmem:[#allocation47_spill] sm:$0xff] %v8679_v55  ;;  %10198 = vst [vmem:[#allocation48_spill] sm:$0xff] %v8682_v48  ;;  %v8703_v25 = vld [vmem:[#allocation7 + $0xa4] ss:$16 sps:$4 sm:$0xff]  }
 0x953   :  { %6530 = vtanh.f32 %v8520_v41  ;;  %10205 = vst [vmem:[#allocation87_spill] sm:$0xff] %v8703_v25 }
 0x954   :  { %6532 = vtanh.f32 %v3223_v9  ;;  %v8706_v9 = vld [vmem:[#allocation7 + $0xac] ss:$16 sps:$4 sm:$0xff]  }
 0x955   :  { %6534 = vtanh.f32 %v8513_v57  ;;  %10206 = vst [vmem:[#allocation88_spill] sm:$0xff] %v8706_v9 }
 0x95d   :  { %v6531_v27 = vpop.eup %6530 }
 0x95e   :  { %v3342_v1 = vmul.f32 %v6531_v27, %v3337_v58  ;;  %v8691_v58 = vld [vmem:[#allocation7 + $0x84] ss:$16 sps:$4 sm:$0xff]   ;;  %v8694_v27 = vld [vmem:[#allocation7 + $0x8c] ss:$16 sps:$4 sm:$0xff]  }
 0x95f   :  { %10201 = vst [vmem:[#allocation51_spill] sm:$0xff] %v8691_v58  ;;  %10202 = vst [vmem:[#allocation52_spill] sm:$0xff] %v8694_v27 }
 0x960   :  { %v8523_v38 = vpack.c.bf16 %v3342_v1, %v3342_v1  ;;  %v8697_v1 = vld [vmem:[#allocation7 + $0x80] ss:$16 sps:$4 sm:$0xff]  }
 0x961   :  { %10203 = vst [vmem:[#allocation61_spill] sm:$0xff] %v8697_v1 }
 0x962   :  { %3377 = vmatmul.mubr.bf16.vlgmr.msra.gmra.mrb[68].mxu0 %v8523_v38  ;;  %3418 = vmatmul.mubr.bf16.vlgmr.msra.gmra.mrb[76].mxu1 %v8523_v38 }
 0x963   :  { %3428 = vmatpush1.bf16.msra.mxu0 %v8200_v14  ;;  %3469 = vmatpush1.bf16.msra.mxu1 %v8203_v3  ;;  %v6533_v14 = vpop.eup %6532 }
 0x964   :  { %3429 = vmatprep.subr.bf16.mxu0 %v8206_v51  ;;  %3470 = vmatprep.subr.bf16.mxu1 %v8209_v5  ;;  %v3225_v3 = vmul.f32 0.5, %v6533_v14  ;;  %v6535_v51 = vpop.eup %6534  ;;  %v8709_v14 = vld [vmem:[#allocation7 + $0xa0] ss:$16 sps:$4 sm:$0xff]  }
 0x965   :  { %3459 = vmatprep.mubr.bf16.mxu0 %v9921_v59  ;;  %3500 = vmatprep.mubr.bf16.mxu1 %v9921_v59  ;;  %10207 = vst [vmem:[#allocation89_spill] sm:$0xff] %v8709_v14 }
 0x966   :  { %v3226_v5 = vadd.f32 0.5, %v3225_v3  ;;  %v8712_v3 = vld [vmem:[#allocation7 + $0xa8] ss:$16 sps:$4 sm:$0xff]  }
 0x967   :  { %3430 = vmatpush1.bf16.msra.mxu0 %v8214_v0  ;;  %3471 = vmatpush1.bf16.msra.mxu1 %v8217_v63  ;;  %10208 = vst [vmem:[#allocation90_spill] sm:$0xff] %v8712_v3 }
 0x968   :  { %3431 = vmatprep.subr.bf16.mxu0 %v8220_v52  ;;  %3472 = vmatprep.subr.bf16.mxu1 %v8223_v56  ;;  %v3231_v0 = vmul.f32 %v6535_v51, %v3226_v5  ;;  %v10174_v52 = vld [vmem:[#allocation53_spill] sm:$0xff]  ;;  %v10175_v56 = vld [vmem:[#allocation54_spill] sm:$0xff] }
 0x969   :  { %v8715_v51 = vld [vmem:[#allocation7 + $0xc4] ss:$16 sps:$4 sm:$0xff]   ;;  %v8718_v5 = vld [vmem:[#allocation7 + $0xcc] ss:$16 sps:$4 sm:$0xff]  }
 0x96a   :  { %v3426_v63 = vpack.c.bf16 %v3231_v0, %v3231_v0  ;;  %10209 = vst [vmem:[#allocation91_spill] sm:$0xff] %v8715_v51  ;;  %10210 = vst [vmem:[#allocation92_spill] sm:$0xff] %v8718_v5  ;;  %v8721_v0 = vld [vmem:[#allocation7 + $0xc0] ss:$16 sps:$4 sm:$0xff]  }
 0x96b   :  { %3432 = vmatpush1.bf16.msra.mxu0 %v8226_v17  ;;  %3473 = vmatpush1.bf16.msra.mxu1 %v8229_v32  ;;  %v8573_v17 = vld [vmem:[#allocation4 + $0x40] ss:$16 sps:$4 sm:$0xff]   ;;  %v8576_v32 = vld [vmem:[#allocation4 + $0x48] ss:$16 sps:$4 sm:$0xff]   ;;  %10211 = vst [vmem:[#allocation93_spill] sm:$0xff] %v8721_v0 }
 0x96c   :  { %3433 = vmatprep.subr.bf16.mxu0 %v8232_v19  ;;  %3474 = vmatprep.subr.bf16.mxu1 %v8235_v18  ;;  %v8579_v19 = vld [vmem:[#allocation4 + $0x64] ss:$16 sps:$4 sm:$0xff]   ;;  %v8582_v18 = vld [vmem:[#allocation4 + $0x6c] ss:$16 sps:$4 sm:$0xff]  }
 0x96d   :  { %10176 = vst [vmem:[#allocation63_spill] sm:$0xff] %v8579_v19 }
 0x96f   :  { %3434 = vmatpush1.bf16.msra.mxu0 %v10117_v50  ;;  %3475 = vmatpush1.bf16.msra.mxu1 %v10118_v46  ;;  %v8600_v50 = vld [vmem:[#allocation4 + $0x88] ss:$16 sps:$4 sm:$0xff]   ;;  %v8603_v46 = vld [vmem:[#allocation4 + $0xa4] ss:$16 sps:$4 sm:$0xff]  }
 0x970   :  { %3435 = vmatprep.subr.bf16.mxu0 %v10119_v26  ;;  %3476 = vmatprep.subr.bf16.mxu1 %v10120_v2  ;;  %10180 = vst [vmem:[#allocation59_spill] sm:$0xff] %v8603_v46  ;;  %v8606_v26 = vld [vmem:[#allocation4 + $0xac] ss:$16 sps:$4 sm:$0xff]   ;;  %v8609_v2 = vld [vmem:[#allocation4 + $0xa0] ss:$16 sps:$4 sm:$0xff]  }
 0x971   :  { %10181 = vst [vmem:[#allocation60_spill] sm:$0xff] %v8609_v2 }
 0x973   :  { %3436 = vmatpush1.bf16.msra.mxu0 %v10121_v7  ;;  %3477 = vmatpush1.bf16.msra.mxu1 %v10122_v34  ;;  %v8612_v7 = vld [vmem:[#allocation4 + $0xa8] ss:$16 sps:$4 sm:$0xff]   ;;  %v8615_v34 = vld [vmem:[#allocation4 + $0xc4] ss:$16 sps:$4 sm:$0xff]  }
 0x974   :  { %3437 = vmatprep.subr.bf16.mxu0 %v10123_v36  ;;  %3478 = vmatprep.subr.bf16.mxu1 %v10124_v20  ;;  %10182 = vst [vmem:[#allocation67_spill] sm:$0xff] %v8612_v7  ;;  %10183 = vst [vmem:[#allocation68_spill] sm:$0xff] %v8615_v34  ;;  %v8618_v36 = vld [vmem:[#allocation4 + $0xcc] ss:$16 sps:$4 sm:$0xff]   ;;  %v8621_v20 = vld [vmem:[#allocation4 + $0xc0] ss:$16 sps:$4 sm:$0xff]  }
 0x975   :  { %10184 = vst [vmem:[#allocation69_spill] sm:$0xff] %v8618_v36  ;;  %10185 = vst [vmem:[#allocation70_spill] sm:$0xff] %v8621_v20 }
 0x977   :  { %3438 = vmatpush1.bf16.msra.mxu0 %v10125_v40  ;;  %3479 = vmatpush1.bf16.msra.mxu1 %v10126_v42  ;;  %v8624_v40 = vld [vmem:[#allocation4 + $0xc8] ss:$16 sps:$4 sm:$0xff]   ;;  %v8627_v42 = vld [vmem:[#allocation4 + $0xe4] ss:$16 sps:$4 sm:$0xff]  }
 0x978   :  { %3439 = vmatprep.subr.bf16.mxu0 %v10127_v6  ;;  %3480 = vmatprep.subr.bf16.mxu1 %v10128_v22  ;;  %10186 = vst [vmem:[#allocation71_spill] sm:$0xff] %v8624_v40  ;;  %10187 = vst [vmem:[#allocation72_spill] sm:$0xff] %v8627_v42  ;;  %v8630_v6 = vld [vmem:[#allocation4 + $0xec] ss:$16 sps:$4 sm:$0xff]   ;;  %v8633_v22 = vld [vmem:[#allocation4 + $0xe0] ss:$16 sps:$4 sm:$0xff]  }
 0x979   :  { %10188 = vst [vmem:[#allocation73_spill] sm:$0xff] %v8630_v6  ;;  %10189 = vst [vmem:[#allocation74_spill] sm:$0xff] %v8633_v22 }
 0x97b   :  { %3440 = vmatpush1.bf16.msra.mxu0 %v10129_v28  ;;  %3481 = vmatpush1.bf16.msra.mxu1 %v8278_v37  ;;  %v8594_v37 = vld [vmem:[#allocation4 + $0x8c] ss:$16 sps:$4 sm:$0xff]   ;;  %v8636_v28 = vld [vmem:[#allocation4 + $0xe8] ss:$16 sps:$4 sm:$0xff]  }
 0x97c   :  { %3441 = vmatprep.subr.bf16.mxu0 %v8281_v12  ;;  %3482 = vmatprep.subr.bf16.mxu1 %v8284_v15  ;;  %v8585_v12 = vld [vmem:[#allocation4 + $0x60] ss:$16 sps:$4 sm:$0xff]   ;;  %v8588_v15 = vld [vmem:[#allocation4 + $0x68] ss:$16 sps:$4 sm:$0xff]   ;;  %10190 = vst [vmem:[#allocation40_spill] sm:$0xff] %v8636_v28 }
 0x97d   :  { %10177 = vst [vmem:[#allocation64_spill] sm:$0xff] %v8585_v12 }
 0x97f   :  { %3442 = vmatpush1.bf16.msra.mxu0 %v8287_v8  ;;  %3483 = vmatpush1.bf16.msra.mxu1 %v8290_v39  ;;  %v8591_v8 = vld [vmem:[#allocation4 + $0x84] ss:$16 sps:$4 sm:$0xff]   ;;  %v8597_v39 = vld [vmem:[#allocation4 + $0x80] ss:$16 sps:$4 sm:$0xff]  }
 0x980   :  { %3538 = vmatprep.subr.bf16.mxu0 %v8417_v61  ;;  %3579 = vmatprep.subr.bf16.mxu1 %v8420_v60  ;;  %10178 = vst [vmem:[#allocation65_spill] sm:$0xff] %v8591_v8  ;;  %10179 = vst [vmem:[#allocation66_spill] sm:$0xff] %v8597_v39 }
 0x982   :  { %3460 = vmatmul.mubr.bf16.vlgmr.msra.gmra.mrb[68].mxu0 %v3426_v63  ;;  %3501 = vmatmul.mubr.bf16.vlgmr.msra.gmra.mrb[76].mxu1 %v3426_v63  ;;  %v8724_v63 = vld [vmem:[#allocation7 + $0xc8] ss:$16 sps:$4 sm:$0xff]  }
 0x983   :  { %3539 = vmatpush1.bf16.msra.mxu0 %v8423_v16  ;;  %3580 = vmatpush1.bf16.msra.mxu1 %v10174_v52  ;;  %10212 = vst [vmem:[#allocation14_spill] sm:$0xff] %v8724_v63 }
 0x984   :  { %3540 = vmatprep.subr.bf16.mxu0 %v10175_v56  ;;  %3581 = vmatprep.subr.bf16.mxu1 %v8432_v35 }
 0x985   :  { %3570 = vmatprep.mubr.bf16.mxu0 %v9921_v59  ;;  %3611 = vmatprep.mubr.bf16.mxu1 %v9921_v59 }
 0x987   :  { %3541 = vmatpush1.bf16.msra.mxu0 %v8437_v11  ;;  %3582 = vmatpush1.bf16.msra.mxu1 %v8440_v13 }
 0x988   :  { %3542 = vmatprep.subr.bf16.mxu0 %v8443_v4  ;;  %3583 = vmatprep.subr.bf16.mxu1 %v8446_v53 }
 0x98b   :  { %3543 = vmatpush1.bf16.msra.mxu0 %v8573_v17  ;;  %3584 = vmatpush1.bf16.msra.mxu1 %v8576_v32 }
 0x98c   :  { %3544 = vmatprep.subr.bf16.mxu0 %v8579_v19  ;;  %3585 = vmatprep.subr.bf16.mxu1 %v8582_v18 }
 0x98f   :  { %3545 = vmatpush1.bf16.msra.mxu0 %v8585_v12  ;;  %3586 = vmatpush1.bf16.msra.mxu1 %v8588_v15 }
 0x990   :  { %3546 = vmatprep.subr.bf16.mxu0 %v8591_v8  ;;  %3587 = vmatprep.subr.bf16.mxu1 %v8594_v37 }
 0x993   :  { %3547 = vmatpush1.bf16.msra.mxu0 %v8597_v39  ;;  %3588 = vmatpush1.bf16.msra.mxu1 %v8600_v50 }
 0x994   :  { %3548 = vmatprep.subr.bf16.mxu0 %v8603_v46  ;;  %3589 = vmatprep.subr.bf16.mxu1 %v8606_v26 }
 0x997   :  { %3549 = vmatpush1.bf16.msra.mxu0 %v8609_v2  ;;  %3590 = vmatpush1.bf16.msra.mxu1 %v8612_v7 }
 0x998   :  { %3550 = vmatprep.subr.bf16.mxu0 %v8615_v34  ;;  %3591 = vmatprep.subr.bf16.mxu1 %v8618_v36 }
 0x99b   :  { %3551 = vmatpush1.bf16.msra.mxu0 %v8621_v20  ;;  %3592 = vmatpush1.bf16.msra.mxu1 %v8624_v40 }
 0x99c   :  { %3552 = vmatprep.subr.bf16.mxu0 %v8627_v42  ;;  %3593 = vmatprep.subr.bf16.mxu1 %v8630_v6 }
 0x99f   :  { %3553 = vmatpush1.bf16.msra.mxu0 %v8633_v22  ;;  %3594 = vmatpush1.bf16.msra.mxu1 %v8636_v28 }
 0x9a0   :  { %3643 = vmatprep.subr.bf16.mxu0 %v8639_v30  ;;  %3684 = vmatprep.subr.bf16.mxu1 %v8642_v29 }
 0x9a2   :  { %3571 = vmatmul.mubr.bf16.vlgmr.msra.gmra.mrb[72].mxu0 %v8523_v38  ;;  %3612 = vmatmul.mubr.bf16.vlgmr.msra.gmra.mrb[80].mxu1 %v8523_v38  ;;  %v8700_v38 = vld [vmem:[#allocation7 + $0x88] ss:$16 sps:$4 sm:$0xff]  }
 0x9a3   :  { %3644 = vmatpush1.bf16.msra.mxu0 %v8647_v33  ;;  %3685 = vmatpush1.bf16.msra.mxu1 %v8650_v23  ;;  %10204 = vst [vmem:[#allocation62_spill] sm:$0xff] %v8700_v38 }
 0x9a4   :  { %3645 = vmatprep.subr.bf16.mxu0 %v8653_v24  ;;  %3686 = vmatprep.subr.bf16.mxu1 %v8656_v62 }
 0x9a5   :  { %3675 = vmatprep.mubr.bf16.mxu0 %v9921_v59  ;;  %3716 = vmatprep.mubr.bf16.mxu1 %v9921_v59 }
 0x9a7   :  { %3646 = vmatpush1.bf16.msra.mxu0 %v8661_v10  ;;  %3687 = vmatpush1.bf16.msra.mxu1 %v8664_v45 }
 0x9a8   :  { %3647 = vmatprep.subr.bf16.mxu0 %v8667_v49  ;;  %3688 = vmatprep.subr.bf16.mxu1 %v8670_v21 }
 0x9ab   :  { %3648 = vmatpush1.bf16.msra.mxu0 %v8673_v43  ;;  %3689 = vmatpush1.bf16.msra.mxu1 %v8676_v47 }
 0x9ac   :  { %3649 = vmatprep.subr.bf16.mxu0 %v8679_v55  ;;  %3690 = vmatprep.subr.bf16.mxu1 %v8682_v48 }
 0x9af   :  { %3650 = vmatpush1.bf16.msra.mxu0 %v8685_v54  ;;  %3691 = vmatpush1.bf16.msra.mxu1 %v8688_v44 }
 0x9b0   :  { %3651 = vmatprep.subr.bf16.mxu0 %v8691_v58  ;;  %3692 = vmatprep.subr.bf16.mxu1 %v8694_v27  ;;  %v10220_v27 = vld [vmem:[#allocation95_spill] sm:$0xff] }
 0x9b3   :  { %3652 = vmatpush1.bf16.msra.mxu0 %v8697_v1  ;;  %3693 = vmatpush1.bf16.msra.mxu1 %v8700_v38 }
 0x9b4   :  { %3653 = vmatprep.subr.bf16.mxu0 %v8703_v25  ;;  %3694 = vmatprep.subr.bf16.mxu1 %v8706_v9  ;;  %v10219_v25 = vld [vmem:[#allocation94_spill] sm:$0xff] }
 0x9b7   :  { %3654 = vmatpush1.bf16.msra.mxu0 %v8709_v14  ;;  %3695 = vmatpush1.bf16.msra.mxu1 %v8712_v3  ;;  %v8727_v14 = vld [vmem:[#allocation7 + $0xe4] ss:$16 sps:$4 sm:$0xff]   ;;  %v8730_v3 = vld [vmem:[#allocation7 + $0xec] ss:$16 sps:$4 sm:$0xff]  }
 0x9b8   :  { %3655 = vmatprep.subr.bf16.mxu0 %v8715_v51  ;;  %3696 = vmatprep.subr.bf16.mxu1 %v8718_v5  ;;  %10213 = vst [vmem:[#allocation15_spill] sm:$0xff] %v8727_v14  ;;  %10214 = vst [vmem:[#allocation16_spill] sm:$0xff] %v8730_v3  ;;  %v8733_v51 = vld [vmem:[#allocation7 + $0xe0] ss:$16 sps:$4 sm:$0xff]   ;;  %v8736_v5 = vld [vmem:[#allocation7 + $0xe8] ss:$16 sps:$4 sm:$0xff]  }
 0x9b9   :  { %10215 = vst [vmem:[#allocation17_spill] sm:$0xff] %v8733_v51  ;;  %10216 = vst [vmem:[#allocation18_spill] sm:$0xff] %v8736_v5 }
 0x9bb   :  { %3656 = vmatpush1.bf16.msra.mxu0 %v8721_v0  ;;  %3697 = vmatpush1.bf16.msra.mxu1 %v8724_v63  ;;  %v8739_v0 = vld [vmem:[#allocation9 + $0x4] ss:$16 sps:$4 sm:$0xff]   ;;  %v8742_v63 = vld [vmem:[#allocation9 + $0xc] ss:$16 sps:$4 sm:$0xff]  }
 0x9bc   :  { %3657 = vmatprep.subr.bf16.mxu0 %v8727_v14  ;;  %3698 = vmatprep.subr.bf16.mxu1 %v8730_v3  ;;  %10217 = vst [vmem:[#allocation19_spill] sm:$0xff] %v8739_v0  ;;  %10218 = vst [vmem:[#allocation20_spill] sm:$0xff] %v8742_v63 }
 0x9bf   :  { %3658 = vmatpush1.bf16.msra.mxu0 %v8733_v51  ;;  %3699 = vmatpush1.bf16.msra.mxu1 %v8736_v5 }
 0x9c0   :  { %3726 = vmatprep.subr.bf16.mxu0 %v8739_v0  ;;  %3767 = vmatprep.subr.bf16.mxu1 %v8742_v63  ;;  %v10221_v0 = vld [vmem:[#allocation96_spill] sm:$0xff] }
 0xa55   :  { %v3461_v14 = vpop.f32.mrb[68].mxu0  ;;  %v3502_v9 = vpop.f32.mrb[76].mxu1 }
 0xa56   :  { %v6098_v3 = vadd.f32 %v3461_v14, %v10219_v25  ;;  %v3463_v38 = vpop.f32.mrb[69].mxu0  ;;  %v3504_v1 = vpop.f32.mrb[77].mxu1  ;;  %v6100_v47 = vadd.f32 %v3502_v9, %v10221_v0 }
 0xa57   :  { %v6099_v51 = vadd.f32 %v3463_v38, %v10220_v27  ;;  %v3465_v58 = vpop.f32.mrb[70].mxu0  ;;  %v3506_v44 = vpop.f32.mrb[78].mxu1 }
 0xa58   :  { %v3513_v54 = vmul.f32 0.5, %v6098_v3  ;;  %v3466_v5 = vpop.f32.mrb[71].mxu0  ;;  %v3507_v48 = vpop.f32.mrb[79].mxu1  ;;  %v10222_v3 = vld [vmem:[#allocation79_spill] sm:$0xff] }
 0xa59   :  { %v3517_v55 = vmul.f32 0.5, %v6099_v51  ;;  %v10223_v51 = vld [vmem:[#allocation80_spill] sm:$0xff]  ;;  %v10224_v5 = vld [vmem:[#allocation81_spill] sm:$0xff] }
 0xa5a   :  { %6536 = vtanh.f32 %v3513_v54 }
 0xa5b   :  { %6538 = vtanh.f32 %v3517_v55 }
 0xa5c   :  { %6540 = vtanh.f32 %v6100_v47 }
 0xa64   :  { %v6537_v63 = vpop.eup %6536 }
 0xa65   :  { %v6539_v43 = vpop.eup %6538  ;;  %v3515_v21 = vmul.f32 0.5, %v6537_v63  ;;  %v10225_v63 = vld [vmem:[#allocation82_spill] sm:$0xff] }
 0xa66   :  { %v3519_v49 = vmul.f32 0.5, %v6539_v43  ;;  %v6541_v25 = vpop.eup %6540 }
 0xa67   :  { %v3516_v14 = vadd.f32 0.5, %v3515_v21 }
 0xa68   :  { %v3520_v45 = vadd.f32 0.5, %v3519_v49 }
 0xa69   :  { %v3527_v10 = vmul.f32 %v6541_v25, %v3516_v14 }
 0xa6a   :  { %v3526_v58 = vmul.f32 %v3520_v45, %v8513_v57 }
 0xa6c   :  { %v8749_v44 = vadd.f32 %v3527_v10, %v3526_v58 }
 0xa75   :  { %v3572_v38 = vpop.f32.mrb[72].mxu0  ;;  %v3613_v48 = vpop.f32.mrb[80].mxu1 }
 0xa76   :  { %v3620_v54 = vadd.f32 %v3572_v38, %v10222_v3  ;;  %v3622_v9 = vadd.f32 %v3613_v48, %v10223_v51  ;;  %v3574_v55 = vpop.f32.mrb[73].mxu0  ;;  %v3615_v47 = vpop.f32.mrb[81].mxu1 }
 0xa77   :  { %v3621_v0 = vadd.f32 %v3574_v55, %v10224_v5  ;;  %v3623_v43 = vadd.f32 %v3615_v47, %v10225_v63  ;;  %v3576_v21 = vpop.f32.mrb[74].mxu0  ;;  %v3617_v27 = vpop.f32.mrb[82].mxu1 }
 0xa78   :  { %v3624_v49 = vmul.f32 0.5, %v3620_v54  ;;  %v3577_v25 = vpop.f32.mrb[75].mxu0  ;;  %v3618_v14 = vpop.f32.mrb[83].mxu1 }
 0xa79   :  { %v3628_v57 = vmul.f32 0.5, %v3621_v0  ;;  %v3633_v10 = vmul.f32 0.5, %v3623_v43  ;;  %v8764_v25 = vld [vmem:[#allocation9] ss:$16 sps:$4 sm:$0xff]   ;;  %v8770_v14 = vld [vmem:[#allocation9 + $0x24] ss:$16 sps:$4 sm:$0xff]  }
 0xa7a   :  { %6542 = vtanh.f32 %v3624_v49  ;;  %v6101_v49 = vadd.f32 %v3504_v1, %v7813_v31 }
 0xa7b   :  { %6544 = vtanh.f32 %v3628_v57  ;;  %v8773_v57 = vld [vmem:[#allocation9 + $0x2c] ss:$16 sps:$4 sm:$0xff]  }
 0xa7c   :  { %6546 = vtanh.f32 %v3622_v9  ;;  %10227 = vst [vmem:[#allocation22_spill] sm:$0xff] %v8773_v57  ;;  %v3522_v1 = vmul.f32 0.5, %v6101_v49  ;;  %v8821_v49 = vld [vmem:[#allocation9 + $0xa4] ss:$16 sps:$4 sm:$0xff]  }
 0xa7d   :  { %6548 = vtanh.f32 %v3633_v10  ;;  %v8778_v10 = vld [vmem:[#allocation9 + $0x20] ss:$16 sps:$4 sm:$0xff]   ;;  %10238 = vst [vmem:[#allocation33_spill] sm:$0xff] %v8821_v49 }
 0xa84   :  { %v6543_v45 = vpop.eup %6542 }
 0xa85   :  { %v6545_v58 = vpop.eup %6544  ;;  %v3626_v38 = vmul.f32 0.5, %v6543_v45  ;;  %v8781_v45 = vld [vmem:[#allocation9 + $0x28] ss:$16 sps:$4 sm:$0xff]  }
 0xa86   :  { %v3630_v48 = vmul.f32 0.5, %v6545_v58  ;;  %v6547_v51 = vpop.eup %6546  ;;  %10228 = vst [vmem:[#allocation23_spill] sm:$0xff] %v8781_v45  ;;  %v8784_v58 = vld [vmem:[#allocation9 + $0x44] ss:$16 sps:$4 sm:$0xff]  }
 0xa87   :  { %v3627_v3 = vadd.f32 0.5, %v3626_v38  ;;  %v6549_v0 = vpop.eup %6548  ;;  %v8787_v38 = vld [vmem:[#allocation9 + $0x4c] ss:$16 sps:$4 sm:$0xff]  }
 0xa88   :  { %v3631_v55 = vadd.f32 0.5, %v3630_v48  ;;  %v3635_v54 = vmul.f32 0.5, %v6549_v0  ;;  %10229 = vst [vmem:[#allocation24_spill] sm:$0xff] %v8787_v38  ;;  %v8790_v48 = vld [vmem:[#allocation9 + $0x40] ss:$16 sps:$4 sm:$0xff]  }
 0xa89   :  { %v3638_v5 = vmul.f32 %v6547_v51, %v3627_v3  ;;  %v8793_v3 = vld [vmem:[#allocation9 + $0x48] ss:$16 sps:$4 sm:$0xff]   ;;  %v8796_v51 = vld [vmem:[#allocation9 + $0x64] ss:$16 sps:$4 sm:$0xff]  }
 0xa8a   :  { %v3637_v47 = vmul.f32 %v3631_v55, %v8520_v41  ;;  %v3636_v63 = vadd.f32 0.5, %v3635_v54  ;;  %v8767_v41 = vld [vmem:[#allocation9 + $0x8] ss:$16 sps:$4 sm:$0xff]   ;;  %10230 = vst [vmem:[#allocation25_spill] sm:$0xff] %v8793_v3  ;;  %v8799_v55 = vld [vmem:[#allocation9 + $0x6c] ss:$16 sps:$4 sm:$0xff]  }
 0xa8b   :  { %10226 = vst [vmem:[#allocation21_spill] sm:$0xff] %v8767_v41  ;;  %10231 = vst [vmem:[#allocation26_spill] sm:$0xff] %v8799_v55  ;;  %v8809_v0 = vld [vmem:[#allocation9 + $0x84] ss:$16 sps:$4 sm:$0xff]   ;;  %v8812_v54 = vld [vmem:[#allocation9 + $0x8c] ss:$16 sps:$4 sm:$0xff]  }
 0xa8c   :  { %v8756_v27 = vadd.f32 %v3638_v5, %v3637_v47  ;;  %v8803_v5 = vld [vmem:[#allocation9 + $0x60] ss:$16 sps:$4 sm:$0xff]   ;;  %v8806_v47 = vld [vmem:[#allocation9 + $0x68] ss:$16 sps:$4 sm:$0xff]   ;;  %10234 = vst [vmem:[#allocation29_spill] sm:$0xff] %v8809_v0  ;;  %10235 = vst [vmem:[#allocation30_spill] sm:$0xff] %v8812_v54 }
 0xa8d   :  { %10232 = vst [vmem:[#allocation27_spill] sm:$0xff] %v8803_v5  ;;  %10233 = vst [vmem:[#allocation28_spill] sm:$0xff] %v8806_v47 }
 0xa8e   :  { %6550 = vtanh.f32 %v8756_v27 }
 0xa8f   :  { %6552 = vtanh.f32 %v3522_v1  ;;  %v8824_v1 = vld [vmem:[#allocation9 + $0xac] ss:$16 sps:$4 sm:$0xff]  }
 0xa90   :  { %6554 = vtanh.f32 %v8749_v44  ;;  %10239 = vst [vmem:[#allocation34_spill] sm:$0xff] %v8824_v1 }
 0xa98   :  { %v6551_v9 = vpop.eup %6550 }
 0xa99   :  { %v3641_v43 = vmul.f32 %v6551_v9, %v3636_v63  ;;  %v6553_v63 = vpop.eup %6552  ;;  %v8815_v9 = vld [vmem:[#allocation9 + $0x80] ss:$16 sps:$4 sm:$0xff]  }
 0xa9a   :  { %10236 = vst [vmem:[#allocation31_spill] sm:$0xff] %v8815_v9 }
 0xa9b   :  { %v8759_v21 = vpack.c.bf16 %v3641_v43, %v3641_v43  ;;  %v8818_v43 = vld [vmem:[#allocation9 + $0x88] ss:$16 sps:$4 sm:$0xff]  }
 0xa9c   :  { %10237 = vst [vmem:[#allocation32_spill] sm:$0xff] %v8818_v43 }
 0xa9d   :  { %3676 = vmatmul.mubr.bf16.vlgmr.msra.gmra.mrb[76].mxu0 %v8759_v21  ;;  %3717 = vmatmul.mubr.bf16.vlgmr.msra.gmra.mrb[84].mxu1 %v8759_v21 }
 0xa9e   :  { %3727 = vmatpush1.bf16.msra.mxu0 %v8764_v25  ;;  %3768 = vmatpush1.bf16.msra.mxu1 %v8767_v41 }
 0xa9f   :  { %3728 = vmatprep.subr.bf16.mxu0 %v8770_v14  ;;  %3769 = vmatprep.subr.bf16.mxu1 %v8773_v57 }
 0xaa0   :  { %3758 = vmatprep.mubr.bf16.mxu0 %v9921_v59  ;;  %3799 = vmatprep.mubr.bf16.mxu1 %v9921_v59 }
 0xaa2   :  { %3729 = vmatpush1.bf16.msra.mxu0 %v8778_v10  ;;  %3770 = vmatpush1.bf16.msra.mxu1 %v8781_v45 }
 0xaa3   :  { %3730 = vmatprep.subr.bf16.mxu0 %v8784_v58  ;;  %3771 = vmatprep.subr.bf16.mxu1 %v8787_v38 }
 0xaa6   :  { %3731 = vmatpush1.bf16.msra.mxu0 %v8790_v48  ;;  %3772 = vmatpush1.bf16.msra.mxu1 %v8793_v3 }
 0xaa7   :  { %3732 = vmatprep.subr.bf16.mxu0 %v8796_v51  ;;  %3773 = vmatprep.subr.bf16.mxu1 %v8799_v55 }
 0xaaa   :  { %3733 = vmatpush1.bf16.msra.mxu0 %v8803_v5  ;;  %3774 = vmatpush1.bf16.msra.mxu1 %v8806_v47  ;;  %v8827_v47 = vld [vmem:[#allocation9 + $0xa0] ss:$16 sps:$4 sm:$0xff]  }
 0xaab   :  { %3734 = vmatprep.subr.bf16.mxu0 %v8809_v0  ;;  %3775 = vmatprep.subr.bf16.mxu1 %v8812_v54  ;;  %v3524_v0 = vmul.f32 0.5, %v6553_v63  ;;  %10240 = vst [vmem:[#allocation35_spill] sm:$0xff] %v8827_v47  ;;  %v8830_v54 = vld [vmem:[#allocation9 + $0xa8] ss:$16 sps:$4 sm:$0xff]  }
 0xaac   :  { %10241 = vst [vmem:[#allocation36_spill] sm:$0xff] %v8830_v54  ;;  %v8842_v63 = vld [vmem:[#allocation9 + $0xc8] ss:$16 sps:$4 sm:$0xff]  }
 0xaad   :  { %v3525_v5 = vadd.f32 0.5, %v3524_v0  ;;  %10245 = vst [vmem:[#allocation75_spill] sm:$0xff] %v8842_v63  ;;  %v8854_v0 = vld [vmem:[#allocation9 + $0xe8] ss:$16 sps:$4 sm:$0xff]  }
 0xaae   :  { %3735 = vmatpush1.bf16.msra.mxu0 %v8815_v9  ;;  %3776 = vmatpush1.bf16.msra.mxu1 %v8818_v43  ;;  %v8833_v9 = vld [vmem:[#allocation9 + $0xc4] ss:$16 sps:$4 sm:$0xff]   ;;  %v8836_v43 = vld [vmem:[#allocation9 + $0xcc] ss:$16 sps:$4 sm:$0xff]   ;;  %10249 = vst [vmem:[#allocation53_spill] sm:$0xff] %v8854_v0 }
 0xaaf   :  { %3736 = vmatprep.subr.bf16.mxu0 %v8821_v49  ;;  %3777 = vmatprep.subr.bf16.mxu1 %v8824_v1  ;;  %10242 = vst [vmem:[#allocation37_spill] sm:$0xff] %v8833_v9  ;;  %10243 = vst [vmem:[#allocation38_spill] sm:$0xff] %v8836_v43  ;;  %v6555_v49 = vpop.eup %6554  ;;  %v8839_v1 = vld [vmem:[#allocation9 + $0xc0] ss:$16 sps:$4 sm:$0xff]  }
 0xab0   :  { %10244 = vst [vmem:[#allocation39_spill] sm:$0xff] %v8839_v1 }
 0xab2   :  { %3737 = vmatpush1.bf16.msra.mxu0 %v8827_v47  ;;  %3778 = vmatpush1.bf16.msra.mxu1 %v8830_v54  ;;  %v3530_v47 = vmul.f32 %v6555_v49, %v3525_v5  ;;  %v8845_v54 = vld [vmem:[#allocation9 + $0xe4] ss:$16 sps:$4 sm:$0xff]   ;;  %v10269_v5 = vld [vmem:[#allocation92_spill] sm:$0xff]  ;;  %v10271_v49 = vld [vmem:[#allocation14_spill] sm:$0xff] }
 0xab3   :  { %3738 = vmatprep.subr.bf16.mxu0 %v8833_v9  ;;  %3779 = vmatprep.subr.bf16.mxu1 %v8836_v43  ;;  %10246 = vst [vmem:[#allocation76_spill] sm:$0xff] %v8845_v54  ;;  %v8848_v9 = vld [vmem:[#allocation9 + $0xec] ss:$16 sps:$4 sm:$0xff]   ;;  %v8851_v43 = vld [vmem:[#allocation9 + $0xe0] ss:$16 sps:$4 sm:$0xff]  }
 0xab4   :  { %10247 = vst [vmem:[#allocation77_spill] sm:$0xff] %v8848_v9  ;;  %10248 = vst [vmem:[#allocation78_spill] sm:$0xff] %v8851_v43 }
 0xab6   :  { %3739 = vmatpush1.bf16.msra.mxu0 %v8839_v1  ;;  %3780 = vmatpush1.bf16.msra.mxu1 %v8842_v63  ;;  %v3725_v1 = vpack.c.bf16 %v3530_v47, %v3530_v47  ;;  %v10270_v47 = vld [vmem:[#allocation93_spill] sm:$0xff] }
 0xab7   :  { %3740 = vmatprep.subr.bf16.mxu0 %v8845_v54  ;;  %3781 = vmatprep.subr.bf16.mxu1 %v8848_v9 }
 0xaba   :  { %3741 = vmatpush1.bf16.msra.mxu0 %v8851_v43  ;;  %3782 = vmatpush1.bf16.msra.mxu1 %v8854_v0 }
 0xabb   :  { %3837 = vmatprep.subr.bf16.mxu0 %v8417_v61  ;;  %3878 = vmatprep.subr.bf16.mxu1 %v8420_v60  ;;  %v10250_v61 = vld [vmem:[#allocation41_spill] sm:$0xff]  ;;  %v10251_v60 = vld [vmem:[#allocation42_spill] sm:$0xff] }
 0xabd   :  { %3759 = vmatmul.mubr.bf16.vlgmr.msra.gmra.mrb[76].mxu0 %v3725_v1  ;;  %3800 = vmatmul.mubr.bf16.vlgmr.msra.gmra.mrb[84].mxu1 %v3725_v1  ;;  %v10272_v1 = vld [vmem:[#allocation15_spill] sm:$0xff] }
 0xabe   :  { %3838 = vmatpush1.bf16.msra.mxu0 %v8423_v16  ;;  %3879 = vmatpush1.bf16.msra.mxu1 %v10174_v52  ;;  %v10252_v16 = vld [vmem:[#allocation43_spill] sm:$0xff]  ;;  %v10258_v52 = vld [vmem:[#allocation49_spill] sm:$0xff] }
 0xabf   :  { %3839 = vmatprep.subr.bf16.mxu0 %v10175_v56  ;;  %3880 = vmatprep.subr.bf16.mxu1 %v8432_v35  ;;  %v10255_v35 = vld [vmem:[#allocation46_spill] sm:$0xff] }
 0xac0   :  { %3869 = vmatprep.mubr.bf16.mxu0 %v9921_v59  ;;  %3910 = vmatprep.mubr.bf16.mxu1 %v9921_v59  ;;  %v10259_v56 = vld [vmem:[#allocation50_spill] sm:$0xff] }
 0xac2   :  { %3840 = vmatpush1.bf16.msra.mxu0 %v8437_v11  ;;  %3881 = vmatpush1.bf16.msra.mxu1 %v8440_v13  ;;  %v10256_v11 = vld [vmem:[#allocation47_spill] sm:$0xff]  ;;  %v10257_v13 = vld [vmem:[#allocation48_spill] sm:$0xff] }
 0xac3   :  { %3841 = vmatprep.subr.bf16.mxu0 %v8443_v4  ;;  %3882 = vmatprep.subr.bf16.mxu1 %v8446_v53  ;;  %v10253_v4 = vld [vmem:[#allocation44_spill] sm:$0xff]  ;;  %v10254_v53 = vld [vmem:[#allocation45_spill] sm:$0xff] }
 0xac6   :  { %3842 = vmatpush1.bf16.msra.mxu0 %v8573_v17  ;;  %3883 = vmatpush1.bf16.msra.mxu1 %v8576_v32  ;;  %v10260_v32 = vld [vmem:[#allocation51_spill] sm:$0xff] }
 0xac7   :  { %3843 = vmatprep.subr.bf16.mxu0 %v8579_v19  ;;  %3884 = vmatprep.subr.bf16.mxu1 %v8582_v18  ;;  %v10261_v18 = vld [vmem:[#allocation52_spill] sm:$0xff] }
 0xaca   :  { %3844 = vmatpush1.bf16.msra.mxu0 %v8585_v12  ;;  %3885 = vmatpush1.bf16.msra.mxu1 %v8588_v15  ;;  %v10262_v15 = vld [vmem:[#allocation61_spill] sm:$0xff] }
 0xacb   :  { %3845 = vmatprep.subr.bf16.mxu0 %v8591_v8  ;;  %3886 = vmatprep.subr.bf16.mxu1 %v8594_v37  ;;  %v10263_v37 = vld [vmem:[#allocation62_spill] sm:$0xff] }
 0xace   :  { %3846 = vmatpush1.bf16.msra.mxu0 %v8597_v39  ;;  %3887 = vmatpush1.bf16.msra.mxu1 %v8600_v50  ;;  %v10264_v50 = vld [vmem:[#allocation87_spill] sm:$0xff] }
 0xacf   :  { %3847 = vmatprep.subr.bf16.mxu0 %v8603_v46  ;;  %3888 = vmatprep.subr.bf16.mxu1 %v8606_v26  ;;  %v10265_v26 = vld [vmem:[#allocation88_spill] sm:$0xff] }
 0xad2   :  { %3848 = vmatpush1.bf16.msra.mxu0 %v8609_v2  ;;  %3889 = vmatpush1.bf16.msra.mxu1 %v8612_v7 }
 0xad3   :  { %3849 = vmatprep.subr.bf16.mxu0 %v8615_v34  ;;  %3890 = vmatprep.subr.bf16.mxu1 %v8618_v36 }
 0xad6   :  { %3850 = vmatpush1.bf16.msra.mxu0 %v8621_v20  ;;  %3891 = vmatpush1.bf16.msra.mxu1 %v8624_v40 }
 0xad7   :  { %3851 = vmatprep.subr.bf16.mxu0 %v8627_v42  ;;  %3892 = vmatprep.subr.bf16.mxu1 %v8630_v6  ;;  %v10279_v6 = vld [vmem:[#allocation95_spill] sm:$0xff] }
 0xada   :  { %3852 = vmatpush1.bf16.msra.mxu0 %v8633_v22  ;;  %3893 = vmatpush1.bf16.msra.mxu1 %v8636_v28 }
 0xadb   :  { %3942 = vmatprep.subr.bf16.mxu0 %v8639_v30  ;;  %3983 = vmatprep.subr.bf16.mxu1 %v8642_v29 }
 0xadd   :  { %3870 = vmatmul.mubr.bf16.vlgmr.msra.gmra.mrb[80].mxu0 %v8759_v21  ;;  %3911 = vmatmul.mubr.bf16.vlgmr.msra.gmra.mrb[88].mxu1 %v8759_v21  ;;  %v10268_v21 = vld [vmem:[#allocation91_spill] sm:$0xff] }
 0xade   :  { %3943 = vmatpush1.bf16.msra.mxu0 %v8647_v33  ;;  %3984 = vmatpush1.bf16.msra.mxu1 %v8650_v23  ;;  %v10266_v23 = vld [vmem:[#allocation89_spill] sm:$0xff] }
 0xadf   :  { %3944 = vmatprep.subr.bf16.mxu0 %v8653_v24  ;;  %3985 = vmatprep.subr.bf16.mxu1 %v8656_v62  ;;  %v10267_v62 = vld [vmem:[#allocation90_spill] sm:$0xff] }
 0xae0   :  { %3974 = vmatprep.mubr.bf16.mxu0 %v9921_v59  ;;  %4015 = vmatprep.mubr.bf16.mxu1 %v9921_v59 }
 0xae2   :  { %3945 = vmatpush1.bf16.msra.mxu0 %v10250_v61  ;;  %3986 = vmatpush1.bf16.msra.mxu1 %v10251_v60  ;;  %v10273_v60 = vld [vmem:[#allocation16_spill] sm:$0xff] }
 0xae3   :  { %3946 = vmatprep.subr.bf16.mxu0 %v10252_v16  ;;  %3987 = vmatprep.subr.bf16.mxu1 %v10253_v4  ;;  %v10274_v4 = vld [vmem:[#allocation17_spill] sm:$0xff] }
 0xae6   :  { %3947 = vmatpush1.bf16.msra.mxu0 %v10254_v53  ;;  %3988 = vmatpush1.bf16.msra.mxu1 %v10255_v35  ;;  %v10275_v35 = vld [vmem:[#allocation18_spill] sm:$0xff] }
 0xae7   :  { %3948 = vmatprep.subr.bf16.mxu0 %v10256_v11  ;;  %3989 = vmatprep.subr.bf16.mxu1 %v10257_v13  ;;  %v10276_v13 = vld [vmem:[#allocation19_spill] sm:$0xff] }
 0xaea   :  { %3949 = vmatpush1.bf16.msra.mxu0 %v10258_v52  ;;  %3990 = vmatpush1.bf16.msra.mxu1 %v10259_v56  ;;  %v10277_v56 = vld [vmem:[#allocation20_spill] sm:$0xff] }
 0xaeb   :  { %3950 = vmatprep.subr.bf16.mxu0 %v10260_v32  ;;  %3991 = vmatprep.subr.bf16.mxu1 %v10261_v18 }
 0xaee   :  { %3951 = vmatpush1.bf16.msra.mxu0 %v10262_v15  ;;  %3992 = vmatpush1.bf16.msra.mxu1 %v10263_v37 }
 0xaef   :  { %3952 = vmatprep.subr.bf16.mxu0 %v10264_v50  ;;  %3993 = vmatprep.subr.bf16.mxu1 %v10265_v26  ;;  %v10278_v26 = vld [vmem:[#allocation94_spill] sm:$0xff] }
 0xaf2   :  { %3953 = vmatpush1.bf16.msra.mxu0 %v10266_v23  ;;  %3994 = vmatpush1.bf16.msra.mxu1 %v10267_v62 }
 0xaf3   :  { %3954 = vmatprep.subr.bf16.mxu0 %v10268_v21  ;;  %3995 = vmatprep.subr.bf16.mxu1 %v10269_v5 }
 0xaf6   :  { %3955 = vmatpush1.bf16.msra.mxu0 %v10270_v47  ;;  %3996 = vmatpush1.bf16.msra.mxu1 %v10271_v49 }
 0xaf7   :  { %3956 = vmatprep.subr.bf16.mxu0 %v10272_v1  ;;  %3997 = vmatprep.subr.bf16.mxu1 %v10273_v60 }
 0xafa   :  { %3957 = vmatpush1.bf16.msra.mxu0 %v10274_v4  ;;  %3998 = vmatpush1.bf16.msra.mxu1 %v10275_v35  ;;  %v10280_v35 = vld [vmem:[#allocation96_spill] sm:$0xff] }
 0xafb   :  { %4025 = vmatprep.subr.bf16.mxu0 %v10276_v13  ;;  %4066 = vmatprep.subr.bf16.mxu1 %v10277_v56 }
 0xb90   :  { %v3760_v18 = vpop.f32.mrb[76].mxu0  ;;  %v3801_v37 = vpop.f32.mrb[84].mxu1 }
 0xb91   :  { %v6102_v62 = vadd.f32 %v3760_v18, %v10278_v26  ;;  %v3762_v5 = vpop.f32.mrb[77].mxu0  ;;  %v3803_v28 = vpop.f32.mrb[85].mxu1  ;;  %v6104_v20 = vadd.f32 %v3801_v37, %v10280_v35 }
 0xb92   :  { %v6103_v49 = vadd.f32 %v3762_v5, %v10279_v6  ;;  %v3764_v40 = vpop.f32.mrb[78].mxu0  ;;  %v3805_v36 = vpop.f32.mrb[86].mxu1  ;;  %v10281_v5 = vld [vmem:[#allocation83_spill] sm:$0xff] }
 0xb93   :  { %v3812_v7 = vmul.f32 0.5, %v6102_v62  ;;  %v3765_v60 = vpop.f32.mrb[79].mxu0  ;;  %v3806_v22 = vpop.f32.mrb[87].mxu1 }
 0xb94   :  { %v3816_v42 = vmul.f32 0.5, %v6103_v49  ;;  %v10282_v49 = vld [vmem:[#allocation84_spill] sm:$0xff]  ;;  %v10283_v60 = vld [vmem:[#allocation85_spill] sm:$0xff] }
 0xb95   :  { %6556 = vtanh.f32 %v3812_v7 }
 0xb96   :  { %6558 = vtanh.f32 %v3816_v42 }
 0xb97   :  { %6560 = vtanh.f32 %v6104_v20 }
 0xb9f   :  { %v6557_v13 = vpop.eup %6556 }
 0xba0   :  { %v6559_v56 = vpop.eup %6558  ;;  %v3814_v34 = vmul.f32 0.5, %v6557_v13  ;;  %v10284_v13 = vld [vmem:[#allocation86_spill] sm:$0xff] }
 0xba1   :  { %v3818_v2 = vmul.f32 0.5, %v6559_v56  ;;  %v6561_v46 = vpop.eup %6560 }
 0xba2   :  { %v3815_v18 = vadd.f32 0.5, %v3814_v34 }
 0xba3   :  { %v3819_v39 = vadd.f32 0.5, %v3818_v2 }
 0xba4   :  { %v3826_v8 = vmul.f32 %v6561_v46, %v3815_v18 }
 0xba5   :  { %v3825_v40 = vmul.f32 %v3819_v39, %v8749_v44 }
 0xba7   :  { %v8933_v36 = vadd.f32 %v3826_v8, %v3825_v40 }
 0xbb0   :  { %v3871_v62 = vpop.f32.mrb[80].mxu0  ;;  %v3912_v22 = vpop.f32.mrb[88].mxu1 }
 0xbb1   :  { %v3919_v7 = vadd.f32 %v3871_v62, %v10281_v5  ;;  %v3921_v37 = vadd.f32 %v3912_v22, %v10282_v49  ;;  %v3873_v42 = vpop.f32.mrb[81].mxu0  ;;  %v3914_v20 = vpop.f32.mrb[89].mxu1 }
 0xbb2   :  { %v3920_v12 = vadd.f32 %v3873_v42, %v10283_v60  ;;  %v3922_v56 = vadd.f32 %v3914_v20, %v10284_v13  ;;  %v3875_v34 = vpop.f32.mrb[82].mxu0  ;;  %v3916_v19 = vpop.f32.mrb[90].mxu1 }
 0xbb3   :  { %v3923_v2 = vmul.f32 0.5, %v3919_v7  ;;  %v3876_v46 = vpop.f32.mrb[83].mxu0  ;;  %v3917_v18 = vpop.f32.mrb[91].mxu1 }
 0xbb4   :  { %v3927_v39 = vmul.f32 0.5, %v3920_v12  ;;  %v3932_v8 = vmul.f32 0.5, %v3922_v56  ;;  %v10286_v46 = vld [vmem:[#allocation28_spill] sm:$0xff]  ;;  %v10287_v18 = vld [vmem:[#allocation29_spill] sm:$0xff] }
 0xbb5   :  { %6562 = vtanh.f32 %v3923_v2  ;;  %v6105_v2 = vadd.f32 %v3803_v28, %v7813_v31  ;;  %v10285_v28 = vld [vmem:[#allocation27_spill] sm:$0xff] }
 0xbb6   :  { %6564 = vtanh.f32 %v3927_v39  ;;  %v10288_v39 = vld [vmem:[#allocation30_spill] sm:$0xff] }
 0xbb7   :  { %6566 = vtanh.f32 %v3921_v37 }
 0xbb8   :  { %6568 = vtanh.f32 %v3932_v8 }
 0xbbf   :  { %v6563_v44 = vpop.eup %6562 }
 0xbc0   :  { %v6565_v40 = vpop.eup %6564  ;;  %v3925_v62 = vmul.f32 0.5, %v6563_v44  ;;  %v10289_v44 = vld [vmem:[#allocation31_spill] sm:$0xff] }
 0xbc1   :  { %v3929_v22 = vmul.f32 0.5, %v6565_v40  ;;  %v6567_v49 = vpop.eup %6566  ;;  %v10290_v40 = vld [vmem:[#allocation32_spill] sm:$0xff] }
 0xbc2   :  { %v3926_v5 = vadd.f32 0.5, %v3925_v62  ;;  %v6569_v12 = vpop.eup %6568  ;;  %v10291_v62 = vld [vmem:[#allocation33_spill] sm:$0xff] }
 0xbc3   :  { %v3930_v42 = vadd.f32 0.5, %v3929_v22  ;;  %v3934_v7 = vmul.f32 0.5, %v6569_v12  ;;  %v10292_v22 = vld [vmem:[#allocation34_spill] sm:$0xff] }
 0xbc4   :  { %v3937_v60 = vmul.f32 %v6567_v49, %v3926_v5  ;;  %v10293_v49 = vld [vmem:[#allocation35_spill] sm:$0xff] }
 0xbc5   :  { %v3936_v20 = vmul.f32 %v3930_v42, %v8756_v27  ;;  %v3935_v13 = vadd.f32 0.5, %v3934_v7  ;;  %v3821_v27 = vmul.f32 0.5, %v6105_v2  ;;  %v10294_v42 = vld [vmem:[#allocation36_spill] sm:$0xff] }
 0xbc6   :  { %v4129_v2 = vld [vmem:[%s9525_s11] sm:$0xff] }
 0xbc7   :  { %v8940_v19 = vadd.f32 %v3937_v60, %v3936_v20  ;;  %v10295_v60 = vld [vmem:[#allocation37_spill] sm:$0xff]  ;;  %v10296_v20 = vld [vmem:[#allocation38_spill] sm:$0xff] }
 0xbc9   :  { %6570 = vtanh.f32 %v8940_v19 }
 0xbca   :  { %6572 = vtanh.f32 %v3821_v27  ;;  %v4130_v27 = vld [vmem:[%s9525_s11 + $0x8] sm:$0xff] }
 0xbcb   :  { %6574 = vtanh.f32 %v8933_v36 }
 0xbd3   :  { %v6571_v37 = vpop.eup %6570 }
 0xbd4   :  { %v3940_v56 = vmul.f32 %v6571_v37, %v3935_v13  ;;  %v6573_v8 = vpop.eup %6572  ;;  %v10297_v13 = vld [vmem:[#allocation39_spill] sm:$0xff] }
 0xbd5   :  { %v3823_v5 = vmul.f32 0.5, %v6573_v8  ;;  %v6575_v12 = vpop.eup %6574  ;;  %v8987_v8 = vpack.c.bf16 %v4130_v27, %v4129_v2  ;;  %v4134_v2 = vld [vmem:[%s9525_s11 + $0x28] sm:$0xff] }
 0xbd6   :  { %v8943_v34 = vpack.c.bf16 %v3940_v56, %v3940_v56 }
 0xbd7   :  { %v3824_v7 = vadd.f32 0.5, %v3823_v5  ;;  %10298 = vst [vmem:[#allocation54_spill] sm:$0xff] %v8987_v8  ;;  %v9814_v5 = vmov 0.0|0.0  }
 0xbd8   :  { %3975 = vmatmul.mubr.bf16.vlgmr.msra.gmra.mrb[84].mxu0 %v8943_v34  ;;  %4016 = vmatmul.mubr.bf16.vlgmr.msra.gmra.mrb[92].mxu1 %v8943_v34 }
 0xbd9   :  { %4026 = vmatpush1.bf16.msra.mxu0 %v8764_v25  ;;  %4067 = vmatpush1.bf16.msra.mxu1 %v8767_v41  ;;  %v3829_v37 = vmul.f32 %v6575_v12, %v3824_v7  ;;  %v4131_v12 = vld [vmem:[%s9525_s11 + $0x10] sm:$0xff]  ;;  %v4132_v7 = vld [vmem:[%s9525_s11 + $0x18] sm:$0xff] }
 0xbda   :  { %4027 = vmatprep.subr.bf16.mxu0 %v8770_v14  ;;  %4068 = vmatprep.subr.bf16.mxu1 %v8773_v57 }
 0xbdb   :  { %4057 = vmatprep.mubr.bf16.mxu0 %v9921_v59  ;;  %4098 = vmatprep.mubr.bf16.mxu1 %v9921_v59  ;;  %v4024_v56 = vpack.c.bf16 %v3829_v37, %v3829_v37  ;;  %v8999_v37 = vpack.c.bf16 %v4132_v7, %v4131_v12  ;;  %v4135_v12 = vld [vmem:[%s9525_s11 + $0x30] sm:$0xff]  ;;  %v4136_v7 = vld [vmem:[%s9525_s11 + $0x38] sm:$0xff] }
 0xbdd   :  { %4028 = vmatpush1.bf16.msra.mxu0 %v8778_v10  ;;  %4069 = vmatpush1.bf16.msra.mxu1 %v8781_v45  ;;  %10299 = vst [vmem:[#allocation79_spill] sm:$0xff] %v8999_v37 }
 0xbde   :  { %4029 = vmatprep.subr.bf16.mxu0 %v8784_v58  ;;  %4070 = vmatprep.subr.bf16.mxu1 %v8787_v38 }
 0xbe1   :  { %4030 = vmatpush1.bf16.msra.mxu0 %v8790_v48  ;;  %4071 = vmatpush1.bf16.msra.mxu1 %v8793_v3 }
 0xbe2   :  { %4031 = vmatprep.subr.bf16.mxu0 %v8796_v51  ;;  %4072 = vmatprep.subr.bf16.mxu1 %v8799_v55 }
 0xbe5   :  { %4032 = vmatpush1.bf16.msra.mxu0 %v10285_v28  ;;  %4073 = vmatpush1.bf16.msra.mxu1 %v10286_v46 }
 0xbe6   :  { %4033 = vmatprep.subr.bf16.mxu0 %v10287_v18  ;;  %4074 = vmatprep.subr.bf16.mxu1 %v10288_v39 }
 0xbe9   :  { %4034 = vmatpush1.bf16.msra.mxu0 %v10289_v44  ;;  %4075 = vmatpush1.bf16.msra.mxu1 %v10290_v40 }
 0xbea   :  { %4035 = vmatprep.subr.bf16.mxu0 %v10291_v62  ;;  %4076 = vmatprep.subr.bf16.mxu1 %v10292_v22  ;;  %v10306_v22 = vmov 0.0  }
 0xbed   :  { %4036 = vmatpush1.bf16.msra.mxu0 %v10293_v49  ;;  %4077 = vmatpush1.bf16.msra.mxu1 %v10294_v42 }
 0xbee   :  { %4037 = vmatprep.subr.bf16.mxu0 %v10295_v60  ;;  %4078 = vmatprep.subr.bf16.mxu1 %v10296_v20 }
 0xbf1   :  { %4038 = vmatpush1.bf16.msra.mxu0 %v10297_v13  ;;  %4079 = vmatpush1.bf16.msra.mxu1 %v8842_v63 }
 0xbf2   :  { %4039 = vmatprep.subr.bf16.mxu0 %v8845_v54  ;;  %4080 = vmatprep.subr.bf16.mxu1 %v8848_v9 }
 0xbf5   :  { %4040 = vmatpush1.bf16.msra.mxu0 %v8851_v43  ;;  %4081 = vmatpush1.bf16.msra.mxu1 %v8854_v0  ;;  %v9019_v0 = vpack.c.bf16 %v4136_v7, %v4135_v12  ;;  %v4139_v12 = vld [vmem:[%s9525_s11 + $0x50] sm:$0xff]  ;;  %v4140_v7 = vld [vmem:[%s9525_s11 + $0x58] sm:$0xff] }
 0xbf6   :  { %5984 = vmatprep.subr.bf16.mxu0 %v9814_v5  ;;  %6008 = vmatprep.subr.bf16.mxu1 %v9814_v5  ;;  %v9039_v63 = vpack.c.bf16 %v4140_v7, %v4139_v12  ;;  %v4143_v12 = vld [vmem:[%s9525_s11 + $0x70] sm:$0xff]  ;;  %v4144_v7 = vld [vmem:[%s9525_s11 + $0x78] sm:$0xff] }
 0xbf7   :  { %10301 = vst [vmem:[#allocation81_spill] sm:$0xff] %v9019_v0  ;;  %v9059_v42 = vpack.c.bf16 %v4144_v7, %v4143_v12 }
 0xbf8   :  { %4058 = vmatmul.mubr.bf16.vlgmr.msra.gmra.mrb[84].mxu0 %v4024_v56  ;;  %4099 = vmatmul.mubr.bf16.vlgmr.msra.gmra.mrb[92].mxu1 %v4024_v56  ;;  %v4133_v56 = vld [vmem:[%s9525_s11 + $0x20] sm:$0xff]  ;;  %10303 = vst [vmem:[#allocation41_spill] sm:$0xff] %v9039_v63 }
 0xbf9   :  { %5986 = vmatpush3.bf16.msra.mxu0 %v8987_v8  ;;  %v9009_v27 = vpack.c.bf16 %v4134_v2, %v4133_v56  ;;  %v4137_v56 = vld [vmem:[%s9525_s11 + $0x40] sm:$0xff]  ;;  %v4138_v2 = vld [vmem:[%s9525_s11 + $0x48] sm:$0xff]  ;;  %10305 = vst [vmem:[#allocation43_spill] sm:$0xff] %v9059_v42  ;;  %5865 = vmatprep.mubr.msk.f32.mxu0 %vm7016_vm3, %v10306_v22 }
 0xbfa   :  { %5987 = vmatprep.subr.bf16.mxu0 %v9814_v5  ;;  %v9029_v9 = vpack.c.bf16 %v4138_v2, %v4137_v56  ;;  %v4141_v56 = vld [vmem:[%s9525_s11 + $0x60] sm:$0xff]  ;;  %v4142_v2 = vld [vmem:[%s9525_s11 + $0x68] sm:$0xff]  ;;  %5876 = vmatprep.mubr.msk.f32.mxu1 %vm7016_vm3, %v10306_v22 }
 0xbfb   :  { %10300 = vst [vmem:[#allocation80_spill] sm:$0xff] %v9009_v27  ;;  %v9049_v20 = vpack.c.bf16 %v4142_v2, %v4141_v56 }
 0xbfc   :  { %10302 = vst [vmem:[#allocation82_spill] sm:$0xff] %v9029_v9 }
 0xbfd   :  { %5989 = vmatpush3.bf16.msra.mxu0 %v8999_v37  ;;  %10304 = vst [vmem:[#allocation42_spill] sm:$0xff] %v9049_v20 }
 0xbfe   :  { %5990 = vmatprep.subr.bf16.mxu0 %v9814_v5 }
 0xc01   :  { %5992 = vmatpush3.bf16.msra.mxu0 %v9009_v27 }
 0xc02   :  { %5993 = vmatprep.subr.bf16.mxu0 %v9814_v5 }
 0xc05   :  { %5995 = vmatpush3.bf16.msra.mxu0 %v9019_v0 }
 0xc06   :  { %5996 = vmatprep.subr.bf16.mxu0 %v9814_v5 }
 0xc09   :  { %5998 = vmatpush3.bf16.msra.mxu0 %v9029_v9 }
 0xc0a   :  { %5999 = vmatprep.subr.bf16.mxu0 %v9814_v5 }
 0xc0d   :  { %6001 = vmatpush3.bf16.msra.mxu0 %v9039_v63 }
 0xc0e   :  { %6002 = vmatprep.subr.bf16.mxu0 %v9814_v5 }
 0xc11   :  { %6004 = vmatpush3.bf16.msra.mxu0 %v9049_v20 }
 0xc12   :  { %6005 = vmatprep.subr.bf16.mxu0 %v9814_v5 }
 0xc15   :  { %6007 = vmatpush3.bf16.msra.mxu0 %v9059_v42 }
 0xc16   :  { %4594 = vmatprep.subr.bf16.mxu0 %v8639_v30 }
 0xccb   :  { %v4059_v56 = vpop.f32.mrb[84].mxu0  ;;  %v4100_v2 = vpop.f32.mrb[92].mxu1 }
 0xccc   :  { %v6106_v5 = vadd.f32 %v4059_v56, %v10278_v26  ;;  %v4061_v40 = vpop.f32.mrb[85].mxu0  ;;  %v4102_v39 = vpop.f32.mrb[93].mxu1  ;;  %v6108_v57 = vadd.f32 %v4100_v2, %v10280_v35 }
 0xccd   :  { %v6107_v12 = vadd.f32 %v4061_v40, %v10279_v6  ;;  %v4063_v7 = vpop.f32.mrb[86].mxu0  ;;  %v4104_v46 = vpop.f32.mrb[94].mxu1  ;;  %v6109_v30 = vadd.f32 %v4102_v39, %v7813_v31 }
 0xcce   :  { %v4111_v55 = vmul.f32 0.5, %v6106_v5  ;;  %v4064_v3 = vpop.f32.mrb[87].mxu0  ;;  %v4105_v38 = vpop.f32.mrb[95].mxu1 }
 0xccf   :  { %v4115_v45 = vmul.f32 0.5, %v6107_v12  ;;  %v4120_v41 = vmul.f32 0.5, %v6109_v30  ;;  %v9161_v12 = vld [vmem:[%s9519_s5 + $0xc] ss:$16 sps:$4 sm:$0xff]   ;;  %v9167_v30 = vld [vmem:[%s9518_s4] ss:$0 sm:$0xff] }
 0xcd0   :  { %6576 = vtanh.f32 %v4111_v55 }
 0xcd1   :  { %6578 = vtanh.f32 %v4115_v45 }
 0xcd2   :  { %6580 = vtanh.f32 %v6108_v57 }
 0xcd3   :  { %6582 = vtanh.f32 %v4120_v41 }
 0xcda   :  { %v6577_v43 = vpop.eup %6576 }
 0xcdb   :  { %v6579_v56 = vpop.eup %6578  ;;  %v4113_v26 = vmul.f32 0.5, %v6577_v43  ;;  %v9105_v43 = vld [vmem:[#allocation3] ss:$0 sm:$0xff] }
 0xcdc   :  { %v4117_v54 = vmul.f32 0.5, %v6579_v56  ;;  %v6581_v7 = vpop.eup %6580 }
 0xcdd   :  { %v4114_v40 = vadd.f32 0.5, %v4113_v26  ;;  %v6583_v45 = vpop.eup %6582  ;;  %v9149_v26 = vld [vmem:[%s9519_s5 + $0x24] ss:$16 sps:$4 sm:$0xff]  }
 0xcde   :  { %v4118_v46 = vadd.f32 0.5, %v4117_v54  ;;  %v4122_v57 = vmul.f32 0.5, %v6583_v45  ;;  %v10307_v54 = vmov 0.0|0.0   ;;  %v9178_v45 = vld [vmem:[%s9519_s5 + $0x2c] ss:$16 sps:$4 sm:$0xff]  }
 0xcdf   :  { %v4125_v5 = vmul.f32 %v6581_v7, %v4114_v40 }
 0xce0   :  { %v4124_v38 = vmul.f32 %v4118_v46, %v8933_v36  ;;  %v4123_v55 = vadd.f32 0.5, %v4122_v57  ;;  %v9154_v36 = vld [vmem:[%s9519_s5 + $0x20] ss:$16 sps:$4 sm:$0xff]   ;;  %v9185_v57 = vld [vmem:[%s9519_s5 + $0x28] ss:$16 sps:$4 sm:$0xff]  }
 0xce2   :  { %v9072_v3 = vadd.f32 %v4125_v5, %v4124_v38  ;;  %v9173_v5 = vld [vmem:[%s9519_s5 + $0x8] ss:$16 sps:$4 sm:$0xff]  }
 0xce4   :  { %6584 = vtanh.f32 %v9072_v3 }
 0xcee   :  { %v6585_v39 = vpop.eup %6584 }
 0xcef   :  { %v9075_v2 = vmul.f32 %v6585_v39, %v4123_v55  ;;  %v9190_v55 = vld [vmem:[#allocation4 + $0x4] ss:$16 sps:$4 sm:$0xff]   ;;  %v9194_v39 = vld [vmem:[#allocation4] ss:$16 sps:$4 sm:$0xff]  }
 0xcf1   :  { %5866 = vmatmul.mubr.f32.vlgmr.msra.gmra.mrb[88].mxu0 %v9075_v2 }
 0xcf2   :  { %4595 = vmatpush1.bf16.msra.mxu0 %v8647_v33  ;;  %4626 = vmatprep.mubr.bf16.mxu0 %v9921_v59  ;;  %v5588_v33 = vld [vmem:[%s9517_s3 + $0x20] sm:$0xff] }
 0xcf3   :  { %4596 = vmatprep.subr.bf16.mxu0 %v8653_v24  ;;  %v5589_v24 = vld [vmem:[%s9517_s3 + $0x28] sm:$0xff] }
 0xcf4   :  { %v9101_v41 = vpack.c.bf16 %v5589_v24, %v5588_v33  ;;  %v9198_v33 = vld [vmem:[#allocation4 + $0x24] ss:$16 sps:$4 sm:$0xff]   ;;  %v9201_v24 = vld [vmem:[#allocation4 + $0x20] ss:$16 sps:$4 sm:$0xff]  }
 0xcf6   :  { %4597 = vmatpush1.bf16.msra.mxu0 %v10250_v61  ;;  %6010 = vmatpush3.bf16.msra.mxu1 %v9101_v41 }
 0xcf7   :  { %4598 = vmatprep.subr.bf16.mxu0 %v10252_v16  ;;  %6011 = vmatprep.subr.bf16.mxu1 %v10307_v54 }
 0xcfa   :  { %4599 = vmatpush1.bf16.msra.mxu0 %v10254_v53  ;;  %v5590_v53 = vld [vmem:[%s9517_s3 + $0x30] sm:$0xff] }
 0xcfb   :  { %4600 = vmatprep.subr.bf16.mxu0 %v10256_v11  ;;  %v5591_v11 = vld [vmem:[%s9517_s3 + $0x38] sm:$0xff] }
 0xcfe   :  { %4601 = vmatpush1.bf16.msra.mxu0 %v10258_v52  ;;  %v9114_v52 = vpack.c.bf16 %v5591_v11, %v5590_v53  ;;  %v10311_v53 = vld [vmem:[#allocation65_spill] sm:$0xff]  ;;  %v10312_v11 = vld [vmem:[#allocation66_spill] sm:$0xff] }
 0xcff   :  { %4602 = vmatprep.subr.bf16.mxu0 %v10260_v32  ;;  %v9120_v32 = vld [vmem:[%s9519_s5 + $0x4] ss:$16 sps:$4 sm:$0xff]  }
 0xd00   :  { %6013 = vmatpush3.bf16.msra.mxu1 %v9114_v52 }
 0xd01   :  { %4407 = vmatprep.subr.bf16.mxu1 %v9120_v32 }
 0xd02   :  { %4603 = vmatpush1.bf16.msra.mxu0 %v10262_v15  ;;  %v9126_v15 = vld [vmem:[%s9527_s13] ss:$0 sm:$0xff] }
 0xd03   :  { %4604 = vmatprep.subr.bf16.mxu0 %v10264_v50  ;;  %v9131_v50 = vld [vmem:[%s9528_s14] ss:$0 sm:$0xff] }
 0xd06   :  { %4605 = vmatpush1.bf16.msra.mxu0 %v10266_v23 }
 0xd07   :  { %4606 = vmatprep.subr.bf16.mxu0 %v10268_v21 }
 0xd0a   :  { %4607 = vmatpush1.bf16.msra.mxu0 %v10270_v47 }
 0xd0b   :  { %4608 = vmatprep.subr.bf16.mxu0 %v10272_v1  ;;  %v9141_v1 = vld [vmem:[%s9519_s5] ss:$16 sps:$4 sm:$0xff]  }
 0xd0e   :  { %4609 = vmatpush1.bf16.msra.mxu0 %v10274_v4 }
 0xd0f   :  { %4635 = vmatprep.subr.bf16.mxu0 %v8642_v29 }
 0xdc4   :  { %v4218_v61 = vpop.f32.mrb[88].mxu0 }
 0xdc5   :  { %v4219_v16 = vadd.f32 %v9105_v43, %v4218_v61  ;;  %v5867_v29 = vpop.f32.mrb[89].mxu0  ;;  %v9204_v61 = vld [vmem:[#allocation4 + $0x44] ss:$16 sps:$4 sm:$0xff]  }
 0xdc6   :  { %v10310_v29 = vld [vmem:[#allocation64_spill] sm:$0xff] }
 0xdc7   :  { %4227 = vperm.xlu0 %6256, %v4219_v16   ;;  %v10309_v16 = vld [vmem:[#allocation63_spill] sm:$0xff] }
 0xe46   :  { %v9133_v23 = vpop.permute.xlu0 %4227 }
 0xe47   :  { %10308 = vst [vmem:[#allocation44_spill] sm:$0xff] %v9133_v23  ;;  %v4238_v21 = vmul.f32 %v9126_v15, %v9133_v23  ;;  %v10328_v23 = vld [vmem:[#allocation71_spill] sm:$0xff] }
 0xe49   :  { %v4246_v47 = vadd.f32 %v9131_v50, %v4238_v21  ;;  %v10313_v21 = vld [vmem:[#allocation59_spill] sm:$0xff] }
 0xe4b   :  { %v4247_v4 = vmax.f32 %v4246_v47, 0.0  ;;  %v10314_v47 = vld [vmem:[#allocation60_spill] sm:$0xff] }
 0xe4d   :  { %5877 = vmatmul.mubr.msk.f32.vlgmr.msra.gmra.mrb[96].mxu1 %vm501_vm2, %v4247_v4  ;;  %v10315_v4 = vld [vmem:[#allocation68_spill] sm:$0xff] }
 0xe4e   :  { %4408 = vmatpush1.bf16.msra.mxu1 %v9141_v1  ;;  %4439 = vmatprep.mubr.bf16.mxu1 %v9921_v59 }
 0xe4f   :  { %4409 = vmatprep.subr.bf16.mxu1 %v9149_v26 }
 0xe52   :  { %4410 = vmatpush1.bf16.msra.mxu1 %v9154_v36 }
 0xe53   :  { %4448 = vmatprep.subr.bf16.mxu1 %v9161_v12 }
 0xf20   :  { %v4328_v56 = vpop.f32.mrb[96].mxu1 }
 0xf21   :  { %v4329_v40 = vadd.f32 %v9167_v30, %v4328_v56  ;;  %v5878_v7 = vpop.f32.mrb[97].mxu1  ;;  %v10316_v56 = vld [vmem:[#allocation70_spill] sm:$0xff] }
 0xf22   :  { %v10318_v7 = vld [vmem:[#allocation74_spill] sm:$0xff] }
 0xf23   :  { %v4332_v46 = vmax.f32 %v4329_v40, 0.0  ;;  %v10317_v40 = vld [vmem:[#allocation72_spill] sm:$0xff] }
 0xf25   :  { %v4333_v38 = vpack.c.bf16 %v4332_v46, %v4332_v46  ;;  %v9222_v46 = vld [vmem:[#allocation4 + $0x8] ss:$16 sps:$4 sm:$0xff]  }
 0xf27   :  { %5602 = vmatmul.mubr.msk.bf16.vlgmr.msra.gmra.mrb[100].mxu1 %vm501_vm2, %v4333_v38 }
 0xf28   :  { %4449 = vmatpush1.bf16.msra.mxu1 %v9173_v5  ;;  %4480 = vmatprep.mubr.bf16.mxu1 %v9921_v59 }
 0xf29   :  { %4450 = vmatprep.subr.bf16.mxu1 %v9178_v45 }
 0xf2c   :  { %4451 = vmatpush1.bf16.msra.mxu1 %v9185_v57 }
 0xf2d   :  { %4489 = vmatprep.subr.bf16.mxu1 %v9190_v55 }
 0xf2f   :  { %5603 = vmatmul.mubr.msk.bf16.vlgmr.msra.gmra.mrb[104].mxu1 %vm501_vm2, %v4333_v38  ;;  %v9226_v38 = vld [vmem:[#allocation4 + $0x2c] ss:$16 sps:$4 sm:$0xff]  }
 0xf30   :  { %4490 = vmatpush1.bf16.msra.mxu1 %v9194_v39  ;;  %4521 = vmatprep.mubr.bf16.mxu1 %v9921_v59 }
 0xf31   :  { %4491 = vmatprep.subr.bf16.mxu1 %v9198_v33 }
 0xf34   :  { %4492 = vmatpush1.bf16.msra.mxu1 %v9201_v24 }
 0xf35   :  { %4493 = vmatprep.subr.bf16.mxu1 %v9204_v61 }
 0xf38   :  { %4494 = vmatpush1.bf16.msra.mxu1 %v8573_v17  ;;  %v9218_v17 = vld [vmem:[#allocation4 + $0xc] ss:$16 sps:$4 sm:$0xff]  }
 0xf39   :  { %4495 = vmatprep.subr.bf16.mxu1 %v10309_v16  ;;  %v9229_v16 = vld [vmem:[#allocation4 + $0x28] ss:$16 sps:$4 sm:$0xff]  }
 0xf3c   :  { %4496 = vmatpush1.bf16.msra.mxu1 %v10310_v29  ;;  %v9232_v29 = vld [vmem:[#allocation4 + $0x4c] ss:$16 sps:$4 sm:$0xff]  }
 0xf3d   :  { %4497 = vmatprep.subr.bf16.mxu1 %v10311_v53  ;;  %10319 = vst [vmem:[#allocation45_spill] sm:$0xff] %v9232_v29  ;;  %v9235_v53 = vld [vmem:[#allocation4 + $0x48] ss:$16 sps:$4 sm:$0xff]  }
 0xf3e   :  { %10320 = vst [vmem:[#allocation46_spill] sm:$0xff] %v9235_v53 }
 0xf40   :  { %4498 = vmatpush1.bf16.msra.mxu1 %v10312_v11  ;;  %v9238_v11 = vld [vmem:[#allocation4 + $0x6c] ss:$16 sps:$4 sm:$0xff]  }
 0xf41   :  { %4499 = vmatprep.subr.bf16.mxu1 %v10313_v21  ;;  %10321 = vst [vmem:[#allocation47_spill] sm:$0xff] %v9238_v11  ;;  %v9241_v21 = vld [vmem:[#allocation4 + $0x68] ss:$16 sps:$4 sm:$0xff]  }
 0xf42   :  { %10322 = vst [vmem:[#allocation48_spill] sm:$0xff] %v9241_v21 }
 0xf44   :  { %4500 = vmatpush1.bf16.msra.mxu1 %v10314_v47  ;;  %v9244_v47 = vld [vmem:[#allocation4 + $0x8c] ss:$16 sps:$4 sm:$0xff]  }
 0xf45   :  { %4501 = vmatprep.subr.bf16.mxu1 %v10315_v4  ;;  %10323 = vst [vmem:[#allocation49_spill] sm:$0xff] %v9244_v47  ;;  %v9247_v4 = vld [vmem:[#allocation4 + $0x88] ss:$16 sps:$4 sm:$0xff]  }
 0xf46   :  { %10324 = vst [vmem:[#allocation50_spill] sm:$0xff] %v9247_v4 }
 0xf48   :  { %4502 = vmatpush1.bf16.msra.mxu1 %v10316_v56  ;;  %v9250_v56 = vld [vmem:[#allocation4 + $0xac] ss:$16 sps:$4 sm:$0xff]  }
 0xf49   :  { %4503 = vmatprep.subr.bf16.mxu1 %v10317_v40  ;;  %10325 = vst [vmem:[#allocation51_spill] sm:$0xff] %v9250_v56  ;;  %v10326_v40 = vld [vmem:[#allocation67_spill] sm:$0xff] }
 0xf4c   :  { %4504 = vmatpush1.bf16.msra.mxu1 %v10318_v7  ;;  %v10327_v7 = vld [vmem:[#allocation69_spill] sm:$0xff] }
 0xf4d   :  { %4530 = vmatprep.subr.bf16.mxu1 %v9218_v17 }
 0xf4f   :  { %4522 = vmatmul.mubr.bf16.vlgmr.msra.gmra.mrb[100].mxu1 %v8943_v34 }
 0xf50   :  { %4531 = vmatpush1.bf16.msra.mxu1 %v9222_v46  ;;  %4562 = vmatprep.mubr.bf16.mxu1 %v9921_v59 }
 0xf51   :  { %4532 = vmatprep.subr.bf16.mxu1 %v9226_v38 }
 0xf54   :  { %4533 = vmatpush1.bf16.msra.mxu1 %v9229_v16 }
 0xf55   :  { %4534 = vmatprep.subr.bf16.mxu1 %v9232_v29 }
 0xf58   :  { %4535 = vmatpush1.bf16.msra.mxu1 %v9235_v53 }
 0xf59   :  { %4536 = vmatprep.subr.bf16.mxu1 %v9238_v11  ;;  %v10329_v11 = vld [vmem:[#allocation73_spill] sm:$0xff] }
 0xf5c   :  { %4537 = vmatpush1.bf16.msra.mxu1 %v9241_v21  ;;  %v10330_v21 = vld [vmem:[#allocation40_spill] sm:$0xff] }
 0xf5d   :  { %4538 = vmatprep.subr.bf16.mxu1 %v9244_v47 }
 0xf60   :  { %4539 = vmatpush1.bf16.msra.mxu1 %v9247_v4 }
 0xf61   :  { %4540 = vmatprep.subr.bf16.mxu1 %v9250_v56 }
 0xf64   :  { %4541 = vmatpush1.bf16.msra.mxu1 %v10326_v40  ;;  %v4342_v40 = vld [vmem:[%s9521_s7] sm:$0xf]  ;;  %s7017_s7 = smov [#allocation10]  }
 0xf65   :  { %4542 = vmatprep.subr.bf16.mxu1 %v10327_v7  ;;  %v10331_v7 = vld [vmem:[#allocation57_spill] sm:$0xff]  ;;  %s5397_s26 = sshll.u32 %s7017_s7, 4  ;;  %s5398_s26 = int_to_ptr.vmem [resolvable:$true] %s5397_s26 }
 0xf66   :  { %s6980_s27 = scalar_lea.vmem %s5398_s26, 128  ;;  %p6985_p11 = scmp.lt.s32.totalorder %s5398_s26, %s5398_s26 }
 0xf67   :  { %p6981_p10 = scmp.ne.s32.totalorder %s5398_s26, %s6980_s27  ;;  %p6986_p12 = scmp.lt.s32.totalorder %s6980_s27, %s6980_s27 }
 0xf68   :  { %4543 = vmatpush1.bf16.msra.mxu1 %v10328_v23 }
 0xf69   :  { %4544 = vmatprep.subr.bf16.mxu1 %v10329_v11  ;;  %p6987_p13 = por %p6986_p12, %p6985_p11 }
 0xf6b   :  { %p6988_p0 = pnand %p6987_p13, %p6981_p10 }
 0xf6c   :  { %4545 = vmatpush1.bf16.msra.mxu1 %v10330_v21 }
 0xf6d   :  { %6014 = vmatprep.subr.bf16.mxu1 %v10307_v54 }
 0xf6f   :  { %4563 = vmatmul.mubr.bf16.vlgmr.msra.gmra.mrb[104].mxu1 %v8943_v34 }
 0xf70   :  { %6016 = vmatpush3.bf16.msra.mxu1 %v8987_v8  ;;  %5911 = vmatprep.mubr.msk.f32.mxu1 %vm7016_vm3, %v10306_v22  ;;  %v10336_v8 = vld [vmem:[#allocation58_spill] sm:$0xff] }
 0xf71   :  { %6017 = vmatprep.subr.bf16.mxu1 %v10307_v54  ;;  %v9293_v56 = vrot.slane %v4342_v40, %v10336_v8 }
 0xf73   :  { %10337 = vst [vmem:[#allocation62_spill] sm:$0xff] %v9293_v56 }
 0xf74   :  { %6019 = vmatpush3.bf16.msra.mxu1 %v8999_v37 }
 0xf75   :  { %6020 = vmatprep.subr.bf16.mxu1 %v10307_v54 }
 0xf78   :  { %6022 = vmatpush3.bf16.msra.mxu1 %v9009_v27 }
 0xf79   :  { %6023 = vmatprep.subr.bf16.mxu1 %v10307_v54 }
 0xf7c   :  { %6025 = vmatpush3.bf16.msra.mxu1 %v9019_v0 }
 0xf7d   :  { %6026 = vmatprep.subr.bf16.mxu1 %v10307_v54 }
 0xf80   :  { %6028 = vmatpush3.bf16.msra.mxu1 %v9029_v9  ;;  %v10333_v9 = vld [vmem:[#allocation55_spill] sm:$0xff] }
 0xf81   :  { %6029 = vmatprep.subr.bf16.mxu1 %v10307_v54  ;;  %v9285_v0 = vrot.slane %v4342_v40, %v10333_v9 }
 0xf83   :  { %10334 = vst [vmem:[#allocation61_spill] sm:$0xff] %v9285_v0 }
 0xf84   :  { %6031 = vmatpush3.bf16.msra.mxu1 %v9039_v63  ;;  %v9282_v63 = vrot.slane %v4342_v40, %v10331_v7 }
 0xf85   :  { %6032 = vmatprep.subr.bf16.mxu1 %v10307_v54 }
 0xf86   :  { %10332 = vst [vmem:[#allocation52_spill] sm:$0xff] %v9282_v63 }
 0xf88   :  { %6034 = vmatpush3.bf16.msra.mxu1 %v9049_v20 }
 0xf89   :  { %6035 = vmatprep.subr.bf16.mxu1 %v10307_v54 }
 0xf8c   :  { %6037 = vmatpush3.bf16.msra.mxu1 %v9059_v42 }
 0xf8d   :  { %6038 = vmatprep.subr.bf16.mxu1 %v10307_v54 }
0x1022   :  { %v4523_v34 = vpop.f32.mrb[100].mxu1 }
0x1023   :  { %v4525_v23 = vpop.f32.mrb[101].mxu1  ;;  %v6110_v42 = vadd.f32 %v4523_v34, %v9285_v0 }
0x1024   :  { %v4527_v11 = vpop.f32.mrb[102].mxu1  ;;  %v6111_v20 = vadd.f32 %v4525_v23, %v9282_v63 }
0x1025   :  { %v4528_v21 = vpop.f32.mrb[103].mxu1  ;;  %v4575_v37 = vmul.f32 0.5, %v6110_v42  ;;  %v10335_v11 = vld [vmem:[#allocation56_spill] sm:$0xff] }
0x1026   :  { %v4579_v27 = vmul.f32 0.5, %v6111_v20  ;;  %v9290_v21 = vrot.slane %v4342_v40, %v10335_v11 }
0x1028   :  { %6586 = vtanh.f32 %v4579_v27 }
0x1029   :  { %6588 = vtanh.f32 %v4575_v37 }
0x1032   :  { %v6587_v23 = vpop.eup %6586 }
0x1033   :  { %v6589_v20 = vpop.eup %6588  ;;  %v4581_v42 = vmul.f32 0.5, %v6587_v23  ;;  %v9317_v23 = vld [vmem:[#allocation7 + $0x48] ss:$16 sps:$4 sm:$0xff]  }
0x1034   :  { %v4577_v37 = vmul.f32 0.5, %v6589_v20  ;;  %v9320_v20 = vld [vmem:[#allocation7 + $0x6c] ss:$16 sps:$4 sm:$0xff]  }
0x1035   :  { %v4582_v0 = vadd.f32 0.5, %v4581_v42  ;;  %v9323_v42 = vld [vmem:[#allocation7 + $0x68] ss:$16 sps:$4 sm:$0xff]  }
0x1036   :  { %v4578_v11 = vadd.f32 0.5, %v4577_v37  ;;  %v9329_v37 = vld [vmem:[#allocation7 + $0x88] ss:$16 sps:$4 sm:$0xff]  }
0x1037   :  { %v4588_v8 = vmul.f32 %v4582_v0, %v8940_v19  ;;  %v9311_v0 = vld [vmem:[#allocation7 + $0x28] ss:$16 sps:$4 sm:$0xff]   ;;  %v9314_v19 = vld [vmem:[#allocation7 + $0x4c] ss:$16 sps:$4 sm:$0xff]  }
0x1042   :  { %v4564_v4 = vpop.f32.mrb[104].mxu1 }
0x1043   :  { %v6112_v7 = vadd.f32 %v4564_v4, %v9290_v21  ;;  %v4566_v47 = vpop.f32.mrb[105].mxu1 }
0x1044   :  { %v6113_v9 = vadd.f32 %v4566_v47, %v9293_v56  ;;  %v4568_v53 = vpop.f32.mrb[106].mxu1 }
0x1045   :  { %6590 = vtanh.f32 %v6112_v7  ;;  %v4569_v34 = vpop.f32.mrb[107].mxu1 }
0x1046   :  { %v4584_v27 = vmul.f32 0.5, %v6113_v9  ;;  %v9304_v9 = vld [vmem:[#allocation7 + $0x8] ss:$16 sps:$4 sm:$0xff]  }
0x1048   :  { %6592 = vtanh.f32 %v4584_v27  ;;  %v9326_v27 = vld [vmem:[#allocation7 + $0x8c] ss:$16 sps:$4 sm:$0xff]  }
0x104f   :  { %v6591_v63 = vpop.eup %6590 }
0x1050   :  { %v4589_v40 = vmul.f32 %v6591_v63, %v4578_v11  ;;  %v9308_v63 = vld [vmem:[#allocation7 + $0x2c] ss:$16 sps:$4 sm:$0xff]  }
0x1051   :  { %v9332_v11 = vld [vmem:[#allocation7 + $0xac] ss:$16 sps:$4 sm:$0xff]  }
0x1052   :  { %v9298_v29 = vadd.f32 %v4589_v40, %v4588_v8  ;;  %v6593_v47 = vpop.eup %6592  ;;  %v9335_v8 = vld [vmem:[#allocation7 + $0xa8] ss:$16 sps:$4 sm:$0xff]   ;;  %v9338_v40 = vld [vmem:[#allocation7 + $0xcc] ss:$16 sps:$4 sm:$0xff]  }
0x1053   :  { %v4586_v53 = vmul.f32 0.5, %v6593_v47  ;;  %v9341_v47 = vld [vmem:[#allocation7 + $0xc8] ss:$16 sps:$4 sm:$0xff]  }
0x1054   :  { %6594 = vtanh.f32 %v9298_v29 }
0x1055   :  { %v4587_v4 = vadd.f32 0.5, %v4586_v53  ;;  %v9344_v53 = vld [vmem:[#allocation7 + $0xec] ss:$16 sps:$4 sm:$0xff]  }
0x105e   :  { %v6595_v7 = vpop.eup %6594 }
0x105f   :  { %v4592_v34 = vmul.f32 %v6595_v7, %v4587_v4  ;;  %v9347_v4 = vld [vmem:[#allocation7 + $0xe8] ss:$16 sps:$4 sm:$0xff]   ;;  %v9350_v7 = vld [vmem:[#allocation9 + $0x4] ss:$16 sps:$4 sm:$0xff]  }
0x1060   :  { %10338 = vst [vmem:[#allocation87_spill] sm:$0xff] %v9347_v4  ;;  %10339 = vst [vmem:[#allocation88_spill] sm:$0xff] %v9350_v7 }
0x1061   :  { %v9301_v56 = vpack.c.bf16 %v4592_v34, %v4592_v34  ;;  %v10353_v34 = vld [vmem:[#allocation36_spill] sm:$0xff] }
0x1063   :  { %4627 = vmatmul.mubr.bf16.vlgmr.msra.gmra.mrb[92].mxu0 %v9301_v56 }
0x1064   :  { %4636 = vmatpush1.bf16.msra.mxu0 %v9304_v9  ;;  %4667 = vmatprep.mubr.bf16.mxu0 %v9921_v59 }
0x1065   :  { %4637 = vmatprep.subr.bf16.mxu0 %v9308_v63 }
0x1068   :  { %4638 = vmatpush1.bf16.msra.mxu0 %v9311_v0 }
0x1069   :  { %4639 = vmatprep.subr.bf16.mxu0 %v9314_v19 }
0x106c   :  { %4640 = vmatpush1.bf16.msra.mxu0 %v9317_v23 }
0x106d   :  { %4641 = vmatprep.subr.bf16.mxu0 %v9320_v20 }
0x1070   :  { %4642 = vmatpush1.bf16.msra.mxu0 %v9323_v42 }
0x1071   :  { %4643 = vmatprep.subr.bf16.mxu0 %v9326_v27 }
0x1074   :  { %4644 = vmatpush1.bf16.msra.mxu0 %v9329_v37 }
0x1075   :  { %4645 = vmatprep.subr.bf16.mxu0 %v9332_v11 }
0x1078   :  { %4646 = vmatpush1.bf16.msra.mxu0 %v9335_v8 }
0x1079   :  { %4647 = vmatprep.subr.bf16.mxu0 %v9338_v40 }
0x107c   :  { %4648 = vmatpush1.bf16.msra.mxu0 %v9341_v47 }
0x107d   :  { %4649 = vmatprep.subr.bf16.mxu0 %v9344_v53 }
0x1080   :  { %4650 = vmatpush1.bf16.msra.mxu0 %v9347_v4 }
0x1081   :  { %4677 = vmatprep.subr.bf16.mxu0 %v9350_v7 }
0x1083   :  { %4668 = vmatmul.mubr.bf16.vlgmr.msra.gmra.mrb[96].mxu0 %v9301_v56 }
0x1084   :  { %4678 = vmatpush1.bf16.msra.mxu0 %v8764_v25  ;;  %4709 = vmatprep.mubr.bf16.mxu0 %v9921_v59  ;;  %v10340_v25 = vld [vmem:[#allocation76_spill] sm:$0xff] }
0x1085   :  { %4679 = vmatprep.subr.bf16.mxu0 %v8770_v14  ;;  %v10341_v14 = vld [vmem:[#allocation78_spill] sm:$0xff] }
0x1088   :  { %4680 = vmatpush1.bf16.msra.mxu0 %v8778_v10  ;;  %v4676_v10 = vpack.c.bf16 %v9075_v2, %v9075_v2  ;;  %v10352_v2 = vld [vmem:[#allocation34_spill] sm:$0xff] }
0x1089   :  { %4681 = vmatprep.subr.bf16.mxu0 %v8784_v58  ;;  %v9372_v58 = vld [vmem:[#allocation9 + $0xc] ss:$16 sps:$4 sm:$0xff]  }
0x108a   :  { %10342 = vst [vmem:[#allocation89_spill] sm:$0xff] %v9372_v58 }
0x108c   :  { %4682 = vmatpush1.bf16.msra.mxu0 %v8790_v48  ;;  %v10343_v48 = vld [vmem:[#allocation21_spill] sm:$0xff] }
0x108d   :  { %4683 = vmatprep.subr.bf16.mxu0 %v8796_v51  ;;  %v10344_v51 = vld [vmem:[#allocation22_spill] sm:$0xff] }
0x1090   :  { %4684 = vmatpush1.bf16.msra.mxu0 %v10285_v28  ;;  %v10345_v28 = vld [vmem:[#allocation23_spill] sm:$0xff] }
0x1091   :  { %4685 = vmatprep.subr.bf16.mxu0 %v10287_v18  ;;  %v10346_v18 = vld [vmem:[#allocation24_spill] sm:$0xff] }
0x1094   :  { %4686 = vmatpush1.bf16.msra.mxu0 %v10289_v44  ;;  %v10347_v44 = vld [vmem:[#allocation25_spill] sm:$0xff] }
0x1095   :  { %4687 = vmatprep.subr.bf16.mxu0 %v10291_v62  ;;  %v10348_v62 = vld [vmem:[#allocation26_spill] sm:$0xff] }
0x1098   :  { %4688 = vmatpush1.bf16.msra.mxu0 %v10293_v49  ;;  %v10349_v49 = vld [vmem:[#allocation28_spill] sm:$0xff] }
0x1099   :  { %4689 = vmatprep.subr.bf16.mxu0 %v10295_v60  ;;  %v10350_v60 = vld [vmem:[#allocation30_spill] sm:$0xff] }
0x109c   :  { %4690 = vmatpush1.bf16.msra.mxu0 %v10297_v13  ;;  %v10351_v13 = vld [vmem:[#allocation32_spill] sm:$0xff] }
0x109d   :  { %4691 = vmatprep.subr.bf16.mxu0 %v10340_v25  ;;  %v10354_v25 = vld [vmem:[#allocation38_spill] sm:$0xff] }
0x10a0   :  { %4692 = vmatpush1.bf16.msra.mxu0 %v10341_v14  ;;  %v10355_v14 = vld [vmem:[#allocation75_spill] sm:$0xff] }
0x10a1   :  { %4718 = vmatprep.subr.bf16.mxu0 %v9372_v58 }
0x10a3   :  { %4710 = vmatmul.mubr.bf16.vlgmr.msra.gmra.mrb[92].mxu0 %v4676_v10 }
0x10a4   :  { %4719 = vmatpush1.bf16.msra.mxu0 %v10343_v48  ;;  %4750 = vmatprep.mubr.bf16.mxu0 %v9921_v59  ;;  %v10356_v48 = vld [vmem:[#allocation77_spill] sm:$0xff] }
0x10a5   :  { %4720 = vmatprep.subr.bf16.mxu0 %v10344_v51  ;;  %v10357_v51 = vld [vmem:[#allocation53_spill] sm:$0xff] }
0x10a8   :  { %4721 = vmatpush1.bf16.msra.mxu0 %v10345_v28  ;;  %v6851_v28 = vld [vmem:[#allocation7 + $0x4] ss:$16 sps:$4 sm:$0xff]  }
0x10a9   :  { %4722 = vmatprep.subr.bf16.mxu0 %v10346_v18  ;;  %v6852_v18 = vld [vmem:[#allocation7] ss:$16 sps:$4 sm:$0xff]  }
0x10ac   :  { %4723 = vmatpush1.bf16.msra.mxu0 %v10347_v44  ;;  %v6853_v44 = vld [vmem:[#allocation7 + $0x24] ss:$16 sps:$4 sm:$0xff]  }
0x10ad   :  { %4724 = vmatprep.subr.bf16.mxu0 %v10348_v62  ;;  %v6854_v62 = vld [vmem:[#allocation7 + $0x20] ss:$16 sps:$4 sm:$0xff]  }
0x10b0   :  { %4725 = vmatpush1.bf16.msra.mxu0 %v10349_v49  ;;  %v6855_v49 = vld [vmem:[#allocation7 + $0x44] ss:$16 sps:$4 sm:$0xff]  }
0x10b1   :  { %4726 = vmatprep.subr.bf16.mxu0 %v10350_v60  ;;  %v6856_v60 = vld [vmem:[#allocation7 + $0x40] ss:$16 sps:$4 sm:$0xff]  }
0x10b4   :  { %4727 = vmatpush1.bf16.msra.mxu0 %v10351_v13  ;;  %v6857_v13 = vld [vmem:[#allocation7 + $0x64] ss:$16 sps:$4 sm:$0xff]  }
0x10b5   :  { %4728 = vmatprep.subr.bf16.mxu0 %v10352_v2  ;;  %v6858_v2 = vld [vmem:[#allocation7 + $0x60] ss:$16 sps:$4 sm:$0xff]  }
0x10b8   :  { %4729 = vmatpush1.bf16.msra.mxu0 %v10353_v34  ;;  %v6859_v34 = vld [vmem:[#allocation7 + $0x84] ss:$16 sps:$4 sm:$0xff]  }
0x10b9   :  { %4730 = vmatprep.subr.bf16.mxu0 %v10354_v25  ;;  %v6860_v25 = vld [vmem:[#allocation7 + $0x80] ss:$16 sps:$4 sm:$0xff]  }
0x10bc   :  { %4731 = vmatpush1.bf16.msra.mxu0 %v10355_v14  ;;  %v6862_v14 = vld [vmem:[#allocation7 + $0xa0] ss:$16 sps:$4 sm:$0xff]  }
0x10bd   :  { %4732 = vmatprep.subr.bf16.mxu0 %v10356_v48  ;;  %v6863_v48 = vld [vmem:[#allocation7 + $0xc4] ss:$16 sps:$4 sm:$0xff]  }
0x10c0   :  { %4733 = vmatpush1.bf16.msra.mxu0 %v10357_v51  ;;  %v6864_v51 = vld [vmem:[#allocation7 + $0xc0] ss:$16 sps:$4 sm:$0xff]  }
0x10c1   :  { %5126 = vmatprep.subr.bf16.mxu0 %v6851_v28  ;;  %v6865_v28 = vld [vmem:[#allocation7 + $0xe4] ss:$16 sps:$4 sm:$0xff]  }
0x10c3   :  { %4751 = vmatmul.mubr.bf16.vlgmr.msra.gmra.mrb[96].mxu0 %v4676_v10  ;;  %v6861_v10 = vld [vmem:[#allocation7 + $0xa4] ss:$16 sps:$4 sm:$0xff]  }
0x10c4   :  { %5127 = vmatpush1.bf16.msra.mxu0 %v6852_v18  ;;  %5158 = vmatprep.mubr.bf16.mxu0 %v9921_v59  ;;  %v6866_v18 = vld [vmem:[#allocation7 + $0xe0] ss:$16 sps:$4 sm:$0xff]  }
0x10c5   :  { %5128 = vmatprep.subr.bf16.mxu0 %v6853_v44  ;;  %v6867_v44 = vld [vmem:[#allocation7 + $0xc] ss:$16 sps:$4 sm:$0xff]  }
0x10c8   :  { %5129 = vmatpush1.bf16.msra.mxu0 %v6854_v62 }
0x10c9   :  { %5130 = vmatprep.subr.bf16.mxu0 %v6855_v49 }
0x10cc   :  { %5131 = vmatpush1.bf16.msra.mxu0 %v6856_v60 }
0x10cd   :  { %5132 = vmatprep.subr.bf16.mxu0 %v6857_v13 }
0x10d0   :  { %5133 = vmatpush1.bf16.msra.mxu0 %v6858_v2 }
0x10d1   :  { %5134 = vmatprep.subr.bf16.mxu0 %v6859_v34  ;;  %v10358_v34 = vld [vmem:[#allocation94_spill] sm:$0xff] }
0x10d4   :  { %5135 = vmatpush1.bf16.msra.mxu0 %v6860_v25 }
0x10d5   :  { %5136 = vmatprep.subr.bf16.mxu0 %v6861_v10 }
0x10d8   :  { %5137 = vmatpush1.bf16.msra.mxu0 %v6862_v14 }
0x10d9   :  { %5138 = vmatprep.subr.bf16.mxu0 %v6863_v48 }
0x10dc   :  { %5139 = vmatpush1.bf16.msra.mxu0 %v6864_v51 }
0x10dd   :  { %5140 = vmatprep.subr.bf16.mxu0 %v6865_v28 }
0x10e0   :  { %5141 = vmatpush1.bf16.msra.mxu0 %v6866_v18 }
0x10e1   :  { %5167 = vmatprep.subr.bf16.mxu0 %v6867_v44 }
0x1176   :  { %v4711_v62 = vpop.f32.mrb[92].mxu0 }
0x1177   :  { %v4713_v49 = vpop.f32.mrb[93].mxu0  ;;  %v6114_v25 = vadd.f32 %v4711_v62, %v10358_v34 }
0x1178   :  { %v4715_v60 = vpop.f32.mrb[94].mxu0  ;;  %v6115_v2 = vadd.f32 %v4713_v49, %v10279_v6 }
0x1179   :  { %v4716_v13 = vpop.f32.mrb[95].mxu0  ;;  %v4763_v14 = vmul.f32 0.5, %v6114_v25 }
0x117a   :  { %v4767_v10 = vmul.f32 0.5, %v6115_v2 }
0x117c   :  { %6596 = vtanh.f32 %v4767_v10 }
0x117d   :  { %6598 = vtanh.f32 %v4763_v14 }
0x1186   :  { %v6597_v44 = vpop.eup %6596 }
0x1187   :  { %v6599_v60 = vpop.eup %6598  ;;  %v4769_v13 = vmul.f32 0.5, %v6597_v44 }
0x1188   :  { %v4765_v49 = vmul.f32 0.5, %v6599_v60 }
0x1189   :  { %v4770_v6 = vadd.f32 0.5, %v4769_v13 }
0x118a   :  { %v4766_v62 = vadd.f32 0.5, %v4765_v49 }
0x118b   :  { %v4776_v25 = vmul.f32 %v4770_v6, %v9072_v3 }
0x1196   :  { %v4752_v48 = vpop.f32.mrb[96].mxu0 }
0x1197   :  { %v6116_v51 = vadd.f32 %v4752_v48, %v10280_v35  ;;  %v4754_v28 = vpop.f32.mrb[97].mxu0 }
0x1198   :  { %v6117_v18 = vadd.f32 %v4754_v28, %v7813_v31  ;;  %v4756_v58 = vpop.f32.mrb[98].mxu0 }
0x1199   :  { %6600 = vtanh.f32 %v6116_v51  ;;  %v4757_v7 = vpop.f32.mrb[99].mxu0 }
0x119a   :  { %v4772_v4 = vmul.f32 0.5, %v6117_v18 }
0x119c   :  { %6602 = vtanh.f32 %v4772_v4 }
0x11a3   :  { %v6601_v2 = vpop.eup %6600 }
0x11a4   :  { %v4777_v10 = vmul.f32 %v6601_v2, %v4766_v62  ;;  %v10362_v62 = vld [vmem:[#allocation48_spill] sm:$0xff]  ;;  %v10363_v2 = vld [vmem:[#allocation49_spill] sm:$0xff] }
0x11a6   :  { %v9397_v14 = vadd.f32 %v4777_v10, %v4776_v25  ;;  %v6603_v48 = vpop.eup %6602  ;;  %v10365_v25 = vld [vmem:[#allocation51_spill] sm:$0xff]  ;;  %v6880_v10 = vld [vmem:[#allocation4 + $0xcc] ss:$16 sps:$4 sm:$0xff]  }
0x11a7   :  { %v4774_v58 = vmul.f32 0.5, %v6603_v48  ;;  %v6883_v48 = vld [vmem:[#allocation4 + $0xe8] ss:$16 sps:$4 sm:$0xff]  }
0x11a8   :  { %6604 = vtanh.f32 %v9397_v14 }
0x11a9   :  { %v4775_v28 = vadd.f32 0.5, %v4774_v58  ;;  %v10366_v58 = vld [vmem:[#allocation54_spill] sm:$0xff] }
0x11b2   :  { %v6605_v51 = vpop.eup %6604 }
0x11b3   :  { %v9400_v7 = vmul.f32 %v6605_v51, %v4775_v28  ;;  %v10367_v28 = vld [vmem:[#allocation79_spill] sm:$0xff]  ;;  %v10368_v51 = vld [vmem:[#allocation80_spill] sm:$0xff] }
0x11b5   :  { %5912 = vmatmul.mubr.f32.vlgmr.msra.gmra.mrb[98].mxu1 %v9400_v7 }
0x11b6   :  { %6040 = vmatpush3.bf16.msra.mxu1 %v9101_v41  ;;  %5922 = vmatprep.mubr.msk.f32.mxu1 %vm7016_vm3, %v10306_v22 }
0x11b7   :  { %6041 = vmatprep.subr.bf16.mxu1 %v10307_v54 }
0x11ba   :  { %6043 = vmatpush3.bf16.msra.mxu1 %v9114_v52 }
0x11bb   :  { %4939 = vmatprep.subr.bf16.mxu1 %v9120_v32 }
0x1288   :  { %v4847_v6 = vpop.f32.mrb[98].mxu1 }
0x1289   :  { %v4848_v3 = vadd.f32 %v9105_v43, %v4847_v6  ;;  %v5913_v4 = vpop.f32.mrb[99].mxu1  ;;  %v10369_v6 = vld [vmem:[#allocation81_spill] sm:$0xff] }
0x128a   :  { %v10373_v4 = vld [vmem:[#allocation43_spill] sm:$0xff] }
0x128b   :  { %4854 = vperm.xlu0 %6256, %v4848_v3   ;;  %v10371_v3 = vld [vmem:[#allocation41_spill] sm:$0xff] }
0x130a   :  { %v9410_v18 = vpop.permute.xlu0 %4854 }
0x130b   :  { %v4858_v44 = vmul.f32 %v9126_v15, %v9410_v18 }
0x130d   :  { %v4859_v41 = vadd.f32 %v9131_v50, %v4858_v44  ;;  %v6868_v50 = vld [vmem:[#allocation4 + $0x40] ss:$16 sps:$4 sm:$0xff]  }
0x130f   :  { %v4860_v60 = vmax.f32 %v4859_v41, 0.0 }
0x1311   :  { %5923 = vmatmul.mubr.msk.f32.vlgmr.msra.gmra.mrb[108].mxu1 %vm501_vm2, %v4860_v60 }
0x1312   :  { %4940 = vmatpush1.bf16.msra.mxu1 %v9141_v1  ;;  %4971 = vmatprep.mubr.bf16.mxu1 %v9921_v59  ;;  %v6869_v1 = vld [vmem:[#allocation4 + $0x64] ss:$16 sps:$4 sm:$0xff]  }
0x1313   :  { %4941 = vmatprep.subr.bf16.mxu1 %v9149_v26  ;;  %v6870_v26 = vld [vmem:[#allocation4 + $0x60] ss:$16 sps:$4 sm:$0xff]  }
0x1316   :  { %4942 = vmatpush1.bf16.msra.mxu1 %v9154_v36  ;;  %v6871_v36 = vld [vmem:[#allocation4 + $0x84] ss:$16 sps:$4 sm:$0xff]  }
0x1317   :  { %4980 = vmatprep.subr.bf16.mxu1 %v9161_v12  ;;  %v6872_v12 = vld [vmem:[#allocation4 + $0x80] ss:$16 sps:$4 sm:$0xff]  }
0x13e4   :  { %v4930_v52 = vpop.f32.mrb[108].mxu1 }
0x13e5   :  { %v4931_v32 = vadd.f32 %v9167_v30, %v4930_v52  ;;  %v5924_v13 = vpop.f32.mrb[109].mxu1  ;;  %v6873_v30 = vld [vmem:[#allocation4 + $0xa4] ss:$16 sps:$4 sm:$0xff]  }
0x13e7   :  { %v4934_v15 = vmax.f32 %v4931_v32, 0.0  ;;  %v10374_v32 = vld [vmem:[#allocation52_spill] sm:$0xff] }
0x13e9   :  { %v4935_v49 = vpack.c.bf16 %v4934_v15, %v4934_v15  ;;  %v10375_v15 = vld [vmem:[#allocation61_spill] sm:$0xff] }
0x13eb   :  { %5605 = vmatmul.mubr.msk.bf16.vlgmr.msra.gmra.mrb[112].mxu1 %vm501_vm2, %v4935_v49 }
0x13ec   :  { %4981 = vmatpush1.bf16.msra.mxu1 %v9173_v5  ;;  %5012 = vmatprep.mubr.bf16.mxu1 %v9921_v59  ;;  %v6874_v5 = vld [vmem:[#allocation4 + $0xa0] ss:$16 sps:$4 sm:$0xff]  }
0x13ed   :  { %4982 = vmatprep.subr.bf16.mxu1 %v9178_v45  ;;  %v6875_v45 = vld [vmem:[#allocation4 + $0xc4] ss:$16 sps:$4 sm:$0xff]  }
0x13f0   :  { %4983 = vmatpush1.bf16.msra.mxu1 %v9185_v57  ;;  %v6876_v57 = vld [vmem:[#allocation4 + $0xc0] ss:$16 sps:$4 sm:$0xff]  }
0x13f1   :  { %5021 = vmatprep.subr.bf16.mxu1 %v9190_v55  ;;  %v6877_v55 = vld [vmem:[#allocation4 + $0xe4] ss:$16 sps:$4 sm:$0xff]  }
0x13f3   :  { %5606 = vmatmul.mubr.msk.bf16.vlgmr.msra.gmra.mrb[116].mxu1 %vm501_vm2, %v4935_v49 }
0x13f4   :  { %5022 = vmatpush1.bf16.msra.mxu1 %v9194_v39  ;;  %5053 = vmatprep.mubr.bf16.mxu1 %v9921_v59  ;;  %v6878_v39 = vld [vmem:[#allocation4 + $0xe0] ss:$16 sps:$4 sm:$0xff]  }
0x13f5   :  { %5023 = vmatprep.subr.bf16.mxu1 %v9198_v33  ;;  %v10359_v33 = vld [vmem:[#allocation45_spill] sm:$0xff] }
0x13f8   :  { %5024 = vmatpush1.bf16.msra.mxu1 %v9201_v24  ;;  %v10360_v24 = vld [vmem:[#allocation46_spill] sm:$0xff] }
0x13f9   :  { %5025 = vmatprep.subr.bf16.mxu1 %v9204_v61  ;;  %v10361_v61 = vld [vmem:[#allocation47_spill] sm:$0xff] }
0x13fc   :  { %5026 = vmatpush1.bf16.msra.mxu1 %v6868_v50 }
0x13fd   :  { %5027 = vmatprep.subr.bf16.mxu1 %v6869_v1 }
0x1400   :  { %5028 = vmatpush1.bf16.msra.mxu1 %v6870_v26 }
0x1401   :  { %5029 = vmatprep.subr.bf16.mxu1 %v6871_v36 }
0x1404   :  { %5030 = vmatpush1.bf16.msra.mxu1 %v6872_v12 }
0x1405   :  { %5031 = vmatprep.subr.bf16.mxu1 %v6873_v30  ;;  %v10376_v30 = vld [vmem:[#allocation62_spill] sm:$0xff] }
0x1408   :  { %5032 = vmatpush1.bf16.msra.mxu1 %v6874_v5 }
0x1409   :  { %5033 = vmatprep.subr.bf16.mxu1 %v6875_v45 }
0x140c   :  { %5034 = vmatpush1.bf16.msra.mxu1 %v6876_v57 }
0x140d   :  { %5035 = vmatprep.subr.bf16.mxu1 %v6877_v55 }
0x1410   :  { %5036 = vmatpush1.bf16.msra.mxu1 %v6878_v39 }
0x1411   :  { %5062 = vmatprep.subr.bf16.mxu1 %v9218_v17  ;;  %v10364_v17 = vld [vmem:[#allocation50_spill] sm:$0xff] }
0x1413   :  { %5054 = vmatmul.mubr.bf16.vlgmr.msra.gmra.mrb[112].mxu1 %v9301_v56 }
0x1414   :  { %5063 = vmatpush1.bf16.msra.mxu1 %v9222_v46  ;;  %5094 = vmatprep.mubr.bf16.mxu1 %v9921_v59  ;;  %v6879_v46 = vld [vmem:[#allocation4 + $0xa8] ss:$16 sps:$4 sm:$0xff]  }
0x1415   :  { %5064 = vmatprep.subr.bf16.mxu1 %v9226_v38  ;;  %v6881_v38 = vld [vmem:[#allocation4 + $0xc8] ss:$16 sps:$4 sm:$0xff]  }
0x1418   :  { %5065 = vmatpush1.bf16.msra.mxu1 %v9229_v16  ;;  %v6882_v16 = vld [vmem:[#allocation4 + $0xec] ss:$16 sps:$4 sm:$0xff]  }
0x1419   :  { %5066 = vmatprep.subr.bf16.mxu1 %v10359_v33 }
0x141c   :  { %5067 = vmatpush1.bf16.msra.mxu1 %v10360_v24 }
0x141d   :  { %5068 = vmatprep.subr.bf16.mxu1 %v10361_v61 }
0x1420   :  { %5069 = vmatpush1.bf16.msra.mxu1 %v10362_v62 }
0x1421   :  { %5070 = vmatprep.subr.bf16.mxu1 %v10363_v2 }
0x1424   :  { %5071 = vmatpush1.bf16.msra.mxu1 %v10364_v17 }
0x1425   :  { %5072 = vmatprep.subr.bf16.mxu1 %v10365_v25 }
0x1428   :  { %5073 = vmatpush1.bf16.msra.mxu1 %v6879_v46 }
0x1429   :  { %5074 = vmatprep.subr.bf16.mxu1 %v6880_v10 }
0x142c   :  { %5075 = vmatpush1.bf16.msra.mxu1 %v6881_v38 }
0x142d   :  { %5076 = vmatprep.subr.bf16.mxu1 %v6882_v16 }
0x1430   :  { %5077 = vmatpush1.bf16.msra.mxu1 %v6883_v48 }
0x1431   :  { %6044 = vmatprep.subr.bf16.mxu1 %v10307_v54 }
0x1433   :  { %5095 = vmatmul.mubr.bf16.vlgmr.msra.gmra.mrb[116].mxu1 %v9301_v56  ;;  %v10370_v56 = vld [vmem:[#allocation82_spill] sm:$0xff] }
0x1434   :  { %6046 = vmatpush3.bf16.msra.mxu1 %v10366_v58  ;;  %5957 = vmatprep.mubr.msk.f32.mxu1 %vm7016_vm3, %v10306_v22  ;;  %v10372_v22 = vld [vmem:[#allocation42_spill] sm:$0xff] }
0x1435   :  { %6047 = vmatprep.subr.bf16.mxu1 %v10307_v54 }
0x1438   :  { %6049 = vmatpush3.bf16.msra.mxu1 %v10367_v28  ;;  %v6897_v28 = vld [vmem:[#allocation9 + $0xe4] ss:$16 sps:$4 sm:$0xff]  }
0x1439   :  { %6050 = vmatprep.subr.bf16.mxu1 %v10307_v54 }
0x143c   :  { %6052 = vmatpush3.bf16.msra.mxu1 %v10368_v51  ;;  %v6898_v51 = vld [vmem:[#allocation9 + $0xe0] ss:$16 sps:$4 sm:$0xff]  }
0x143d   :  { %6053 = vmatprep.subr.bf16.mxu1 %v10307_v54 }
0x1440   :  { %6055 = vmatpush3.bf16.msra.mxu1 %v10369_v6  ;;  %v5208_v6 = vpack.c.bf16 %v9400_v7, %v9400_v7  ;;  %v6906_v7 = vld [vmem:[#allocation9 + $0x8c] ss:$16 sps:$4 sm:$0xff]  }
0x1441   :  { %6056 = vmatprep.subr.bf16.mxu1 %v10307_v54 }
0x1444   :  { %6058 = vmatpush3.bf16.msra.mxu1 %v10370_v56  ;;  %v10379_v56 = vld [vmem:[#allocation89_spill] sm:$0xff] }
0x1445   :  { %6059 = vmatprep.subr.bf16.mxu1 %v10307_v54 }
0x1448   :  { %6061 = vmatpush3.bf16.msra.mxu1 %v10371_v3  ;;  %v6899_v3 = vld [vmem:[#allocation9 + $0x8] ss:$16 sps:$4 sm:$0xff]  }
0x1449   :  { %6062 = vmatprep.subr.bf16.mxu1 %v10307_v54 }
0x144c   :  { %6064 = vmatpush3.bf16.msra.mxu1 %v10372_v22  ;;  %v6900_v22 = vld [vmem:[#allocation9 + $0x2c] ss:$16 sps:$4 sm:$0xff]  }
0x144d   :  { %6065 = vmatprep.subr.bf16.mxu1 %v10307_v54 }
0x1450   :  { %6067 = vmatpush3.bf16.msra.mxu1 %v10373_v4  ;;  %v6901_v4 = vld [vmem:[#allocation9 + $0x28] ss:$16 sps:$4 sm:$0xff]  }
0x14e6   :  { %v5055_v44 = vpop.f32.mrb[112].mxu1 }
0x14e7   :  { %v5057_v41 = vpop.f32.mrb[113].mxu1  ;;  %v6118_v49 = vadd.f32 %v5055_v44, %v10375_v15  ;;  %v6902_v44 = vld [vmem:[#allocation9 + $0x4c] ss:$16 sps:$4 sm:$0xff]   ;;  %v6909_v15 = vld [vmem:[#allocation9 + $0xa8] ss:$16 sps:$4 sm:$0xff]  }
0x14e8   :  { %v5059_v60 = vpop.f32.mrb[114].mxu1  ;;  %v6119_v13 = vadd.f32 %v5057_v41, %v10374_v32  ;;  %v6903_v41 = vld [vmem:[#allocation9 + $0x48] ss:$16 sps:$4 sm:$0xff]  }
0x14e9   :  { %v5060_v52 = vpop.f32.mrb[115].mxu1  ;;  %v5107_v1 = vmul.f32 0.5, %v6118_v49  ;;  %v6904_v60 = vld [vmem:[#allocation9 + $0x6c] ss:$16 sps:$4 sm:$0xff]   ;;  %v6907_v32 = vld [vmem:[#allocation9 + $0x88] ss:$16 sps:$4 sm:$0xff]  }
0x14ea   :  { %v5111_v50 = vmul.f32 0.5, %v6119_v13  ;;  %v6905_v52 = vld [vmem:[#allocation9 + $0x68] ss:$16 sps:$4 sm:$0xff]   ;;  %v6908_v13 = vld [vmem:[#allocation9 + $0xac] ss:$16 sps:$4 sm:$0xff]  }
0x14eb   :  { %v6911_v49 = vld [vmem:[#allocation9 + $0xc8] ss:$16 sps:$4 sm:$0xff]  }
0x14ec   :  { %6606 = vtanh.f32 %v5111_v50  ;;  %v6912_v50 = vld [vmem:[#allocation9 + $0xec] ss:$16 sps:$4 sm:$0xff]  }
0x14ed   :  { %6608 = vtanh.f32 %v5107_v1  ;;  %v6913_v1 = vld [vmem:[#allocation9 + $0xe8] ss:$16 sps:$4 sm:$0xff]  }
0x14f6   :  { %v6607_v45 = vpop.eup %6606 }
0x14f7   :  { %v6609_v55 = vpop.eup %6608  ;;  %v5113_v39 = vmul.f32 0.5, %v6607_v45 }
0x14f8   :  { %v5109_v24 = vmul.f32 0.5, %v6609_v55 }
0x14f9   :  { %v5114_v61 = vadd.f32 0.5, %v5113_v39 }
0x14fa   :  { %v5110_v62 = vadd.f32 0.5, %v5109_v24 }
0x14fb   :  { %v5120_v17 = vmul.f32 %v5114_v61, %v9298_v29  ;;  %v10377_v29 = vld [vmem:[#allocation87_spill] sm:$0xff] }
0x1506   :  { %v5096_v26 = vpop.f32.mrb[116].mxu1 }
0x1507   :  { %v6120_v36 = vadd.f32 %v5096_v26, %v9290_v21  ;;  %v5098_v12 = vpop.f32.mrb[117].mxu1 }
0x1508   :  { %v6121_v54 = vadd.f32 %v5098_v12, %v10376_v30  ;;  %v5100_v5 = vpop.f32.mrb[118].mxu1 }
0x1509   :  { %6610 = vtanh.f32 %v6120_v36  ;;  %v5101_v57 = vpop.f32.mrb[119].mxu1 }
0x150a   :  { %v5116_v33 = vmul.f32 0.5, %v6121_v54  ;;  %v10380_v54 = vld [vmem:[#allocation95_spill] sm:$0xff] }
0x150c   :  { %6612 = vtanh.f32 %v5116_v33 }
0x1513   :  { %v6611_v2 = vpop.eup %6610 }
0x1514   :  { %v5121_v25 = vmul.f32 %v6611_v2, %v5110_v62 }
0x1516   :  { %v5122_v46 = vadd.f32 %v5121_v25, %v5120_v17  ;;  %v6613_v21 = vpop.eup %6612 }
0x1517   :  { %v5118_v10 = vmul.f32 0.5, %v6613_v21 }
0x1518   :  { %6614 = vtanh.f32 %v5122_v46 }
0x1519   :  { %v5119_v38 = vadd.f32 0.5, %v5118_v10 }
0x1522   :  { %v6615_v16 = vpop.eup %6614 }
0x1523   :  { %v5124_v48 = vmul.f32 %v6615_v16, %v5119_v38 }
0x1525   :  { %v5125_v58 = vpack.c.bf16 %v5124_v48, %v5124_v48 }
0x1527   :  { %5159 = vmatmul.mubr.bf16.vlgmr.msra.gmra.mrb[100].mxu0 %v5125_v58 }
0x1528   :  { %5168 = vmatpush1.bf16.msra.mxu0 %v9304_v9  ;;  %5199 = vmatprep.mubr.bf16.mxu0 %v9921_v59  ;;  %v10378_v9 = vld [vmem:[#allocation88_spill] sm:$0xff] }
0x1529   :  { %5169 = vmatprep.subr.bf16.mxu0 %v9308_v63  ;;  %v6884_v63 = vld [vmem:[#allocation9] ss:$16 sps:$4 sm:$0xff]  }
0x152c   :  { %5170 = vmatpush1.bf16.msra.mxu0 %v9311_v0  ;;  %v6885_v0 = vld [vmem:[#allocation9 + $0x24] ss:$16 sps:$4 sm:$0xff]  }
0x152d   :  { %5171 = vmatprep.subr.bf16.mxu0 %v9314_v19  ;;  %v6886_v19 = vld [vmem:[#allocation9 + $0x20] ss:$16 sps:$4 sm:$0xff]  }
0x1530   :  { %5172 = vmatpush1.bf16.msra.mxu0 %v9317_v23  ;;  %v6887_v23 = vld [vmem:[#allocation9 + $0x44] ss:$16 sps:$4 sm:$0xff]  }
0x1531   :  { %5173 = vmatprep.subr.bf16.mxu0 %v9320_v20  ;;  %v6888_v20 = vld [vmem:[#allocation9 + $0x40] ss:$16 sps:$4 sm:$0xff]  }
0x1534   :  { %5174 = vmatpush1.bf16.msra.mxu0 %v9323_v42  ;;  %v6889_v42 = vld [vmem:[#allocation9 + $0x64] ss:$16 sps:$4 sm:$0xff]  }
0x1535   :  { %5175 = vmatprep.subr.bf16.mxu0 %v9326_v27  ;;  %v6890_v27 = vld [vmem:[#allocation9 + $0x60] ss:$16 sps:$4 sm:$0xff]  }
0x1538   :  { %5176 = vmatpush1.bf16.msra.mxu0 %v9329_v37  ;;  %v6891_v37 = vld [vmem:[#allocation9 + $0x84] ss:$16 sps:$4 sm:$0xff]  }
0x1539   :  { %5177 = vmatprep.subr.bf16.mxu0 %v9332_v11  ;;  %v6892_v11 = vld [vmem:[#allocation9 + $0x80] ss:$16 sps:$4 sm:$0xff]  }
0x153c   :  { %5178 = vmatpush1.bf16.msra.mxu0 %v9335_v8  ;;  %v6893_v8 = vld [vmem:[#allocation9 + $0xa4] ss:$16 sps:$4 sm:$0xff]  }
0x153d   :  { %5179 = vmatprep.subr.bf16.mxu0 %v9338_v40  ;;  %v6894_v40 = vld [vmem:[#allocation9 + $0xa0] ss:$16 sps:$4 sm:$0xff]  }
0x1540   :  { %5180 = vmatpush1.bf16.msra.mxu0 %v9341_v47  ;;  %v6895_v47 = vld [vmem:[#allocation9 + $0xc4] ss:$16 sps:$4 sm:$0xff]  }
0x1541   :  { %5181 = vmatprep.subr.bf16.mxu0 %v9344_v53  ;;  %v6896_v53 = vld [vmem:[#allocation9 + $0xc0] ss:$16 sps:$4 sm:$0xff]  }
0x1544   :  { %5182 = vmatpush1.bf16.msra.mxu0 %v10377_v29 }
0x1545   :  { %5209 = vmatprep.subr.bf16.mxu0 %v10378_v9 }
0x1547   :  { %5200 = vmatmul.mubr.bf16.vlgmr.msra.gmra.mrb[104].mxu0 %v5125_v58 }
0x1548   :  { %5210 = vmatpush1.bf16.msra.mxu0 %v6884_v63  ;;  %5241 = vmatprep.mubr.bf16.mxu0 %v9921_v59 }
0x1549   :  { %5211 = vmatprep.subr.bf16.mxu0 %v6885_v0 }
0x154c   :  { %5212 = vmatpush1.bf16.msra.mxu0 %v6886_v19 }
0x154d   :  { %5213 = vmatprep.subr.bf16.mxu0 %v6887_v23 }
0x1550   :  { %5214 = vmatpush1.bf16.msra.mxu0 %v6888_v20 }
0x1551   :  { %5215 = vmatprep.subr.bf16.mxu0 %v6889_v42  ;;  %v10381_v42 = vlaneseq }
0x1554   :  { %5216 = vmatpush1.bf16.msra.mxu0 %v6890_v27  ;;  %v4223_v27 = vand.u32 127, %v10381_v42 }
0x1555   :  { %5217 = vmatprep.subr.bf16.mxu0 %v6891_v37 }
0x1556   :  { %vm4224_vm4 = vcmp.eq.s32.totalorder %v4223_v27, 0  ;;  %vm4851_vm5 = vcmp.eq.s32.totalorder %v4223_v27, 1  ;;  %vm5383_vm6 = vcmp.eq.s32.totalorder %v4223_v27, 2 }
0x1558   :  { %5218 = vmatpush1.bf16.msra.mxu0 %v6892_v11 }
0x1559   :  { %5219 = vmatprep.subr.bf16.mxu0 %v6893_v8 }
0x155c   :  { %5220 = vmatpush1.bf16.msra.mxu0 %v6894_v40 }
0x155d   :  { %5221 = vmatprep.subr.bf16.mxu0 %v6895_v47 }
0x1560   :  { %5222 = vmatpush1.bf16.msra.mxu0 %v6896_v53 }
0x1561   :  { %5223 = vmatprep.subr.bf16.mxu0 %v6897_v28 }
0x1564   :  { %5224 = vmatpush1.bf16.msra.mxu0 %v6898_v51 }
0x1565   :  { %5250 = vmatprep.subr.bf16.mxu0 %v10379_v56 }
0x1567   :  { %5242 = vmatmul.mubr.bf16.vlgmr.msra.gmra.mrb[100].mxu0 %v5208_v6 }
0x1568   :  { %5251 = vmatpush1.bf16.msra.mxu0 %v6899_v3  ;;  %5282 = vmatprep.mubr.bf16.mxu0 %v9921_v59  ;;  %v6910_v59 = vld [vmem:[#allocation9 + $0xcc] ss:$16 sps:$4 sm:$0xff]  }
0x1569   :  { %5252 = vmatprep.subr.bf16.mxu0 %v6900_v22 }
0x156c   :  { %5253 = vmatpush1.bf16.msra.mxu0 %v6901_v4 }
0x156d   :  { %5254 = vmatprep.subr.bf16.mxu0 %v6902_v44 }
0x1570   :  { %5255 = vmatpush1.bf16.msra.mxu0 %v6903_v41 }
0x1571   :  { %5256 = vmatprep.subr.bf16.mxu0 %v6904_v60 }
0x1574   :  { %5257 = vmatpush1.bf16.msra.mxu0 %v6905_v52 }
0x1575   :  { %5258 = vmatprep.subr.bf16.mxu0 %v6906_v7 }
0x1578   :  { %5259 = vmatpush1.bf16.msra.mxu0 %v6907_v32 }
0x1579   :  { %5260 = vmatprep.subr.bf16.mxu0 %v6908_v13 }
0x157c   :  { %5261 = vmatpush1.bf16.msra.mxu0 %v6909_v15 }
0x157d   :  { %5262 = vmatprep.subr.bf16.mxu0 %v6910_v59 }
0x1580   :  { %5263 = vmatpush1.bf16.msra.mxu0 %v6911_v49 }
0x1581   :  { %5264 = vmatprep.subr.bf16.mxu0 %v6912_v50 }
0x1584   :  { %5265 = vmatpush1.bf16.msra.mxu0 %v6913_v1 }
0x1587   :  { %5283 = vmatmul.mubr.bf16.vlgmr.msra.gmra.mrb[104].mxu0 %v5208_v6 }
0x163a   :  { %v5243_v26 = vpop.f32.mrb[100].mxu0 }
0x163b   :  { %v5245_v36 = vpop.f32.mrb[101].mxu0  ;;  %v6122_v45 = vadd.f32 %v5243_v26, %v10358_v34 }
0x163c   :  { %v5247_v12 = vpop.f32.mrb[102].mxu0  ;;  %v6123_v5 = vadd.f32 %v5245_v36, %v10380_v54 }
0x163d   :  { %v5248_v30 = vpop.f32.mrb[103].mxu0  ;;  %v5295_v55 = vmul.f32 0.5, %v6122_v45 }
0x163e   :  { %v5299_v57 = vmul.f32 0.5, %v6123_v5 }
0x1640   :  { %6616 = vtanh.f32 %v5299_v57 }
0x1641   :  { %6618 = vtanh.f32 %v5295_v55 }
0x164a   :  { %v6617_v2 = vpop.eup %6616 }
0x164b   :  { %v6619_v25 = vpop.eup %6618  ;;  %v5301_v46 = vmul.f32 0.5, %v6617_v2 }
0x164c   :  { %v5297_v10 = vmul.f32 0.5, %v6619_v25 }
0x164d   :  { %v5302_v38 = vadd.f32 0.5, %v5301_v46 }
0x164e   :  { %v5298_v34 = vadd.f32 0.5, %v5297_v10 }
0x164f   :  { %v5308_v48 = vmul.f32 %v5302_v38, %v9397_v14  ;;  %v10382_v14 = vld [vmem:[#allocation44_spill] sm:$0xff] }
0x1650   :  { %v4230_v37 = vsel %vm4224_vm4, %v10382_v14, 0.0 }
0x1651   :  { %v4857_v11 = vsel %vm4851_vm5, %v9410_v18, %v4230_v37 }
0x165a   :  { %v5284_v39 = vpop.f32.mrb[104].mxu0 }
0x165b   :  { %v6124_v33 = vadd.f32 %v5284_v39, %v10280_v35  ;;  %v5286_v24 = vpop.f32.mrb[105].mxu0 }
0x165c   :  { %v6125_v61 = vadd.f32 %v5286_v24, %v7813_v31  ;;  %v5288_v62 = vpop.f32.mrb[106].mxu0 }
0x165d   :  { %6620 = vtanh.f32 %v6124_v33  ;;  %v5289_v17 = vpop.f32.mrb[107].mxu0 }
0x165e   :  { %v5304_v21 = vmul.f32 0.5, %v6125_v61 }
0x1660   :  { %6622 = vtanh.f32 %v5304_v21 }
0x1667   :  { %v6621_v16 = vpop.eup %6620 }
0x1668   :  { %v5309_v58 = vmul.f32 %v6621_v16, %v5298_v34 }
0x166a   :  { %v5310_v29 = vadd.f32 %v5309_v58, %v5308_v48  ;;  %v6623_v35 = vpop.eup %6622 }
0x166b   :  { %v5306_v9 = vmul.f32 0.5, %v6623_v35 }
0x166c   :  { %6624 = vtanh.f32 %v5310_v29 }
0x166d   :  { %v5307_v31 = vadd.f32 0.5, %v5306_v9 }
0x1676   :  { %v6625_v63 = vpop.eup %6624 }
0x1677   :  { %v5312_v0 = vmul.f32 %v6625_v63, %v5307_v31 }
0x1679   :  { %5958 = vmatmul.mubr.f32.vlgmr.msra.gmra.mrb[110].mxu1 %v5312_v0 }
0x174c   :  { %v5379_v19 = vpop.f32.mrb[110].mxu1 }
0x174d   :  { %v5380_v23 = vadd.f32 %v9105_v43, %v5379_v19  ;;  %v5959_v20 = vpop.f32.mrb[111].mxu1 }
0x174f   :  { %5386 = vperm.xlu1 %6257, %v5380_v23  }
0x17ce   :  { %v5387_v8 = vpop.permute.xlu1 %5386 }
0x17cf   :  { %v5389_v40 = vsel %vm5383_vm6, %v5387_v8, %v4857_v11 }
0x17d0   :  { %5390 = vst [vmem:[#allocation10] sm:$0xff] %v5389_v40 }
0x17d1   :  { %6991 = shalt.err (!%p6988_p0)
}
0x17d2   :  { %s6992_s23 = scalar_lea.hbm %s9529_s15, 128 }
0x17d3   :  { %p6993_p1 = scmp.ne.s32.totalorder %s9529_s15, %s6992_s23  ;;  %p6996_p2 = scmp.lt.u32.totalorder %s6992_s23, %s9529_s15 }
0x17d5   :  { %p6998_p3 = pnand %p6996_p2, %p6993_p1 }
0x17d7   :  { %7001 = shalt.err (!%p6998_p3)
}
0x17d8   :  { %5400 = dma.vmem_to_hbm [thread:$0]  %s5398_s26, 128, %s9529_s15, [#allocation6]  }
0x17d9   :  { %7006 = dma.done.wait [#allocation6], 128  }
0x17da   :  { %7007 = vsyncadd [#allocation6], 4294967168 }
0x17db   :  { %5404 = vsyncpa [#allocation5], 1 }
0x17dc   :  { %5405 = vsyncpa [#allocation8], 1 }
0x17dd   :  { %5406 = vsyncpa [#allocation6], 1 }

</bundles_post_ra>
